<compile_context>
chip_gen: v6e
topology: v6e:2x2x1
jax: 0.10.0
libtpu: 0.0.40
codegen_flags: <defaults>
</compile_context>

<pallas_src>
import jax
import jax.numpy as jnp
from jax import lax
from jax.experimental import pallas as pl
from jax.experimental.pallas import tpu as pltpu


def _dt5_kernel(xpad_ref, inp_ref, w_ref, b_ref, o_ref):
    # xpad_ref : (1, T+2, H+2, W+2, C)   spatially padded x, NDHWC
    # inp_ref  : (1, THW, C_embed)       token tensor ("input")
    # w_ref    : (27, C, 2)              fused conv weights, tap-major [tap, c_in, {gama,beta}]
    # b_ref    : (1, 2)                  [bias_gama, bias_beta]
    # o_ref    : (1, THW, C_embed)
    T = xpad_ref.shape[1] - 2
    H = xpad_ref.shape[2] - 2
    W = xpad_ref.shape[3] - 2
    C = xpad_ref.shape[4]
    THW = T * H * W

    # 3x3x3 "same" conv (C -> 2 channels) as 27 shifted-slice matmuls, f32 accumulate.
    acc = jnp.zeros((THW, 2), jnp.float32)
    for tap in range(27):
        dt, dh, dw = tap // 9, (tap // 3) % 3, tap % 3
        patch = xpad_ref[0, dt:dt + T, dh:dh + H, dw:dw + W, :].reshape(THW, C)
        acc = acc + jnp.dot(patch, w_ref[tap], preferred_element_type=jnp.float32)
    acc = acc + b_ref[...]                       # (1, 2) broadcasts over rows

    gama = jax.nn.sigmoid(acc[:, 0:1])           # (THW, 1)
    beta = acc[:, 1:2]                           # (THW, 1)

    # Lane-dense elementwise: broadcast gama/beta over the embedding lanes.
    o_ref[0] = gama * inp_ref[0] + beta


def dist_transformation5(x, inp, params):
    """x: (B, C, T, H, W) f32; inp: (B, T*H*W, C_embed) f32. Returns (B, T*H*W, C_embed)."""
    wg, bg, wb, bb = params
    B, C, T, H, W = x.shape
    Bi, THW, C2 = inp.shape
    assert Bi == B and THW == T * H * W

    # Glue (all tiny / metadata-only on the big path):
    #  NCDHW -> NDHWC, spatial zero-pad by 1; fuse the two conv weights tap-major.
    x_ndhwc = jnp.transpose(x, (0, 2, 3, 4, 1))                       # (B, T, H, W, C)
    x_pad = jnp.pad(x_ndhwc, ((0, 0), (1, 1), (1, 1), (1, 1), (0, 0)))
    w_all = jnp.stack([wg[0], wb[0]], axis=-1)                        # (C, 3, 3, 3, 2)
    w_taps = jnp.transpose(w_all, (1, 2, 3, 0, 4)).reshape(27, C, 2)  # [tap, c_in, out]
    b_all = jnp.stack([bg[0], bb[0]]).reshape(1, 2)

    out = pl.pallas_call(
        _dt5_kernel,
        out_shape=jax.ShapeDtypeStruct((B, THW, C2), jnp.float32),
        grid_spec=pltpu.PrefetchScalarGridSpec(
            num_scalar_prefetch=0,
            grid=(B,),
            in_specs=[
                pl.BlockSpec((1, T + 2, H + 2, W + 2, C),
                             lambda n: (n, 0, 0, 0, 0)),
                pl.BlockSpec((1, THW, C2), lambda n: (n, 0, 0)),
                pl.BlockSpec((27, C, 2), lambda n: (0, 0, 0)),
                pl.BlockSpec((1, 2), lambda n: (0, 0)),
            ],
            out_specs=pl.BlockSpec((1, THW, C2), lambda n: (n, 0, 0)),
        ),
        compiler_params=pltpu.CompilerParams(
            dimension_semantics=("parallel",)),
    )(x_pad, inp, w_taps, b_all)
    return out


def _reference(x, inp, params):
    """Plain-JAX reference mirroring the PyTorch forward."""
    wg, bg, wb, bb = params
    dn = ("NCDHW", "OIDHW", "NCDHW")
    g = lax.conv_general_dilated(x, wg, (1, 1, 1), "SAME", dimension_numbers=dn)
    g = jax.nn.sigmoid(g + bg[None, :, None, None, None])
    be = (lax.conv_general_dilated(x, wb, (1, 1, 1), "SAME", dimension_numbers=dn)
          + bb[None, :, None, None, None])
    B = x.shape[0]
    thw = inp.shape[1]
    g = g.reshape(B, 1, thw)
    be = be.reshape(B, 1, thw)
    y = g * jnp.transpose(inp, (0, 2, 1)) + be          # (B, C_embed, THW)
    return jnp.transpose(y, (0, 2, 1))                  # (B, THW, C_embed)


def init_params(key, in_channels):
    """Deterministic init with shapes matching the nn.Module (Conv3d C->1, k=3)."""
    C = in_channels
    k = jax.random.split(key, 4)
    bound = (C * 27) ** -0.5
    wg = jax.random.uniform(k[0], (1, C, 3, 3, 3), jnp.float32, -bound, bound)
    bg = jax.random.uniform(k[1], (1,), jnp.float32, -bound, bound)
    wb = jax.random.uniform(k[2], (1, C, 3, 3, 3), jnp.float32, -bound, bound)
    bb = jax.random.uniform(k[3], (1,), jnp.float32, -bound, bound)
    return (wg, bg, wb, bb)


if __name__ == "__main__":
    B, C, T, H, W = 2, 4, 4, 8, 8          # inChannels = 4, THW = 256
    C_EMBED = 128                          # token dim of `input` (lane-dense on TPU)
    THW = T * H * W

    key = jax.random.PRNGKey(0)
    kx, ki, kp = jax.random.split(key, 3)
    x = jax.random.normal(kx, (B, C, T, H, W), jnp.float32)
    inp = jax.random.normal(ki, (B, THW, C_EMBED), jnp.float32)
    params = init_params(kp, C)

    y = dist_transformation5(x, inp, params)
    y = jax.block_until_ready(y)

    y_ref = _reference(x, inp, params)
    assert y.shape == (B, THW, C_EMBED)
    assert jnp.allclose(y, y_ref, atol=2e-4, rtol=2e-4), "mismatch vs reference"

    print("KERNEL_OK")
</pallas_src>

<mosaic_0001>
module attributes {stable_mosaic.version = 11 : i64} {
  func.func @_dt5_kernel(%arg0: i32, %arg1: memref<1x6x10x10x4xf32, #tpu.memory_space<vmem>>, %arg2: memref<1x256x128xf32, #tpu.memory_space<vmem>>, %arg3: memref<27x4x2xf32, #tpu.memory_space<vmem>>, %arg4: memref<1x2xf32, #tpu.memory_space<vmem>>, %arg5: memref<1x256x128xf32, #tpu.memory_space<vmem>>) attributes {dimension_semantics = [#tpu.dimension_semantics<parallel>], iteration_bounds = array<i64: 2>, scalar_prefetch = 0 : i64, scratch_operands = 0 : i64, tpu.core_type = #tpu.core_type<tc>, window_params = [{transform_indices = @transform_0, window_bounds = array<i64: 1, 6, 10, 10, 4>}, {transform_indices = @transform_1, window_bounds = array<i64: 1, 256, 128>}, {pipeline_mode = #tpu.pipeline_mode<synchronous>, transform_indices = @transform_2, window_bounds = array<i64: 27, 4, 2>}, {pipeline_mode = #tpu.pipeline_mode<synchronous>, transform_indices = @transform_3, window_bounds = array<i64: 1, 2>}, {transform_indices = @transform_4, window_bounds = array<i64: 1, 256, 128>}]} {
    %cst = arith.constant 0.000000e+00 : f32
    %0 = vector.broadcast %cst : f32 to vector<256x2xf32>
    %c0 = arith.constant 0 : index
    %c0_0 = arith.constant 0 : index
    %c0_1 = arith.constant 0 : index
    %c0_2 = arith.constant 0 : index
    %c0_3 = arith.constant 0 : index
    %1 = vector.load %arg1[%c0, %c0_0, %c0_1, %c0_2, %c0_3] : memref<1x6x10x10x4xf32, #tpu.memory_space<vmem>>, vector<1x4x8x8x4xf32>
    %2 = vector.shape_cast %1 : vector<1x4x8x8x4xf32> to vector<4x8x8x4xf32>
    %3 = vector.shape_cast %2 : vector<4x8x8x4xf32> to vector<256x4xf32>
    %c0_4 = arith.constant 0 : index
    %c0_5 = arith.constant 0 : index
    %c0_6 = arith.constant 0 : index
    %4 = vector.load %arg3[%c0_4, %c0_5, %c0_6] : memref<27x4x2xf32, #tpu.memory_space<vmem>>, vector<1x4x2xf32>
    %5 = vector.shape_cast %4 : vector<1x4x2xf32> to vector<4x2xf32>
    %cst_7 = arith.constant dense<0.000000e+00> : vector<256x2xf32>
    %6 = tpu.matmul %3, %5, %cst_7 {dimension_numbers = #tpu.dot_dimension_numbers<[1], [0], [0], [1], [0, 0, 1, 1], [], []>} : vector<256x4xf32>, vector<4x2xf32>, vector<256x2xf32> -> vector<256x2xf32>
    %7 = arith.addf %0, %6 : vector<256x2xf32>
    %c0_8 = arith.constant 0 : index
    %c0_9 = arith.constant 0 : index
    %c0_10 = arith.constant 0 : index
    %c1 = arith.constant 1 : index
    %c0_11 = arith.constant 0 : index
    %8 = vector.load %arg1[%c0_8, %c0_9, %c0_10, %c1, %c0_11] : memref<1x6x10x10x4xf32, #tpu.memory_space<vmem>>, vector<1x4x8x8x4xf32>
    %9 = vector.shape_cast %8 : vector<1x4x8x8x4xf32> to vector<4x8x8x4xf32>
    %10 = vector.shape_cast %9 : vector<4x8x8x4xf32> to vector<256x4xf32>
    %c1_12 = arith.constant 1 : index
    %c0_13 = arith.constant 0 : index
    %c0_14 = arith.constant 0 : index
    %11 = vector.load %arg3[%c1_12, %c0_13, %c0_14] : memref<27x4x2xf32, #tpu.memory_space<vmem>>, vector<1x4x2xf32>
    %12 = vector.shape_cast %11 : vector<1x4x2xf32> to vector<4x2xf32>
    %cst_15 = arith.constant dense<0.000000e+00> : vector<256x2xf32>
    %13 = tpu.matmul %10, %12, %cst_15 {dimension_numbers = #tpu.dot_dimension_numbers<[1], [0], [0], [1], [0, 0, 1, 1], [], []>} : vector<256x4xf32>, vector<4x2xf32>, vector<256x2xf32> -> vector<256x2xf32>
    %14 = arith.addf %7, %13 : vector<256x2xf32>
    %c0_16 = arith.constant 0 : index
    %c0_17 = arith.constant 0 : index
    %c0_18 = arith.constant 0 : index
    %c2 = arith.constant 2 : index
    %c0_19 = arith.constant 0 : index
    %15 = vector.load %arg1[%c0_16, %c0_17, %c0_18, %c2, %c0_19] : memref<1x6x10x10x4xf32, #tpu.memory_space<vmem>>, vector<1x4x8x8x4xf32>
    %16 = vector.shape_cast %15 : vector<1x4x8x8x4xf32> to vector<4x8x8x4xf32>
    %17 = vector.shape_cast %16 : vector<4x8x8x4xf32> to vector<256x4xf32>
    %c2_20 = arith.constant 2 : index
    %c0_21 = arith.constant 0 : index
    %c0_22 = arith.constant 0 : index
    %18 = vector.load %arg3[%c2_20, %c0_21, %c0_22] : memref<27x4x2xf32, #tpu.memory_space<vmem>>, vector<1x4x2xf32>
    %19 = vector.shape_cast %18 : vector<1x4x2xf32> to vector<4x2xf32>
    %cst_23 = arith.constant dense<0.000000e+00> : vector<256x2xf32>
    %20 = tpu.matmul %17, %19, %cst_23 {dimension_numbers = #tpu.dot_dimension_numbers<[1], [0], [0], [1], [0, 0, 1, 1], [], []>} : vector<256x4xf32>, vector<4x2xf32>, vector<256x2xf32> -> vector<256x2xf32>
    %21 = arith.addf %14, %20 : vector<256x2xf32>
    %c0_24 = arith.constant 0 : index
    %c0_25 = arith.constant 0 : index
    %c1_26 = arith.constant 1 : index
    %c0_27 = arith.constant 0 : index
    %c0_28 = arith.constant 0 : index
    %22 = vector.load %arg1[%c0_24, %c0_25, %c1_26, %c0_27, %c0_28] : memref<1x6x10x10x4xf32, #tpu.memory_space<vmem>>, vector<1x4x8x8x4xf32>
    %23 = vector.shape_cast %22 : vector<1x4x8x8x4xf32> to vector<4x8x8x4xf32>
    %24 = vector.shape_cast %23 : vector<4x8x8x4xf32> to vector<256x4xf32>
    %c3 = arith.constant 3 : index
    %c0_29 = arith.constant 0 : index
    %c0_30 = arith.constant 0 : index
    %25 = vector.load %arg3[%c3, %c0_29, %c0_30] : memref<27x4x2xf32, #tpu.memory_space<vmem>>, vector<1x4x2xf32>
    %26 = vector.shape_cast %25 : vector<1x4x2xf32> to vector<4x2xf32>
    %cst_31 = arith.constant dense<0.000000e+00> : vector<256x2xf32>
    %27 = tpu.matmul %24, %26, %cst_31 {dimension_numbers = #tpu.dot_dimension_numbers<[1], [0], [0], [1], [0, 0, 1, 1], [], []>} : vector<256x4xf32>, vector<4x2xf32>, vector<256x2xf32> -> vector<256x2xf32>
    %28 = arith.addf %21, %27 : vector<256x2xf32>
    %c0_32 = arith.constant 0 : index
    %c0_33 = arith.constant 0 : index
    %c1_34 = arith.constant 1 : index
    %c1_35 = arith.constant 1 : index
    %c0_36 = arith.constant 0 : index
    %29 = vector.load %arg1[%c0_32, %c0_33, %c1_34, %c1_35, %c0_36] : memref<1x6x10x10x4xf32, #tpu.memory_space<vmem>>, vector<1x4x8x8x4xf32>
    %30 = vector.shape_cast %29 : vector<1x4x8x8x4xf32> to vector<4x8x8x4xf32>
    %31 = vector.shape_cast %30 : vector<4x8x8x4xf32> to vector<256x4xf32>
    %c4 = arith.constant 4 : index
    %c0_37 = arith.constant 0 : index
    %c0_38 = arith.constant 0 : index
    %32 = vector.load %arg3[%c4, %c0_37, %c0_38] : memref<27x4x2xf32, #tpu.memory_space<vmem>>, vector<1x4x2xf32>
    %33 = vector.shape_cast %32 : vector<1x4x2xf32> to vector<4x2xf32>
    %cst_39 = arith.constant dense<0.000000e+00> : vector<256x2xf32>
    %34 = tpu.matmul %31, %33, %cst_39 {dimension_numbers = #tpu.dot_dimension_numbers<[1], [0], [0], [1], [0, 0, 1, 1], [], []>} : vector<256x4xf32>, vector<4x2xf32>, vector<256x2xf32> -> vector<256x2xf32>
    %35 = arith.addf %28, %34 : vector<256x2xf32>
    %c0_40 = arith.constant 0 : index
    %c0_41 = arith.constant 0 : index
    %c1_42 = arith.constant 1 : index
    %c2_43 = arith.constant 2 : index
    %c0_44 = arith.constant 0 : index
    %36 = vector.load %arg1[%c0_40, %c0_41, %c1_42, %c2_43, %c0_44] : memref<1x6x10x10x4xf32, #tpu.memory_space<vmem>>, vector<1x4x8x8x4xf32>
    %37 = vector.shape_cast %36 : vector<1x4x8x8x4xf32> to vector<4x8x8x4xf32>
    %38 = vector.shape_cast %37 : vector<4x8x8x4xf32> to vector<256x4xf32>
    %c5 = arith.constant 5 : index
    %c0_45 = arith.constant 0 : index
    %c0_46 = arith.constant 0 : index
    %39 = vector.load %arg3[%c5, %c0_45, %c0_46] : memref<27x4x2xf32, #tpu.memory_space<vmem>>, vector<1x4x2xf32>
    %40 = vector.shape_cast %39 : vector<1x4x2xf32> to vector<4x2xf32>
    %cst_47 = arith.constant dense<0.000000e+00> : vector<256x2xf32>
    %41 = tpu.matmul %38, %40, %cst_47 {dimension_numbers = #tpu.dot_dimension_numbers<[1], [0], [0], [1], [0, 0, 1, 1], [], []>} : vector<256x4xf32>, vector<4x2xf32>, vector<256x2xf32> -> vector<256x2xf32>
    %42 = arith.addf %35, %41 : vector<256x2xf32>
    %c0_48 = arith.constant 0 : index
    %c0_49 = arith.constant 0 : index
    %c2_50 = arith.constant 2 : index
    %c0_51 = arith.constant 0 : index
    %c0_52 = arith.constant 0 : index
    %43 = vector.load %arg1[%c0_48, %c0_49, %c2_50, %c0_51, %c0_52] : memref<1x6x10x10x4xf32, #tpu.memory_space<vmem>>, vector<1x4x8x8x4xf32>
    %44 = vector.shape_cast %43 : vector<1x4x8x8x4xf32> to vector<4x8x8x4xf32>
    %45 = vector.shape_cast %44 : vector<4x8x8x4xf32> to vector<256x4xf32>
    %c6 = arith.constant 6 : index
    %c0_53 = arith.constant 0 : index
    %c0_54 = arith.constant 0 : index
    %46 = vector.load %arg3[%c6, %c0_53, %c0_54] : memref<27x4x2xf32, #tpu.memory_space<vmem>>, vector<1x4x2xf32>
    %47 = vector.shape_cast %46 : vector<1x4x2xf32> to vector<4x2xf32>
    %cst_55 = arith.constant dense<0.000000e+00> : vector<256x2xf32>
    %48 = tpu.matmul %45, %47, %cst_55 {dimension_numbers = #tpu.dot_dimension_numbers<[1], [0], [0], [1], [0, 0, 1, 1], [], []>} : vector<256x4xf32>, vector<4x2xf32>, vector<256x2xf32> -> vector<256x2xf32>
    %49 = arith.addf %42, %48 : vector<256x2xf32>
    %c0_56 = arith.constant 0 : index
    %c0_57 = arith.constant 0 : index
    %c2_58 = arith.constant 2 : index
    %c1_59 = arith.constant 1 : index
    %c0_60 = arith.constant 0 : index
    %50 = vector.load %arg1[%c0_56, %c0_57, %c2_58, %c1_59, %c0_60] : memref<1x6x10x10x4xf32, #tpu.memory_space<vmem>>, vector<1x4x8x8x4xf32>
    %51 = vector.shape_cast %50 : vector<1x4x8x8x4xf32> to vector<4x8x8x4xf32>
    %52 = vector.shape_cast %51 : vector<4x8x8x4xf32> to vector<256x4xf32>
    %c7 = arith.constant 7 : index
    %c0_61 = arith.constant 0 : index
    %c0_62 = arith.constant 0 : index
    %53 = vector.load %arg3[%c7, %c0_61, %c0_62] : memref<27x4x2xf32, #tpu.memory_space<vmem>>, vector<1x4x2xf32>
    %54 = vector.shape_cast %53 : vector<1x4x2xf32> to vector<4x2xf32>
    %cst_63 = arith.constant dense<0.000000e+00> : vector<256x2xf32>
    %55 = tpu.matmul %52, %54, %cst_63 {dimension_numbers = #tpu.dot_dimension_numbers<[1], [0], [0], [1], [0, 0, 1, 1], [], []>} : vector<256x4xf32>, vector<4x2xf32>, vector<256x2xf32> -> vector<256x2xf32>
    %56 = arith.addf %49, %55 : vector<256x2xf32>
    %c0_64 = arith.constant 0 : index
    %c0_65 = arith.constant 0 : index
    %c2_66 = arith.constant 2 : index
    %c2_67 = arith.constant 2 : index
    %c0_68 = arith.constant 0 : index
    %57 = vector.load %arg1[%c0_64, %c0_65, %c2_66, %c2_67, %c0_68] : memref<1x6x10x10x4xf32, #tpu.memory_space<vmem>>, vector<1x4x8x8x4xf32>
    %58 = vector.shape_cast %57 : vector<1x4x8x8x4xf32> to vector<4x8x8x4xf32>
    %59 = vector.shape_cast %58 : vector<4x8x8x4xf32> to vector<256x4xf32>
    %c8 = arith.constant 8 : index
    %c0_69 = arith.constant 0 : index
    %c0_70 = arith.constant 0 : index
    %60 = vector.load %arg3[%c8, %c0_69, %c0_70] : memref<27x4x2xf32, #tpu.memory_space<vmem>>, vector<1x4x2xf32>
    %61 = vector.shape_cast %60 : vector<1x4x2xf32> to vector<4x2xf32>
    %cst_71 = arith.constant dense<0.000000e+00> : vector<256x2xf32>
    %62 = tpu.matmul %59, %61, %cst_71 {dimension_numbers = #tpu.dot_dimension_numbers<[1], [0], [0], [1], [0, 0, 1, 1], [], []>} : vector<256x4xf32>, vector<4x2xf32>, vector<256x2xf32> -> vector<256x2xf32>
    %63 = arith.addf %56, %62 : vector<256x2xf32>
    %c0_72 = arith.constant 0 : index
    %c1_73 = arith.constant 1 : index
    %c0_74 = arith.constant 0 : index
    %c0_75 = arith.constant 0 : index
    %c0_76 = arith.constant 0 : index
    %64 = vector.load %arg1[%c0_72, %c1_73, %c0_74, %c0_75, %c0_76] : memref<1x6x10x10x4xf32, #tpu.memory_space<vmem>>, vector<1x4x8x8x4xf32>
    %65 = vector.shape_cast %64 : vector<1x4x8x8x4xf32> to vector<4x8x8x4xf32>
    %66 = vector.shape_cast %65 : vector<4x8x8x4xf32> to vector<256x4xf32>
    %c9 = arith.constant 9 : index
    %c0_77 = arith.constant 0 : index
    %c0_78 = arith.constant 0 : index
    %67 = vector.load %arg3[%c9, %c0_77, %c0_78] : memref<27x4x2xf32, #tpu.memory_space<vmem>>, vector<1x4x2xf32>
    %68 = vector.shape_cast %67 : vector<1x4x2xf32> to vector<4x2xf32>
    %cst_79 = arith.constant dense<0.000000e+00> : vector<256x2xf32>
    %69 = tpu.matmul %66, %68, %cst_79 {dimension_numbers = #tpu.dot_dimension_numbers<[1], [0], [0], [1], [0, 0, 1, 1], [], []>} : vector<256x4xf32>, vector<4x2xf32>, vector<256x2xf32> -> vector<256x2xf32>
    %70 = arith.addf %63, %69 : vector<256x2xf32>
    %c0_80 = arith.constant 0 : index
    %c1_81 = arith.constant 1 : index
    %c0_82 = arith.constant 0 : index
    %c1_83 = arith.constant 1 : index
    %c0_84 = arith.constant 0 : index
    %71 = vector.load %arg1[%c0_80, %c1_81, %c0_82, %c1_83, %c0_84] : memref<1x6x10x10x4xf32, #tpu.memory_space<vmem>>, vector<1x4x8x8x4xf32>
    %72 = vector.shape_cast %71 : vector<1x4x8x8x4xf32> to vector<4x8x8x4xf32>
    %73 = vector.shape_cast %72 : vector<4x8x8x4xf32> to vector<256x4xf32>
    %c10 = arith.constant 10 : index
    %c0_85 = arith.constant 0 : index
    %c0_86 = arith.constant 0 : index
    %74 = vector.load %arg3[%c10, %c0_85, %c0_86] : memref<27x4x2xf32, #tpu.memory_space<vmem>>, vector<1x4x2xf32>
    %75 = vector.shape_cast %74 : vector<1x4x2xf32> to vector<4x2xf32>
    %cst_87 = arith.constant dense<0.000000e+00> : vector<256x2xf32>
    %76 = tpu.matmul %73, %75, %cst_87 {dimension_numbers = #tpu.dot_dimension_numbers<[1], [0], [0], [1], [0, 0, 1, 1], [], []>} : vector<256x4xf32>, vector<4x2xf32>, vector<256x2xf32> -> vector<256x2xf32>
    %77 = arith.addf %70, %76 : vector<256x2xf32>
    %c0_88 = arith.constant 0 : index
    %c1_89 = arith.constant 1 : index
    %c0_90 = arith.constant 0 : index
    %c2_91 = arith.constant 2 : index
    %c0_92 = arith.constant 0 : index
    %78 = vector.load %arg1[%c0_88, %c1_89, %c0_90, %c2_91, %c0_92] : memref<1x6x10x10x4xf32, #tpu.memory_space<vmem>>, vector<1x4x8x8x4xf32>
    %79 = vector.shape_cast %78 : vector<1x4x8x8x4xf32> to vector<4x8x8x4xf32>
    %80 = vector.shape_cast %79 : vector<4x8x8x4xf32> to vector<256x4xf32>
    %c11 = arith.constant 11 : index
    %c0_93 = arith.constant 0 : index
    %c0_94 = arith.constant 0 : index
    %81 = vector.load %arg3[%c11, %c0_93, %c0_94] : memref<27x4x2xf32, #tpu.memory_space<vmem>>, vector<1x4x2xf32>
    %82 = vector.shape_cast %81 : vector<1x4x2xf32> to vector<4x2xf32>
    %cst_95 = arith.constant dense<0.000000e+00> : vector<256x2xf32>
    %83 = tpu.matmul %80, %82, %cst_95 {dimension_numbers = #tpu.dot_dimension_numbers<[1], [0], [0], [1], [0, 0, 1, 1], [], []>} : vector<256x4xf32>, vector<4x2xf32>, vector<256x2xf32> -> vector<256x2xf32>
    %84 = arith.addf %77, %83 : vector<256x2xf32>
    %c0_96 = arith.constant 0 : index
    %c1_97 = arith.constant 1 : index
    %c1_98 = arith.constant 1 : index
    %c0_99 = arith.constant 0 : index
    %c0_100 = arith.constant 0 : index
    %85 = vector.load %arg1[%c0_96, %c1_97, %c1_98, %c0_99, %c0_100] : memref<1x6x10x10x4xf32, #tpu.memory_space<vmem>>, vector<1x4x8x8x4xf32>
    %86 = vector.shape_cast %85 : vector<1x4x8x8x4xf32> to vector<4x8x8x4xf32>
    %87 = vector.shape_cast %86 : vector<4x8x8x4xf32> to vector<256x4xf32>
    %c12 = arith.constant 12 : index
    %c0_101 = arith.constant 0 : index
    %c0_102 = arith.constant 0 : index
    %88 = vector.load %arg3[%c12, %c0_101, %c0_102] : memref<27x4x2xf32, #tpu.memory_space<vmem>>, vector<1x4x2xf32>
    %89 = vector.shape_cast %88 : vector<1x4x2xf32> to vector<4x2xf32>
    %cst_103 = arith.constant dense<0.000000e+00> : vector<256x2xf32>
    %90 = tpu.matmul %87, %89, %cst_103 {dimension_numbers = #tpu.dot_dimension_numbers<[1], [0], [0], [1], [0, 0, 1, 1], [], []>} : vector<256x4xf32>, vector<4x2xf32>, vector<256x2xf32> -> vector<256x2xf32>
    %91 = arith.addf %84, %90 : vector<256x2xf32>
    %c0_104 = arith.constant 0 : index
    %c1_105 = arith.constant 1 : index
    %c1_106 = arith.constant 1 : index
    %c1_107 = arith.constant 1 : index
    %c0_108 = arith.constant 0 : index
    %92 = vector.load %arg1[%c0_104, %c1_105, %c1_106, %c1_107, %c0_108] : memref<1x6x10x10x4xf32, #tpu.memory_space<vmem>>, vector<1x4x8x8x4xf32>
    %93 = vector.shape_cast %92 : vector<1x4x8x8x4xf32> to vector<4x8x8x4xf32>
    %94 = vector.shape_cast %93 : vector<4x8x8x4xf32> to vector<256x4xf32>
    %c13 = arith.constant 13 : index
    %c0_109 = arith.constant 0 : index
    %c0_110 = arith.constant 0 : index
    %95 = vector.load %arg3[%c13, %c0_109, %c0_110] : memref<27x4x2xf32, #tpu.memory_space<vmem>>, vector<1x4x2xf32>
    %96 = vector.shape_cast %95 : vector<1x4x2xf32> to vector<4x2xf32>
    %cst_111 = arith.constant dense<0.000000e+00> : vector<256x2xf32>
    %97 = tpu.matmul %94, %96, %cst_111 {dimension_numbers = #tpu.dot_dimension_numbers<[1], [0], [0], [1], [0, 0, 1, 1], [], []>} : vector<256x4xf32>, vector<4x2xf32>, vector<256x2xf32> -> vector<256x2xf32>
    %98 = arith.addf %91, %97 : vector<256x2xf32>
    %c0_112 = arith.constant 0 : index
    %c1_113 = arith.constant 1 : index
    %c1_114 = arith.constant 1 : index
    %c2_115 = arith.constant 2 : index
    %c0_116 = arith.constant 0 : index
    %99 = vector.load %arg1[%c0_112, %c1_113, %c1_114, %c2_115, %c0_116] : memref<1x6x10x10x4xf32, #tpu.memory_space<vmem>>, vector<1x4x8x8x4xf32>
    %100 = vector.shape_cast %99 : vector<1x4x8x8x4xf32> to vector<4x8x8x4xf32>
    %101 = vector.shape_cast %100 : vector<4x8x8x4xf32> to vector<256x4xf32>
    %c14 = arith.constant 14 : index
    %c0_117 = arith.constant 0 : index
    %c0_118 = arith.constant 0 : index
    %102 = vector.load %arg3[%c14, %c0_117, %c0_118] : memref<27x4x2xf32, #tpu.memory_space<vmem>>, vector<1x4x2xf32>
    %103 = vector.shape_cast %102 : vector<1x4x2xf32> to vector<4x2xf32>
    %cst_119 = arith.constant dense<0.000000e+00> : vector<256x2xf32>
    %104 = tpu.matmul %101, %103, %cst_119 {dimension_numbers = #tpu.dot_dimension_numbers<[1], [0], [0], [1], [0, 0, 1, 1], [], []>} : vector<256x4xf32>, vector<4x2xf32>, vector<256x2xf32> -> vector<256x2xf32>
    %105 = arith.addf %98, %104 : vector<256x2xf32>
    %c0_120 = arith.constant 0 : index
    %c1_121 = arith.constant 1 : index
    %c2_122 = arith.constant 2 : index
    %c0_123 = arith.constant 0 : index
    %c0_124 = arith.constant 0 : index
    %106 = vector.load %arg1[%c0_120, %c1_121, %c2_122, %c0_123, %c0_124] : memref<1x6x10x10x4xf32, #tpu.memory_space<vmem>>, vector<1x4x8x8x4xf32>
    %107 = vector.shape_cast %106 : vector<1x4x8x8x4xf32> to vector<4x8x8x4xf32>
    %108 = vector.shape_cast %107 : vector<4x8x8x4xf32> to vector<256x4xf32>
    %c15 = arith.constant 15 : index
    %c0_125 = arith.constant 0 : index
    %c0_126 = arith.constant 0 : index
    %109 = vector.load %arg3[%c15, %c0_125, %c0_126] : memref<27x4x2xf32, #tpu.memory_space<vmem>>, vector<1x4x2xf32>
    %110 = vector.shape_cast %109 : vector<1x4x2xf32> to vector<4x2xf32>
    %cst_127 = arith.constant dense<0.000000e+00> : vector<256x2xf32>
    %111 = tpu.matmul %108, %110, %cst_127 {dimension_numbers = #tpu.dot_dimension_numbers<[1], [0], [0], [1], [0, 0, 1, 1], [], []>} : vector<256x4xf32>, vector<4x2xf32>, vector<256x2xf32> -> vector<256x2xf32>
    %112 = arith.addf %105, %111 : vector<256x2xf32>
    %c0_128 = arith.constant 0 : index
    %c1_129 = arith.constant 1 : index
    %c2_130 = arith.constant 2 : index
    %c1_131 = arith.constant 1 : index
    %c0_132 = arith.constant 0 : index
    %113 = vector.load %arg1[%c0_128, %c1_129, %c2_130, %c1_131, %c0_132] : memref<1x6x10x10x4xf32, #tpu.memory_space<vmem>>, vector<1x4x8x8x4xf32>
    %114 = vector.shape_cast %113 : vector<1x4x8x8x4xf32> to vector<4x8x8x4xf32>
    %115 = vector.shape_cast %114 : vector<4x8x8x4xf32> to vector<256x4xf32>
    %c16 = arith.constant 16 : index
    %c0_133 = arith.constant 0 : index
    %c0_134 = arith.constant 0 : index
    %116 = vector.load %arg3[%c16, %c0_133, %c0_134] : memref<27x4x2xf32, #tpu.memory_space<vmem>>, vector<1x4x2xf32>
    %117 = vector.shape_cast %116 : vector<1x4x2xf32> to vector<4x2xf32>
    %cst_135 = arith.constant dense<0.000000e+00> : vector<256x2xf32>
    %118 = tpu.matmul %115, %117, %cst_135 {dimension_numbers = #tpu.dot_dimension_numbers<[1], [0], [0], [1], [0, 0, 1, 1], [], []>} : vector<256x4xf32>, vector<4x2xf32>, vector<256x2xf32> -> vector<256x2xf32>
    %119 = arith.addf %112, %118 : vector<256x2xf32>
    %c0_136 = arith.constant 0 : index
    %c1_137 = arith.constant 1 : index
    %c2_138 = arith.constant 2 : index
    %c2_139 = arith.constant 2 : index
    %c0_140 = arith.constant 0 : index
    %120 = vector.load %arg1[%c0_136, %c1_137, %c2_138, %c2_139, %c0_140] : memref<1x6x10x10x4xf32, #tpu.memory_space<vmem>>, vector<1x4x8x8x4xf32>
    %121 = vector.shape_cast %120 : vector<1x4x8x8x4xf32> to vector<4x8x8x4xf32>
    %122 = vector.shape_cast %121 : vector<4x8x8x4xf32> to vector<256x4xf32>
    %c17 = arith.constant 17 : index
    %c0_141 = arith.constant 0 : index
    %c0_142 = arith.constant 0 : index
    %123 = vector.load %arg3[%c17, %c0_141, %c0_142] : memref<27x4x2xf32, #tpu.memory_space<vmem>>, vector<1x4x2xf32>
    %124 = vector.shape_cast %123 : vector<1x4x2xf32> to vector<4x2xf32>
    %cst_143 = arith.constant dense<0.000000e+00> : vector<256x2xf32>
    %125 = tpu.matmul %122, %124, %cst_143 {dimension_numbers = #tpu.dot_dimension_numbers<[1], [0], [0], [1], [0, 0, 1, 1], [], []>} : vector<256x4xf32>, vector<4x2xf32>, vector<256x2xf32> -> vector<256x2xf32>
    %126 = arith.addf %119, %125 : vector<256x2xf32>
    %c0_144 = arith.constant 0 : index
    %c2_145 = arith.constant 2 : index
    %c0_146 = arith.constant 0 : index
    %c0_147 = arith.constant 0 : index
    %c0_148 = arith.constant 0 : index
    %127 = vector.load %arg1[%c0_144, %c2_145, %c0_146, %c0_147, %c0_148] : memref<1x6x10x10x4xf32, #tpu.memory_space<vmem>>, vector<1x4x8x8x4xf32>
    %128 = vector.shape_cast %127 : vector<1x4x8x8x4xf32> to vector<4x8x8x4xf32>
    %129 = vector.shape_cast %128 : vector<4x8x8x4xf32> to vector<256x4xf32>
    %c18 = arith.constant 18 : index
    %c0_149 = arith.constant 0 : index
    %c0_150 = arith.constant 0 : index
    %130 = vector.load %arg3[%c18, %c0_149, %c0_150] : memref<27x4x2xf32, #tpu.memory_space<vmem>>, vector<1x4x2xf32>
    %131 = vector.shape_cast %130 : vector<1x4x2xf32> to vector<4x2xf32>
    %cst_151 = arith.constant dense<0.000000e+00> : vector<256x2xf32>
    %132 = tpu.matmul %129, %131, %cst_151 {dimension_numbers = #tpu.dot_dimension_numbers<[1], [0], [0], [1], [0, 0, 1, 1], [], []>} : vector<256x4xf32>, vector<4x2xf32>, vector<256x2xf32> -> vector<256x2xf32>
    %133 = arith.addf %126, %132 : vector<256x2xf32>
    %c0_152 = arith.constant 0 : index
    %c2_153 = arith.constant 2 : index
    %c0_154 = arith.constant 0 : index
    %c1_155 = arith.constant 1 : index
    %c0_156 = arith.constant 0 : index
    %134 = vector.load %arg1[%c0_152, %c2_153, %c0_154, %c1_155, %c0_156] : memref<1x6x10x10x4xf32, #tpu.memory_space<vmem>>, vector<1x4x8x8x4xf32>
    %135 = vector.shape_cast %134 : vector<1x4x8x8x4xf32> to vector<4x8x8x4xf32>
    %136 = vector.shape_cast %135 : vector<4x8x8x4xf32> to vector<256x4xf32>
    %c19 = arith.constant 19 : index
    %c0_157 = arith.constant 0 : index
    %c0_158 = arith.constant 0 : index
    %137 = vector.load %arg3[%c19, %c0_157, %c0_158] : memref<27x4x2xf32, #tpu.memory_space<vmem>>, vector<1x4x2xf32>
    %138 = vector.shape_cast %137 : vector<1x4x2xf32> to vector<4x2xf32>
    %cst_159 = arith.constant dense<0.000000e+00> : vector<256x2xf32>
    %139 = tpu.matmul %136, %138, %cst_159 {dimension_numbers = #tpu.dot_dimension_numbers<[1], [0], [0], [1], [0, 0, 1, 1], [], []>} : vector<256x4xf32>, vector<4x2xf32>, vector<256x2xf32> -> vector<256x2xf32>
    %140 = arith.addf %133, %139 : vector<256x2xf32>
    %c0_160 = arith.constant 0 : index
    %c2_161 = arith.constant 2 : index
    %c0_162 = arith.constant 0 : index
    %c2_163 = arith.constant 2 : index
    %c0_164 = arith.constant 0 : index
    %141 = vector.load %arg1[%c0_160, %c2_161, %c0_162, %c2_163, %c0_164] : memref<1x6x10x10x4xf32, #tpu.memory_space<vmem>>, vector<1x4x8x8x4xf32>
    %142 = vector.shape_cast %141 : vector<1x4x8x8x4xf32> to vector<4x8x8x4xf32>
    %143 = vector.shape_cast %142 : vector<4x8x8x4xf32> to vector<256x4xf32>
    %c20 = arith.constant 20 : index
    %c0_165 = arith.constant 0 : index
    %c0_166 = arith.constant 0 : index
    %144 = vector.load %arg3[%c20, %c0_165, %c0_166] : memref<27x4x2xf32, #tpu.memory_space<vmem>>, vector<1x4x2xf32>
    %145 = vector.shape_cast %144 : vector<1x4x2xf32> to vector<4x2xf32>
    %cst_167 = arith.constant dense<0.000000e+00> : vector<256x2xf32>
    %146 = tpu.matmul %143, %145, %cst_167 {dimension_numbers = #tpu.dot_dimension_numbers<[1], [0], [0], [1], [0, 0, 1, 1], [], []>} : vector<256x4xf32>, vector<4x2xf32>, vector<256x2xf32> -> vector<256x2xf32>
    %147 = arith.addf %140, %146 : vector<256x2xf32>
    %c0_168 = arith.constant 0 : index
    %c2_169 = arith.constant 2 : index
    %c1_170 = arith.constant 1 : index
    %c0_171 = arith.constant 0 : index
    %c0_172 = arith.constant 0 : index
    %148 = vector.load %arg1[%c0_168, %c2_169, %c1_170, %c0_171, %c0_172] : memref<1x6x10x10x4xf32, #tpu.memory_space<vmem>>, vector<1x4x8x8x4xf32>
    %149 = vector.shape_cast %148 : vector<1x4x8x8x4xf32> to vector<4x8x8x4xf32>
    %150 = vector.shape_cast %149 : vector<4x8x8x4xf32> to vector<256x4xf32>
    %c21 = arith.constant 21 : index
    %c0_173 = arith.constant 0 : index
    %c0_174 = arith.constant 0 : index
    %151 = vector.load %arg3[%c21, %c0_173, %c0_174] : memref<27x4x2xf32, #tpu.memory_space<vmem>>, vector<1x4x2xf32>
    %152 = vector.shape_cast %151 : vector<1x4x2xf32> to vector<4x2xf32>
    %cst_175 = arith.constant dense<0.000000e+00> : vector<256x2xf32>
    %153 = tpu.matmul %150, %152, %cst_175 {dimension_numbers = #tpu.dot_dimension_numbers<[1], [0], [0], [1], [0, 0, 1, 1], [], []>} : vector<256x4xf32>, vector<4x2xf32>, vector<256x2xf32> -> vector<256x2xf32>
    %154 = arith.addf %147, %153 : vector<256x2xf32>
    %c0_176 = arith.constant 0 : index
    %c2_177 = arith.constant 2 : index
    %c1_178 = arith.constant 1 : index
    %c1_179 = arith.constant 1 : index
    %c0_180 = arith.constant 0 : index
    %155 = vector.load %arg1[%c0_176, %c2_177, %c1_178, %c1_179, %c0_180] : memref<1x6x10x10x4xf32, #tpu.memory_space<vmem>>, vector<1x4x8x8x4xf32>
    %156 = vector.shape_cast %155 : vector<1x4x8x8x4xf32> to vector<4x8x8x4xf32>
    %157 = vector.shape_cast %156 : vector<4x8x8x4xf32> to vector<256x4xf32>
    %c22 = arith.constant 22 : index
    %c0_181 = arith.constant 0 : index
    %c0_182 = arith.constant 0 : index
    %158 = vector.load %arg3[%c22, %c0_181, %c0_182] : memref<27x4x2xf32, #tpu.memory_space<vmem>>, vector<1x4x2xf32>
    %159 = vector.shape_cast %158 : vector<1x4x2xf32> to vector<4x2xf32>
    %cst_183 = arith.constant dense<0.000000e+00> : vector<256x2xf32>
    %160 = tpu.matmul %157, %159, %cst_183 {dimension_numbers = #tpu.dot_dimension_numbers<[1], [0], [0], [1], [0, 0, 1, 1], [], []>} : vector<256x4xf32>, vector<4x2xf32>, vector<256x2xf32> -> vector<256x2xf32>
    %161 = arith.addf %154, %160 : vector<256x2xf32>
    %c0_184 = arith.constant 0 : index
    %c2_185 = arith.constant 2 : index
    %c1_186 = arith.constant 1 : index
    %c2_187 = arith.constant 2 : index
    %c0_188 = arith.constant 0 : index
    %162 = vector.load %arg1[%c0_184, %c2_185, %c1_186, %c2_187, %c0_188] : memref<1x6x10x10x4xf32, #tpu.memory_space<vmem>>, vector<1x4x8x8x4xf32>
    %163 = vector.shape_cast %162 : vector<1x4x8x8x4xf32> to vector<4x8x8x4xf32>
    %164 = vector.shape_cast %163 : vector<4x8x8x4xf32> to vector<256x4xf32>
    %c23 = arith.constant 23 : index
    %c0_189 = arith.constant 0 : index
    %c0_190 = arith.constant 0 : index
    %165 = vector.load %arg3[%c23, %c0_189, %c0_190] : memref<27x4x2xf32, #tpu.memory_space<vmem>>, vector<1x4x2xf32>
    %166 = vector.shape_cast %165 : vector<1x4x2xf32> to vector<4x2xf32>
    %cst_191 = arith.constant dense<0.000000e+00> : vector<256x2xf32>
    %167 = tpu.matmul %164, %166, %cst_191 {dimension_numbers = #tpu.dot_dimension_numbers<[1], [0], [0], [1], [0, 0, 1, 1], [], []>} : vector<256x4xf32>, vector<4x2xf32>, vector<256x2xf32> -> vector<256x2xf32>
    %168 = arith.addf %161, %167 : vector<256x2xf32>
    %c0_192 = arith.constant 0 : index
    %c2_193 = arith.constant 2 : index
    %c2_194 = arith.constant 2 : index
    %c0_195 = arith.constant 0 : index
    %c0_196 = arith.constant 0 : index
    %169 = vector.load %arg1[%c0_192, %c2_193, %c2_194, %c0_195, %c0_196] : memref<1x6x10x10x4xf32, #tpu.memory_space<vmem>>, vector<1x4x8x8x4xf32>
    %170 = vector.shape_cast %169 : vector<1x4x8x8x4xf32> to vector<4x8x8x4xf32>
    %171 = vector.shape_cast %170 : vector<4x8x8x4xf32> to vector<256x4xf32>
    %c24 = arith.constant 24 : index
    %c0_197 = arith.constant 0 : index
    %c0_198 = arith.constant 0 : index
    %172 = vector.load %arg3[%c24, %c0_197, %c0_198] : memref<27x4x2xf32, #tpu.memory_space<vmem>>, vector<1x4x2xf32>
    %173 = vector.shape_cast %172 : vector<1x4x2xf32> to vector<4x2xf32>
    %cst_199 = arith.constant dense<0.000000e+00> : vector<256x2xf32>
    %174 = tpu.matmul %171, %173, %cst_199 {dimension_numbers = #tpu.dot_dimension_numbers<[1], [0], [0], [1], [0, 0, 1, 1], [], []>} : vector<256x4xf32>, vector<4x2xf32>, vector<256x2xf32> -> vector<256x2xf32>
    %175 = arith.addf %168, %174 : vector<256x2xf32>
    %c0_200 = arith.constant 0 : index
    %c2_201 = arith.constant 2 : index
    %c2_202 = arith.constant 2 : index
    %c1_203 = arith.constant 1 : index
    %c0_204 = arith.constant 0 : index
    %176 = vector.load %arg1[%c0_200, %c2_201, %c2_202, %c1_203, %c0_204] : memref<1x6x10x10x4xf32, #tpu.memory_space<vmem>>, vector<1x4x8x8x4xf32>
    %177 = vector.shape_cast %176 : vector<1x4x8x8x4xf32> to vector<4x8x8x4xf32>
    %178 = vector.shape_cast %177 : vector<4x8x8x4xf32> to vector<256x4xf32>
    %c25 = arith.constant 25 : index
    %c0_205 = arith.constant 0 : index
    %c0_206 = arith.constant 0 : index
    %179 = vector.load %arg3[%c25, %c0_205, %c0_206] : memref<27x4x2xf32, #tpu.memory_space<vmem>>, vector<1x4x2xf32>
    %180 = vector.shape_cast %179 : vector<1x4x2xf32> to vector<4x2xf32>
    %cst_207 = arith.constant dense<0.000000e+00> : vector<256x2xf32>
    %181 = tpu.matmul %178, %180, %cst_207 {dimension_numbers = #tpu.dot_dimension_numbers<[1], [0], [0], [1], [0, 0, 1, 1], [], []>} : vector<256x4xf32>, vector<4x2xf32>, vector<256x2xf32> -> vector<256x2xf32>
    %182 = arith.addf %175, %181 : vector<256x2xf32>
    %c0_208 = arith.constant 0 : index
    %c2_209 = arith.constant 2 : index
    %c2_210 = arith.constant 2 : index
    %c2_211 = arith.constant 2 : index
    %c0_212 = arith.constant 0 : index
    %183 = vector.load %arg1[%c0_208, %c2_209, %c2_210, %c2_211, %c0_212] : memref<1x6x10x10x4xf32, #tpu.memory_space<vmem>>, vector<1x4x8x8x4xf32>
    %184 = vector.shape_cast %183 : vector<1x4x8x8x4xf32> to vector<4x8x8x4xf32>
    %185 = vector.shape_cast %184 : vector<4x8x8x4xf32> to vector<256x4xf32>
    %c26 = arith.constant 26 : index
    %c0_213 = arith.constant 0 : index
    %c0_214 = arith.constant 0 : index
    %186 = vector.load %arg3[%c26, %c0_213, %c0_214] : memref<27x4x2xf32, #tpu.memory_space<vmem>>, vector<1x4x2xf32>
    %187 = vector.shape_cast %186 : vector<1x4x2xf32> to vector<4x2xf32>
    %cst_215 = arith.constant dense<0.000000e+00> : vector<256x2xf32>
    %188 = tpu.matmul %185, %187, %cst_215 {dimension_numbers = #tpu.dot_dimension_numbers<[1], [0], [0], [1], [0, 0, 1, 1], [], []>} : vector<256x4xf32>, vector<4x2xf32>, vector<256x2xf32> -> vector<256x2xf32>
    %189 = arith.addf %182, %188 : vector<256x2xf32>
    %c0_216 = arith.constant 0 : index
    %c0_217 = arith.constant 0 : index
    %190 = vector.load %arg4[%c0_216, %c0_217] : memref<1x2xf32, #tpu.memory_space<vmem>>, vector<1x2xf32>
    %191 = vector.broadcast %190 : vector<1x2xf32> to vector<256x2xf32>
    %192 = arith.addf %189, %191 : vector<256x2xf32>
    %193 = vector.extract_strided_slice %192 {offsets = [0, 0], sizes = [256, 1], strides = [1, 1]} : vector<256x2xf32> to vector<256x1xf32>
    %194 = arith.negf %193 : vector<256x1xf32>
    %195 = math.exp %194 : vector<256x1xf32>
    %cst_218 = arith.constant 1.000000e+00 : f32
    %196 = vector.broadcast %cst_218 : f32 to vector<256x1xf32>
    %197 = arith.addf %196, %195 : vector<256x1xf32>
    %198 = arith.divf %196, %197 : vector<256x1xf32>
    %199 = vector.extract_strided_slice %192 {offsets = [0, 1], sizes = [256, 1], strides = [1, 1]} : vector<256x2xf32> to vector<256x1xf32>
    %c0_219 = arith.constant 0 : index
    %c0_220 = arith.constant 0 : index
    %c0_221 = arith.constant 0 : index
    %200 = vector.load %arg2[%c0_219, %c0_220, %c0_221] : memref<1x256x128xf32, #tpu.memory_space<vmem>>, vector<1x256x128xf32>
    %201 = vector.shape_cast %200 : vector<1x256x128xf32> to vector<256x128xf32>
    %202 = vector.broadcast %198 : vector<256x1xf32> to vector<256x128xf32>
    %203 = arith.mulf %202, %201 : vector<256x128xf32>
    %204 = vector.broadcast %199 : vector<256x1xf32> to vector<256x128xf32>
    %205 = arith.addf %203, %204 : vector<256x128xf32>
    %c0_222 = arith.constant 0 : index
    %c0_223 = arith.constant 0 : index
    %c0_224 = arith.constant 0 : index
    %206 = vector.load %arg5[%c0_222, %c0_223, %c0_224] : memref<1x256x128xf32, #tpu.memory_space<vmem>>, vector<1x256x128xf32>
    %207 = vector.shape_cast %206 : vector<1x256x128xf32> to vector<256x128xf32>
    %208 = vector.shape_cast %205 : vector<256x128xf32> to vector<1x256x128xf32>
    tpu.vector_store %arg5[%c0_222, %c0_223, %c0_224], %208 {strides = array<i32>} : memref<1x256x128xf32, #tpu.memory_space<vmem>>, vector<1x256x128xf32>,
    return
  }
  func.func @transform_0(%arg0: i32) -> (i32, i32, i32, i32, i32) {
    %c0_i32 = arith.constant 0 : i32
    %c0_i32_0 = arith.constant 0 : i32
    %c0_i32_1 = arith.constant 0 : i32
    %c0_i32_2 = arith.constant 0 : i32
    %c0_i32_3 = arith.constant 0 : i32
    return %arg0, %c0_i32, %c0_i32_0, %c0_i32_1, %c0_i32_2 : i32, i32, i32, i32, i32
  }
  func.func @transform_1(%arg0: i32) -> (i32, i32, i32) {
    %c0_i32 = arith.constant 0 : i32
    %c0_i32_0 = arith.constant 0 : i32
    %c0_i32_1 = arith.constant 0 : i32
    return %arg0, %c0_i32, %c0_i32_0 : i32, i32, i32
  }
  func.func @transform_2(%arg0: i32) -> (i32, i32, i32) {
    %c0_i32 = arith.constant 0 : i32
    %c0_i32_0 = arith.constant 0 : i32
    %c0_i32_1 = arith.constant 0 : i32
    %c0_i32_2 = arith.constant 0 : i32
    return %c0_i32, %c0_i32_0, %c0_i32_1 : i32, i32, i32
  }
  func.func @transform_3(%arg0: i32) -> (i32, i32) {
    %c0_i32 = arith.constant 0 : i32
    %c0_i32_0 = arith.constant 0 : i32
    %c0_i32_1 = arith.constant 0 : i32
    return %c0_i32, %c0_i32_0 : i32, i32
  }
  func.func @transform_4(%arg0: i32) -> (i32, i32, i32) {
    %c0_i32 = arith.constant 0 : i32
    %c0_i32_0 = arith.constant 0 : i32
    %c0_i32_1 = arith.constant 0 : i32
    return %arg0, %c0_i32, %c0_i32_0 : i32, i32, i32
  }
}

</mosaic_0001>

<bundles_post_ra>
// kernel: tpu_custom_call.1
= control target key start
LH: loop header
LB: loop body
LE: loop exit
PB: predicated region body
PF: predicated region fallthrough
CT: control target
= control target key end

     0   :  { %9 = vsyncpa [#allocation3], 0  ;;  %s20385_s0 = inlined_call_operand.vmem [shape: f32[2,6,10,10,4], index: 0, kind: input, shape index: {}]   ;;  %s20386_s1 = inlined_call_operand.vmem [shape: f32[2,256,128], index: 1, kind: input, shape index: {}]   ;;  %s20387_s2 = inlined_call_operand.vmem [shape: f32[27,4,2], index: 2, kind: input, shape index: {}]   ;;  %s20388_s3 = inlined_call_operand.vmem [shape: f32[1,2], index: 3, kind: input, shape index: {}]   ;;  %s20389_s4 = inlined_call_operand.hbm [shape: f32[2,256,128], index: 4, kind: output, shape index: {}]  }
   0x1   :  { %11 = vsyncpa [#allocation3 + $0x1], 0  ;;  %s15728_s15 = smov 0   ;;  %s15730_s16 = smov 0  }
   0x2   :  { %s15732_s17 = smov 0   ;;  %s15734_s18 = smov 0  }
   0x3 LB: > { %s15749_s19 = sadd.s32 4294967295, %s15696_s18   ;;  %s11458_s20 = sadd.s32 4294967294, %s15696_s18   ;;  %s15696_s18 = sphi %s15734_s18, %s20733_s18   ;;  %s15692_s17 = sphi %s15732_s17, %s20732_s17   ;;  %s15688_s16 = sphi %s15730_s16, %s20731_s16   ;;  %s15684_s15 = sphi %s15728_s15, %s20730_s15  }
   0x4   : > { %s15753_s21 = sadd.s32 1, %s15696_s18   ;;  %s118_s22 = sadd.s32 1, %s15692_s17 }
   0x5   : > { %s115_s23 = ssub.s32 %s15696_s18, %s15753_s21  ;;  %p128_p0 = scmp.ne.s32.totalorder %s15692_s17, %s15688_s16 }
   0x6   : > { %p116_p1 = scmp.eq.s32.totalorder %s115_s23, 0  ;;  %p129_p2 = scmp.eq.s32.totalorder %s15749_s19, 1 }
   0x7   : > { %p134_p3 = scmp.ne.s32.totalorder %s15688_s16, %s15684_s15  ;;  %p135_p4 = scmp.eq.s32.totalorder %s11458_s20, 1 }
   0x8   : > { %s15764_s24 = scalar_select %p116_p1, %s15692_s17, %s118_s22  }
   0x9   : > { %p15766_p5 = por %p129_p2, %p128_p0  ;;  %p15770_p6 = por %p135_p4, %p134_p3 }
   0xa   : > { %p11461_p7 = scmp.ge.s32.totalorder %s15696_s18, 1  ;;  %p175_p8 = scmp.lt.s32.totalorder %s15696_s18, 3 }
   0xc   : > { %p176_p9 = pnand %p11461_p7, %p175_p8 }
   0xe   : > { %179 = sbr.rel (%p176_p9) target bundleno = 1308 (0x51c), region = 36 }
  0x13   : > { %v11466_v0 = vld [vmem:[%s20387_s2 + $0x4] sm:$0xf]  ;;  %vm380_vm0 = vcmask 1043456   ;;  %p206_p10 = scmp.lt.s32.totalorder %s15749_s19, 1  ;;  %v248_v1 = vld [vmem:[%s20387_s2] sm:$0xf] }
  0x14   : > { %15432 = vmatprep.subr.msk.mxu1 %vm380_vm0, %v11466_v0  ;;  %14082 = vmatprep.subr.msk.mxu0 %vm380_vm0, %v11466_v0  ;;  %v11533_v2 = vld [vmem:[%s20387_s2 + $0x8] sm:$0xf]  ;;  %vm283_vm1 = vcmask 31744   ;;  %v15824_v9 = vld [vmem:[%s20387_s2 + $0xc] sm:$0xf]  ;;  %s203_s29 = sand.u32 1, %s15688_s16  }
  0x15   : > { %15433 = vmatpush3.msk.msra.mxu1 %vm380_vm0, %v11466_v0  ;;  %14083 = vmatpush3.msk.msra.mxu0 %vm380_vm0, %v11466_v0  ;;  %s15791_s7 = scalar_select %p206_p10, %s15749_s19, 1  ;;  %v15829_v10 = vld [vmem:[%s20387_s2 + $0x10] sm:$0xf]  ;;  %v15988_v43 = vld [vmem:[%s20387_s2 + $0x14] sm:$0xf] }
  0x16   : > { %14132 = vmatprep.subr.msk.mxu1 %vm380_vm0, %v248_v1  ;;  %14182 = vmatprep.subr.msk.mxu0 %vm380_vm0, %v11533_v2  ;;  %v15993_v44 = vld [vmem:[%s20387_s2 + $0x18] sm:$0xf]  ;;  %s11462_s30 = sshll.u32 %s203_s29, 8  ;;  %s13190_s5 = sshll.u32 %s15749_s19, 12 }
  0x17   : > { %s15434_s8 = smul.u32 960, %s15791_s7  ;;  %s13189_s22 = sshll.u32 %s15791_s7, 8 }
  0x18   : > { %s20210_s28 = scalar_lea.vmem %s20386_s1, %s13189_s22  ;;  %s20221_s7 = scalar_lea.vmem [#allocation2], %s11462_s30 }
  0x19   : > { %s15799_s11 = scalar_lea.vmem %s20385_s0, %s15434_s8  ;;  %s11384_s6 = sshll.u32 %s20221_s7, 4  ;;  %s20339_s6 = int_to_ptr.vmem [resolvable:$true] %s11384_s6 }
  0x1a   : > { %v249_v3 = vld [vmem:[%s15799_s11 + $0x1] sm:$0xff]  ;;  %v15804_v5 = vld [vmem:[%s15799_s11 + $0x11] sm:$0xff]  ;;  %s20337_s10 = scalar_lea.hbm %s20389_s4, %s13190_s5  ;;  %s20345_s19 = scalar_lea.sflag [#allocation3], %s203_s29 }
  0x1b   : > { %v265_v4 = vld [vmem:[%s15799_s11 + $0x141] sm:$0xff]  ;;  %14084 = vmatprep.mubr.msk.f32.mxu0 %vm283_vm1, %v249_v3  ;;  %v15809_v6 = vld [vmem:[%s15799_s11 + $0x151] sm:$0xff]  ;;  %s15636_s12 = scalar_lea.vmem %s20339_s6, 4096  ;;  %s15700_s13 = smov [#allocation2]  }
  0x1c   : > { %14108 = vmatprep.mubr.msk.f32.mxu1 %vm283_vm1, %v265_v4  ;;  %v15812_v7 = vld [vmem:[%s15799_s11 + $0x21] sm:$0xff]  ;;  %14085 = vmatmul.mubr.msk.f32.vlgmr.msra.gmra.mxu0 %vm283_vm1, %v15804_v5  ;;  %v15834_v11 = vld [vmem:[%s15799_s11 + $0x31] sm:$0xff]  ;;  %p15637_p11 = scmp.ne.s32.totalorder %s20339_s6, %s15636_s12  ;;  %s15640_s14 = sshll.u32 %s15700_s13, 4  ;;  %s15641_s14 = int_to_ptr.vmem [resolvable:$false] %s15640_s14 }
  0x1d   : > { %v15815_v8 = vld [vmem:[%s15799_s11 + $0x161] sm:$0xff]  ;;  %14109 = vmatmul.mubr.msk.f32.vlgmr.msra.gmra.mxu1 %vm283_vm1, %v15809_v6  ;;  %14183 = vmatpush3.msk.msra.mxu0 %vm380_vm0, %v11533_v2  ;;  %v15837_v12 = vld [vmem:[%s15799_s11 + $0x171] sm:$0xff]  ;;  %p15643_p0 = scmp.lt.s32.totalorder %s20339_s6, %s15641_s14 }
  0x1e   : > { %14133 = vmatpush3.msk.msra.mxu1 %vm380_vm0, %v248_v1  ;;  %14087 = vmatprep.mubr.msk.f32.mxu0 %vm283_vm1, %v15812_v7  ;;  %v15844_v13 = vld [vmem:[%s15799_s11 + $0x41] sm:$0xff]  ;;  %v15862_v15 = vld [vmem:[%s15799_s11 + $0x51] sm:$0xff]  ;;  %p15638_p12 = pnand %p15637_p11, %p15766_p5 }
  0x1f   : > { %14111 = vmatprep.mubr.msk.f32.mxu1 %vm283_vm1, %v15815_v8  ;;  %v15847_v14 = vld [vmem:[%s15799_s11 + $0x181] sm:$0xff]  ;;  %14232 = vmatprep.subr.msk.mxu1 %vm380_vm0, %v15824_v9  ;;  %v15865_v16 = vld [vmem:[%s15799_s11 + $0x191] sm:$0xff] }
  0x20   : > { %14282 = vmatprep.subr.msk.mxu0 %vm380_vm0, %v15829_v10  ;;  %14088 = vmatmul.mubr.msk.f32.gmra.mxu0 %vm283_vm1, %v15834_v11  ;;  %v15868_v17 = vld [vmem:[%s15799_s11 + $0x61] sm:$0xff]  ;;  %v15882_v19 = vld [vmem:[%s15799_s11 + $0x71] sm:$0xff]  ;;  %p15639_p13 = pneg %p15638_p12 }
  0x21   : > { %14112 = vmatmul.mubr.msk.f32.gmra.mxu1 %vm283_vm1, %v15837_v12  ;;  %14090 = vmatprep.mubr.msk.f32.mxu0 %vm283_vm1, %v15844_v13  ;;  %v15871_v18 = vld [vmem:[%s15799_s11 + $0x1a1] sm:$0xff]  ;;  %v15885_v20 = vld [vmem:[%s15799_s11 + $0x1b1] sm:$0xff] }
  0x22   : > { %14114 = vmatprep.mubr.msk.f32.mxu1 %vm283_vm1, %v15847_v14  ;;  %v257_v21 = vld [vmem:[%s15799_s11 + $0xa1] sm:$0xff]  ;;  %v15896_v23 = vld [vmem:[%s15799_s11 + $0xb1] sm:$0xff] }
  0x23   : > { %v273_v22 = vld [vmem:[%s15799_s11 + $0x1e1] sm:$0xff]  ;;  %v15899_v24 = vld [vmem:[%s15799_s11 + $0x1f1] sm:$0xff] }
  0x24   : > { %14091 = vmatmul.mubr.msk.f32.gmra.mxu0 %vm283_vm1, %v15862_v15  ;;  %v15902_v25 = vld [vmem:[%s15799_s11 + $0xc1] sm:$0xff]  ;;  %v15916_v27 = vld [vmem:[%s15799_s11 + $0xd1] sm:$0xff] }
  0x25   : > { %14115 = vmatmul.mubr.msk.f32.gmra.mxu1 %vm283_vm1, %v15865_v16  ;;  %14093 = vmatprep.mubr.msk.f32.mxu0 %vm283_vm1, %v15868_v17  ;;  %v15905_v26 = vld [vmem:[%s15799_s11 + $0x201] sm:$0xff]  ;;  %v15919_v28 = vld [vmem:[%s15799_s11 + $0x211] sm:$0xff] }
  0x26   : > { %14117 = vmatprep.mubr.msk.f32.mxu1 %vm283_vm1, %v15871_v18  ;;  %v15922_v29 = vld [vmem:[%s15799_s11 + $0xe1] sm:$0xff]  ;;  %v15936_v31 = vld [vmem:[%s15799_s11 + $0xf1] sm:$0xff] }
  0x27   : > { %v15925_v30 = vld [vmem:[%s15799_s11 + $0x221] sm:$0xff]  ;;  %v15939_v32 = vld [vmem:[%s15799_s11 + $0x231] sm:$0xff] }
  0x28   : > { %14094 = vmatmul.mubr.msk.f32.gmra.mxu0 %vm283_vm1, %v15882_v19  ;;  %v15942_v33 = vld [vmem:[%s15799_s11 + $0x101] sm:$0xff]  ;;  %v15956_v35 = vld [vmem:[%s15799_s11 + $0x111] sm:$0xff] }
  0x29   : > { %14118 = vmatmul.mubr.msk.f32.gmra.mxu1 %vm283_vm1, %v15885_v20  ;;  %14096 = vmatprep.mubr.msk.f32.mxu0 %vm283_vm1, %v257_v21  ;;  %v15945_v34 = vld [vmem:[%s15799_s11 + $0x241] sm:$0xff]  ;;  %v15959_v36 = vld [vmem:[%s15799_s11 + $0x251] sm:$0xff] }
  0x2a   : > { %14120 = vmatprep.mubr.msk.f32.mxu1 %vm283_vm1, %v273_v22  ;;  %v216_v37 = vld [vmem:[%s15799_s11] sm:$0xff]  ;;  %v15970_v39 = vld [vmem:[%s15799_s11 + $0x10] sm:$0xff] }
  0x2b   : > { %v933_v38 = vld [vmem:[%s15799_s11 + $0x2] sm:$0xff]  ;;  %v15973_v40 = vld [vmem:[%s15799_s11 + $0x12] sm:$0xff] }
  0x2c   : > { %14097 = vmatmul.mubr.msk.f32.gmra.mxu0 %vm283_vm1, %v15896_v23  ;;  %v15976_v41 = vld [vmem:[%s15799_s11 + $0x20] sm:$0xff]  ;;  %v16000_v45 = vld [vmem:[%s15799_s11 + $0x30] sm:$0xff] }
  0x2d   : > { %14121 = vmatmul.mubr.msk.f32.gmra.mxu1 %vm283_vm1, %v15899_v24  ;;  %14099 = vmatprep.mubr.msk.f32.mxu0 %vm283_vm1, %v15902_v25  ;;  %v15979_v42 = vld [vmem:[%s15799_s11 + $0x22] sm:$0xff]  ;;  %v16003_v46 = vld [vmem:[%s15799_s11 + $0x32] sm:$0xff] }
  0x2e   : > { %14123 = vmatprep.mubr.msk.f32.mxu1 %vm283_vm1, %v15905_v26  ;;  %v16010_v47 = vld [vmem:[%s15799_s11 + $0x40] sm:$0xff]  ;;  %v16028_v49 = vld [vmem:[%s15799_s11 + $0x50] sm:$0xff] }
  0x2f   : > { %v16013_v48 = vld [vmem:[%s15799_s11 + $0x42] sm:$0xff]  ;;  %v16031_v50 = vld [vmem:[%s15799_s11 + $0x52] sm:$0xff] }
  0x30   : > { %14100 = vmatmul.mubr.msk.f32.gmra.mxu0 %vm283_vm1, %v15916_v27  ;;  %20483 = vst [vmem:[#allocation5_spill] sm:$0xff] %v16013_v48  ;;  %20484 = vst [vmem:[#allocation6_spill] sm:$0xff] %v16031_v50  ;;  %v16034_v51 = vld [vmem:[%s15799_s11 + $0x60] sm:$0xff]  ;;  %v16048_v53 = vld [vmem:[%s15799_s11 + $0x70] sm:$0xff] }
  0x31   : > { %14124 = vmatmul.mubr.msk.f32.gmra.mxu1 %vm283_vm1, %v15919_v28  ;;  %14102 = vmatprep.mubr.msk.f32.mxu0 %vm283_vm1, %v15922_v29  ;;  %v16037_v52 = vld [vmem:[%s15799_s11 + $0x62] sm:$0xff]  ;;  %v16051_v54 = vld [vmem:[%s15799_s11 + $0x72] sm:$0xff] }
  0x32   : > { %14126 = vmatprep.mubr.msk.f32.mxu1 %vm283_vm1, %v15925_v30  ;;  %20485 = vst [vmem:[#allocation7_spill] sm:$0xff] %v16037_v52  ;;  %20486 = vst [vmem:[#allocation8_spill] sm:$0xff] %v16051_v54  ;;  %v224_v55 = vld [vmem:[%s15799_s11 + $0xa0] sm:$0xff]  ;;  %v16062_v57 = vld [vmem:[%s15799_s11 + $0xb0] sm:$0xff] }
  0x33   : > { %v941_v56 = vld [vmem:[%s15799_s11 + $0xa2] sm:$0xff]  ;;  %v16065_v58 = vld [vmem:[%s15799_s11 + $0xb2] sm:$0xff] }
  0x34   : > { %14103 = vmatmul.mubr.msk.f32.gmra.mxu0 %vm283_vm1, %v15936_v31  ;;  %20487 = vst [vmem:[#allocation9_spill] sm:$0xff] %v16065_v58  ;;  %v16068_v59 = vld [vmem:[%s15799_s11 + $0xc0] sm:$0xff]  ;;  %v16082_v61 = vld [vmem:[%s15799_s11 + $0xd0] sm:$0xff] }
  0x35   : > { %14127 = vmatmul.mubr.msk.f32.gmra.mxu1 %vm283_vm1, %v15939_v32  ;;  %14105 = vmatprep.mubr.msk.f32.mxu0 %vm283_vm1, %v15942_v33  ;;  %v16071_v60 = vld [vmem:[%s15799_s11 + $0xc2] sm:$0xff]  ;;  %v16085_v62 = vld [vmem:[%s15799_s11 + $0xd2] sm:$0xff] }
  0x36   : > { %14129 = vmatprep.mubr.msk.f32.mxu1 %vm283_vm1, %v15945_v34  ;;  %20488 = vst [vmem:[#allocation10_spill] sm:$0xff] %v16071_v60  ;;  %20489 = vst [vmem:[#allocation11_spill] sm:$0xff] %v16085_v62  ;;  %v16088_v63 = vld [vmem:[%s15799_s11 + $0xe0] sm:$0xff]  ;;  %v16102_v1 = vld [vmem:[%s15799_s11 + $0xf0] sm:$0xff] }
  0x37   : > { %v16091_v0 = vld [vmem:[%s15799_s11 + $0xe2] sm:$0xff]  ;;  %v16105_v2 = vld [vmem:[%s15799_s11 + $0xf2] sm:$0xff] }
  0x38   : > { %14106 = vmatmul.mubr.msk.f32.gmra.mxu0 %vm283_vm1, %v15956_v35  ;;  %20490 = vst [vmem:[#allocation12_spill] sm:$0xff] %v16091_v0  ;;  %20491 = vst [vmem:[#allocation13_spill] sm:$0xff] %v16105_v2  ;;  %v16108_v3 = vld [vmem:[%s15799_s11 + $0x100] sm:$0xff] }
  0x39   : > { %14130 = vmatmul.mubr.msk.f32.gmra.mxu1 %vm283_vm1, %v15959_v36  ;;  %14184 = vmatprep.mubr.msk.f32.mxu0 %vm283_vm1, %v933_v38  ;;  %v16111_v4 = vld [vmem:[%s15799_s11 + $0x102] sm:$0xff]  ;;  %v16139_v38 = vld [vmem:[%s15799_s11 + $0x152] sm:$0xff] }
  0x3a   : > { %14134 = vmatprep.mubr.msk.f32.mxu1 %vm283_vm1, %v216_v37  ;;  %20492 = vst [vmem:[#allocation14_spill] sm:$0xff] %v16111_v4  ;;  %v232_v21 = vld [vmem:[%s15799_s11 + $0x140] sm:$0xff]  ;;  %v16136_v37 = vld [vmem:[%s15799_s11 + $0x150] sm:$0xff]  ;;  %20494 = vst [vmem:[#allocation16_spill] sm:$0xff] %v16139_v38 }
  0x3b   : > { %v949_v22 = vld [vmem:[%s15799_s11 + $0x142] sm:$0xff] }
  0x3c   : > { %14185 = vmatmul.mubr.msk.f32.vlgmr.msra.gmra.mxu0 %vm283_vm1, %v15973_v40 }
  0x3d   : > { %14135 = vmatmul.mubr.msk.f32.vlgmr.msra.gmra.mxu1 %vm283_vm1, %v15970_v39  ;;  %14283 = vmatpush3.msk.msra.mxu0 %vm380_vm0, %v15829_v10  ;;  %v16125_v10 = vld [vmem:[%s15799_s11 + $0x112] sm:$0xff] }
  0x3e   : > { %14233 = vmatpush3.msk.msra.mxu1 %vm380_vm0, %v15824_v9  ;;  %14137 = vmatprep.mubr.msk.f32.mxu1 %vm283_vm1, %v15976_v41  ;;  %v16122_v9 = vld [vmem:[%s15799_s11 + $0x110] sm:$0xff]  ;;  %20493 = vst [vmem:[#allocation15_spill] sm:$0xff] %v16125_v10 }
  0x3f   : > { %14187 = vmatprep.mubr.msk.f32.mxu0 %vm283_vm1, %v15979_v42  ;;  %14332 = vmatprep.subr.msk.mxu1 %vm380_vm0, %v15988_v43 }
  0x40   : > { %14382 = vmatprep.subr.msk.mxu0 %vm380_vm0, %v15993_v44  ;;  %14188 = vmatmul.mubr.msk.f32.gmra.mxu0 %vm283_vm1, %v16003_v46 }
  0x41   : > { %14138 = vmatmul.mubr.msk.f32.gmra.mxu1 %vm283_vm1, %v16000_v45  ;;  %14190 = vmatprep.mubr.msk.f32.mxu0 %vm283_vm1, %v16013_v48  ;;  %v16259_v48 = vld [vmem:[%s15799_s11 + $0x242] sm:$0xff] }
  0x42   : > { %14140 = vmatprep.mubr.msk.f32.mxu1 %vm283_vm1, %v16010_v47  ;;  %20505 = vst [vmem:[#allocation27_spill] sm:$0xff] %v16259_v48 }
  0x44   : > { %14191 = vmatmul.mubr.msk.f32.gmra.mxu0 %vm283_vm1, %v16031_v50  ;;  %v16256_v50 = vld [vmem:[%s15799_s11 + $0x240] sm:$0xff] }
  0x45   : > { %14141 = vmatmul.mubr.msk.f32.gmra.mxu1 %vm283_vm1, %v16028_v49  ;;  %14193 = vmatprep.mubr.msk.f32.mxu0 %vm283_vm1, %v16037_v52  ;;  %v16239_v52 = vld [vmem:[%s15799_s11 + $0x222] sm:$0xff] }
  0x46   : > { %14143 = vmatprep.mubr.msk.f32.mxu1 %vm283_vm1, %v16034_v51  ;;  %20504 = vst [vmem:[#allocation26_spill] sm:$0xff] %v16239_v52 }
  0x48   : > { %14194 = vmatmul.mubr.msk.f32.gmra.mxu0 %vm283_vm1, %v16051_v54  ;;  %v16219_v54 = vld [vmem:[%s15799_s11 + $0x202] sm:$0xff] }
  0x49   : > { %14144 = vmatmul.mubr.msk.f32.gmra.mxu1 %vm283_vm1, %v16048_v53  ;;  %14196 = vmatprep.mubr.msk.f32.mxu0 %vm283_vm1, %v941_v56  ;;  %v16145_v56 = vld [vmem:[%s15799_s11 + $0x162] sm:$0xff]  ;;  %20502 = vst [vmem:[#allocation24_spill] sm:$0xff] %v16219_v54 }
  0x4a   : > { %14146 = vmatprep.mubr.msk.f32.mxu1 %vm283_vm1, %v224_v55  ;;  %v16142_v55 = vld [vmem:[%s15799_s11 + $0x160] sm:$0xff]  ;;  %20495 = vst [vmem:[#allocation17_spill] sm:$0xff] %v16145_v56 }
  0x4c   : > { %14197 = vmatmul.mubr.msk.f32.gmra.mxu0 %vm283_vm1, %v16065_v58  ;;  %v16216_v58 = vld [vmem:[%s15799_s11 + $0x200] sm:$0xff] }
  0x4d   : > { %14147 = vmatmul.mubr.msk.f32.gmra.mxu1 %vm283_vm1, %v16062_v57  ;;  %14199 = vmatprep.mubr.msk.f32.mxu0 %vm283_vm1, %v16071_v60  ;;  %v957_v60 = vld [vmem:[%s15799_s11 + $0x1e2] sm:$0xff] }
  0x4e   : > { %14149 = vmatprep.mubr.msk.f32.mxu1 %vm283_vm1, %v16068_v59 }
  0x50   : > { %14200 = vmatmul.mubr.msk.f32.gmra.mxu0 %vm283_vm1, %v16085_v62  ;;  %v240_v62 = vld [vmem:[%s15799_s11 + $0x1e0] sm:$0xff] }
  0x51   : > { %14150 = vmatmul.mubr.msk.f32.gmra.mxu1 %vm283_vm1, %v16082_v61  ;;  %14202 = vmatprep.mubr.msk.f32.mxu0 %vm283_vm1, %v16091_v0  ;;  %v16185_v0 = vld [vmem:[%s15799_s11 + $0x1a2] sm:$0xff] }
  0x52   : > { %14152 = vmatprep.mubr.msk.f32.mxu1 %vm283_vm1, %v16088_v63  ;;  %20499 = vst [vmem:[#allocation21_spill] sm:$0xff] %v16185_v0 }
  0x54   : > { %14203 = vmatmul.mubr.msk.f32.gmra.mxu0 %vm283_vm1, %v16105_v2  ;;  %v16182_v2 = vld [vmem:[%s15799_s11 + $0x1a0] sm:$0xff] }
  0x55   : > { %14153 = vmatmul.mubr.msk.f32.gmra.mxu1 %vm283_vm1, %v16102_v1  ;;  %14205 = vmatprep.mubr.msk.f32.mxu0 %vm283_vm1, %v16111_v4  ;;  %v16165_v4 = vld [vmem:[%s15799_s11 + $0x182] sm:$0xff] }
  0x56   : > { %14155 = vmatprep.mubr.msk.f32.mxu1 %vm283_vm1, %v16108_v3  ;;  %20497 = vst [vmem:[#allocation19_spill] sm:$0xff] %v16165_v4 }
  0x58   : > { %14206 = vmatmul.mubr.msk.f32.gmra.mxu0 %vm283_vm1, %v16125_v10  ;;  %v16162_v10 = vld [vmem:[%s15799_s11 + $0x180] sm:$0xff] }
  0x59   : > { %14156 = vmatmul.mubr.msk.f32.gmra.mxu1 %vm283_vm1, %v16122_v9  ;;  %14208 = vmatprep.mubr.msk.f32.mxu0 %vm283_vm1, %v949_v22  ;;  %v16159_v22 = vld [vmem:[%s15799_s11 + $0x172] sm:$0xff] }
  0x5a   : > { %14158 = vmatprep.mubr.msk.f32.mxu1 %vm283_vm1, %v232_v21  ;;  %v16156_v21 = vld [vmem:[%s15799_s11 + $0x170] sm:$0xff]  ;;  %20496 = vst [vmem:[#allocation18_spill] sm:$0xff] %v16159_v22 }
  0x5c   : > { %14209 = vmatmul.mubr.msk.f32.gmra.mxu0 %vm283_vm1, %v16139_v38  ;;  %v16179_v38 = vld [vmem:[%s15799_s11 + $0x192] sm:$0xff] }
  0x5d   : > { %14159 = vmatmul.mubr.msk.f32.gmra.mxu1 %vm283_vm1, %v16136_v37  ;;  %14211 = vmatprep.mubr.msk.f32.mxu0 %vm283_vm1, %v16145_v56  ;;  %v16176_v56 = vld [vmem:[%s15799_s11 + $0x190] sm:$0xff]  ;;  %20498 = vst [vmem:[#allocation20_spill] sm:$0xff] %v16179_v38 }
  0x5e   : > { %14161 = vmatprep.mubr.msk.f32.mxu1 %vm283_vm1, %v16142_v55 }
  0x60   : > { %14212 = vmatmul.mubr.msk.f32.gmra.mxu0 %vm283_vm1, %v16159_v22  ;;  %v16199_v22 = vld [vmem:[%s15799_s11 + $0x1b2] sm:$0xff] }
  0x61   : > { %14162 = vmatmul.mubr.msk.f32.gmra.mxu1 %vm283_vm1, %v16156_v21  ;;  %14214 = vmatprep.mubr.msk.f32.mxu0 %vm283_vm1, %v16165_v4  ;;  %v16196_v4 = vld [vmem:[%s15799_s11 + $0x1b0] sm:$0xff]  ;;  %20500 = vst [vmem:[#allocation22_spill] sm:$0xff] %v16199_v22 }
  0x62   : > { %14164 = vmatprep.mubr.msk.f32.mxu1 %vm283_vm1, %v16162_v10 }
  0x64   : > { %14215 = vmatmul.mubr.msk.f32.gmra.mxu0 %vm283_vm1, %v16179_v38  ;;  %v16213_v38 = vld [vmem:[%s15799_s11 + $0x1f2] sm:$0xff] }
  0x65   : > { %14165 = vmatmul.mubr.msk.f32.gmra.mxu1 %vm283_vm1, %v16176_v56  ;;  %14217 = vmatprep.mubr.msk.f32.mxu0 %vm283_vm1, %v16185_v0  ;;  %v16210_v0 = vld [vmem:[%s15799_s11 + $0x1f0] sm:$0xff]  ;;  %20501 = vst [vmem:[#allocation23_spill] sm:$0xff] %v16213_v38 }
  0x66   : > { %14167 = vmatprep.mubr.msk.f32.mxu1 %vm283_vm1, %v16182_v2 }
  0x68   : > { %14218 = vmatmul.mubr.msk.f32.gmra.mxu0 %vm283_vm1, %v16199_v22  ;;  %v16236_v22 = vld [vmem:[%s15799_s11 + $0x220] sm:$0xff] }
  0x69   : > { %14168 = vmatmul.mubr.msk.f32.gmra.mxu1 %vm283_vm1, %v16196_v4  ;;  %14220 = vmatprep.mubr.msk.f32.mxu0 %vm283_vm1, %v957_v60  ;;  %v16230_v60 = vld [vmem:[%s15799_s11 + $0x210] sm:$0xff] }
  0x6a   : > { %14170 = vmatprep.mubr.msk.f32.mxu1 %vm283_vm1, %v240_v62  ;;  %v16233_v62 = vld [vmem:[%s15799_s11 + $0x212] sm:$0xff] }
  0x6b   : > { %20503 = vst [vmem:[#allocation25_spill] sm:$0xff] %v16233_v62 }
  0x6c   : > { %14221 = vmatmul.mubr.msk.f32.gmra.mxu0 %vm283_vm1, %v16213_v38  ;;  %v16253_v38 = vld [vmem:[%s15799_s11 + $0x232] sm:$0xff] }
  0x6d   : > { %14171 = vmatmul.mubr.msk.f32.gmra.mxu1 %vm283_vm1, %v16210_v0  ;;  %14223 = vmatprep.mubr.msk.f32.mxu0 %vm283_vm1, %v16219_v54  ;;  %v16250_v54 = vld [vmem:[%s15799_s11 + $0x230] sm:$0xff] }
  0x6e   : > { %14173 = vmatprep.mubr.msk.f32.mxu1 %vm283_vm1, %v16216_v58 }
  0x70   : > { %14224 = vmatmul.mubr.msk.f32.gmra.mxu0 %vm283_vm1, %v16233_v62  ;;  %v16273_v62 = vld [vmem:[%s15799_s11 + $0x252] sm:$0xff] }
  0x71   : > { %14174 = vmatmul.mubr.msk.f32.gmra.mxu1 %vm283_vm1, %v16230_v60  ;;  %14226 = vmatprep.mubr.msk.f32.mxu0 %vm283_vm1, %v16239_v52  ;;  %v16270_v52 = vld [vmem:[%s15799_s11 + $0x250] sm:$0xff]  ;;  %20506 = vst [vmem:[#allocation28_spill] sm:$0xff] %v16273_v62 }
  0x72   : > { %14176 = vmatprep.mubr.msk.f32.mxu1 %vm283_vm1, %v16236_v22 }
  0x74   : > { %14227 = vmatmul.mubr.msk.f32.gmra.mxu0 %vm283_vm1, %v16253_v38 }
  0x75   : > { %14177 = vmatmul.mubr.msk.f32.gmra.mxu1 %vm283_vm1, %v16250_v54  ;;  %14229 = vmatprep.mubr.msk.f32.mxu0 %vm283_vm1, %v16259_v48  ;;  %v16290_v48 = vld [vmem:[%s20387_s2 + $0x1c] sm:$0xf] }
  0x76   : > { %14179 = vmatprep.mubr.msk.f32.mxu1 %vm283_vm1, %v16256_v50 }
  0x78   : > { %14230 = vmatmul.mubr.msk.f32.gmra.mxu0 %vm283_vm1, %v16273_v62  ;;  %v16295_v62 = vld [vmem:[%s20387_s2 + $0x20] sm:$0xf] }
  0x79   : > { %14180 = vmatmul.mubr.msk.f32.gmra.mxu1 %vm283_vm1, %v16270_v52  ;;  %14284 = vmatprep.mubr.msk.f32.mxu0 %vm283_vm1, %v15804_v5  ;;  %v16326_v5 = vld [vmem:[%s15799_s11 + $0x80] sm:$0xff] }
  0x7a   : > { %14234 = vmatprep.mubr.msk.f32.mxu1 %vm283_vm1, %v15970_v39  ;;  %v16329_v39 = vld [vmem:[%s15799_s11 + $0x81] sm:$0xff] }
  0x7c   : > { %14285 = vmatmul.mubr.msk.f32.vlgmr.msra.gmra.mxu0 %vm283_vm1, %v15812_v7 }
  0x7d   : > { %14235 = vmatmul.mubr.msk.f32.vlgmr.msra.gmra.mxu1 %vm283_vm1, %v15976_v41  ;;  %14383 = vmatpush3.msk.msra.mxu0 %vm380_vm0, %v15993_v44 }
  0x7e   : > { %14333 = vmatpush3.msk.msra.mxu1 %vm380_vm0, %v15988_v43  ;;  %14237 = vmatprep.mubr.msk.f32.mxu1 %vm283_vm1, %v16000_v45 }
  0x7f   : > { %14287 = vmatprep.mubr.msk.f32.mxu0 %vm283_vm1, %v15834_v11  ;;  %14432 = vmatprep.subr.msk.mxu1 %vm380_vm0, %v16290_v48 }
  0x80   : > { %14482 = vmatprep.subr.msk.mxu0 %vm380_vm0, %v16295_v62  ;;  %14288 = vmatmul.mubr.msk.f32.gmra.mxu0 %vm283_vm1, %v15844_v13 }
  0x81   : > { %14238 = vmatmul.mubr.msk.f32.gmra.mxu1 %vm283_vm1, %v16010_v47  ;;  %14290 = vmatprep.mubr.msk.f32.mxu0 %vm283_vm1, %v15862_v15 }
  0x82   : > { %14240 = vmatprep.mubr.msk.f32.mxu1 %vm283_vm1, %v16028_v49 }
  0x84   : > { %14291 = vmatmul.mubr.msk.f32.gmra.mxu0 %vm283_vm1, %v15868_v17 }
  0x85   : > { %14241 = vmatmul.mubr.msk.f32.gmra.mxu1 %vm283_vm1, %v16034_v51  ;;  %14293 = vmatprep.mubr.msk.f32.mxu0 %vm283_vm1, %v15882_v19  ;;  %v16364_v19 = vld [vmem:[%s15799_s11 + $0x120] sm:$0xff] }
  0x86   : > { %14243 = vmatprep.mubr.msk.f32.mxu1 %vm283_vm1, %v16048_v53 }
  0x88   : > { %14294 = vmatmul.mubr.msk.f32.gmra.mxu0 %vm283_vm1, %v16329_v39 }
  0x89   : > { %14244 = vmatmul.mubr.msk.f32.gmra.mxu1 %vm283_vm1, %v16326_v5  ;;  %14296 = vmatprep.mubr.msk.f32.mxu0 %vm283_vm1, %v15896_v23  ;;  %v16367_v23 = vld [vmem:[%s15799_s11 + $0x121] sm:$0xff] }
  0x8a   : > { %14246 = vmatprep.mubr.msk.f32.mxu1 %vm283_vm1, %v16062_v57  ;;  %v20522_v57 = vld [vmem:[#allocation19_spill] sm:$0xff] }
  0x8c   : > { %14297 = vmatmul.mubr.msk.f32.gmra.mxu0 %vm283_vm1, %v15902_v25  ;;  %v20510_v25 = vld [vmem:[#allocation7_spill] sm:$0xff] }
  0x8d   : > { %14247 = vmatmul.mubr.msk.f32.gmra.mxu1 %vm283_vm1, %v16068_v59  ;;  %14299 = vmatprep.mubr.msk.f32.mxu0 %vm283_vm1, %v15916_v27  ;;  %v16496_v27 = vld [vmem:[%s15799_s11 + $0x82] sm:$0xff] }
  0x8e   : > { %14249 = vmatprep.mubr.msk.f32.mxu1 %vm283_vm1, %v16082_v61 }
  0x90   : > { %14300 = vmatmul.mubr.msk.f32.gmra.mxu0 %vm283_vm1, %v15922_v29  ;;  %v20512_v29 = vld [vmem:[#allocation9_spill] sm:$0xff] }
  0x91   : > { %14250 = vmatmul.mubr.msk.f32.gmra.mxu1 %vm283_vm1, %v16088_v63  ;;  %14302 = vmatprep.mubr.msk.f32.mxu0 %vm283_vm1, %v15936_v31  ;;  %v20514_v31 = vld [vmem:[#allocation11_spill] sm:$0xff] }
  0x92   : > { %14252 = vmatprep.mubr.msk.f32.mxu1 %vm283_vm1, %v16102_v1 }
  0x94   : > { %14303 = vmatmul.mubr.msk.f32.gmra.mxu0 %vm283_vm1, %v15942_v33  ;;  %v20516_v33 = vld [vmem:[#allocation13_spill] sm:$0xff] }
  0x95   : > { %14253 = vmatmul.mubr.msk.f32.gmra.mxu1 %vm283_vm1, %v16108_v3  ;;  %14305 = vmatprep.mubr.msk.f32.mxu0 %vm283_vm1, %v15956_v35  ;;  %v20518_v35 = vld [vmem:[#allocation15_spill] sm:$0xff] }
  0x96   : > { %14255 = vmatprep.mubr.msk.f32.mxu1 %vm283_vm1, %v16122_v9 }
  0x98   : > { %14306 = vmatmul.mubr.msk.f32.gmra.mxu0 %vm283_vm1, %v16367_v23 }
  0x99   : > { %14256 = vmatmul.mubr.msk.f32.gmra.mxu1 %vm283_vm1, %v16364_v19  ;;  %14308 = vmatprep.mubr.msk.f32.mxu0 %vm283_vm1, %v15809_v6  ;;  %v16402_v6 = vld [vmem:[%s15799_s11 + $0x1c0] sm:$0xff] }
  0x9a   : > { %14258 = vmatprep.mubr.msk.f32.mxu1 %vm283_vm1, %v16136_v37 }
  0x9c   : > { %14309 = vmatmul.mubr.msk.f32.gmra.mxu0 %vm283_vm1, %v15815_v8  ;;  %v16405_v8 = vld [vmem:[%s15799_s11 + $0x1c1] sm:$0xff] }
  0x9d   : > { %14259 = vmatmul.mubr.msk.f32.gmra.mxu1 %vm283_vm1, %v16142_v55  ;;  %14311 = vmatprep.mubr.msk.f32.mxu0 %vm283_vm1, %v15837_v12  ;;  %v16440_v12 = vld [vmem:[%s15799_s11 + $0x260] sm:$0xff] }
  0x9e   : > { %14261 = vmatprep.mubr.msk.f32.mxu1 %vm283_vm1, %v16156_v21 }
  0xa0   : > { %14312 = vmatmul.mubr.msk.f32.gmra.mxu0 %vm283_vm1, %v15847_v14  ;;  %v16443_v14 = vld [vmem:[%s15799_s11 + $0x261] sm:$0xff] }
  0xa1   : > { %14262 = vmatmul.mubr.msk.f32.gmra.mxu1 %vm283_vm1, %v16162_v10  ;;  %14314 = vmatprep.mubr.msk.f32.mxu0 %vm283_vm1, %v15865_v16  ;;  %20507 = vst [vmem:[#allocation29_spill] sm:$0xff] %v16443_v14  ;;  %v16460_v16 = vld [vmem:[%s20387_s2 + $0x24] sm:$0xf] }
  0xa2   : > { %14264 = vmatprep.mubr.msk.f32.mxu1 %vm283_vm1, %v16176_v56 }
  0xa4   : > { %14315 = vmatmul.mubr.msk.f32.gmra.mxu0 %vm283_vm1, %v15871_v18  ;;  %v16465_v18 = vld [vmem:[%s20387_s2 + $0x28] sm:$0xf] }
  0xa5   : > { %14265 = vmatmul.mubr.msk.f32.gmra.mxu1 %vm283_vm1, %v16182_v2  ;;  %14317 = vmatprep.mubr.msk.f32.mxu0 %vm283_vm1, %v15885_v20  ;;  %v20508_v20 = vld [vmem:[#allocation5_spill] sm:$0xff] }
  0xa6   : > { %14267 = vmatprep.mubr.msk.f32.mxu1 %vm283_vm1, %v16196_v4 }
  0xa8   : > { %14318 = vmatmul.mubr.msk.f32.gmra.mxu0 %vm283_vm1, %v16405_v8 }
  0xa9   : > { %14268 = vmatmul.mubr.msk.f32.gmra.mxu1 %vm283_vm1, %v16402_v6  ;;  %14320 = vmatprep.mubr.msk.f32.mxu0 %vm283_vm1, %v15899_v24  ;;  %v20509_v24 = vld [vmem:[#allocation6_spill] sm:$0xff] }
  0xaa   : > { %14270 = vmatprep.mubr.msk.f32.mxu1 %vm283_vm1, %v16210_v0 }
  0xac   : > { %14321 = vmatmul.mubr.msk.f32.gmra.mxu0 %vm283_vm1, %v15905_v26  ;;  %v20511_v26 = vld [vmem:[#allocation8_spill] sm:$0xff] }
  0xad   : > { %14271 = vmatmul.mubr.msk.f32.gmra.mxu1 %vm283_vm1, %v16216_v58  ;;  %14323 = vmatprep.mubr.msk.f32.mxu0 %vm283_vm1, %v15919_v28  ;;  %v11772_v28 = vld [vmem:[%s15799_s11 + $0x90] sm:$0xff] }
  0xae   : > { %14273 = vmatprep.mubr.msk.f32.mxu1 %vm283_vm1, %v16230_v60 }
  0xb0   : > { %14324 = vmatmul.mubr.msk.f32.gmra.mxu0 %vm283_vm1, %v15925_v30  ;;  %v20513_v30 = vld [vmem:[#allocation10_spill] sm:$0xff] }
  0xb1   : > { %14274 = vmatmul.mubr.msk.f32.gmra.mxu1 %vm283_vm1, %v16236_v22  ;;  %14326 = vmatprep.mubr.msk.f32.mxu0 %vm283_vm1, %v15939_v32  ;;  %v20515_v32 = vld [vmem:[#allocation12_spill] sm:$0xff] }
  0xb2   : > { %14276 = vmatprep.mubr.msk.f32.mxu1 %vm283_vm1, %v16250_v54 }
  0xb4   : > { %14327 = vmatmul.mubr.msk.f32.gmra.mxu0 %vm283_vm1, %v15945_v34  ;;  %v20517_v34 = vld [vmem:[#allocation14_spill] sm:$0xff] }
  0xb5   : > { %14277 = vmatmul.mubr.msk.f32.gmra.mxu1 %vm283_vm1, %v16256_v50  ;;  %14329 = vmatprep.mubr.msk.f32.mxu0 %vm283_vm1, %v15959_v36  ;;  %v16531_v36 = vld [vmem:[%s15799_s11 + $0x122] sm:$0xff] }
  0xb6   : > { %14279 = vmatprep.mubr.msk.f32.mxu1 %vm283_vm1, %v16270_v52 }
  0xb8   : > { %14330 = vmatmul.mubr.msk.f32.gmra.mxu0 %vm283_vm1, %v16443_v14  ;;  %v20533_v14 = vld [vmem:[#allocation27_spill] sm:$0xff] }
  0xb9   : > { %14280 = vmatmul.mubr.msk.f32.gmra.mxu1 %vm283_vm1, %v16440_v12  ;;  %14384 = vmatprep.mubr.msk.f32.mxu0 %vm283_vm1, %v15976_v41  ;;  %v20519_v41 = vld [vmem:[#allocation16_spill] sm:$0xff] }
  0xba   : > { %14334 = vmatprep.mubr.msk.f32.mxu1 %vm283_vm1, %v15973_v40  ;;  %v11780_v40 = vld [vmem:[%s15799_s11 + $0x130] sm:$0xff] }
  0xbc   : > { %14385 = vmatmul.mubr.msk.f32.vlgmr.msra.gmra.mxu0 %vm283_vm1, %v16000_v45  ;;  %v20520_v45 = vld [vmem:[#allocation17_spill] sm:$0xff] }
  0xbd   : > { %14335 = vmatmul.mubr.msk.f32.vlgmr.msra.gmra.mxu1 %vm283_vm1, %v15979_v42  ;;  %14483 = vmatpush3.msk.msra.mxu0 %vm380_vm0, %v16295_v62 }
  0xbe   : > { %14433 = vmatpush3.msk.msra.mxu1 %vm380_vm0, %v16290_v48  ;;  %14337 = vmatprep.mubr.msk.f32.mxu1 %vm283_vm1, %v16003_v46 }
  0xbf   : > { %14387 = vmatprep.mubr.msk.f32.mxu0 %vm283_vm1, %v16010_v47  ;;  %14532 = vmatprep.subr.msk.mxu1 %vm380_vm0, %v16460_v16  ;;  %v20521_v47 = vld [vmem:[#allocation18_spill] sm:$0xff] }
  0xc0   : > { %14582 = vmatprep.subr.msk.mxu0 %vm380_vm0, %v16465_v18  ;;  %14388 = vmatmul.mubr.msk.f32.gmra.mxu0 %vm283_vm1, %v16028_v49 }
  0xc1   : > { %14338 = vmatmul.mubr.msk.f32.gmra.mxu1 %vm283_vm1, %v20508_v20  ;;  %14390 = vmatprep.mubr.msk.f32.mxu0 %vm283_vm1, %v16034_v51 }
  0xc2   : > { %14340 = vmatprep.mubr.msk.f32.mxu1 %vm283_vm1, %v20509_v24 }
  0xc4   : > { %14391 = vmatmul.mubr.msk.f32.gmra.mxu0 %vm283_vm1, %v16048_v53 }
  0xc5   : > { %14341 = vmatmul.mubr.msk.f32.gmra.mxu1 %vm283_vm1, %v20510_v25  ;;  %14393 = vmatprep.mubr.msk.f32.mxu0 %vm283_vm1, %v16326_v5 }
  0xc6   : > { %14343 = vmatprep.mubr.msk.f32.mxu1 %vm283_vm1, %v20511_v26 }
  0xc8   : > { %14394 = vmatmul.mubr.msk.f32.gmra.mxu0 %vm283_vm1, %v11772_v28  ;;  %v20527_v28 = vld [vmem:[#allocation24_spill] sm:$0xff] }
  0xc9   : > { %14344 = vmatmul.mubr.msk.f32.gmra.mxu1 %vm283_vm1, %v16496_v27  ;;  %14396 = vmatprep.mubr.msk.f32.mxu0 %vm283_vm1, %v16068_v59  ;;  %v20523_v59 = vld [vmem:[#allocation20_spill] sm:$0xff] }
  0xca   : > { %14346 = vmatprep.mubr.msk.f32.mxu1 %vm283_vm1, %v20512_v29  ;;  %v20528_v29 = vld [vmem:[#allocation25_spill] sm:$0xff] }
  0xcc   : > { %14397 = vmatmul.mubr.msk.f32.gmra.mxu0 %vm283_vm1, %v16082_v61 }
  0xcd   : > { %14347 = vmatmul.mubr.msk.f32.gmra.mxu1 %vm283_vm1, %v20513_v30  ;;  %14399 = vmatprep.mubr.msk.f32.mxu0 %vm283_vm1, %v16088_v63 }
  0xce   : > { %14349 = vmatprep.mubr.msk.f32.mxu1 %vm283_vm1, %v20514_v31 }
  0xd0   : > { %14400 = vmatmul.mubr.msk.f32.gmra.mxu0 %vm283_vm1, %v16102_v1 }
  0xd1   : > { %14350 = vmatmul.mubr.msk.f32.gmra.mxu1 %vm283_vm1, %v20515_v32  ;;  %14402 = vmatprep.mubr.msk.f32.mxu0 %vm283_vm1, %v16108_v3  ;;  %v20524_v3 = vld [vmem:[#allocation21_spill] sm:$0xff] }
  0xd2   : > { %14352 = vmatprep.mubr.msk.f32.mxu1 %vm283_vm1, %v20516_v33 }
  0xd4   : > { %14403 = vmatmul.mubr.msk.f32.gmra.mxu0 %vm283_vm1, %v16122_v9  ;;  %v20525_v9 = vld [vmem:[#allocation22_spill] sm:$0xff] }
  0xd5   : > { %14353 = vmatmul.mubr.msk.f32.gmra.mxu1 %vm283_vm1, %v20517_v34  ;;  %14405 = vmatprep.mubr.msk.f32.mxu0 %vm283_vm1, %v16364_v19 }
  0xd6   : > { %14355 = vmatprep.mubr.msk.f32.mxu1 %vm283_vm1, %v20518_v35 }
  0xd8   : > { %14406 = vmatmul.mubr.msk.f32.gmra.mxu0 %vm283_vm1, %v11780_v40 }
  0xd9   : > { %14356 = vmatmul.mubr.msk.f32.gmra.mxu1 %vm283_vm1, %v16531_v36  ;;  %14408 = vmatprep.mubr.msk.f32.mxu0 %vm283_vm1, %v16142_v55 }
  0xda   : > { %14358 = vmatprep.mubr.msk.f32.mxu1 %vm283_vm1, %v20519_v41 }
  0xdc   : > { %v16541_v43 = vpop.f32.mrf.mxu0  ;;  %14409 = vmatmul.mubr.msk.f32.gmra.mxu0 %vm283_vm1, %v16156_v21 }
  0xdd   : > { %v16543_v44 = vpop.f32.mrf.mxu1  ;;  %14359 = vmatmul.mubr.msk.f32.gmra.mxu1 %vm283_vm1, %v20520_v45  ;;  %14411 = vmatprep.mubr.msk.f32.mxu0 %vm283_vm1, %v16162_v10  ;;  %v11788_v10 = vld [vmem:[%s15799_s11 + $0x1d0] sm:$0xff] }
  0xde   : > { %14361 = vmatprep.mubr.msk.f32.mxu1 %vm283_vm1, %v20521_v47  ;;  %v16553_v48 = vpop.f32.mrf.mxu0 }
  0xdf   : > { %v16555_v49 = vpop.f32.mrf.mxu1 }
  0xe0   : > { %v16557_v51 = vpop.f32.mrf.mxu0  ;;  %14412 = vmatmul.mubr.msk.f32.gmra.mxu0 %vm283_vm1, %v16176_v56 }
  0xe1   : > { %v16559_v53 = vpop.f32.mrf.mxu1  ;;  %14362 = vmatmul.mubr.msk.f32.gmra.mxu1 %vm283_vm1, %v20522_v57  ;;  %14414 = vmatprep.mubr.msk.f32.mxu0 %vm283_vm1, %v16182_v2  ;;  %v16586_v2 = vld [vmem:[%s15799_s11 + $0x1c2] sm:$0xff] }
  0xe2   : > { %14364 = vmatprep.mubr.msk.f32.mxu1 %vm283_vm1, %v20523_v59  ;;  %v16569_v61 = vpop.f32.mrf.mxu0 }
  0xe3   : > { %v16571_v63 = vpop.f32.mrf.mxu1 }
  0xe4   : > { %v16573_v0 = vpop.f32.mrf.mxu0  ;;  %14415 = vmatmul.mubr.msk.f32.gmra.mxu0 %vm283_vm1, %v16196_v4  ;;  %v20526_v4 = vld [vmem:[#allocation23_spill] sm:$0xff] }
  0xe5   : > { %v16575_v1 = vpop.f32.mrf.mxu1  ;;  %14365 = vmatmul.mubr.msk.f32.gmra.mxu1 %vm283_vm1, %v20524_v3  ;;  %14417 = vmatprep.mubr.msk.f32.mxu0 %vm283_vm1, %v16402_v6 }
  0xe6   : > { %14367 = vmatprep.mubr.msk.f32.mxu1 %vm283_vm1, %v20525_v9  ;;  %v16589_v37 = vpop.f32.mrf.mxu0 }
  0xe7   : > { %v16591_v55 = vpop.f32.mrf.mxu1 }
  0xe8   : > { %v16593_v56 = vpop.f32.mrf.mxu0  ;;  %14418 = vmatmul.mubr.msk.f32.gmra.mxu0 %vm283_vm1, %v11788_v10 }
  0xe9   : > { %v16595_v21 = vpop.f32.mrf.mxu1  ;;  %14368 = vmatmul.mubr.msk.f32.gmra.mxu1 %vm283_vm1, %v16586_v2  ;;  %14420 = vmatprep.mubr.msk.f32.mxu0 %vm283_vm1, %v16216_v58 }
  0xea   : > { %14370 = vmatprep.mubr.msk.f32.mxu1 %vm283_vm1, %v20526_v4  ;;  %v16604_v62 = vpop.f32.mrf.mxu0  ;;  %v20530_v4 = vld [vmem:[#allocation26_spill] sm:$0xff] }
  0xeb   : > { %v16606_v5 = vpop.f32.mrf.mxu1 }
  0xec   : > { %v16608_v19 = vpop.f32.mrf.mxu0  ;;  %14421 = vmatmul.mubr.msk.f32.gmra.mxu0 %vm283_vm1, %v16230_v60 }
  0xed   : > { %v16610_v6 = vpop.f32.mrf.mxu1  ;;  %14371 = vmatmul.mubr.msk.f32.gmra.mxu1 %vm283_vm1, %v20527_v28  ;;  %14423 = vmatprep.mubr.msk.f32.mxu0 %vm283_vm1, %v16236_v22 }
  0xee   : > { %14373 = vmatprep.mubr.msk.f32.mxu1 %vm283_vm1, %v20528_v29  ;;  %v16620_v58 = vpop.f32.mrf.mxu0 }
  0xef   : > { %v16622_v40 = vpop.f32.mrf.mxu1 }
  0xf0   : > { %v16624_v41 = vpop.f32.mrf.mxu0  ;;  %14424 = vmatmul.mubr.msk.f32.gmra.mxu0 %vm283_vm1, %v16250_v54  ;;  %v20534_v54 = vld [vmem:[#allocation28_spill] sm:$0xff] }
  0xf1   : > { %v16626_v10 = vpop.f32.mrf.mxu1  ;;  %14374 = vmatmul.mubr.msk.f32.gmra.mxu1 %vm283_vm1, %v20530_v4  ;;  %14426 = vmatprep.mubr.msk.f32.mxu0 %vm283_vm1, %v16256_v50  ;;  %v16653_v50 = vld [vmem:[%s15799_s11 + $0x262] sm:$0xff] }
  0xf2   : > { %20529 = vst [vmem:[#allocation5_spill] sm:$0xff] %v16626_v10  ;;  %14376 = vmatprep.mubr.msk.f32.mxu1 %vm283_vm1, %v16253_v38  ;;  %v16636_v22 = vpop.f32.mrf.mxu0  ;;  %v11796_v38 = vld [vmem:[%s15799_s11 + $0x270] sm:$0xff] }
  0xf3   : > { %v16638_v60 = vpop.f32.mrf.mxu1 }
  0xf4   : > { %20531 = vst [vmem:[#allocation6_spill] sm:$0xff] %v16638_v60  ;;  %v16640_v28 = vpop.f32.mrf.mxu0  ;;  %14427 = vmatmul.mubr.msk.f32.gmra.mxu0 %vm283_vm1, %v16270_v52 }
  0xf5   : > { %v16642_v29 = vpop.f32.mrf.mxu1  ;;  %14377 = vmatmul.mubr.msk.f32.gmra.mxu1 %vm283_vm1, %v20533_v14  ;;  %14429 = vmatprep.mubr.msk.f32.mxu0 %vm283_vm1, %v16440_v12 }
  0xf6   : > { %20532 = vst [vmem:[#allocation7_spill] sm:$0xff] %v16642_v29  ;;  %14379 = vmatprep.mubr.msk.f32.mxu1 %vm283_vm1, %v20534_v54  ;;  %v16656_v4 = vpop.f32.mrf.mxu0 }
  0xf7   : > { %v16658_v60 = vpop.f32.mrf.mxu1 }
  0xf8   : > { %v16660_v29 = vpop.f32.mrf.mxu0  ;;  %14430 = vmatmul.mubr.msk.f32.gmra.mxu0 %vm283_vm1, %v11796_v38  ;;  %v16682_v38 = vld [vmem:[%s20387_s2 + $0x2c] sm:$0xf] }
  0xf9   : > { %v16662_v10 = vpop.f32.mrf.mxu1  ;;  %14380 = vmatmul.mubr.msk.f32.gmra.mxu1 %vm283_vm1, %v16653_v50  ;;  %14484 = vmatprep.mubr.msk.f32.mxu0 %vm283_vm1, %v15979_v42 }
  0xfa   : > { %20535 = vst [vmem:[#allocation8_spill] sm:$0xff] %v16662_v10  ;;  %14434 = vmatprep.mubr.msk.f32.mxu1 %vm283_vm1, %v15812_v7  ;;  %v16671_v52 = vpop.f32.mrf.mxu0  ;;  %v16687_v7 = vld [vmem:[%s20387_s2 + $0x30] sm:$0xf] }
  0xfb   : > { %v16673_v12 = vpop.f32.mrf.mxu1 }
  0xfc   : > { %20536 = vst [vmem:[#allocation9_spill] sm:$0xff] %v16673_v12  ;;  %v14186_v54 = vpop.f32.mrf.mxu0  ;;  %14485 = vmatmul.mubr.msk.f32.vlgmr.msra.gmra.mxu0 %vm283_vm1, %v16003_v46 }
  0xfd   : > { %v14136_v14 = vpop.f32.mrf.mxu1  ;;  %14435 = vmatmul.mubr.msk.f32.vlgmr.msra.gmra.mxu1 %vm283_vm1, %v15834_v11  ;;  %14583 = vmatpush3.msk.msra.mxu0 %vm380_vm0, %v16465_v18 }
  0xfe   : > { %v780_v42 = vadd.f32 %v14136_v14, %v16541_v43  ;;  %14533 = vmatpush3.msk.msra.mxu1 %vm380_vm0, %v16460_v16  ;;  %v1132_v46 = vpop.f32.mrf.mxu0  ;;  %14437 = vmatprep.mubr.msk.f32.mxu1 %vm283_vm1, %v15844_v13  ;;  %v11836_v43 = vld [vmem:[%s15799_s11 + $0x71] sm:$0xff] }
  0xff   : > { %v774_v11 = vpop.f32.mrf.mxu1  ;;  %14487 = vmatprep.mubr.msk.f32.mxu0 %vm283_vm1, %v20508_v20  ;;  %14632 = vmatprep.subr.msk.mxu1 %vm380_vm0, %v16682_v38 }
 0x100   : > { %v16698_v12 = vadd.f32 %v14186_v54, %v780_v42  ;;  %v775_v10 = vadd.f32 %v774_v11, %v16553_v48  ;;  %14682 = vmatprep.subr.msk.mxu0 %vm380_vm0, %v16687_v7  ;;  %v14189_v18 = vpop.f32.mrf.mxu0  ;;  %14488 = vmatmul.mubr.msk.f32.gmra.mxu0 %vm283_vm1, %v20509_v24 }
 0x101   : > { %v14139_v16 = vpop.f32.mrf.mxu1  ;;  %14438 = vmatmul.mubr.msk.f32.gmra.mxu1 %vm283_vm1, %v15862_v15  ;;  %14490 = vmatprep.mubr.msk.f32.mxu0 %vm283_vm1, %v20510_v25  ;;  %v11838_v25 = vld [vmem:[%s15799_s11 + $0x91] sm:$0xff] }
 0x102   : > { %v16709_v13 = vadd.f32 %v1132_v46, %v775_v10  ;;  %v790_v20 = vadd.f32 %v14139_v16, %v16557_v51  ;;  %14440 = vmatprep.mubr.msk.f32.mxu1 %vm283_vm1, %v15868_v17  ;;  %v1142_v14 = vpop.f32.mrf.mxu0  ;;  %v16733_v46 = vld [vmem:[%s15799_s11 + $0xc1] sm:$0xff] }
 0x103   : > { %v784_v48 = vpop.f32.mrf.mxu1 }
 0x104   : > { %v16717_v15 = vadd.f32 %v14189_v18, %v790_v20  ;;  %v785_v24 = vadd.f32 %v784_v48, %v16569_v61  ;;  %v14192_v54 = vpop.f32.mrf.mxu0  ;;  %14491 = vmatmul.mubr.msk.f32.gmra.mxu0 %vm283_vm1, %v20511_v26  ;;  %v11904_v61 = vld [vmem:[%s15799_s11 + $0x92] sm:$0xff]  ;;  %v16751_v48 = vld [vmem:[%s15799_s11 + $0xe1] sm:$0xff] }
 0x105   : > { %v14142_v10 = vpop.f32.mrf.mxu1  ;;  %14441 = vmatmul.mubr.msk.f32.gmra.mxu1 %vm283_vm1, %v11836_v43  ;;  %14493 = vmatprep.mubr.msk.f32.mxu0 %vm283_vm1, %v16496_v27  ;;  %v16748_v20 = vld [vmem:[%s15799_s11 + $0xd1] sm:$0xff] }
 0x106   : > { %v16723_v17 = vadd.f32 %v1142_v14, %v785_v24  ;;  %v800_v51 = vadd.f32 %v14142_v10, %v16573_v0  ;;  %14443 = vmatprep.mubr.msk.f32.mxu1 %vm283_vm1, %v16329_v39  ;;  %v1152_v11 = vpop.f32.mrf.mxu0 }
 0x107   : > { %v794_v42 = vpop.f32.mrf.mxu1 }
 0x108   : > { %v16735_v16 = vadd.f32 %v14192_v54, %v800_v51  ;;  %v795_v26 = vadd.f32 %v794_v42, %v16589_v37  ;;  %v14195_v0 = vpop.f32.mrf.mxu0  ;;  %14494 = vmatmul.mubr.msk.f32.gmra.mxu0 %vm283_vm1, %v11904_v61  ;;  %v16771_v61 = vld [vmem:[%s15799_s11 + $0x101] sm:$0xff] }
 0x109   : > { %v14145_v18 = vpop.f32.mrf.mxu1  ;;  %14444 = vmatmul.mubr.msk.f32.gmra.mxu1 %vm283_vm1, %v11838_v25  ;;  %14496 = vmatprep.mubr.msk.f32.mxu0 %vm283_vm1, %v20513_v30 }
 0x10a   : > { %v16740_v39 = vadd.f32 %v1152_v11, %v795_v26  ;;  %v810_v27 = vadd.f32 %v14145_v18, %v16593_v56  ;;  %14446 = vmatprep.mubr.msk.f32.mxu1 %vm283_vm1, %v16733_v46  ;;  %v1162_v43 = vpop.f32.mrf.mxu0 }
 0x10b   : > { %v804_v37 = vpop.f32.mrf.mxu1 }
 0x10c   : > { %v16753_v14 = vadd.f32 %v14195_v0, %v810_v27  ;;  %v805_v24 = vadd.f32 %v804_v37, %v16604_v62  ;;  %v14198_v56 = vpop.f32.mrf.mxu0  ;;  %14497 = vmatmul.mubr.msk.f32.gmra.mxu0 %vm283_vm1, %v20514_v31  ;;  %v16768_v62 = vld [vmem:[%s15799_s11 + $0xf1] sm:$0xff] }
 0x10d   : > { %v14148_v10 = vpop.f32.mrf.mxu1  ;;  %14447 = vmatmul.mubr.msk.f32.gmra.mxu1 %vm283_vm1, %v16748_v20  ;;  %14499 = vmatprep.mubr.msk.f32.mxu0 %vm283_vm1, %v20515_v32 }
 0x10e   : > { %v16760_v30 = vadd.f32 %v1162_v43, %v805_v24  ;;  %v820_v54 = vadd.f32 %v14148_v10, %v16608_v19  ;;  %14449 = vmatprep.mubr.msk.f32.mxu1 %vm283_vm1, %v16751_v48  ;;  %v1172_v25 = vpop.f32.mrf.mxu0  ;;  %v11912_v24 = vld [vmem:[%s15799_s11 + $0x132] sm:$0xff] }
 0x10f   : > { %v814_v51 = vpop.f32.mrf.mxu1 }
 0x110   : > { %v16773_v42 = vadd.f32 %v14198_v56, %v820_v54  ;;  %v815_v31 = vadd.f32 %v814_v51, %v16620_v58  ;;  %v14201_v26 = vpop.f32.mrf.mxu0  ;;  %14500 = vmatmul.mubr.msk.f32.gmra.mxu0 %vm283_vm1, %v20516_v33  ;;  %v16788_v58 = vld [vmem:[%s15799_s11 + $0x111] sm:$0xff]  ;;  %v16807_v54 = vld [vmem:[%s15799_s11 + $0x161] sm:$0xff] }
 0x111   : > { %v14151_v11 = vpop.f32.mrf.mxu1  ;;  %14450 = vmatmul.mubr.msk.f32.gmra.mxu1 %vm283_vm1, %v16768_v62  ;;  %14502 = vmatprep.mubr.msk.f32.mxu0 %vm283_vm1, %v20517_v34 }
 0x112   : > { %v16780_v19 = vadd.f32 %v1172_v25, %v815_v31  ;;  %v830_v32 = vadd.f32 %v14151_v11, %v16624_v41  ;;  %14452 = vmatprep.mubr.msk.f32.mxu1 %vm283_vm1, %v16771_v61  ;;  %v1182_v0 = vpop.f32.mrf.mxu0  ;;  %v16822_v31 = vld [vmem:[%s15799_s11 + $0x171] sm:$0xff] }
 0x113   : > { %v824_v18 = vpop.f32.mrf.mxu1 }
 0x114   : > { %v16790_v27 = vadd.f32 %v14201_v26, %v830_v32  ;;  %v825_v33 = vadd.f32 %v824_v18, %v16636_v22  ;;  %v14204_v43 = vpop.f32.mrf.mxu0  ;;  %14503 = vmatmul.mubr.msk.f32.gmra.mxu0 %vm283_vm1, %v20518_v35  ;;  %v11846_v22 = vld [vmem:[%s15799_s11 + $0x131] sm:$0xff]  ;;  %v16825_v26 = vld [vmem:[%s15799_s11 + $0x181] sm:$0xff] }
 0x115   : > { %v14154_v37 = vpop.f32.mrf.mxu1  ;;  %14453 = vmatmul.mubr.msk.f32.gmra.mxu1 %vm283_vm1, %v16788_v58  ;;  %14505 = vmatprep.mubr.msk.f32.mxu0 %vm283_vm1, %v16531_v36 }
 0x116   : > { %v16797_v41 = vadd.f32 %v1182_v0, %v825_v33  ;;  %v840_v34 = vadd.f32 %v14154_v37, %v16640_v28  ;;  %14455 = vmatprep.mubr.msk.f32.mxu1 %vm283_vm1, %v16367_v23  ;;  %v1192_v56 = vpop.f32.mrf.mxu0 }
 0x117   : > { %v834_v10 = vpop.f32.mrf.mxu1 }
 0x118   : > { %v16809_v51 = vadd.f32 %v14204_v43, %v840_v34  ;;  %v835_v35 = vadd.f32 %v834_v10, %v16656_v4  ;;  %v14207_v28 = vpop.f32.mrf.mxu0  ;;  %14506 = vmatmul.mubr.msk.f32.gmra.mxu0 %vm283_vm1, %v11912_v24  ;;  %v16845_v34 = vld [vmem:[%s15799_s11 + $0x1a1] sm:$0xff] }
 0x119   : > { %v14157_v25 = vpop.f32.mrf.mxu1  ;;  %14456 = vmatmul.mubr.msk.f32.gmra.mxu1 %vm283_vm1, %v11846_v22  ;;  %14508 = vmatprep.mubr.msk.f32.mxu0 %vm283_vm1, %v20520_v45 }
 0x11a   : > { %v16814_v23 = vadd.f32 %v1192_v56, %v835_v35  ;;  %v850_v36 = vadd.f32 %v14157_v25, %v16660_v29  ;;  %14458 = vmatprep.mubr.msk.f32.mxu1 %vm283_vm1, %v16807_v54  ;;  %v1202_v11 = vpop.f32.mrf.mxu0 }
 0x11b   : > { %v844_v4 = vpop.f32.mrf.mxu1 }
 0x11c   : > { %v16827_v32 = vadd.f32 %v14207_v28, %v850_v36  ;;  %v845_v18 = vadd.f32 %v844_v4, %v16671_v52  ;;  %v14210_v29 = vpop.f32.mrf.mxu0  ;;  %14509 = vmatmul.mubr.msk.f32.gmra.mxu0 %vm283_vm1, %v20521_v47  ;;  %v16842_v52 = vld [vmem:[%s15799_s11 + $0x191] sm:$0xff] }
 0x11d   : > { %v14160_v0 = vpop.f32.mrf.mxu1  ;;  %14459 = vmatmul.mubr.msk.f32.gmra.mxu1 %vm283_vm1, %v16822_v31  ;;  %14511 = vmatprep.mubr.msk.f32.mxu0 %vm283_vm1, %v20522_v57  ;;  %v11854_v4 = vld [vmem:[%s15799_s11 + $0x1d1] sm:$0xff] }
 0x11e   : > { %v16834_v45 = vadd.f32 %v1202_v11, %v845_v18  ;;  %v860_v33 = vadd.f32 %v14160_v0, %v16543_v44  ;;  %14461 = vmatprep.mubr.msk.f32.mxu1 %vm283_vm1, %v16825_v26  ;;  %v1212_v43 = vpop.f32.mrf.mxu0  ;;  %v16881_v0 = vld [vmem:[%s15799_s11 + $0x201] sm:$0xff] }
 0x11f   : > { %v854_v37 = vpop.f32.mrf.mxu1 }
 0x120   : > { %v16847_v22 = vadd.f32 %v14210_v29, %v860_v33  ;;  %v855_v47 = vadd.f32 %v854_v37, %v16555_v49  ;;  %v14213_v10 = vpop.f32.mrf.mxu0  ;;  %14512 = vmatmul.mubr.msk.f32.gmra.mxu0 %vm283_vm1, %v20523_v59  ;;  %v16862_v49 = vld [vmem:[%s15799_s11 + $0x1b1] sm:$0xff] }
 0x121   : > { %v14163_v24 = vpop.f32.mrf.mxu1  ;;  %14462 = vmatmul.mubr.msk.f32.gmra.mxu1 %vm283_vm1, %v16842_v52  ;;  %14514 = vmatprep.mubr.msk.f32.mxu0 %vm283_vm1, %v20524_v3 }
 0x122   : > { %v16854_v44 = vadd.f32 %v1212_v43, %v855_v47  ;;  %v870_v57 = vadd.f32 %v14163_v24, %v16559_v53  ;;  %14464 = vmatprep.mubr.msk.f32.mxu1 %vm283_vm1, %v16845_v34  ;;  %v1222_v35 = vpop.f32.mrf.mxu0  ;;  %v16899_v43 = vld [vmem:[%s15799_s11 + $0x211] sm:$0xff] }
 0x123   : > { %v864_v56 = vpop.f32.mrf.mxu1 }
 0x124   : > { %v16864_v25 = vadd.f32 %v14213_v10, %v870_v57  ;;  %v865_v59 = vadd.f32 %v864_v56, %v16571_v63  ;;  %v14216_v53 = vpop.f32.mrf.mxu0  ;;  %14515 = vmatmul.mubr.msk.f32.gmra.mxu0 %vm283_vm1, %v20525_v9  ;;  %v11920_v63 = vld [vmem:[%s15799_s11 + $0x1d2] sm:$0xff]  ;;  %v16884_v9 = vld [vmem:[%s15799_s11 + $0x202] sm:$0xff] }
 0x125   : > { %v14166_v28 = vpop.f32.mrf.mxu1  ;;  %14465 = vmatmul.mubr.msk.f32.gmra.mxu1 %vm283_vm1, %v16862_v49  ;;  %14517 = vmatprep.mubr.msk.f32.mxu0 %vm283_vm1, %v16586_v2  ;;  %20537 = vst [vmem:[#allocation10_spill] sm:$0xff] %v16884_v9  ;;  %v16905_v10 = vld [vmem:[%s15799_s11 + $0x221] sm:$0xff] }
 0x126   : > { %v16871_v36 = vadd.f32 %v1222_v35, %v865_v59  ;;  %v880_v3 = vadd.f32 %v14166_v28, %v16575_v1  ;;  %14467 = vmatprep.mubr.msk.f32.mxu1 %vm283_vm1, %v16405_v8  ;;  %v1232_v18 = vpop.f32.mrf.mxu0  ;;  %v16908_v57 = vld [vmem:[%s15799_s11 + $0x222] sm:$0xff] }
 0x127   : > { %v874_v11 = vpop.f32.mrf.mxu1  ;;  %20539 = vst [vmem:[#allocation12_spill] sm:$0xff] %v16908_v57 }
 0x128   : > { %v16886_v29 = vadd.f32 %v14216_v53, %v880_v3  ;;  %v875_v1 = vadd.f32 %v874_v11, %v16591_v55  ;;  %v14219_v33 = vpop.f32.mrf.mxu0  ;;  %14518 = vmatmul.mubr.msk.f32.gmra.mxu0 %vm283_vm1, %v11920_v63  ;;  %v16902_v55 = vld [vmem:[%s15799_s11 + $0x212] sm:$0xff]  ;;  %v16931_v11 = vld [vmem:[%s15799_s11 + $0x241] sm:$0xff] }
 0x129   : > { %v14169_v8 = vpop.f32.mrf.mxu1  ;;  %14468 = vmatmul.mubr.msk.f32.gmra.mxu1 %vm283_vm1, %v11854_v4  ;;  %14520 = vmatprep.mubr.msk.f32.mxu0 %vm283_vm1, %v16884_v9  ;;  %20538 = vst [vmem:[#allocation11_spill] sm:$0xff] %v16902_v55  ;;  %v16925_v3 = vld [vmem:[%s15799_s11 + $0x231] sm:$0xff]  ;;  %v12029_v9 = vld [vmem:[%s15799_s11 + $0xa1] sm:$0xff] }
 0x12a   : > { %v16891_v2 = vadd.f32 %v1232_v18, %v875_v1  ;;  %v890_v37 = vadd.f32 %v14169_v8, %v16595_v21  ;;  %14470 = vmatprep.mubr.msk.f32.mxu1 %vm283_vm1, %v16881_v0  ;;  %v1242_v24 = vpop.f32.mrf.mxu0  ;;  %v16934_v18 = vld [vmem:[%s15799_s11 + $0x242] sm:$0xff] }
 0x12b   : > { %v884_v47 = vpop.f32.mrf.mxu1  ;;  %20541 = vst [vmem:[#allocation14_spill] sm:$0xff] %v16934_v18 }
 0x12c   : > { %v16910_v21 = vadd.f32 %v14219_v33, %v890_v37  ;;  %v885_v56 = vadd.f32 %v884_v47, %v16606_v5  ;;  %v14222_v59 = vpop.f32.mrf.mxu0  ;;  %14521 = vmatmul.mubr.msk.f32.gmra.mxu0 %vm283_vm1, %v16902_v55  ;;  %v16928_v5 = vld [vmem:[%s15799_s11 + $0x232] sm:$0xff]  ;;  %v20542_v47 = vld [vmem:[#allocation5_spill] sm:$0xff] }
 0x12d   : > { %v14172_v35 = vpop.f32.mrf.mxu1  ;;  %14471 = vmatmul.mubr.msk.f32.gmra.mxu1 %vm283_vm1, %v16899_v43  ;;  %14523 = vmatprep.mubr.msk.f32.mxu0 %vm283_vm1, %v16908_v57  ;;  %20540 = vst [vmem:[#allocation13_spill] sm:$0xff] %v16928_v5  ;;  %v20547_v57 = vld [vmem:[#allocation29_spill] sm:$0xff] }
 0x12e   : > { %v16917_v28 = vadd.f32 %v1242_v24, %v885_v56  ;;  %v900_v53 = vadd.f32 %v14172_v35, %v16610_v6  ;;  %14473 = vmatprep.mubr.msk.f32.mxu1 %vm283_vm1, %v16905_v10  ;;  %v1252_v63 = vpop.f32.mrf.mxu0  ;;  %v16954_v56 = vld [vmem:[%s15799_s11 + $0x252] sm:$0xff]  ;;  %v11963_v55 = vld [vmem:[%s15799_s11 + $0xa0] sm:$0xff] }
 0x12f   : > { %v894_v4 = vpop.f32.mrf.mxu1  ;;  %20543 = vst [vmem:[#allocation15_spill] sm:$0xff] %v16954_v56 }
 0x130   : > { %v16936_v1 = vadd.f32 %v14222_v59, %v900_v53  ;;  %v895_v6 = vadd.f32 %v894_v4, %v16622_v40  ;;  %v14225_v33 = vpop.f32.mrf.mxu0  ;;  %14524 = vmatmul.mubr.msk.f32.gmra.mxu0 %vm283_vm1, %v16928_v5  ;;  %v16951_v40 = vld [vmem:[%s15799_s11 + $0x251] sm:$0xff]  ;;  %v20545_v4 = vld [vmem:[#allocation6_spill] sm:$0xff] }
 0x131   : > { %v14175_v8 = vpop.f32.mrf.mxu1  ;;  %14474 = vmatmul.mubr.msk.f32.gmra.mxu1 %vm283_vm1, %v16925_v3  ;;  %14526 = vmatprep.mubr.msk.f32.mxu0 %vm283_vm1, %v16934_v18  ;;  %v20546_v18 = vld [vmem:[#allocation7_spill] sm:$0xff] }
 0x132   : > { %v16943_v37 = vadd.f32 %v1252_v63, %v895_v6  ;;  %v910_v24 = vadd.f32 %v14175_v8, %v20542_v47  ;;  %14476 = vmatprep.mubr.msk.f32.mxu1 %vm283_vm1, %v16931_v11  ;;  %v1262_v59 = vpop.f32.mrf.mxu0 }
 0x133   : > { %v904_v35 = vpop.f32.mrf.mxu1 }
 0x134   : > { %v16956_v53 = vadd.f32 %v14225_v33, %v910_v24  ;;  %v905_v63 = vadd.f32 %v904_v35, %v20545_v4  ;;  %v14228_v8 = vpop.f32.mrf.mxu0  ;;  %14527 = vmatmul.mubr.msk.f32.gmra.mxu0 %vm283_vm1, %v16954_v56  ;;  %v11862_v33 = vld [vmem:[%s15799_s11 + $0x271] sm:$0xff] }
 0x135   : > { %v14178_v6 = vpop.f32.mrf.mxu1  ;;  %14477 = vmatmul.mubr.msk.f32.gmra.mxu1 %vm283_vm1, %v16951_v40  ;;  %14529 = vmatprep.mubr.msk.f32.mxu0 %vm283_vm1, %v16653_v50  ;;  %v11928_v24 = vld [vmem:[%s15799_s11 + $0x272] sm:$0xff] }
 0x136   : > { %20544 = vst [vmem:[#allocation16_spill] sm:$0xff] %v16956_v53  ;;  %v16963_v47 = vadd.f32 %v1262_v59, %v905_v63  ;;  %v920_v5 = vadd.f32 %v14178_v6, %v20546_v18  ;;  %14479 = vmatprep.mubr.msk.f32.mxu1 %vm283_vm1, %v20547_v57  ;;  %v1272_v4 = vpop.f32.mrf.mxu0  ;;  %v20549_v57 = vld [vmem:[#allocation8_spill] sm:$0xff]  ;;  %v16985_v56 = vld [vmem:[%s15799_s11 + $0xb0] sm:$0xff] }
 0x137   : > { %v914_v35 = vpop.f32.mrf.mxu1 }
 0x138   : > { %v16974_v53 = vadd.f32 %v14228_v8, %v920_v5  ;;  %v915_v59 = vadd.f32 %v914_v35, %v16658_v60  ;;  %v14231_v63 = vpop.f32.mrf.mxu0  ;;  %14530 = vmatmul.mubr.msk.f32.gmra.mxu0 %vm283_vm1, %v11928_v24  ;;  %v16988_v5 = vld [vmem:[%s15799_s11 + $0xb1] sm:$0xff]  ;;  %v16994_v24 = vld [vmem:[%s15799_s11 + $0xc0] sm:$0xff] }
 0x139   : > { %v14181_v18 = vpop.f32.mrf.mxu1  ;;  %14480 = vmatmul.mubr.msk.f32.gmra.mxu1 %vm283_vm1, %v11862_v33  ;;  %14584 = vmatprep.mubr.msk.f32.mxu0 %vm283_vm1, %v12029_v9  ;;  %20550 = vst [vmem:[#allocation18_spill] sm:$0xff] %v16988_v5  ;;  %v20551_v33 = vld [vmem:[#allocation9_spill] sm:$0xff]  ;;  %v17003_v9 = vld [vmem:[%s20387_s2 + $0x34] sm:$0xf] }
 0x13a   : > { %20548 = vst [vmem:[#allocation17_spill] sm:$0xff] %v16974_v53  ;;  %v16979_v50 = vadd.f32 %v1272_v4, %v915_v59  ;;  %v930_v6 = vadd.f32 %v14181_v18, %v20549_v57  ;;  %14534 = vmatprep.mubr.msk.f32.mxu1 %vm283_vm1, %v11963_v55  ;;  %v1282_v8 = vpop.f32.mrf.mxu0  ;;  %v17008_v55 = vld [vmem:[%s20387_s2 + $0x38] sm:$0xf]  ;;  %v17018_v57 = vld [vmem:[%s15799_s11 + $0xd0] sm:$0xff] }
 0x13b   : > { %v924_v60 = vpop.f32.mrf.mxu1 }
 0x13c   : > { %v16990_v35 = vadd.f32 %v14231_v63, %v930_v6  ;;  %v925_v53 = vadd.f32 %v924_v60, %v20551_v33  ;;  %v14286_v59 = vpop.f32.mrf.mxu0  ;;  %14585 = vmatmul.mubr.msk.f32.vlgmr.msra.gmra.mxu0 %vm283_vm1, %v16988_v5  ;;  %v17087_v5 = vld [vmem:[%s15799_s11 + $0x160] sm:$0xff] }
 0x13d   : > { %v14236_v4 = vpop.f32.mrf.mxu1  ;;  %14535 = vmatmul.mubr.msk.f32.vlgmr.msra.gmra.mxu1 %vm283_vm1, %v16985_v56  ;;  %14683 = vmatpush3.msk.msra.mxu0 %vm380_vm0, %v16687_v7 }
 0x13e   : > { %v17010_v18 = vadd.f32 %v1282_v8, %v925_v53  ;;  %v1683_v63 = vadd.f32 %v14236_v4, %v16698_v12  ;;  %14633 = vmatpush3.msk.msra.mxu1 %vm380_vm0, %v16682_v38  ;;  %v1913_v60 = vpop.f32.mrf.mxu0  ;;  %14537 = vmatprep.mubr.msk.f32.mxu1 %vm283_vm1, %v16994_v24  ;;  %v17025_v53 = vld [vmem:[%s15799_s11 + $0xe0] sm:$0xff] }
 0x13f   : > { %v1523_v6 = vpop.f32.mrf.mxu1  ;;  %14587 = vmatprep.mubr.msk.f32.mxu0 %vm283_vm1, %v16733_v46  ;;  %14732 = vmatprep.subr.msk.mxu1 %vm380_vm0, %v17003_v9 }
 0x140   : > { %v17027_v12 = vadd.f32 %v14286_v59, %v1683_v63  ;;  %v1682_v38 = vadd.f32 %v1523_v6, %v16709_v13  ;;  %14782 = vmatprep.subr.msk.mxu0 %vm380_vm0, %v17008_v55  ;;  %v14289_v8 = vpop.f32.mrf.mxu0  ;;  %14588 = vmatmul.mubr.msk.f32.gmra.mxu0 %vm283_vm1, %v16748_v20  ;;  %v17046_v13 = vld [vmem:[%s15799_s11 + $0xf0] sm:$0xff]  ;;  %v17049_v63 = vld [vmem:[%s15799_s11 + $0x100] sm:$0xff] }
 0x141   : > { %v14239_v7 = vpop.f32.mrf.mxu1  ;;  %14538 = vmatmul.mubr.msk.f32.gmra.mxu1 %vm283_vm1, %v17018_v57  ;;  %14590 = vmatprep.mubr.msk.f32.mxu0 %vm283_vm1, %v16751_v48 }
 0x142   : > { %v17038_v46 = vadd.f32 %v1913_v60, %v1682_v38  ;;  %v1685_v33 = vadd.f32 %v14239_v7, %v16717_v15  ;;  %14540 = vmatprep.mubr.msk.f32.mxu1 %vm283_vm1, %v17025_v53  ;;  %v1923_v59 = vpop.f32.mrf.mxu0 }
 0x143   : > { %v1533_v4 = vpop.f32.mrf.mxu1 }
 0x144   : > { %v17051_v20 = vadd.f32 %v14289_v8, %v1685_v33  ;;  %v1684_v6 = vadd.f32 %v1533_v4, %v16723_v17  ;;  %v14292_v60 = vpop.f32.mrf.mxu0  ;;  %14591 = vmatmul.mubr.msk.f32.gmra.mxu0 %vm283_vm1, %v16768_v62  ;;  %v17066_v17 = vld [vmem:[%s15799_s11 + $0x110] sm:$0xff]  ;;  %v11971_v33 = vld [vmem:[%s15799_s11 + $0x140] sm:$0xff] }
 0x145   : > { %v14242_v15 = vpop.f32.mrf.mxu1  ;;  %14541 = vmatmul.mubr.msk.f32.gmra.mxu1 %vm283_vm1, %v17046_v13  ;;  %14593 = vmatprep.mubr.msk.f32.mxu0 %vm283_vm1, %v16771_v61  ;;  %20552 = vst [vmem:[#allocation19_spill] sm:$0xff] %v17066_v17  ;;  %v12037_v4 = vld [vmem:[%s15799_s11 + $0x141] sm:$0xff] }
 0x146   : > { %v17058_v48 = vadd.f32 %v1923_v59, %v1684_v6  ;;  %v1687_v38 = vadd.f32 %v14242_v15, %v16735_v16  ;;  %14543 = vmatprep.mubr.msk.f32.mxu1 %vm283_vm1, %v17049_v63  ;;  %v1933_v8 = vpop.f32.mrf.mxu0 }
 0x147   : > { %v1543_v7 = vpop.f32.mrf.mxu1 }
 0x148   : > { %v17070_v62 = vadd.f32 %v14292_v60, %v1687_v38  ;;  %v1686_v59 = vadd.f32 %v1543_v7, %v16740_v39  ;;  %v14295_v6 = vpop.f32.mrf.mxu0  ;;  %14594 = vmatmul.mubr.msk.f32.gmra.mxu0 %vm283_vm1, %v16788_v58  ;;  %v17083_v60 = vld [vmem:[%s15799_s11 + $0x150] sm:$0xff] }
 0x149   : > { %v14245_v16 = vpop.f32.mrf.mxu1  ;;  %14544 = vmatmul.mubr.msk.f32.gmra.mxu1 %vm283_vm1, %v17066_v17  ;;  %14596 = vmatprep.mubr.msk.f32.mxu0 %vm283_vm1, %v12037_v4  ;;  %v12038_v39 = vld [vmem:[%s15799_s11 + $0x151] sm:$0xff] }
 0x14a   : > { %v17077_v61 = vadd.f32 %v1933_v8, %v1686_v59  ;;  %v1689_v15 = vadd.f32 %v14245_v16, %v16753_v14  ;;  %14546 = vmatprep.mubr.msk.f32.mxu1 %vm283_vm1, %v11971_v33  ;;  %v1943_v7 = vpop.f32.mrf.mxu0  ;;  %v17103_v4 = vld [vmem:[%s15799_s11 + $0x170] sm:$0xff] }
 0x14b   : > { %v1553_v38 = vpop.f32.mrf.mxu1 }
 0x14c   : > { %v17089_v17 = vadd.f32 %v14295_v6, %v1689_v15  ;;  %v1688_v58 = vadd.f32 %v1553_v38, %v16760_v30  ;;  %v14298_v59 = vpop.f32.mrf.mxu0  ;;  %14597 = vmatmul.mubr.msk.f32.gmra.mxu0 %vm283_vm1, %v12038_v39  ;;  %v17106_v6 = vld [vmem:[%s15799_s11 + $0x180] sm:$0xff] }
 0x14d   : > { %v14248_v8 = vpop.f32.mrf.mxu1  ;;  %14547 = vmatmul.mubr.msk.f32.gmra.mxu1 %vm283_vm1, %v17083_v60  ;;  %14599 = vmatprep.mubr.msk.f32.mxu0 %vm283_vm1, %v16807_v54 }
 0x14e   : > { %v17095_v14 = vadd.f32 %v1943_v7, %v1688_v58  ;;  %v1691_v33 = vadd.f32 %v14248_v8, %v16773_v42  ;;  %14549 = vmatprep.mubr.msk.f32.mxu1 %vm283_vm1, %v17087_v5  ;;  %v1953_v16 = vpop.f32.mrf.mxu0 }
 0x14f   : > { %v1563_v30 = vpop.f32.mrf.mxu1 }
 0x150   : > { %v17108_v15 = vadd.f32 %v14298_v59, %v1691_v33  ;;  %v1690_v39 = vadd.f32 %v1563_v30, %v16780_v19  ;;  %v14301_v42 = vpop.f32.mrf.mxu0  ;;  %14600 = vmatmul.mubr.msk.f32.gmra.mxu0 %vm283_vm1, %v16822_v31  ;;  %v17123_v19 = vld [vmem:[%s15799_s11 + $0x190] sm:$0xff]  ;;  %v17126_v59 = vld [vmem:[%s15799_s11 + $0x1a0] sm:$0xff] }
 0x151   : > { %v14251_v38 = vpop.f32.mrf.mxu1  ;;  %14550 = vmatmul.mubr.msk.f32.gmra.mxu1 %vm283_vm1, %v17103_v4  ;;  %14602 = vmatprep.mubr.msk.f32.mxu0 %vm283_vm1, %v16825_v26 }
 0x152   : > { %v17115_v54 = vadd.f32 %v1953_v16, %v1690_v39  ;;  %v1693_v7 = vadd.f32 %v14251_v38, %v16790_v27  ;;  %14552 = vmatprep.mubr.msk.f32.mxu1 %vm283_vm1, %v17106_v6  ;;  %v1963_v8 = vpop.f32.mrf.mxu0 }
 0x153   : > { %v1573_v58 = vpop.f32.mrf.mxu1 }
 0x154   : > { %v17128_v31 = vadd.f32 %v14301_v42, %v1693_v7  ;;  %v1692_v33 = vadd.f32 %v1573_v58, %v16797_v41  ;;  %v14304_v30 = vpop.f32.mrf.mxu0  ;;  %14603 = vmatmul.mubr.msk.f32.gmra.mxu0 %vm283_vm1, %v16842_v52  ;;  %v17143_v41 = vld [vmem:[%s15799_s11 + $0x1b0] sm:$0xff]  ;;  %v11979_v42 = vld [vmem:[%s15799_s11 + $0x1e0] sm:$0xff] }
 0x155   : > { %v14254_v27 = vpop.f32.mrf.mxu1  ;;  %14553 = vmatmul.mubr.msk.f32.gmra.mxu1 %vm283_vm1, %v17123_v19  ;;  %14605 = vmatprep.mubr.msk.f32.mxu0 %vm283_vm1, %v16845_v34  ;;  %20553 = vst [vmem:[#allocation20_spill] sm:$0xff] %v17143_v41  ;;  %v12045_v7 = vld [vmem:[%s15799_s11 + $0x1e1] sm:$0xff] }
 0x156   : > { %v17135_v26 = vadd.f32 %v1963_v8, %v1692_v33  ;;  %v1695_v16 = vadd.f32 %v14254_v27, %v16809_v51  ;;  %14555 = vmatprep.mubr.msk.f32.mxu1 %vm283_vm1, %v17126_v59  ;;  %v1973_v38 = vpop.f32.mrf.mxu0  ;;  %v17160_v27 = vld [vmem:[%s15799_s11 + $0x1f0] sm:$0xff] }
 0x157   : > { %v1583_v39 = vpop.f32.mrf.mxu1 }
 0x158   : > { %v17147_v52 = vadd.f32 %v14304_v30, %v1695_v16  ;;  %v1694_v58 = vadd.f32 %v1583_v39, %v16814_v23  ;;  %v14307_v8 = vpop.f32.mrf.mxu0  ;;  %14606 = vmatmul.mubr.msk.f32.gmra.mxu0 %vm283_vm1, %v16862_v49  ;;  %v12046_v23 = vld [vmem:[%s15799_s11 + $0x1f1] sm:$0xff]  ;;  %v17164_v39 = vld [vmem:[%s15799_s11 + $0x200] sm:$0xff] }
 0x159   : > { %v14257_v51 = vpop.f32.mrf.mxu1  ;;  %14556 = vmatmul.mubr.msk.f32.gmra.mxu1 %vm283_vm1, %v17143_v41  ;;  %14608 = vmatprep.mubr.msk.f32.mxu0 %vm283_vm1, %v12045_v7  ;;  %v17180_v7 = vld [vmem:[%s15799_s11 + $0x210] sm:$0xff] }
 0x15a   : > { %v17154_v34 = vadd.f32 %v1973_v38, %v1694_v58  ;;  %v1697_v33 = vadd.f32 %v14257_v51, %v16827_v32  ;;  %14558 = vmatprep.mubr.msk.f32.mxu1 %vm283_vm1, %v11979_v42  ;;  %v1983_v16 = vpop.f32.mrf.mxu0 }
 0x15b   : > { %v1593_v30 = vpop.f32.mrf.mxu1 }
 0x15c   : > { %v17166_v41 = vadd.f32 %v14307_v8, %v1697_v33  ;;  %v1696_v49 = vadd.f32 %v1593_v30, %v16834_v45  ;;  %v14310_v58 = vpop.f32.mrf.mxu0  ;;  %14609 = vmatmul.mubr.msk.f32.gmra.mxu0 %vm283_vm1, %v12046_v23  ;;  %v17183_v8 = vld [vmem:[%s15799_s11 + $0x220] sm:$0xff] }
 0x15d   : > { %v14260_v38 = vpop.f32.mrf.mxu1  ;;  %14559 = vmatmul.mubr.msk.f32.gmra.mxu1 %vm283_vm1, %v17160_v27  ;;  %14611 = vmatprep.mubr.msk.f32.mxu0 %vm283_vm1, %v16881_v0 }
 0x15e   : > { %v17172_v32 = vadd.f32 %v1983_v16, %v1696_v49  ;;  %v1699_v42 = vadd.f32 %v14260_v38, %v16847_v22  ;;  %14561 = vmatprep.mubr.msk.f32.mxu1 %vm283_vm1, %v17164_v39  ;;  %v1993_v51 = vpop.f32.mrf.mxu0 }
 0x15f   : > { %v1603_v45 = vpop.f32.mrf.mxu1 }
 0x160   : > { %v17185_v33 = vadd.f32 %v14310_v58, %v1699_v42  ;;  %v1698_v23 = vadd.f32 %v1603_v45, %v16854_v44  ;;  %v14313_v22 = vpop.f32.mrf.mxu0  ;;  %14612 = vmatmul.mubr.msk.f32.gmra.mxu0 %vm283_vm1, %v16899_v43  ;;  %v17200_v44 = vld [vmem:[%s15799_s11 + $0x230] sm:$0xff]  ;;  %v17203_v58 = vld [vmem:[%s15799_s11 + $0x240] sm:$0xff] }
 0x161   : > { %v14263_v30 = vpop.f32.mrf.mxu1  ;;  %14562 = vmatmul.mubr.msk.f32.gmra.mxu1 %vm283_vm1, %v17180_v7  ;;  %14614 = vmatprep.mubr.msk.f32.mxu0 %vm283_vm1, %v16905_v10 }
 0x162   : > { %v17192_v0 = vadd.f32 %v1993_v51, %v1698_v23  ;;  %v1701_v16 = vadd.f32 %v14263_v30, %v16864_v25  ;;  %14564 = vmatprep.mubr.msk.f32.mxu1 %vm283_vm1, %v17183_v8  ;;  %v2003_v38 = vpop.f32.mrf.mxu0 }
 0x163   : > { %v1613_v49 = vpop.f32.mrf.mxu1 }
 0x164   : > { %v17205_v43 = vadd.f32 %v14313_v22, %v1701_v16  ;;  %v1700_v42 = vadd.f32 %v1613_v49, %v16871_v36  ;;  %v14316_v45 = vpop.f32.mrf.mxu0  ;;  %14615 = vmatmul.mubr.msk.f32.gmra.mxu0 %vm283_vm1, %v16925_v3  ;;  %v17220_v36 = vld [vmem:[%s15799_s11 + $0x250] sm:$0xff]  ;;  %v11987_v22 = vld [vmem:[%s15799_s11 + $0x280] sm:$0xff] }
 0x165   : > { %v14266_v25 = vpop.f32.mrf.mxu1  ;;  %14565 = vmatmul.mubr.msk.f32.gmra.mxu1 %vm283_vm1, %v17200_v44  ;;  %14617 = vmatprep.mubr.msk.f32.mxu0 %vm283_vm1, %v16931_v11  ;;  %20554 = vst [vmem:[#allocation21_spill] sm:$0xff] %v17220_v36  ;;  %v12053_v16 = vld [vmem:[%s15799_s11 + $0x281] sm:$0xff] }
 0x166   : > { %v17212_v10 = vadd.f32 %v2003_v38, %v1700_v42  ;;  %v1703_v51 = vadd.f32 %v14266_v25, %v16886_v29  ;;  %14567 = vmatprep.mubr.msk.f32.mxu1 %vm283_vm1, %v17203_v58  ;;  %v2013_v30 = vpop.f32.mrf.mxu0  ;;  %v17237_v25 = vld [vmem:[%s15799_s11 + $0x290] sm:$0xff] }
 0x167   : > { %v1623_v23 = vpop.f32.mrf.mxu1 }
 0x168   : > { %v17224_v3 = vadd.f32 %v14316_v45, %v1703_v51  ;;  %v1702_v29 = vadd.f32 %v1623_v23, %v16891_v2  ;;  %v14319_v38 = vpop.f32.mrf.mxu0  ;;  %14618 = vmatmul.mubr.msk.f32.gmra.mxu0 %vm283_vm1, %v16951_v40  ;;  %v12054_v2 = vld [vmem:[%s15799_s11 + $0x291] sm:$0xff]  ;;  %v17241_v23 = vld [vmem:[%s15799_s11 + $0x2a0] sm:$0xff] }
 0x169   : > { %v14269_v49 = vpop.f32.mrf.mxu1  ;;  %14568 = vmatmul.mubr.msk.f32.gmra.mxu1 %vm283_vm1, %v17220_v36  ;;  %14620 = vmatprep.mubr.msk.f32.mxu0 %vm283_vm1, %v12053_v16  ;;  %20555 = vst [vmem:[#allocation22_spill] sm:$0xff] %v17241_v23  ;;  %v12055_v36 = vld [vmem:[%s15799_s11 + $0x2a1] sm:$0xff] }
 0x16a   : > { %v17231_v11 = vadd.f32 %v2013_v30, %v1702_v29  ;;  %v1705_v42 = vadd.f32 %v14269_v49, %v16910_v21  ;;  %14570 = vmatprep.mubr.msk.f32.mxu1 %vm283_vm1, %v11987_v22  ;;  %v2023_v51 = vpop.f32.mrf.mxu0  ;;  %v17257_v49 = vld [vmem:[%s15799_s11 + $0x2b0] sm:$0xff] }
 0x16b   : > { %v1633_v45 = vpop.f32.mrf.mxu1 }
 0x16c   : > { %v17244_v40 = vadd.f32 %v14319_v38, %v1705_v42  ;;  %v1704_v21 = vadd.f32 %v1633_v45, %v16917_v28  ;;  %v14322_v22 = vpop.f32.mrf.mxu0  ;;  %14621 = vmatmul.mubr.msk.f32.gmra.mxu0 %vm283_vm1, %v12054_v2  ;;  %v12056_v28 = vld [vmem:[%s15799_s11 + $0x2b1] sm:$0xff]  ;;  %v17261_v45 = vld [vmem:[%s15799_s11 + $0x2c0] sm:$0xff] }
 0x16d   : > { %v14272_v30 = vpop.f32.mrf.mxu1  ;;  %14571 = vmatmul.mubr.msk.f32.gmra.mxu1 %vm283_vm1, %v17237_v25  ;;  %14623 = vmatprep.mubr.msk.f32.mxu0 %vm283_vm1, %v12055_v36  ;;  %20557 = vst [vmem:[#allocation24_spill] sm:$0xff] %v17261_v45  ;;  %v12057_v2 = vld [vmem:[%s15799_s11 + $0x2c1] sm:$0xff] }
 0x16e   : > { %v17250_v16 = vadd.f32 %v2023_v51, %v1704_v21  ;;  %v1707_v29 = vadd.f32 %v14272_v30, %v16936_v1  ;;  %14573 = vmatprep.mubr.msk.f32.mxu1 %vm283_vm1, %v17241_v23  ;;  %v2033_v42 = vpop.f32.mrf.mxu0  ;;  %v20560_v23 = vld [vmem:[#allocation16_spill] sm:$0xff] }
 0x16f   : > { %v1643_v38 = vpop.f32.mrf.mxu1 }
 0x170   : > { %20556 = vst [vmem:[#allocation23_spill] sm:$0xff] %v17250_v16  ;;  %v17264_v51 = vadd.f32 %v14322_v22, %v1707_v29  ;;  %v1706_v1 = vadd.f32 %v1643_v38, %v16943_v37  ;;  %v14325_v30 = vpop.f32.mrf.mxu0  ;;  %14624 = vmatmul.mubr.msk.f32.gmra.mxu0 %vm283_vm1, %v12056_v28  ;;  %v17277_v22 = vld [vmem:[%s15799_s11 + $0x2d0] sm:$0xff]  ;;  %v12059_v28 = vld [vmem:[%s15799_s11 + $0x2e1] sm:$0xff] }
 0x171   : > { %v14275_v21 = vpop.f32.mrf.mxu1  ;;  %14574 = vmatmul.mubr.msk.f32.gmra.mxu1 %vm283_vm1, %v17257_v49  ;;  %14626 = vmatprep.mubr.msk.f32.mxu0 %vm283_vm1, %v12057_v2  ;;  %20561 = vst [vmem:[#allocation27_spill] sm:$0xff] %v17277_v22  ;;  %v12058_v37 = vld [vmem:[%s15799_s11 + $0x2d1] sm:$0xff] }
 0x172   : > { %20558 = vst [vmem:[#allocation25_spill] sm:$0xff] %v17264_v51  ;;  %v17270_v36 = vadd.f32 %v2033_v42, %v1706_v1  ;;  %v1709_v16 = vadd.f32 %v14275_v21, %v20560_v23  ;;  %14576 = vmatprep.mubr.msk.f32.mxu1 %vm283_vm1, %v17261_v45  ;;  %v2043_v38 = vpop.f32.mrf.mxu0  ;;  %v17281_v51 = vld [vmem:[%s15799_s11 + $0x2e0] sm:$0xff] }
 0x173   : > { %v1653_v29 = vpop.f32.mrf.mxu1  ;;  %v20563_v45 = vld [vmem:[#allocation17_spill] sm:$0xff] }
 0x174   : > { %20559 = vst [vmem:[#allocation26_spill] sm:$0xff] %v17270_v36  ;;  %v17284_v42 = vadd.f32 %v14325_v30, %v1709_v16  ;;  %v1708_v23 = vadd.f32 %v1653_v29, %v16963_v47  ;;  %v14328_v21 = vpop.f32.mrf.mxu0  ;;  %14627 = vmatmul.mubr.msk.f32.gmra.mxu0 %vm283_vm1, %v12058_v37  ;;  %v17297_v16 = vld [vmem:[%s15799_s11 + $0x2f0] sm:$0xff] }
 0x175   : > { %v14278_v1 = vpop.f32.mrf.mxu1  ;;  %14577 = vmatmul.mubr.msk.f32.gmra.mxu1 %vm283_vm1, %v17277_v22  ;;  %14629 = vmatprep.mubr.msk.f32.mxu0 %vm283_vm1, %v12059_v28  ;;  %20564 = vst [vmem:[#allocation5_spill] sm:$0xff] %v17297_v16  ;;  %v12060_v47 = vld [vmem:[%s15799_s11 + $0x2f1] sm:$0xff] }
 0x176   : > { %20562 = vst [vmem:[#allocation28_spill] sm:$0xff] %v17284_v42  ;;  %v17290_v2 = vadd.f32 %v2043_v38, %v1708_v23  ;;  %v1711_v36 = vadd.f32 %v14278_v1, %v20563_v45  ;;  %14579 = vmatprep.mubr.msk.f32.mxu1 %vm283_vm1, %v17281_v51  ;;  %v2053_v29 = vpop.f32.mrf.mxu0  ;;  %v12095_v42 = vld [vmem:[%s15799_s11 + $0xa2] sm:$0xff] }
 0x177   : > { %v1663_v30 = vpop.f32.mrf.mxu1 }
 0x178   : > { %v17301_v22 = vadd.f32 %v14328_v21, %v1711_v36  ;;  %v1710_v37 = vadd.f32 %v1663_v30, %v16979_v50  ;;  %v14331_v23 = vpop.f32.mrf.mxu0  ;;  %14630 = vmatmul.mubr.msk.f32.gmra.mxu0 %vm283_vm1, %v12060_v47  ;;  %v17314_v36 = vld [vmem:[%s15799_s11 + $0xb2] sm:$0xff] }
 0x179   : > { %v14281_v38 = vpop.f32.mrf.mxu1  ;;  %14580 = vmatmul.mubr.msk.f32.gmra.mxu1 %vm283_vm1, %v17297_v16  ;;  %14684 = vmatprep.mubr.msk.f32.mxu0 %vm283_vm1, %v16985_v56  ;;  %v17320_v16 = vld [vmem:[%s15799_s11 + $0xc2] sm:$0xff]  ;;  %v17329_v56 = vld [vmem:[%s20387_s2 + $0x3c] sm:$0xf] }
 0x17a   : > { %v17307_v45 = vadd.f32 %v2053_v29, %v1710_v37  ;;  %v1713_v28 = vadd.f32 %v14281_v38, %v16990_v35  ;;  %14634 = vmatprep.mubr.msk.f32.mxu1 %vm283_vm1, %v12095_v42  ;;  %v2063_v1 = vpop.f32.mrf.mxu0  ;;  %v17334_v35 = vld [vmem:[%s20387_s2 + $0x40] sm:$0xf] }
 0x17b   : > { %v1673_v50 = vpop.f32.mrf.mxu1 }
 0x17c   : > { %v17316_v21 = vadd.f32 %v14331_v23, %v1713_v28  ;;  %v1712_v30 = vadd.f32 %v1673_v50, %v17010_v18  ;;  %v14386_v29 = vpop.f32.mrf.mxu0  ;;  %14685 = vmatmul.mubr.msk.f32.vlgmr.msra.gmra.mxu0 %vm283_vm1, %v16994_v24  ;;  %v17344_v24 = vld [vmem:[%s15799_s11 + $0xd2] sm:$0xff]  ;;  %v17351_v23 = vld [vmem:[%s15799_s11 + $0xe2] sm:$0xff] }
 0x17d   : > { %v14336_v47 = vpop.f32.mrf.mxu1  ;;  %14635 = vmatmul.mubr.msk.f32.vlgmr.msra.gmra.mxu1 %vm283_vm1, %v17314_v36  ;;  %14783 = vmatpush3.msk.msra.mxu0 %vm380_vm0, %v17008_v55 }
 0x17e   : > { %v17336_v18 = vadd.f32 %v2063_v1, %v1712_v30  ;;  %v2463_v42 = vadd.f32 %v14336_v47, %v17027_v12  ;;  %14733 = vmatpush3.msk.msra.mxu1 %vm380_vm0, %v17003_v9  ;;  %v2694_v38 = vpop.f32.mrf.mxu0  ;;  %14637 = vmatprep.mubr.msk.f32.mxu1 %vm283_vm1, %v17320_v16  ;;  %v17375_v47 = vld [vmem:[%s15799_s11 + $0x102] sm:$0xff] }
 0x17f   : > { %v2303_v37 = vpop.f32.mrf.mxu1  ;;  %14687 = vmatprep.mubr.msk.f32.mxu0 %vm283_vm1, %v17018_v57  ;;  %14832 = vmatprep.subr.msk.mxu1 %vm380_vm0, %v17329_v56 }
 0x180   : > { %v17353_v12 = vadd.f32 %v14386_v29, %v2463_v42  ;;  %v2462_v9 = vadd.f32 %v2303_v37, %v17038_v46  ;;  %14882 = vmatprep.subr.msk.mxu0 %vm380_vm0, %v17334_v35  ;;  %v14389_v28 = vpop.f32.mrf.mxu0  ;;  %14688 = vmatmul.mubr.msk.f32.gmra.mxu0 %vm283_vm1, %v17025_v53  ;;  %v17372_v46 = vld [vmem:[%s15799_s11 + $0xf2] sm:$0xff] }
 0x181   : > { %v14339_v55 = vpop.f32.mrf.mxu1  ;;  %14638 = vmatmul.mubr.msk.f32.gmra.mxu1 %vm283_vm1, %v17344_v24  ;;  %14690 = vmatprep.mubr.msk.f32.mxu0 %vm283_vm1, %v17046_v13 }
 0x182   : > { %v17364_v57 = vadd.f32 %v2694_v38, %v2462_v9  ;;  %v2465_v50 = vadd.f32 %v14339_v55, %v17051_v20  ;;  %14640 = vmatprep.mubr.msk.f32.mxu1 %vm283_vm1, %v17351_v23  ;;  %v2704_v30 = vpop.f32.mrf.mxu0  ;;  %v20565_v38 = vld [vmem:[#allocation19_spill] sm:$0xff]  ;;  %v12168_v9 = vld [vmem:[%s15799_s11 + $0x120] sm:$0xff] }
 0x183   : > { %v2313_v1 = vpop.f32.mrf.mxu1 }
 0x184   : > { %v17377_v53 = vadd.f32 %v14389_v28, %v2465_v50  ;;  %v2464_v29 = vadd.f32 %v2313_v1, %v17058_v48  ;;  %v14392_v42 = vpop.f32.mrf.mxu0  ;;  %14691 = vmatmul.mubr.msk.f32.gmra.mxu0 %vm283_vm1, %v17049_v63  ;;  %v17392_v48 = vld [vmem:[%s15799_s11 + $0x112] sm:$0xff]  ;;  %v12103_v50 = vld [vmem:[%s15799_s11 + $0x142] sm:$0xff] }
 0x185   : > { %v14342_v20 = vpop.f32.mrf.mxu1  ;;  %14641 = vmatmul.mubr.msk.f32.gmra.mxu1 %vm283_vm1, %v17372_v46  ;;  %14693 = vmatprep.mubr.msk.f32.mxu0 %vm283_vm1, %v20565_v38  ;;  %v17412_v38 = vld [vmem:[%s15799_s11 + $0x162] sm:$0xff] }
 0x186   : > { %v17384_v13 = vadd.f32 %v2704_v30, %v2464_v29  ;;  %v2467_v37 = vadd.f32 %v14342_v20, %v17070_v62  ;;  %14643 = vmatprep.mubr.msk.f32.mxu1 %vm283_vm1, %v17375_v47  ;;  %v2714_v28 = vpop.f32.mrf.mxu0 }
 0x187   : > { %v2323_v55 = vpop.f32.mrf.mxu1 }
 0x188   : > { %v17396_v1 = vadd.f32 %v14392_v42, %v2467_v37  ;;  %v2466_v63 = vadd.f32 %v2323_v55, %v17077_v61  ;;  %v14395_v62 = vpop.f32.mrf.mxu0  ;;  %14694 = vmatmul.mubr.msk.f32.gmra.mxu0 %vm283_vm1, %v12168_v9  ;;  %v17409_v42 = vld [vmem:[%s15799_s11 + $0x152] sm:$0xff] }
 0x189   : > { %v14345_v30 = vpop.f32.mrf.mxu1  ;;  %14644 = vmatmul.mubr.msk.f32.gmra.mxu1 %vm283_vm1, %v17392_v48  ;;  %14696 = vmatprep.mubr.msk.f32.mxu0 %vm283_vm1, %v17083_v60 }
 0x18a   : > { %v17402_v29 = vadd.f32 %v2714_v28, %v2466_v63  ;;  %v2469_v20 = vadd.f32 %v14345_v30, %v17089_v17  ;;  %14646 = vmatprep.mubr.msk.f32.mxu1 %vm283_vm1, %v12103_v50  ;;  %v2724_v37 = vpop.f32.mrf.mxu0 }
 0x18b   : > { %v2333_v61 = vpop.f32.mrf.mxu1 }
 0x18c   : > { %v17414_v55 = vadd.f32 %v14395_v62, %v2469_v20  ;;  %v2468_v9 = vadd.f32 %v2333_v61, %v17095_v14  ;;  %v14398_v63 = vpop.f32.mrf.mxu0  ;;  %14697 = vmatmul.mubr.msk.f32.gmra.mxu0 %vm283_vm1, %v17087_v5  ;;  %v17429_v14 = vld [vmem:[%s15799_s11 + $0x172] sm:$0xff]  ;;  %v17432_v62 = vld [vmem:[%s15799_s11 + $0x182] sm:$0xff] }
 0x18d   : > { %v14348_v28 = vpop.f32.mrf.mxu1  ;;  %14647 = vmatmul.mubr.msk.f32.gmra.mxu1 %vm283_vm1, %v17409_v42  ;;  %14699 = vmatprep.mubr.msk.f32.mxu0 %vm283_vm1, %v17103_v4 }
 0x18e   : > { %v17421_v17 = vadd.f32 %v2724_v37, %v2468_v9  ;;  %v2471_v60 = vadd.f32 %v14348_v28, %v17108_v15  ;;  %14649 = vmatprep.mubr.msk.f32.mxu1 %vm283_vm1, %v17412_v38  ;;  %v2734_v30 = vpop.f32.mrf.mxu0 }
 0x18f   : > { %v2343_v50 = vpop.f32.mrf.mxu1 }
 0x190   : > { %v17434_v20 = vadd.f32 %v14398_v63, %v2471_v60  ;;  %v2470_v5 = vadd.f32 %v2343_v50, %v17115_v54  ;;  %v14401_v15 = vpop.f32.mrf.mxu0  ;;  %14700 = vmatmul.mubr.msk.f32.gmra.mxu0 %vm283_vm1, %v17106_v6  ;;  %v17449_v54 = vld [vmem:[%s15799_s11 + $0x192] sm:$0xff]  ;;  %v17452_v63 = vld [vmem:[%s15799_s11 + $0x1a2] sm:$0xff] }
 0x191   : > { %v14351_v61 = vpop.f32.mrf.mxu1  ;;  %14650 = vmatmul.mubr.msk.f32.gmra.mxu1 %vm283_vm1, %v17429_v14  ;;  %14702 = vmatprep.mubr.msk.f32.mxu0 %vm283_vm1, %v17123_v19  ;;  %20566 = vst [vmem:[#allocation6_spill] sm:$0xff] %v17449_v54 }
 0x192   : > { %v17441_v4 = vadd.f32 %v2734_v30, %v2470_v5  ;;  %v2473_v37 = vadd.f32 %v14351_v61, %v17128_v31  ;;  %14652 = vmatprep.mubr.msk.f32.mxu1 %vm283_vm1, %v17432_v62  ;;  %v2744_v28 = vpop.f32.mrf.mxu0  ;;  %v20567_v5 = vld [vmem:[#allocation20_spill] sm:$0xff]  ;;  %v12176_v61 = vld [vmem:[%s15799_s11 + $0x1c0] sm:$0xff] }
 0x193   : > { %v2353_v9 = vpop.f32.mrf.mxu1 }
 0x194   : > { %v17454_v6 = vadd.f32 %v14401_v15, %v2473_v37  ;;  %v2472_v60 = vadd.f32 %v2353_v9, %v17135_v26  ;;  %v14404_v50 = vpop.f32.mrf.mxu0  ;;  %14703 = vmatmul.mubr.msk.f32.gmra.mxu0 %vm283_vm1, %v17126_v59  ;;  %v17469_v26 = vld [vmem:[%s15799_s11 + $0x1b2] sm:$0xff]  ;;  %v12111_v9 = vld [vmem:[%s15799_s11 + $0x1e2] sm:$0xff] }
 0x195   : > { %v14354_v31 = vpop.f32.mrf.mxu1  ;;  %14653 = vmatmul.mubr.msk.f32.gmra.mxu1 %vm283_vm1, %v17449_v54  ;;  %14705 = vmatprep.mubr.msk.f32.mxu0 %vm283_vm1, %v20567_v5  ;;  %20568 = vst [vmem:[#allocation7_spill] sm:$0xff] %v17469_v26 }
 0x196   : > { %v17461_v19 = vadd.f32 %v2744_v28, %v2472_v60  ;;  %v2475_v30 = vadd.f32 %v14354_v31, %v17147_v52  ;;  %14655 = vmatprep.mubr.msk.f32.mxu1 %vm283_vm1, %v17452_v63  ;;  %v2754_v37 = vpop.f32.mrf.mxu0 }
 0x197   : > { %v2363_v15 = vpop.f32.mrf.mxu1 }
 0x198   : > { %v17473_v54 = vadd.f32 %v14404_v50, %v2475_v30  ;;  %v2474_v59 = vadd.f32 %v2363_v15, %v17154_v34  ;;  %v14407_v60 = vpop.f32.mrf.mxu0  ;;  %14706 = vmatmul.mubr.msk.f32.gmra.mxu0 %vm283_vm1, %v12176_v61  ;;  %v17486_v50 = vld [vmem:[%s15799_s11 + $0x1f2] sm:$0xff]  ;;  %v20570_v61 = vld [vmem:[#allocation10_spill] sm:$0xff] }
 0x199   : > { %v14357_v28 = vpop.f32.mrf.mxu1  ;;  %14656 = vmatmul.mubr.msk.f32.gmra.mxu1 %vm283_vm1, %v17469_v26  ;;  %14708 = vmatprep.mubr.msk.f32.mxu0 %vm283_vm1, %v17160_v27 }
 0x19a   : > { %20569 = vst [vmem:[#allocation29_spill] sm:$0xff] %v17473_v54  ;;  %v17479_v52 = vadd.f32 %v2754_v37, %v2474_v59  ;;  %v2477_v31 = vadd.f32 %v14357_v28, %v17166_v41  ;;  %14658 = vmatprep.mubr.msk.f32.mxu1 %vm283_vm1, %v12111_v9  ;;  %v2764_v34 = vpop.f32.mrf.mxu0 }
 0x19b   : > { %v2373_v30 = vpop.f32.mrf.mxu1 }
 0x19c   : > { %v17488_v5 = vadd.f32 %v14407_v60, %v2477_v31  ;;  %v2476_v15 = vadd.f32 %v2373_v30, %v17172_v32  ;;  %v14410_v54 = vpop.f32.mrf.mxu0  ;;  %14709 = vmatmul.mubr.msk.f32.gmra.mxu0 %vm283_vm1, %v17164_v39  ;;  %v20571_v31 = vld [vmem:[#allocation11_spill] sm:$0xff] }
 0x19d   : > { %v14360_v26 = vpop.f32.mrf.mxu1  ;;  %14659 = vmatmul.mubr.msk.f32.gmra.mxu1 %vm283_vm1, %v17486_v50  ;;  %14711 = vmatprep.mubr.msk.f32.mxu0 %vm283_vm1, %v17180_v7  ;;  %v20572_v7 = vld [vmem:[#allocation12_spill] sm:$0xff] }
 0x19e   : > { %v17495_v41 = vadd.f32 %v2764_v34, %v2476_v15  ;;  %v2479_v27 = vadd.f32 %v14360_v26, %v17185_v33  ;;  %14661 = vmatprep.mubr.msk.f32.mxu1 %vm283_vm1, %v20570_v61  ;;  %v2774_v32 = vpop.f32.mrf.mxu0  ;;  %v20573_v15 = vld [vmem:[#allocation13_spill] sm:$0xff] }
 0x19f   : > { %v2383_v37 = vpop.f32.mrf.mxu1  ;;  %v20575_v61 = vld [vmem:[#allocation21_spill] sm:$0xff] }
 0x1a0   : > { %v17502_v9 = vadd.f32 %v14410_v54, %v2479_v27  ;;  %v2478_v59 = vadd.f32 %v2383_v37, %v17192_v0  ;;  %v14413_v60 = vpop.f32.mrf.mxu0  ;;  %14712 = vmatmul.mubr.msk.f32.gmra.mxu0 %vm283_vm1, %v17183_v8 }
 0x1a1   : > { %v14363_v28 = vpop.f32.mrf.mxu1  ;;  %14662 = vmatmul.mubr.msk.f32.gmra.mxu1 %vm283_vm1, %v20571_v31  ;;  %14714 = vmatprep.mubr.msk.f32.mxu0 %vm283_vm1, %v17200_v44  ;;  %v20574_v44 = vld [vmem:[#allocation14_spill] sm:$0xff] }
 0x1a2   : > { %v17509_v39 = vadd.f32 %v2774_v32, %v2478_v59  ;;  %v2481_v33 = vadd.f32 %v14363_v28, %v17205_v43  ;;  %14664 = vmatprep.mubr.msk.f32.mxu1 %vm283_vm1, %v20572_v7  ;;  %v2784_v54 = vpop.f32.mrf.mxu0  ;;  %v12119_v59 = vld [vmem:[%s15799_s11 + $0x282] sm:$0xff] }
 0x1a3   : > { %v2393_v0 = vpop.f32.mrf.mxu1 }
 0x1a4   : > { %v17516_v26 = vadd.f32 %v14413_v60, %v2481_v33  ;;  %v2480_v30 = vadd.f32 %v2393_v0, %v17212_v10  ;;  %v14416_v8 = vpop.f32.mrf.mxu0  ;;  %14715 = vmatmul.mubr.msk.f32.gmra.mxu0 %vm283_vm1, %v17203_v58  ;;  %v12184_v10 = vld [vmem:[%s15799_s11 + $0x260] sm:$0xff]  ;;  %v20576_v33 = vld [vmem:[#allocation15_spill] sm:$0xff] }
 0x1a5   : > { %v14366_v34 = vpop.f32.mrf.mxu1  ;;  %14665 = vmatmul.mubr.msk.f32.gmra.mxu1 %vm283_vm1, %v20573_v15  ;;  %14717 = vmatprep.mubr.msk.f32.mxu0 %vm283_vm1, %v20575_v61  ;;  %v17545_v0 = vld [vmem:[%s15799_s11 + $0x292] sm:$0xff]  ;;  %v20579_v61 = vld [vmem:[#allocation25_spill] sm:$0xff] }
 0x1a6   : > { %v17523_v43 = vadd.f32 %v2784_v54, %v2480_v30  ;;  %v2483_v27 = vadd.f32 %v14366_v34, %v17224_v3  ;;  %14667 = vmatprep.mubr.msk.f32.mxu1 %vm283_vm1, %v20574_v44  ;;  %v2794_v32 = vpop.f32.mrf.mxu0  ;;  %v17548_v30 = vld [vmem:[%s15799_s11 + $0x2a2] sm:$0xff] }
 0x1a7   : > { %v2403_v37 = vpop.f32.mrf.mxu1 }
 0x1a8   : > { %v17532_v28 = vadd.f32 %v14416_v8, %v2483_v27  ;;  %v2482_v58 = vadd.f32 %v2403_v37, %v17231_v11  ;;  %v14419_v31 = vpop.f32.mrf.mxu0  ;;  %14718 = vmatmul.mubr.msk.f32.gmra.mxu0 %vm283_vm1, %v12184_v10  ;;  %v20577_v8 = vld [vmem:[#allocation23_spill] sm:$0xff] }
 0x1a9   : > { %v14369_v60 = vpop.f32.mrf.mxu1  ;;  %14668 = vmatmul.mubr.msk.f32.gmra.mxu1 %vm283_vm1, %v20576_v33  ;;  %14720 = vmatprep.mubr.msk.f32.mxu0 %vm283_vm1, %v17237_v25  ;;  %v17565_v37 = vld [vmem:[%s15799_s11 + $0x2b2] sm:$0xff] }
 0x1aa   : > { %v17538_v3 = vadd.f32 %v2794_v32, %v2482_v58  ;;  %v2485_v7 = vadd.f32 %v14369_v60, %v17244_v40  ;;  %14670 = vmatprep.mubr.msk.f32.mxu1 %vm283_vm1, %v12119_v59  ;;  %v2804_v54 = vpop.f32.mrf.mxu0  ;;  %v20578_v40 = vld [vmem:[#allocation22_spill] sm:$0xff] }
 0x1ab   : > { %v2413_v11 = vpop.f32.mrf.mxu1  ;;  %v17568_v58 = vld [vmem:[%s15799_s11 + $0x2c2] sm:$0xff] }
 0x1ac   : > { %v17550_v34 = vadd.f32 %v14419_v31, %v2485_v7  ;;  %v2484_v15 = vadd.f32 %v2413_v11, %v20577_v8  ;;  %v14422_v44 = vpop.f32.mrf.mxu0  ;;  %14721 = vmatmul.mubr.msk.f32.gmra.mxu0 %vm283_vm1, %v20578_v40  ;;  %v20580_v31 = vld [vmem:[#allocation26_spill] sm:$0xff]  ;;  %v20582_v8 = vld [vmem:[#allocation28_spill] sm:$0xff] }
 0x1ad   : > { %v14372_v27 = vpop.f32.mrf.mxu1  ;;  %14671 = vmatmul.mubr.msk.f32.gmra.mxu1 %vm283_vm1, %v17545_v0  ;;  %14723 = vmatprep.mubr.msk.f32.mxu0 %vm283_vm1, %v17257_v49 }
 0x1ae   : > { %v17557_v25 = vadd.f32 %v2804_v54, %v2484_v15  ;;  %v2487_v10 = vadd.f32 %v14372_v27, %v20579_v61  ;;  %14673 = vmatprep.mubr.msk.f32.mxu1 %vm283_vm1, %v17548_v30  ;;  %v2814_v59 = vpop.f32.mrf.mxu0  ;;  %v20581_v54 = vld [vmem:[#allocation24_spill] sm:$0xff]  ;;  %v20583_v27 = vld [vmem:[#allocation27_spill] sm:$0xff] }
 0x1af   : > { %v2423_v32 = vpop.f32.mrf.mxu1 }
 0x1b0   : > { %v17570_v60 = vadd.f32 %v14422_v44, %v2487_v10  ;;  %v2486_v33 = vadd.f32 %v2423_v32, %v20580_v31  ;;  %v14425_v11 = vpop.f32.mrf.mxu0  ;;  %14724 = vmatmul.mubr.msk.f32.gmra.mxu0 %vm283_vm1, %v20581_v54  ;;  %v17585_v44 = vld [vmem:[%s15799_s11 + $0x2d2] sm:$0xff]  ;;  %v17588_v10 = vld [vmem:[%s15799_s11 + $0x2e2] sm:$0xff] }
 0x1b1   : > { %v14375_v7 = vpop.f32.mrf.mxu1  ;;  %14674 = vmatmul.mubr.msk.f32.gmra.mxu1 %vm283_vm1, %v17565_v37  ;;  %14726 = vmatprep.mubr.msk.f32.mxu0 %vm283_vm1, %v20583_v27 }
 0x1b2   : > { %v17577_v49 = vadd.f32 %v2814_v59, %v2486_v33  ;;  %v2489_v15 = vadd.f32 %v14375_v7, %v20582_v8  ;;  %14676 = vmatprep.mubr.msk.f32.mxu1 %vm283_vm1, %v17568_v58  ;;  %v2824_v61 = vpop.f32.mrf.mxu0  ;;  %v20584_v8 = vld [vmem:[#allocation5_spill] sm:$0xff] }
 0x1b3   : > { %v2433_v40 = vpop.f32.mrf.mxu1 }
 0x1b4   : > { %v17590_v32 = vadd.f32 %v14425_v11, %v2489_v15  ;;  %v2488_v59 = vadd.f32 %v2433_v40, %v17290_v2  ;;  %v14428_v33 = vpop.f32.mrf.mxu0  ;;  %14727 = vmatmul.mubr.msk.f32.gmra.mxu0 %vm283_vm1, %v17281_v51  ;;  %v17605_v2 = vld [vmem:[%s15799_s11 + $0x2f2] sm:$0xff]  ;;  %v12192_v11 = vld [vmem:[%s15799_s11 + $0x300] sm:$0xff] }
 0x1b5   : > { %v14378_v31 = vpop.f32.mrf.mxu1  ;;  %14677 = vmatmul.mubr.msk.f32.gmra.mxu1 %vm283_vm1, %v17585_v44  ;;  %14729 = vmatprep.mubr.msk.f32.mxu0 %vm283_vm1, %v20584_v8  ;;  %20585 = vst [vmem:[#allocation8_spill] sm:$0xff] %v17605_v2  ;;  %v20586_v8 = vld [vmem:[#allocation18_spill] sm:$0xff] }
 0x1b6   : > { %v17597_v7 = vadd.f32 %v2824_v61, %v2488_v59  ;;  %v2491_v54 = vadd.f32 %v14378_v31, %v17301_v22  ;;  %14679 = vmatprep.mubr.msk.f32.mxu1 %vm283_vm1, %v17588_v10  ;;  %v2834_v27 = vpop.f32.mrf.mxu0 }
 0x1b7   : > { %v2443_v15 = vpop.f32.mrf.mxu1 }
 0x1b8   : > { %v17608_v40 = vadd.f32 %v14428_v33, %v2491_v54  ;;  %v2490_v51 = vadd.f32 %v2443_v15, %v17307_v45  ;;  %v14431_v59 = vpop.f32.mrf.mxu0  ;;  %14730 = vmatmul.mubr.msk.f32.gmra.mxu0 %vm283_vm1, %v12192_v11  ;;  %v17622_v33 = vld [vmem:[%s15799_s11 + $0xc1] sm:$0xff]  ;;  %v17628_v11 = vld [vmem:[%s15799_s11 + $0xd1] sm:$0xff] }
 0x1b9   : > { %v14381_v61 = vpop.f32.mrf.mxu1  ;;  %14680 = vmatmul.mubr.msk.f32.gmra.mxu1 %vm283_vm1, %v17605_v2  ;;  %14784 = vmatprep.mubr.msk.f32.mxu0 %vm283_vm1, %v17314_v36  ;;  %v17637_v36 = vld [vmem:[%s20387_s2 + $0x44] sm:$0xf] }
 0x1ba   : > { %v17614_v22 = vadd.f32 %v2834_v27, %v2490_v51  ;;  %v2493_v31 = vadd.f32 %v14381_v61, %v17316_v21  ;;  %14734 = vmatprep.mubr.msk.f32.mxu1 %vm283_vm1, %v20586_v8  ;;  %v2844_v54 = vpop.f32.mrf.mxu0 }
 0x1bb   : > { %v2453_v45 = vpop.f32.mrf.mxu1 }
 0x1bc   : > { %v17624_v15 = vadd.f32 %v14431_v59, %v2493_v31  ;;  %v2492_v2 = vadd.f32 %v2453_v45, %v17336_v18  ;;  %v14486_v21 = vpop.f32.mrf.mxu0  ;;  %14785 = vmatmul.mubr.msk.f32.vlgmr.msra.gmra.mxu0 %vm283_vm1, %v17320_v16  ;;  %v17642_v18 = vld [vmem:[%s20387_s2 + $0x48] sm:$0xf] }
 0x1bd   : > { %v14436_v27 = vpop.f32.mrf.mxu1  ;;  %14735 = vmatmul.mubr.msk.f32.vlgmr.msra.gmra.mxu1 %vm283_vm1, %v17622_v33  ;;  %14883 = vmatpush3.msk.msra.mxu0 %vm380_vm0, %v17334_v35  ;;  %v17652_v16 = vld [vmem:[%s15799_s11 + $0xe1] sm:$0xff] }
 0x1be   : > { %v17644_v51 = vadd.f32 %v2844_v54, %v2492_v2  ;;  %v3244_v61 = vadd.f32 %v14436_v27, %v17353_v12  ;;  %14833 = vmatpush3.msk.msra.mxu1 %vm380_vm0, %v17329_v56  ;;  %v3474_v31 = vpop.f32.mrf.mxu0  ;;  %14737 = vmatprep.mubr.msk.f32.mxu1 %vm283_vm1, %v17628_v11  ;;  %v17659_v2 = vld [vmem:[%s15799_s11 + $0xf1] sm:$0xff] }
 0x1bf   : > { %v3084_v59 = vpop.f32.mrf.mxu1  ;;  %14787 = vmatprep.mubr.msk.f32.mxu0 %vm283_vm1, %v17344_v24  ;;  %14932 = vmatprep.subr.msk.mxu1 %vm380_vm0, %v17637_v36 }
 0x1c0   : > { %v17661_v12 = vadd.f32 %v14486_v21, %v3244_v61  ;;  %v3243_v56 = vadd.f32 %v3084_v59, %v17364_v57  ;;  %14982 = vmatprep.subr.msk.mxu0 %vm380_vm0, %v17642_v18  ;;  %v14489_v8 = vpop.f32.mrf.mxu0  ;;  %14788 = vmatmul.mubr.msk.f32.gmra.mxu0 %vm283_vm1, %v17351_v23  ;;  %v17680_v57 = vld [vmem:[%s15799_s11 + $0x101] sm:$0xff]  ;;  %v17683_v21 = vld [vmem:[%s15799_s11 + $0x111] sm:$0xff] }
 0x1c1   : > { %v14439_v35 = vpop.f32.mrf.mxu1  ;;  %14738 = vmatmul.mubr.msk.f32.gmra.mxu1 %vm283_vm1, %v17652_v16  ;;  %14790 = vmatprep.mubr.msk.f32.mxu0 %vm283_vm1, %v17372_v46 }
 0x1c2   : > { %v17672_v24 = vadd.f32 %v3474_v31, %v3243_v56  ;;  %v3246_v45 = vadd.f32 %v14439_v35, %v17377_v53  ;;  %14740 = vmatprep.mubr.msk.f32.mxu1 %vm283_vm1, %v17659_v2  ;;  %v3484_v27 = vpop.f32.mrf.mxu0  ;;  %v12300_v56 = vld [vmem:[%s15799_s11 + $0x122] sm:$0xff] }
 0x1c3   : > { %v3094_v54 = vpop.f32.mrf.mxu1 }
 0x1c4   : > { %v17685_v23 = vadd.f32 %v14489_v8, %v3246_v45  ;;  %v3245_v61 = vadd.f32 %v3094_v54, %v17384_v13  ;;  %v14492_v59 = vpop.f32.mrf.mxu0  ;;  %14791 = vmatmul.mubr.msk.f32.gmra.mxu0 %vm283_vm1, %v17375_v47  ;;  %v17700_v13 = vld [vmem:[%s15799_s11 + $0x121] sm:$0xff]  ;;  %v12235_v45 = vld [vmem:[%s15799_s11 + $0x151] sm:$0xff] }
 0x1c5   : > { %v14442_v53 = vpop.f32.mrf.mxu1  ;;  %14741 = vmatmul.mubr.msk.f32.gmra.mxu1 %vm283_vm1, %v17680_v57  ;;  %14793 = vmatprep.mubr.msk.f32.mxu0 %vm283_vm1, %v17392_v48 }
 0x1c6   : > { %v17692_v46 = vadd.f32 %v3484_v27, %v3245_v61  ;;  %v3248_v31 = vadd.f32 %v14442_v53, %v17396_v1  ;;  %14743 = vmatprep.mubr.msk.f32.mxu1 %vm283_vm1, %v17683_v21  ;;  %v3494_v8 = vpop.f32.mrf.mxu0  ;;  %v17717_v53 = vld [vmem:[%s15799_s11 + $0x161] sm:$0xff] }
 0x1c7   : > { %v3104_v35 = vpop.f32.mrf.mxu1 }
 0x1c8   : > { %v17704_v54 = vadd.f32 %v14492_v59, %v3248_v31  ;;  %v3247_v47 = vadd.f32 %v3104_v35, %v17402_v29  ;;  %v14495_v1 = vpop.f32.mrf.mxu0  ;;  %14794 = vmatmul.mubr.msk.f32.gmra.mxu0 %vm283_vm1, %v12300_v56  ;;  %v17720_v31 = vld [vmem:[%s15799_s11 + $0x171] sm:$0xff] }
 0x1c9   : > { %v14445_v27 = vpop.f32.mrf.mxu1  ;;  %14744 = vmatmul.mubr.msk.f32.gmra.mxu1 %vm283_vm1, %v17700_v13  ;;  %14796 = vmatprep.mubr.msk.f32.mxu0 %vm283_vm1, %v17409_v42 }
 0x1ca   : > { %v17710_v48 = vadd.f32 %v3494_v8, %v3247_v47  ;;  %v3250_v61 = vadd.f32 %v14445_v27, %v17414_v55  ;;  %14746 = vmatprep.mubr.msk.f32.mxu1 %vm283_vm1, %v12235_v45  ;;  %v3504_v59 = vpop.f32.mrf.mxu0 }
 0x1cb   : > { %v3114_v29 = vpop.f32.mrf.mxu1 }
 0x1cc   : > { %v17722_v35 = vadd.f32 %v14495_v1, %v3250_v61  ;;  %v3249_v56 = vadd.f32 %v3114_v29, %v17421_v17  ;;  %v14498_v47 = vpop.f32.mrf.mxu0  ;;  %14797 = vmatmul.mubr.msk.f32.gmra.mxu0 %vm283_vm1, %v17412_v38  ;;  %v17737_v17 = vld [vmem:[%s15799_s11 + $0x181] sm:$0xff]  ;;  %v17740_v1 = vld [vmem:[%s15799_s11 + $0x191] sm:$0xff] }
 0x1cd   : > { %v14448_v8 = vpop.f32.mrf.mxu1  ;;  %14747 = vmatmul.mubr.msk.f32.gmra.mxu1 %vm283_vm1, %v17717_v53  ;;  %14799 = vmatprep.mubr.msk.f32.mxu0 %vm283_vm1, %v17429_v14  ;;  %20587 = vst [vmem:[#allocation9_spill] sm:$0xff] %v17740_v1 }
 0x1ce   : > { %v17729_v42 = vadd.f32 %v3504_v59, %v3249_v56  ;;  %v3252_v55 = vadd.f32 %v14448_v8, %v17434_v20  ;;  %14749 = vmatprep.mubr.msk.f32.mxu1 %vm283_vm1, %v17720_v31  ;;  %v3514_v27 = vpop.f32.mrf.mxu0  ;;  %v20588_v56 = vld [vmem:[#allocation6_spill] sm:$0xff] }
 0x1cf   : > { %v3124_v45 = vpop.f32.mrf.mxu1 }
 0x1d0   : > { %v17742_v61 = vadd.f32 %v14498_v47, %v3252_v55  ;;  %v3251_v38 = vadd.f32 %v3124_v45, %v17441_v4  ;;  %v14501_v20 = vpop.f32.mrf.mxu0  ;;  %14800 = vmatmul.mubr.msk.f32.gmra.mxu0 %vm283_vm1, %v17432_v62  ;;  %v17757_v4 = vld [vmem:[%s15799_s11 + $0x1a1] sm:$0xff]  ;;  %v17760_v55 = vld [vmem:[%s15799_s11 + $0x1b1] sm:$0xff] }
 0x1d1   : > { %v14451_v29 = vpop.f32.mrf.mxu1  ;;  %14750 = vmatmul.mubr.msk.f32.gmra.mxu1 %vm283_vm1, %v17737_v17  ;;  %14802 = vmatprep.mubr.msk.f32.mxu0 %vm283_vm1, %v20588_v56  ;;  %20589 = vst [vmem:[#allocation16_spill] sm:$0xff] %v17757_v4 }
 0x1d2   : > { %v17749_v14 = vadd.f32 %v3514_v27, %v3251_v38  ;;  %v3254_v59 = vadd.f32 %v14451_v29, %v17454_v6  ;;  %14752 = vmatprep.mubr.msk.f32.mxu1 %vm283_vm1, %v17740_v1  ;;  %v3524_v47 = vpop.f32.mrf.mxu0  ;;  %v20590_v29 = vld [vmem:[#allocation29_spill] sm:$0xff]  ;;  %v20591_v1 = vld [vmem:[#allocation7_spill] sm:$0xff] }
 0x1d3   : > { %v3134_v8 = vpop.f32.mrf.mxu1 }
 0x1d4   : > { %v17762_v62 = vadd.f32 %v14501_v20, %v3254_v59  ;;  %v3253_v45 = vadd.f32 %v3134_v8, %v17461_v19  ;;  %v14504_v27 = vpop.f32.mrf.mxu0  ;;  %14803 = vmatmul.mubr.msk.f32.gmra.mxu0 %vm283_vm1, %v17452_v63  ;;  %v17777_v19 = vld [vmem:[%s15799_s11 + $0x1c1] sm:$0xff] }
 0x1d5   : > { %v14454_v6 = vpop.f32.mrf.mxu1  ;;  %14753 = vmatmul.mubr.msk.f32.gmra.mxu1 %vm283_vm1, %v17757_v4  ;;  %14805 = vmatprep.mubr.msk.f32.mxu0 %vm283_vm1, %v20591_v1  ;;  %v12308_v20 = vld [vmem:[%s15799_s11 + $0x1c2] sm:$0xff]  ;;  %v12243_v4 = vld [vmem:[%s15799_s11 + $0x1f1] sm:$0xff] }
 0x1d6   : > { %v17769_v38 = vadd.f32 %v3524_v47, %v3253_v45  ;;  %v3256_v56 = vadd.f32 %v14454_v6, %v20590_v29  ;;  %14755 = vmatprep.mubr.msk.f32.mxu1 %vm283_vm1, %v17760_v55  ;;  %v3534_v8 = vpop.f32.mrf.mxu0 }
 0x1d7   : > { %v3144_v59 = vpop.f32.mrf.mxu1 }
 0x1d8   : > { %v17781_v63 = vadd.f32 %v14504_v27, %v3256_v56  ;;  %v3255_v47 = vadd.f32 %v3144_v59, %v17479_v52  ;;  %v14507_v6 = vpop.f32.mrf.mxu0  ;;  %14806 = vmatmul.mubr.msk.f32.gmra.mxu0 %vm283_vm1, %v12308_v20  ;;  %v17794_v27 = vld [vmem:[%s15799_s11 + $0x201] sm:$0xff]  ;;  %v12311_v20 = vld [vmem:[%s15799_s11 + $0x212] sm:$0xff] }
 0x1d9   : > { %v14457_v45 = vpop.f32.mrf.mxu1  ;;  %14756 = vmatmul.mubr.msk.f32.gmra.mxu1 %vm283_vm1, %v17777_v19  ;;  %14808 = vmatprep.mubr.msk.f32.mxu0 %vm283_vm1, %v17486_v50  ;;  %v12310_v52 = vld [vmem:[%s15799_s11 + $0x202] sm:$0xff] }
 0x1da   : > { %20592 = vst [vmem:[#allocation17_spill] sm:$0xff] %v17781_v63  ;;  %v17787_v1 = vadd.f32 %v3534_v8, %v3255_v47  ;;  %v3258_v29 = vadd.f32 %v14457_v45, %v17488_v5  ;;  %14758 = vmatprep.mubr.msk.f32.mxu1 %vm283_vm1, %v12243_v4  ;;  %v3544_v59 = vpop.f32.mrf.mxu0  ;;  %v17798_v63 = vld [vmem:[%s15799_s11 + $0x211] sm:$0xff] }
 0x1db   : > { %v3154_v56 = vpop.f32.mrf.mxu1  ;;  %20593 = vst [vmem:[#allocation19_spill] sm:$0xff] %v17798_v63 }
 0x1dc   : > { %v17801_v8 = vadd.f32 %v14507_v6, %v3258_v29  ;;  %v3257_v5 = vadd.f32 %v3154_v56, %v17495_v41  ;;  %v14510_v47 = vpop.f32.mrf.mxu0  ;;  %14809 = vmatmul.mubr.msk.f32.gmra.mxu0 %vm283_vm1, %v12310_v52  ;;  %v17814_v6 = vld [vmem:[%s15799_s11 + $0x221] sm:$0xff]  ;;  %v12313_v52 = vld [vmem:[%s15799_s11 + $0x232] sm:$0xff] }
 0x1dd   : > { %v14460_v4 = vpop.f32.mrf.mxu1  ;;  %14759 = vmatmul.mubr.msk.f32.gmra.mxu1 %vm283_vm1, %v17794_v27  ;;  %14811 = vmatprep.mubr.msk.f32.mxu0 %vm283_vm1, %v12311_v20  ;;  %v12312_v41 = vld [vmem:[%s15799_s11 + $0x222] sm:$0xff] }
 0x1de   : > { %20594 = vst [vmem:[#allocation20_spill] sm:$0xff] %v17801_v8  ;;  %v17807_v50 = vadd.f32 %v3544_v59, %v3257_v5  ;;  %v3260_v45 = vadd.f32 %v14460_v4, %v17502_v9  ;;  %14761 = vmatprep.mubr.msk.f32.mxu1 %vm283_vm1, %v17798_v63  ;;  %v3554_v56 = vpop.f32.mrf.mxu0  ;;  %v17818_v8 = vld [vmem:[%s15799_s11 + $0x231] sm:$0xff] }
 0x1df   : > { %v3164_v29 = vpop.f32.mrf.mxu1  ;;  %20595 = vst [vmem:[#allocation10_spill] sm:$0xff] %v17818_v8 }
 0x1e0   : > { %v17821_v59 = vadd.f32 %v14510_v47, %v3260_v45  ;;  %v3259_v9 = vadd.f32 %v3164_v29, %v17509_v39  ;;  %v14513_v4 = vpop.f32.mrf.mxu0  ;;  %14812 = vmatmul.mubr.msk.f32.gmra.mxu0 %vm283_vm1, %v12312_v41  ;;  %v17834_v47 = vld [vmem:[%s15799_s11 + $0x241] sm:$0xff]  ;;  %v12315_v41 = vld [vmem:[%s15799_s11 + $0x252] sm:$0xff] }
 0x1e1   : > { %v14463_v5 = vpop.f32.mrf.mxu1  ;;  %14762 = vmatmul.mubr.msk.f32.gmra.mxu1 %vm283_vm1, %v17814_v6  ;;  %14814 = vmatprep.mubr.msk.f32.mxu0 %vm283_vm1, %v12313_v52  ;;  %20597 = vst [vmem:[#allocation12_spill] sm:$0xff] %v17834_v47  ;;  %v12314_v39 = vld [vmem:[%s15799_s11 + $0x242] sm:$0xff] }
 0x1e2   : > { %20596 = vst [vmem:[#allocation11_spill] sm:$0xff] %v17821_v59  ;;  %v17827_v20 = vadd.f32 %v3554_v56, %v3259_v9  ;;  %v3262_v63 = vadd.f32 %v14463_v5, %v17516_v26  ;;  %14764 = vmatprep.mubr.msk.f32.mxu1 %vm283_vm1, %v17818_v8  ;;  %v3564_v29 = vpop.f32.mrf.mxu0  ;;  %v17838_v59 = vld [vmem:[%s15799_s11 + $0x251] sm:$0xff] }
 0x1e3   : > { %v3174_v45 = vpop.f32.mrf.mxu1 }
 0x1e4   : > { %v17841_v56 = vadd.f32 %v14513_v4, %v3262_v63  ;;  %v3261_v26 = vadd.f32 %v3174_v45, %v17523_v43  ;;  %v14516_v5 = vpop.f32.mrf.mxu0  ;;  %14815 = vmatmul.mubr.msk.f32.gmra.mxu0 %vm283_vm1, %v12314_v39  ;;  %v17854_v63 = vld [vmem:[%s15799_s11 + $0x261] sm:$0xff] }
 0x1e5   : > { %v14466_v9 = vpop.f32.mrf.mxu1  ;;  %14765 = vmatmul.mubr.msk.f32.gmra.mxu1 %vm283_vm1, %v17834_v47  ;;  %14817 = vmatprep.mubr.msk.f32.mxu0 %vm283_vm1, %v12315_v41  ;;  %v12316_v43 = vld [vmem:[%s15799_s11 + $0x262] sm:$0xff] }
 0x1e6   : > { %20598 = vst [vmem:[#allocation13_spill] sm:$0xff] %v17841_v56  ;;  %v17847_v52 = vadd.f32 %v3564_v29, %v3261_v26  ;;  %v3264_v8 = vadd.f32 %v14466_v9, %v17532_v28  ;;  %14767 = vmatprep.mubr.msk.f32.mxu1 %vm283_vm1, %v17838_v59  ;;  %v3574_v45 = vpop.f32.mrf.mxu0  ;;  %v12251_v56 = vld [vmem:[%s15799_s11 + $0x291] sm:$0xff] }
 0x1e7   : > { %v3184_v4 = vpop.f32.mrf.mxu1 }
 0x1e8   : > { %v17858_v47 = vadd.f32 %v14516_v5, %v3264_v8  ;;  %v3263_v39 = vadd.f32 %v3184_v4, %v17538_v3  ;;  %v14519_v26 = vpop.f32.mrf.mxu0  ;;  %14818 = vmatmul.mubr.msk.f32.gmra.mxu0 %vm283_vm1, %v12316_v43  ;;  %v17871_v8 = vld [vmem:[%s15799_s11 + $0x2a1] sm:$0xff]  ;;  %v17874_v5 = vld [vmem:[%s15799_s11 + $0x2b1] sm:$0xff] }
 0x1e9   : > { %v14469_v29 = vpop.f32.mrf.mxu1  ;;  %14768 = vmatmul.mubr.msk.f32.gmra.mxu1 %vm283_vm1, %v17854_v63  ;;  %14820 = vmatprep.mubr.msk.f32.mxu0 %vm283_vm1, %v17545_v0 }
 0x1ea   : > { %v17864_v28 = vadd.f32 %v3574_v45, %v3263_v39  ;;  %v3266_v41 = vadd.f32 %v14469_v29, %v17550_v34  ;;  %14770 = vmatprep.mubr.msk.f32.mxu1 %vm283_vm1, %v12251_v56  ;;  %v3584_v9 = vpop.f32.mrf.mxu0 }
 0x1eb   : > { %v3194_v3 = vpop.f32.mrf.mxu1 }
 0x1ec   : > { %v17876_v4 = vadd.f32 %v14519_v26, %v3266_v41  ;;  %v3265_v43 = vadd.f32 %v3194_v3, %v17557_v25  ;;  %v14522_v39 = vpop.f32.mrf.mxu0  ;;  %14821 = vmatmul.mubr.msk.f32.gmra.mxu0 %vm283_vm1, %v17548_v30  ;;  %v17891_v25 = vld [vmem:[%s15799_s11 + $0x2c1] sm:$0xff]  ;;  %v17894_v26 = vld [vmem:[%s15799_s11 + $0x2d1] sm:$0xff] }
 0x1ed   : > { %v14472_v45 = vpop.f32.mrf.mxu1  ;;  %14771 = vmatmul.mubr.msk.f32.gmra.mxu1 %vm283_vm1, %v17871_v8  ;;  %14823 = vmatprep.mubr.msk.f32.mxu0 %vm283_vm1, %v17565_v37 }
 0x1ee   : > { %v17883_v0 = vadd.f32 %v3584_v9, %v3265_v43  ;;  %v3268_v34 = vadd.f32 %v14472_v45, %v17570_v60  ;;  %14773 = vmatprep.mubr.msk.f32.mxu1 %vm283_vm1, %v17874_v5  ;;  %v3594_v29 = vpop.f32.mrf.mxu0 }
 0x1ef   : > { %v3204_v56 = vpop.f32.mrf.mxu1 }
 0x1f0   : > { %v17896_v41 = vadd.f32 %v14522_v39, %v3268_v34  ;;  %v3267_v30 = vadd.f32 %v3204_v56, %v17577_v49  ;;  %v14525_v60 = vpop.f32.mrf.mxu0  ;;  %14824 = vmatmul.mubr.msk.f32.gmra.mxu0 %vm283_vm1, %v17568_v58  ;;  %v17911_v49 = vld [vmem:[%s15799_s11 + $0x2e1] sm:$0xff]  ;;  %v17914_v39 = vld [vmem:[%s15799_s11 + $0x2f1] sm:$0xff] }
 0x1f1   : > { %v14475_v3 = vpop.f32.mrf.mxu1  ;;  %14774 = vmatmul.mubr.msk.f32.gmra.mxu1 %vm283_vm1, %v17891_v25  ;;  %14826 = vmatprep.mubr.msk.f32.mxu0 %vm283_vm1, %v17585_v44  ;;  %20599 = vst [vmem:[#allocation14_spill] sm:$0xff] %v17911_v49 }
 0x1f2   : > { %v17903_v37 = vadd.f32 %v3594_v29, %v3267_v30  ;;  %v3270_v9 = vadd.f32 %v14475_v3, %v17590_v32  ;;  %14776 = vmatprep.mubr.msk.f32.mxu1 %vm283_vm1, %v17894_v26  ;;  %v3604_v45 = vpop.f32.mrf.mxu0  ;;  %v20600_v30 = vld [vmem:[#allocation8_spill] sm:$0xff]  ;;  %v12324_v3 = vld [vmem:[%s15799_s11 + $0x302] sm:$0xff] }
 0x1f3   : > { %v3214_v43 = vpop.f32.mrf.mxu1 }
 0x1f4   : > { %v17916_v58 = vadd.f32 %v14525_v60, %v3270_v9  ;;  %v3269_v34 = vadd.f32 %v3214_v43, %v17597_v7  ;;  %v14528_v56 = vpop.f32.mrf.mxu0  ;;  %14827 = vmatmul.mubr.msk.f32.gmra.mxu0 %vm283_vm1, %v17588_v10  ;;  %v17931_v7 = vld [vmem:[%s15799_s11 + $0x301] sm:$0xff] }
 0x1f5   : > { %v14478_v32 = vpop.f32.mrf.mxu1  ;;  %14777 = vmatmul.mubr.msk.f32.gmra.mxu1 %vm283_vm1, %v17911_v49  ;;  %14829 = vmatprep.mubr.msk.f32.mxu0 %vm283_vm1, %v20600_v30  ;;  %20601 = vst [vmem:[#allocation21_spill] sm:$0xff] %v17931_v7  ;;  %v12359_v43 = vld [vmem:[%s15799_s11 + $0xc0] sm:$0xff] }
 0x1f6   : > { %v17923_v44 = vadd.f32 %v3604_v45, %v3269_v34  ;;  %v3272_v29 = vadd.f32 %v14478_v32, %v17608_v40  ;;  %14779 = vmatprep.mubr.msk.f32.mxu1 %vm283_vm1, %v17914_v39  ;;  %v3614_v9 = vpop.f32.mrf.mxu0 }
 0x1f7   : > { %v3224_v60 = vpop.f32.mrf.mxu1 }
 0x1f8   : > { %v17935_v49 = vadd.f32 %v14528_v56, %v3272_v29  ;;  %v3271_v10 = vadd.f32 %v3224_v60, %v17614_v22  ;;  %v14531_v40 = vpop.f32.mrf.mxu0  ;;  %14830 = vmatmul.mubr.msk.f32.gmra.mxu0 %vm283_vm1, %v12324_v3  ;;  %v12360_v56 = vld [vmem:[%s15799_s11 + $0xd0] sm:$0xff] }
 0x1f9   : > { %v14481_v45 = vpop.f32.mrf.mxu1  ;;  %14780 = vmatmul.mubr.msk.f32.gmra.mxu1 %vm283_vm1, %v17931_v7  ;;  %14884 = vmatprep.mubr.msk.f32.mxu0 %vm283_vm1, %v17622_v33  ;;  %v12361_v7 = vld [vmem:[%s15799_s11 + $0xe0] sm:$0xff]  ;;  %v17958_v33 = vld [vmem:[%s20387_s2 + $0x4c] sm:$0xf] }
 0x1fa   : > { %v17941_v34 = vadd.f32 %v3614_v9, %v3271_v10  ;;  %v3274_v32 = vadd.f32 %v14481_v45, %v17624_v15  ;;  %14834 = vmatprep.mubr.msk.f32.mxu1 %vm283_vm1, %v12359_v43  ;;  %v3624_v22 = vpop.f32.mrf.mxu0  ;;  %v17963_v15 = vld [vmem:[%s20387_s2 + $0x50] sm:$0xf] }
 0x1fb   : > { %v3234_v29 = vpop.f32.mrf.mxu1 }
 0x1fc   : > { %v17948_v30 = vadd.f32 %v14531_v40, %v3274_v32  ;;  %v3273_v60 = vadd.f32 %v3234_v29, %v17644_v51  ;;  %v14586_v9 = vpop.f32.mrf.mxu0  ;;  %14885 = vmatmul.mubr.msk.f32.vlgmr.msra.gmra.mxu0 %vm283_vm1, %v17628_v11  ;;  %v12362_v11 = vld [vmem:[%s15799_s11 + $0xf0] sm:$0xff]  ;;  %v12363_v40 = vld [vmem:[%s15799_s11 + $0x100] sm:$0xff] }
 0x1fd   : > { %v14536_v3 = vpop.f32.mrf.mxu1  ;;  %14835 = vmatmul.mubr.msk.f32.vlgmr.msra.gmra.mxu1 %vm283_vm1, %v12360_v56  ;;  %14983 = vmatpush3.msk.msra.mxu0 %vm380_vm0, %v17642_v18 }
 0x1fe   : > { %v17965_v51 = vadd.f32 %v3624_v22, %v3273_v60  ;;  %v4025_v43 = vadd.f32 %v14536_v3, %v17661_v12  ;;  %14933 = vmatpush3.msk.msra.mxu1 %vm380_vm0, %v17637_v36  ;;  %v4255_v45 = vpop.f32.mrf.mxu0  ;;  %14837 = vmatprep.mubr.msk.f32.mxu1 %vm283_vm1, %v12361_v7  ;;  %v12365_v22 = vld [vmem:[%s15799_s11 + $0x120] sm:$0xff] }
 0x1ff   : > { %v3865_v10 = vpop.f32.mrf.mxu1  ;;  %14887 = vmatprep.mubr.msk.f32.mxu0 %vm283_vm1, %v17652_v16  ;;  %15032 = vmatprep.subr.msk.mxu1 %vm380_vm0, %v17958_v33 }
 0x200   : > { %v17977_v32 = vadd.f32 %v14586_v9, %v4025_v43  ;;  %v4024_v12 = vadd.f32 %v3865_v10, %v17672_v24  ;;  %15082 = vmatprep.subr.msk.mxu0 %vm380_vm0, %v17963_v15  ;;  %v14589_v18 = vpop.f32.mrf.mxu0  ;;  %14888 = vmatmul.mubr.msk.f32.gmra.mxu0 %vm283_vm1, %v17659_v2  ;;  %v12364_v24 = vld [vmem:[%s15799_s11 + $0x110] sm:$0xff] }
 0x201   : > { %v14539_v36 = vpop.f32.mrf.mxu1  ;;  %14838 = vmatmul.mubr.msk.f32.gmra.mxu1 %vm283_vm1, %v12362_v11  ;;  %14890 = vmatprep.mubr.msk.f32.mxu0 %vm283_vm1, %v17680_v57  ;;  %v12366_v43 = vld [vmem:[%s15799_s11 + $0x130] sm:$0xff] }
 0x202   : > { %v17987_v16 = vadd.f32 %v4255_v45, %v4024_v12  ;;  %v4027_v7 = vadd.f32 %v14539_v36, %v17685_v23  ;;  %14840 = vmatprep.mubr.msk.f32.mxu1 %vm283_vm1, %v12363_v40  ;;  %v4265_v29 = vpop.f32.mrf.mxu0  ;;  %v12432_v11 = vld [vmem:[%s15799_s11 + $0x131] sm:$0xff]  ;;  %v18010_v45 = vld [vmem:[%s15799_s11 + $0x160] sm:$0xff] }
 0x203   : > { %v3875_v56 = vpop.f32.mrf.mxu1 }
 0x204   : > { %v17995_v60 = vadd.f32 %v14589_v18, %v4027_v7  ;;  %v4026_v2 = vadd.f32 %v3875_v56, %v17692_v46  ;;  %v14592_v9 = vpop.f32.mrf.mxu0  ;;  %14891 = vmatmul.mubr.msk.f32.gmra.mxu0 %vm283_vm1, %v17683_v21  ;;  %v18025_v18 = vld [vmem:[%s15799_s11 + $0x170] sm:$0xff] }
 0x205   : > { %v14542_v3 = vpop.f32.mrf.mxu1  ;;  %14841 = vmatmul.mubr.msk.f32.gmra.mxu1 %vm283_vm1, %v12364_v24  ;;  %14893 = vmatprep.mubr.msk.f32.mxu0 %vm283_vm1, %v17700_v13  ;;  %v18028_v24 = vld [vmem:[%s15799_s11 + $0x180] sm:$0xff] }
 0x206   : > { %v18001_v23 = vadd.f32 %v4265_v29, %v4026_v2  ;;  %v4029_v57 = vadd.f32 %v14542_v3, %v17704_v54  ;;  %14843 = vmatprep.mubr.msk.f32.mxu1 %vm283_vm1, %v12365_v22  ;;  %v4275_v10 = vpop.f32.mrf.mxu0 }
 0x207   : > { %v3885_v46 = vpop.f32.mrf.mxu1 }
 0x208   : > { %v18012_v40 = vadd.f32 %v14592_v9, %v4029_v57  ;;  %v4028_v21 = vadd.f32 %v3885_v46, %v17710_v48  ;;  %v14595_v36 = vpop.f32.mrf.mxu0  ;;  %14894 = vmatmul.mubr.msk.f32.gmra.mxu0 %vm283_vm1, %v12432_v11  ;;  %v18048_v57 = vld [vmem:[%s15799_s11 + $0x1a0] sm:$0xff] }
 0x209   : > { %v14545_v12 = vpop.f32.mrf.mxu1  ;;  %14844 = vmatmul.mubr.msk.f32.gmra.mxu1 %vm283_vm1, %v12366_v43  ;;  %14896 = vmatprep.mubr.msk.f32.mxu0 %vm283_vm1, %v17717_v53  ;;  %v20602_v46 = vld [vmem:[#allocation9_spill] sm:$0xff] }
 0x20a   : > { %v18017_v54 = vadd.f32 %v4275_v10, %v4028_v21  ;;  %v4031_v13 = vadd.f32 %v14545_v12, %v17722_v35  ;;  %14846 = vmatprep.mubr.msk.f32.mxu1 %vm283_vm1, %v18010_v45  ;;  %v4285_v7 = vpop.f32.mrf.mxu0  ;;  %v20603_v21 = vld [vmem:[#allocation16_spill] sm:$0xff] }
 0x20b   : > { %v3895_v48 = vpop.f32.mrf.mxu1 }
 0x20c   : > { %v18030_v56 = vadd.f32 %v14595_v36, %v4031_v13  ;;  %v4030_v29 = vadd.f32 %v3895_v48, %v17729_v42  ;;  %v14598_v35 = vpop.f32.mrf.mxu0  ;;  %14897 = vmatmul.mubr.msk.f32.gmra.mxu0 %vm283_vm1, %v17720_v31  ;;  %v18045_v42 = vld [vmem:[%s15799_s11 + $0x190] sm:$0xff]  ;;  %v12373_v13 = vld [vmem:[%s15799_s11 + $0x1c0] sm:$0xff] }
 0x20d   : > { %v14548_v22 = vpop.f32.mrf.mxu1  ;;  %14847 = vmatmul.mubr.msk.f32.gmra.mxu1 %vm283_vm1, %v18025_v18  ;;  %14899 = vmatprep.mubr.msk.f32.mxu0 %vm283_vm1, %v17737_v17 }
 0x20e   : > { %v18037_v53 = vadd.f32 %v4285_v7, %v4030_v29  ;;  %v4033_v2 = vadd.f32 %v14548_v22, %v17742_v61  ;;  %14849 = vmatprep.mubr.msk.f32.mxu1 %vm283_vm1, %v18028_v24  ;;  %v4295_v9 = vpop.f32.mrf.mxu0 }
 0x20f   : > { %v3905_v3 = vpop.f32.mrf.mxu1 }
 0x210   : > { %v18050_v43 = vadd.f32 %v14598_v35, %v4033_v2  ;;  %v4032_v31 = vadd.f32 %v3905_v3, %v17749_v14  ;;  %v14601_v61 = vpop.f32.mrf.mxu0  ;;  %14900 = vmatmul.mubr.msk.f32.gmra.mxu0 %vm283_vm1, %v20602_v46  ;;  %v18065_v14 = vld [vmem:[%s15799_s11 + $0x1b0] sm:$0xff]  ;;  %v20604_v35 = vld [vmem:[#allocation17_spill] sm:$0xff] }
 0x211   : > { %v14551_v11 = vpop.f32.mrf.mxu1  ;;  %14850 = vmatmul.mubr.msk.f32.gmra.mxu1 %vm283_vm1, %v18045_v42  ;;  %14902 = vmatprep.mubr.msk.f32.mxu0 %vm283_vm1, %v20603_v21  ;;  %v12374_v3 = vld [vmem:[%s15799_s11 + $0x1d0] sm:$0xff] }
 0x212   : > { %v18057_v17 = vadd.f32 %v4295_v9, %v4032_v31  ;;  %v4035_v10 = vadd.f32 %v14551_v11, %v17762_v62  ;;  %14852 = vmatprep.mubr.msk.f32.mxu1 %vm283_vm1, %v18048_v57  ;;  %v4305_v36 = vpop.f32.mrf.mxu0  ;;  %v18084_v11 = vld [vmem:[%s15799_s11 + $0x200] sm:$0xff] }
 0x213   : > { %v3915_v12 = vpop.f32.mrf.mxu1 }
 0x214   : > { %v18068_v48 = vadd.f32 %v14601_v61, %v4035_v10  ;;  %v4034_v7 = vadd.f32 %v3915_v12, %v17769_v38  ;;  %v14604_v62 = vpop.f32.mrf.mxu0  ;;  %14903 = vmatmul.mubr.msk.f32.gmra.mxu0 %vm283_vm1, %v17760_v55  ;;  %v12440_v38 = vld [vmem:[%s15799_s11 + $0x1d1] sm:$0xff] }
 0x215   : > { %v14554_v29 = vpop.f32.mrf.mxu1  ;;  %14853 = vmatmul.mubr.msk.f32.gmra.mxu1 %vm283_vm1, %v18065_v14  ;;  %14905 = vmatprep.mubr.msk.f32.mxu0 %vm283_vm1, %v17777_v19  ;;  %v20605_v19 = vld [vmem:[#allocation20_spill] sm:$0xff] }
 0x216   : > { %v18075_v22 = vadd.f32 %v4305_v36, %v4034_v7  ;;  %v4037_v2 = vadd.f32 %v14554_v29, %v20604_v35  ;;  %14855 = vmatprep.mubr.msk.f32.mxu1 %vm283_vm1, %v12373_v13  ;;  %v4315_v31 = vpop.f32.mrf.mxu0  ;;  %v18099_v36 = vld [vmem:[%s15799_s11 + $0x210] sm:$0xff]  ;;  %v18102_v7 = vld [vmem:[%s15799_s11 + $0x220] sm:$0xff] }
 0x217   : > { %v3925_v9 = vpop.f32.mrf.mxu1 }
 0x218   : > { %v18086_v61 = vadd.f32 %v14604_v62, %v4037_v2  ;;  %v4036_v55 = vadd.f32 %v3925_v9, %v17787_v1  ;;  %v14607_v10 = vpop.f32.mrf.mxu0  ;;  %14906 = vmatmul.mubr.msk.f32.gmra.mxu0 %vm283_vm1, %v12440_v38  ;;  %v20607_v38 = vld [vmem:[#allocation11_spill] sm:$0xff] }
 0x219   : > { %v14557_v46 = vpop.f32.mrf.mxu1  ;;  %14856 = vmatmul.mubr.msk.f32.gmra.mxu1 %vm283_vm1, %v12374_v3  ;;  %14908 = vmatprep.mubr.msk.f32.mxu0 %vm283_vm1, %v17794_v27  ;;  %v20606_v3 = vld [vmem:[#allocation19_spill] sm:$0xff] }
 0x21a   : > { %v18091_v21 = vadd.f32 %v4315_v31, %v4036_v55  ;;  %v4039_v12 = vadd.f32 %v14557_v46, %v20605_v19  ;;  %14858 = vmatprep.mubr.msk.f32.mxu1 %vm283_vm1, %v18084_v11  ;;  %v4325_v13 = vpop.f32.mrf.mxu0  ;;  %v18122_v46 = vld [vmem:[%s15799_s11 + $0x240] sm:$0xff] }
 0x21b   : > { %v3935_v1 = vpop.f32.mrf.mxu1 }
 0x21c   : > { %v18104_v29 = vadd.f32 %v14607_v10, %v4039_v12  ;;  %v4038_v62 = vadd.f32 %v3935_v1, %v17807_v50  ;;  %v14610_v2 = vpop.f32.mrf.mxu0  ;;  %14909 = vmatmul.mubr.msk.f32.gmra.mxu0 %vm283_vm1, %v20606_v3  ;;  %v18119_v50 = vld [vmem:[%s15799_s11 + $0x230] sm:$0xff]  ;;  %v20610_v3 = vld [vmem:[#allocation12_spill] sm:$0xff] }
 0x21d   : > { %v14560_v35 = vpop.f32.mrf.mxu1  ;;  %14859 = vmatmul.mubr.msk.f32.gmra.mxu1 %vm283_vm1, %v18099_v36  ;;  %14911 = vmatprep.mubr.msk.f32.mxu0 %vm283_vm1, %v17814_v6 }
 0x21e   : > { %v18111_v27 = vadd.f32 %v4325_v13, %v4038_v62  ;;  %v4041_v9 = vadd.f32 %v14560_v35, %v20607_v38  ;;  %14861 = vmatprep.mubr.msk.f32.mxu1 %vm283_vm1, %v18102_v7  ;;  %v4335_v55 = vpop.f32.mrf.mxu0  ;;  %v20608_v13 = vld [vmem:[#allocation10_spill] sm:$0xff]  ;;  %v20609_v62 = vld [vmem:[#allocation13_spill] sm:$0xff] }
 0x21f   : > { %v3945_v31 = vpop.f32.mrf.mxu1 }
 0x220   : > { %v18124_v10 = vadd.f32 %v14610_v2, %v4041_v9  ;;  %v4040_v19 = vadd.f32 %v3945_v31, %v17827_v20  ;;  %v14613_v1 = vpop.f32.mrf.mxu0  ;;  %14912 = vmatmul.mubr.msk.f32.gmra.mxu0 %vm283_vm1, %v20608_v13  ;;  %v18139_v20 = vld [vmem:[%s15799_s11 + $0x250] sm:$0xff]  ;;  %v12381_v9 = vld [vmem:[%s15799_s11 + $0x260] sm:$0xff] }
 0x221   : > { %v14563_v12 = vpop.f32.mrf.mxu1  ;;  %14862 = vmatmul.mubr.msk.f32.gmra.mxu1 %vm283_vm1, %v18119_v50  ;;  %14914 = vmatprep.mubr.msk.f32.mxu0 %vm283_vm1, %v20610_v3 }
 0x222   : > { %v18131_v6 = vadd.f32 %v4335_v55, %v4040_v19  ;;  %v4043_v35 = vadd.f32 %v14563_v12, %v20609_v62  ;;  %14864 = vmatprep.mubr.msk.f32.mxu1 %vm283_vm1, %v18122_v46  ;;  %v4345_v38 = vpop.f32.mrf.mxu0 }
 0x223   : > { %v3955_v2 = vpop.f32.mrf.mxu1 }
 0x224   : > { %v18142_v31 = vadd.f32 %v14613_v1, %v4043_v35  ;;  %v4042_v55 = vadd.f32 %v3955_v2, %v17847_v52  ;;  %v14616_v12 = vpop.f32.mrf.mxu0  ;;  %14915 = vmatmul.mubr.msk.f32.gmra.mxu0 %vm283_vm1, %v17838_v59  ;;  %v12382_v1 = vld [vmem:[%s15799_s11 + $0x270] sm:$0xff]  ;;  %v18158_v2 = vld [vmem:[%s15799_s11 + $0x2a0] sm:$0xff] }
 0x225   : > { %v14566_v19 = vpop.f32.mrf.mxu1  ;;  %14865 = vmatmul.mubr.msk.f32.gmra.mxu1 %vm283_vm1, %v18139_v20  ;;  %14917 = vmatprep.mubr.msk.f32.mxu0 %vm283_vm1, %v17854_v63  ;;  %v12448_v52 = vld [vmem:[%s15799_s11 + $0x271] sm:$0xff] }
 0x226   : > { %20611 = vst [vmem:[#allocation15_spill] sm:$0xff] %v18142_v31  ;;  %v18149_v13 = vadd.f32 %v4345_v38, %v4042_v55  ;;  %v4045_v62 = vadd.f32 %v14566_v19, %v17858_v47  ;;  %14867 = vmatprep.mubr.msk.f32.mxu1 %vm283_vm1, %v12381_v9  ;;  %v4355_v3 = vpop.f32.mrf.mxu0  ;;  %v18173_v9 = vld [vmem:[%s15799_s11 + $0x2b0] sm:$0xff] }
 0x227   : > { %v3965_v35 = vpop.f32.mrf.mxu1 }
 0x228   : > { %v18160_v31 = vadd.f32 %v14616_v12, %v4045_v62  ;;  %v4044_v59 = vadd.f32 %v3965_v35, %v17864_v28  ;;  %v14619_v55 = vpop.f32.mrf.mxu0  ;;  %14918 = vmatmul.mubr.msk.f32.gmra.mxu0 %vm283_vm1, %v12448_v52  ;;  %v18176_v12 = vld [vmem:[%s15799_s11 + $0x2c0] sm:$0xff] }
 0x229   : > { %v14569_v38 = vpop.f32.mrf.mxu1  ;;  %14868 = vmatmul.mubr.msk.f32.gmra.mxu1 %vm283_vm1, %v12382_v1  ;;  %14920 = vmatprep.mubr.msk.f32.mxu0 %vm283_vm1, %v17871_v8 }
 0x22a   : > { %v18165_v47 = vadd.f32 %v4355_v3, %v4044_v59  ;;  %v4047_v63 = vadd.f32 %v14569_v38, %v17876_v4  ;;  %14870 = vmatprep.mubr.msk.f32.mxu1 %vm283_vm1, %v18158_v2  ;;  %v4365_v19 = vpop.f32.mrf.mxu0  ;;  %v18196_v38 = vld [vmem:[%s15799_s11 + $0x2e0] sm:$0xff] }
 0x22b   : > { %v3975_v28 = vpop.f32.mrf.mxu1 }
 0x22c   : > { %v18178_v62 = vadd.f32 %v14619_v55, %v4047_v63  ;;  %v4046_v1 = vadd.f32 %v3975_v28, %v17883_v0  ;;  %v14622_v4 = vpop.f32.mrf.mxu0  ;;  %14921 = vmatmul.mubr.msk.f32.gmra.mxu0 %vm283_vm1, %v17874_v5  ;;  %v18193_v0 = vld [vmem:[%s15799_s11 + $0x2d0] sm:$0xff] }
 0x22d   : > { %v14572_v52 = vpop.f32.mrf.mxu1  ;;  %14871 = vmatmul.mubr.msk.f32.gmra.mxu1 %vm283_vm1, %v18173_v9  ;;  %14923 = vmatprep.mubr.msk.f32.mxu0 %vm283_vm1, %v17891_v25 }
 0x22e   : > { %v18185_v8 = vadd.f32 %v4365_v19, %v4046_v1  ;;  %v4049_v35 = vadd.f32 %v14572_v52, %v17896_v41  ;;  %14873 = vmatprep.mubr.msk.f32.mxu1 %vm283_vm1, %v18176_v12  ;;  %v4375_v59 = vpop.f32.mrf.mxu0  ;;  %v20613_v19 = vld [vmem:[#allocation14_spill] sm:$0xff] }
 0x22f   : > { %v3985_v3 = vpop.f32.mrf.mxu1 }
 0x230   : > { %v18198_v55 = vadd.f32 %v14622_v4, %v4049_v35  ;;  %v4048_v5 = vadd.f32 %v3985_v3, %v17903_v37  ;;  %v14625_v41 = vpop.f32.mrf.mxu0  ;;  %14924 = vmatmul.mubr.msk.f32.gmra.mxu0 %vm283_vm1, %v17894_v26  ;;  %v18213_v37 = vld [vmem:[%s15799_s11 + $0x2f0] sm:$0xff]  ;;  %v12389_v4 = vld [vmem:[%s15799_s11 + $0x300] sm:$0xff] }
 0x231   : > { %v14575_v63 = vpop.f32.mrf.mxu1  ;;  %14874 = vmatmul.mubr.msk.f32.gmra.mxu1 %vm283_vm1, %v18193_v0  ;;  %14926 = vmatprep.mubr.msk.f32.mxu0 %vm283_vm1, %v20613_v19 }
 0x232   : > { %v18205_v25 = vadd.f32 %v4375_v59, %v4048_v5  ;;  %v4051_v28 = vadd.f32 %v14575_v63, %v17916_v58  ;;  %14876 = vmatprep.mubr.msk.f32.mxu1 %vm283_vm1, %v18196_v38  ;;  %v4385_v52 = vpop.f32.mrf.mxu0  ;;  %v20615_v63 = vld [vmem:[#allocation21_spill] sm:$0xff] }
 0x233   : > { %v3995_v1 = vpop.f32.mrf.mxu1 }
 0x234   : > { %20612 = vst [vmem:[#allocation23_spill] sm:$0xff] %v18205_v25  ;;  %v18216_v26 = vadd.f32 %v14625_v41, %v4051_v28  ;;  %v4050_v35 = vadd.f32 %v3995_v1, %v17923_v44  ;;  %v14628_v3 = vpop.f32.mrf.mxu0  ;;  %14927 = vmatmul.mubr.msk.f32.gmra.mxu0 %vm283_vm1, %v17914_v39  ;;  %v12390_v41 = vld [vmem:[%s15799_s11 + $0x310] sm:$0xff]  ;;  %v12491_v1 = vld [vmem:[%s15799_s11 + $0xc2] sm:$0xff] }
 0x235   : > { %v14578_v58 = vpop.f32.mrf.mxu1  ;;  %14877 = vmatmul.mubr.msk.f32.gmra.mxu1 %vm283_vm1, %v18213_v37  ;;  %14929 = vmatprep.mubr.msk.f32.mxu0 %vm283_vm1, %v20615_v63  ;;  %v12456_v44 = vld [vmem:[%s15799_s11 + $0x311] sm:$0xff] }
 0x236   : > { %20614 = vst [vmem:[#allocation22_spill] sm:$0xff] %v18216_v26  ;;  %v18223_v59 = vadd.f32 %v4385_v52, %v4050_v35  ;;  %v4053_v5 = vadd.f32 %v14578_v58, %v17935_v49  ;;  %14879 = vmatprep.mubr.msk.f32.mxu1 %vm283_vm1, %v12389_v4  ;;  %v4395_v19 = vpop.f32.mrf.mxu0  ;;  %v12557_v26 = vld [vmem:[%s15799_s11 + $0x140] sm:$0xff]  ;;  %v12492_v58 = vld [vmem:[%s15799_s11 + $0xd2] sm:$0xff] }
 0x237   : > { %v4005_v28 = vpop.f32.mrf.mxu1 }
 0x238   : > { %v18233_v25 = vadd.f32 %v14628_v3, %v4053_v5  ;;  %v4052_v39 = vadd.f32 %v4005_v28, %v17941_v34  ;;  %v14631_v49 = vpop.f32.mrf.mxu0  ;;  %14930 = vmatmul.mubr.msk.f32.gmra.mxu0 %vm283_vm1, %v12456_v44  ;;  %v18245_v3 = vld [vmem:[%s15799_s11 + $0x150] sm:$0xff]  ;;  %v12493_v28 = vld [vmem:[%s15799_s11 + $0xe2] sm:$0xff] }
 0x239   : > { %v14581_v52 = vpop.f32.mrf.mxu1  ;;  %14880 = vmatmul.mubr.msk.f32.gmra.mxu1 %vm283_vm1, %v12390_v41  ;;  %14984 = vmatprep.mubr.msk.f32.mxu0 %vm283_vm1, %v12557_v26  ;;  %20616 = vst [vmem:[#allocation25_spill] sm:$0xff] %v18245_v3  ;;  %v18262_v26 = vld [vmem:[%s20387_s2 + $0x58] sm:$0xf] }
 0x23a   : > { %v18238_v4 = vadd.f32 %v4395_v19, %v4052_v39  ;;  %v4055_v35 = vadd.f32 %v14581_v52, %v17948_v30  ;;  %14934 = vmatprep.mubr.msk.f32.mxu1 %vm283_vm1, %v12491_v1  ;;  %v4405_v34 = vpop.f32.mrf.mxu0  ;;  %v18257_v30 = vld [vmem:[%s20387_s2 + $0x54] sm:$0xf] }
 0x23b   : > { %v4015_v5 = vpop.f32.mrf.mxu1  ;;  %v12494_v39 = vld [vmem:[%s15799_s11 + $0xf2] sm:$0xff] }
 0x23c   : > { %v18247_v63 = vadd.f32 %v14631_v49, %v4055_v35  ;;  %v4054_v41 = vadd.f32 %v4015_v5, %v17965_v51  ;;  %v14686_v19 = vpop.f32.mrf.mxu0  ;;  %14985 = vmatmul.mubr.msk.f32.vlgmr.msra.gmra.mxu0 %vm283_vm1, %v18245_v3  ;;  %v12495_v35 = vld [vmem:[%s15799_s11 + $0x102] sm:$0xff] }
 0x23d   : > { %v14636_v44 = vpop.f32.mrf.mxu1  ;;  %14935 = vmatmul.mubr.msk.f32.vlgmr.msra.gmra.mxu1 %vm283_vm1, %v12492_v58  ;;  %15083 = vmatpush3.msk.msra.mxu0 %vm380_vm0, %v17963_v15  ;;  %v12587_v3 = vld [vmem:[%s15799_s11 + $0x380] sm:$0xff] }
 0x23e   : > { %v18264_v51 = vadd.f32 %v4405_v34, %v4054_v41  ;;  %v4805_v1 = vadd.f32 %v14636_v44, %v17977_v32  ;;  %15033 = vmatpush3.msk.msra.mxu1 %vm380_vm0, %v17958_v33  ;;  %v5036_v49 = vpop.f32.mrf.mxu0  ;;  %14937 = vmatprep.mubr.msk.f32.mxu1 %vm283_vm1, %v12493_v28  ;;  %v12497_v28 = vld [vmem:[%s15799_s11 + $0x122] sm:$0xff] }
 0x23f   : > { %v4645_v52 = vpop.f32.mrf.mxu1  ;;  %14987 = vmatprep.mubr.msk.f32.mxu0 %vm283_vm1, %v18010_v45  ;;  %15132 = vmatprep.subr.msk.mxu1 %vm380_vm0, %v18257_v30 }
 0x240   : > { %v18276_v58 = vadd.f32 %v14686_v19, %v4805_v1  ;;  %v4804_v32 = vadd.f32 %v4645_v52, %v17987_v16  ;;  %15182 = vmatprep.subr.msk.mxu0 %vm380_vm0, %v18262_v26  ;;  %v14689_v15 = vpop.f32.mrf.mxu0  ;;  %14988 = vmatmul.mubr.msk.f32.gmra.mxu0 %vm283_vm1, %v18025_v18  ;;  %v12496_v16 = vld [vmem:[%s15799_s11 + $0x112] sm:$0xff] }
 0x241   : > { %v14639_v33 = vpop.f32.mrf.mxu1  ;;  %14938 = vmatmul.mubr.msk.f32.gmra.mxu1 %vm283_vm1, %v12494_v39  ;;  %14990 = vmatprep.mubr.msk.f32.mxu0 %vm283_vm1, %v18028_v24  ;;  %v12498_v39 = vld [vmem:[%s15799_s11 + $0x132] sm:$0xff] }
 0x242   : > { %v18286_v45 = vadd.f32 %v5036_v49, %v4804_v32  ;;  %v4807_v5 = vadd.f32 %v14639_v33, %v17995_v60  ;;  %14940 = vmatprep.mubr.msk.f32.mxu1 %vm283_vm1, %v12495_v35  ;;  %v5046_v41 = vpop.f32.mrf.mxu0  ;;  %v18308_v49 = vld [vmem:[%s15799_s11 + $0x162] sm:$0xff] }
 0x243   : > { %v4655_v34 = vpop.f32.mrf.mxu1  ;;  %v12565_v35 = vld [vmem:[%s15799_s11 + $0x1e0] sm:$0xff] }
 0x244   : > { %v18294_v44 = vadd.f32 %v14689_v15, %v4807_v5  ;;  %v4806_v18 = vadd.f32 %v4655_v34, %v18001_v23  ;;  %v14692_v1 = vpop.f32.mrf.mxu0  ;;  %14991 = vmatmul.mubr.msk.f32.gmra.mxu0 %vm283_vm1, %v18045_v42  ;;  %v18324_v5 = vld [vmem:[%s15799_s11 + $0x172] sm:$0xff] }
 0x245   : > { %v14642_v19 = vpop.f32.mrf.mxu1  ;;  %14941 = vmatmul.mubr.msk.f32.gmra.mxu1 %vm283_vm1, %v12496_v16  ;;  %14993 = vmatprep.mubr.msk.f32.mxu0 %vm283_vm1, %v18048_v57 }
 0x246   : > { %v18300_v60 = vadd.f32 %v5046_v41, %v4806_v18  ;;  %v4809_v24 = vadd.f32 %v14642_v19, %v18012_v40  ;;  %14943 = vmatprep.mubr.msk.f32.mxu1 %vm283_vm1, %v12497_v28  ;;  %v5056_v52 = vpop.f32.mrf.mxu0  ;;  %v18328_v41 = vld [vmem:[%s15799_s11 + $0x182] sm:$0xff] }
 0x247   : > { %v4665_v23 = vpop.f32.mrf.mxu1 }
 0x248   : > { %v18311_v32 = vadd.f32 %v14692_v1, %v4809_v24  ;;  %v4808_v42 = vadd.f32 %v4665_v23, %v18017_v54  ;;  %v14695_v40 = vpop.f32.mrf.mxu0  ;;  %14994 = vmatmul.mubr.msk.f32.gmra.mxu0 %vm283_vm1, %v18065_v14  ;;  %v12566_v54 = vld [vmem:[%s15799_s11 + $0x1f0] sm:$0xff]  ;;  %v18347_v23 = vld [vmem:[%s15799_s11 + $0x1a2] sm:$0xff] }
 0x249   : > { %v14645_v33 = vpop.f32.mrf.mxu1  ;;  %14944 = vmatmul.mubr.msk.f32.gmra.mxu1 %vm283_vm1, %v12498_v39  ;;  %14996 = vmatprep.mubr.msk.f32.mxu0 %vm283_vm1, %v12565_v35  ;;  %v18344_v24 = vld [vmem:[%s15799_s11 + $0x192] sm:$0xff] }
 0x24a   : > { %v18317_v57 = vadd.f32 %v5056_v52, %v4808_v42  ;;  %v4811_v15 = vadd.f32 %v14645_v33, %v18030_v56  ;;  %14946 = vmatprep.mubr.msk.f32.mxu1 %vm283_vm1, %v18308_v49  ;;  %v5066_v34 = vpop.f32.mrf.mxu0 }
 0x24b   : > { %v4675_v16 = vpop.f32.mrf.mxu1 }
 0x24c   : > { %v18330_v28 = vadd.f32 %v14695_v40, %v4811_v15  ;;  %v4810_v14 = vadd.f32 %v4675_v16, %v18037_v53  ;;  %v14698_v56 = vpop.f32.mrf.mxu0  ;;  %14997 = vmatmul.mubr.msk.f32.gmra.mxu0 %vm283_vm1, %v12566_v54  ;;  %v12505_v54 = vld [vmem:[%s15799_s11 + $0x1c2] sm:$0xff] }
 0x24d   : > { %v14648_v18 = vpop.f32.mrf.mxu1  ;;  %14947 = vmatmul.mubr.msk.f32.gmra.mxu1 %vm283_vm1, %v18324_v5  ;;  %14999 = vmatprep.mubr.msk.f32.mxu0 %vm283_vm1, %v18084_v11 }
 0x24e   : > { %v18336_v19 = vadd.f32 %v5066_v34, %v4810_v14  ;;  %v4813_v1 = vadd.f32 %v14648_v18, %v18050_v43  ;;  %14949 = vmatprep.mubr.msk.f32.mxu1 %vm283_vm1, %v18328_v41  ;;  %v5076_v39 = vpop.f32.mrf.mxu0  ;;  %v12506_v18 = vld [vmem:[%s15799_s11 + $0x1d2] sm:$0xff] }
 0x24f   : > { %v4685_v53 = vpop.f32.mrf.mxu1 }
 0x250   : > { %v18349_v52 = vadd.f32 %v14698_v56, %v4813_v1  ;;  %v4812_v35 = vadd.f32 %v4685_v53, %v18057_v17  ;;  %v14701_v43 = vpop.f32.mrf.mxu0  ;;  %15000 = vmatmul.mubr.msk.f32.gmra.mxu0 %vm283_vm1, %v18099_v36  ;;  %v18364_v17 = vld [vmem:[%s15799_s11 + $0x1b2] sm:$0xff]  ;;  %v18382_v1 = vld [vmem:[%s15799_s11 + $0x202] sm:$0xff] }
 0x251   : > { %v14651_v42 = vpop.f32.mrf.mxu1  ;;  %14950 = vmatmul.mubr.msk.f32.gmra.mxu1 %vm283_vm1, %v18344_v24  ;;  %15002 = vmatprep.mubr.msk.f32.mxu0 %vm283_vm1, %v18102_v7  ;;  %v12573_v53 = vld [vmem:[%s15799_s11 + $0x280] sm:$0xff] }
 0x252   : > { %v18356_v11 = vadd.f32 %v5076_v39, %v4812_v35  ;;  %v4815_v33 = vadd.f32 %v14651_v42, %v18068_v48  ;;  %14952 = vmatprep.mubr.msk.f32.mxu1 %vm283_vm1, %v18347_v23  ;;  %v5086_v15 = vpop.f32.mrf.mxu0 }
 0x253   : > { %v4695_v40 = vpop.f32.mrf.mxu1 }
 0x254   : > { %v18367_v16 = vadd.f32 %v14701_v43, %v4815_v33  ;;  %v4814_v36 = vadd.f32 %v4695_v40, %v18075_v22  ;;  %v14704_v48 = vpop.f32.mrf.mxu0  ;;  %15003 = vmatmul.mubr.msk.f32.gmra.mxu0 %vm283_vm1, %v18119_v50  ;;  %v18398_v43 = vld [vmem:[%s15799_s11 + $0x212] sm:$0xff] }
 0x255   : > { %v14654_v34 = vpop.f32.mrf.mxu1  ;;  %14953 = vmatmul.mubr.msk.f32.gmra.mxu1 %vm283_vm1, %v18364_v17  ;;  %15005 = vmatprep.mubr.msk.f32.mxu0 %vm283_vm1, %v18122_v46 }
 0x256   : > { %v18374_v7 = vadd.f32 %v5086_v15, %v4814_v36  ;;  %v4817_v14 = vadd.f32 %v14654_v34, %v18086_v61  ;;  %14955 = vmatprep.mubr.msk.f32.mxu1 %vm283_vm1, %v12505_v54  ;;  %v5096_v56 = vpop.f32.mrf.mxu0  ;;  %v18402_v15 = vld [vmem:[%s15799_s11 + $0x222] sm:$0xff] }
 0x257   : > { %v4705_v22 = vpop.f32.mrf.mxu1 }
 0x258   : > { %v18385_v39 = vadd.f32 %v14704_v48, %v4817_v14  ;;  %v4816_v50 = vadd.f32 %v4705_v22, %v18091_v21  ;;  %v14707_v61 = vpop.f32.mrf.mxu0  ;;  %15006 = vmatmul.mubr.msk.f32.gmra.mxu0 %vm283_vm1, %v18139_v20  ;;  %v12574_v21 = vld [vmem:[%s15799_s11 + $0x290] sm:$0xff]  ;;  %v18421_v22 = vld [vmem:[%s15799_s11 + $0x242] sm:$0xff] }
 0x259   : > { %v14657_v35 = vpop.f32.mrf.mxu1  ;;  %14956 = vmatmul.mubr.msk.f32.gmra.mxu1 %vm283_vm1, %v12506_v18  ;;  %15008 = vmatprep.mubr.msk.f32.mxu0 %vm283_vm1, %v12573_v53  ;;  %v18418_v14 = vld [vmem:[%s15799_s11 + $0x232] sm:$0xff] }
 0x25a   : > { %v18391_v46 = vadd.f32 %v5096_v56, %v4816_v50  ;;  %v4819_v42 = vadd.f32 %v14657_v35, %v18104_v29  ;;  %14958 = vmatprep.mubr.msk.f32.mxu1 %vm283_vm1, %v18382_v1  ;;  %v5106_v40 = vpop.f32.mrf.mxu0  ;;  %v20617_v35 = vld [vmem:[#allocation15_spill] sm:$0xff] }
 0x25b   : > { %v4715_v33 = vpop.f32.mrf.mxu1 }
 0x25c   : > { %v18404_v54 = vadd.f32 %v14707_v61, %v4819_v42  ;;  %v4818_v20 = vadd.f32 %v4715_v33, %v18111_v27  ;;  %v14710_v29 = vpop.f32.mrf.mxu0  ;;  %15009 = vmatmul.mubr.msk.f32.gmra.mxu0 %vm283_vm1, %v12574_v21  ;;  %v12513_v33 = vld [vmem:[%s15799_s11 + $0x262] sm:$0xff] }
 0x25d   : > { %v14660_v36 = vpop.f32.mrf.mxu1  ;;  %14959 = vmatmul.mubr.msk.f32.gmra.mxu1 %vm283_vm1, %v18398_v43  ;;  %15011 = vmatprep.mubr.msk.f32.mxu0 %vm283_vm1, %v18158_v2 }
 0x25e   : > { %v18410_v34 = vadd.f32 %v5106_v40, %v4818_v20  ;;  %v4821_v48 = vadd.f32 %v14660_v36, %v18124_v10  ;;  %14961 = vmatprep.mubr.msk.f32.mxu1 %vm283_vm1, %v18402_v15  ;;  %v5116_v18 = vpop.f32.mrf.mxu0 }
 0x25f   : > { %v4725_v27 = vpop.f32.mrf.mxu1 }
 0x260   : > { %v18423_v56 = vadd.f32 %v14710_v29, %v4821_v48  ;;  %v4820_v53 = vadd.f32 %v4725_v27, %v18131_v6  ;;  %v14713_v10 = vpop.f32.mrf.mxu0  ;;  %15012 = vmatmul.mubr.msk.f32.gmra.mxu0 %vm283_vm1, %v18173_v9  ;;  %v18438_v6 = vld [vmem:[%s15799_s11 + $0x252] sm:$0xff] }
 0x261   : > { %v14663_v50 = vpop.f32.mrf.mxu1  ;;  %14962 = vmatmul.mubr.msk.f32.gmra.mxu1 %vm283_vm1, %v18418_v14  ;;  %15014 = vmatprep.mubr.msk.f32.mxu0 %vm283_vm1, %v18176_v12  ;;  %v12514_v48 = vld [vmem:[%s15799_s11 + $0x272] sm:$0xff] }
 0x262   : > { %v18430_v2 = vadd.f32 %v5116_v18, %v4820_v53  ;;  %v4823_v61 = vadd.f32 %v14663_v50, %v20617_v35  ;;  %14964 = vmatprep.mubr.msk.f32.mxu1 %vm283_vm1, %v18421_v22  ;;  %v5126_v21 = vpop.f32.mrf.mxu0  ;;  %v18456_v18 = vld [vmem:[%s15799_s11 + $0x2a2] sm:$0xff] }
 0x263   : > { %v4735_v42 = vpop.f32.mrf.mxu1  ;;  %v12581_v53 = vld [vmem:[%s15799_s11 + $0x320] sm:$0xff] }
 0x264   : > { %v18441_v40 = vadd.f32 %v14713_v10, %v4823_v61  ;;  %v4822_v9 = vadd.f32 %v4735_v42, %v18149_v13  ;;  %v14716_v36 = vpop.f32.mrf.mxu0  ;;  %15015 = vmatmul.mubr.msk.f32.gmra.mxu0 %vm283_vm1, %v18193_v0  ;;  %v18472_v61 = vld [vmem:[%s15799_s11 + $0x2b2] sm:$0xff] }
 0x265   : > { %v14666_v20 = vpop.f32.mrf.mxu1  ;;  %14965 = vmatmul.mubr.msk.f32.gmra.mxu1 %vm283_vm1, %v18438_v6  ;;  %15017 = vmatprep.mubr.msk.f32.mxu0 %vm283_vm1, %v18196_v38 }
 0x266   : > { %v18448_v12 = vadd.f32 %v5126_v21, %v4822_v9  ;;  %v4825_v29 = vadd.f32 %v14666_v20, %v18160_v31  ;;  %14967 = vmatprep.mubr.msk.f32.mxu1 %vm283_vm1, %v12513_v33  ;;  %v5136_v27 = vpop.f32.mrf.mxu0  ;;  %v18476_v33 = vld [vmem:[%s15799_s11 + $0x2c2] sm:$0xff] }
 0x267   : > { %v4745_v13 = vpop.f32.mrf.mxu1 }
 0x268   : > { %v18459_v0 = vadd.f32 %v14716_v36, %v4825_v29  ;;  %v4824_v50 = vadd.f32 %v4745_v13, %v18165_v47  ;;  %v14719_v10 = vpop.f32.mrf.mxu0  ;;  %15018 = vmatmul.mubr.msk.f32.gmra.mxu0 %vm283_vm1, %v18213_v37  ;;  %v12582_v47 = vld [vmem:[%s15799_s11 + $0x330] sm:$0xff]  ;;  %v12583_v37 = vld [vmem:[%s15799_s11 + $0x340] sm:$0xff] }
 0x269   : > { %v14669_v31 = vpop.f32.mrf.mxu1  ;;  %14968 = vmatmul.mubr.msk.f32.gmra.mxu1 %vm283_vm1, %v12514_v48  ;;  %15020 = vmatprep.mubr.msk.f32.mxu0 %vm283_vm1, %v12581_v53  ;;  %v18492_v13 = vld [vmem:[%s15799_s11 + $0x2d2] sm:$0xff] }
 0x26a   : > { %v18465_v38 = vadd.f32 %v5136_v27, %v4824_v50  ;;  %v4827_v35 = vadd.f32 %v14669_v31, %v18178_v62  ;;  %14970 = vmatprep.mubr.msk.f32.mxu1 %vm283_vm1, %v18456_v18  ;;  %v5146_v21 = vpop.f32.mrf.mxu0  ;;  %v18496_v50 = vld [vmem:[%s15799_s11 + $0x2e2] sm:$0xff] }
 0x26b   : > { %v4755_v42 = vpop.f32.mrf.mxu1  ;;  %v12585_v31 = vld [vmem:[%s15799_s11 + $0x360] sm:$0xff] }
 0x26c   : > { %v18479_v9 = vadd.f32 %v14719_v10, %v4827_v35  ;;  %v4826_v62 = vadd.f32 %v4755_v42, %v18185_v8  ;;  %v14722_v36 = vpop.f32.mrf.mxu0  ;;  %15021 = vmatmul.mubr.msk.f32.gmra.mxu0 %vm283_vm1, %v12582_v47  ;;  %v12584_v8 = vld [vmem:[%s15799_s11 + $0x350] sm:$0xff] }
 0x26d   : > { %v14672_v20 = vpop.f32.mrf.mxu1  ;;  %14971 = vmatmul.mubr.msk.f32.gmra.mxu1 %vm283_vm1, %v18472_v61  ;;  %15023 = vmatprep.mubr.msk.f32.mxu0 %vm283_vm1, %v12583_v37  ;;  %v20621_v37 = vld [vmem:[#allocation22_spill] sm:$0xff] }
 0x26e   : > { %v18485_v29 = vadd.f32 %v5146_v21, %v4826_v62  ;;  %v4829_v48 = vadd.f32 %v14672_v20, %v18198_v55  ;;  %14973 = vmatprep.mubr.msk.f32.mxu1 %vm283_vm1, %v18476_v33  ;;  %v5156_v53 = vpop.f32.mrf.mxu0  ;;  %v20619_v55 = vld [vmem:[#allocation23_spill] sm:$0xff] }
 0x26f   : > { %v4765_v27 = vpop.f32.mrf.mxu1  ;;  %v18512_v20 = vld [vmem:[%s15799_s11 + $0x2f2] sm:$0xff] }
 0x270   : > { %v18499_v10 = vadd.f32 %v14722_v36, %v4829_v48  ;;  %v4828_v35 = vadd.f32 %v4765_v27, %v20619_v55  ;;  %v14725_v42 = vpop.f32.mrf.mxu0  ;;  %15024 = vmatmul.mubr.msk.f32.gmra.mxu0 %vm283_vm1, %v12584_v8  ;;  %v12586_v36 = vld [vmem:[%s15799_s11 + $0x370] sm:$0xff]  ;;  %v12521_v55 = vld [vmem:[%s15799_s11 + $0x302] sm:$0xff] }
 0x271   : > { %v14675_v47 = vpop.f32.mrf.mxu1  ;;  %14974 = vmatmul.mubr.msk.f32.gmra.mxu1 %vm283_vm1, %v18492_v13  ;;  %15026 = vmatprep.mubr.msk.f32.mxu0 %vm283_vm1, %v12585_v31 }
 0x272   : > { %20618 = vst [vmem:[#allocation26_spill] sm:$0xff] %v18499_v10  ;;  %v18505_v21 = vadd.f32 %v5156_v53, %v4828_v35  ;;  %v4831_v62 = vadd.f32 %v14675_v47, %v20621_v37  ;;  %14976 = vmatprep.mubr.msk.f32.mxu1 %vm283_vm1, %v18496_v50  ;;  %v5166_v27 = vpop.f32.mrf.mxu0 }
 0x273   : > { %v4775_v48 = vpop.f32.mrf.mxu1 }
 0x274   : > { %20620 = vst [vmem:[#allocation24_spill] sm:$0xff] %v18505_v21  ;;  %v18517_v8 = vadd.f32 %v14725_v42, %v4831_v62  ;;  %v4830_v53 = vadd.f32 %v4775_v48, %v18223_v59  ;;  %v14728_v47 = vpop.f32.mrf.mxu0  ;;  %15027 = vmatmul.mubr.msk.f32.gmra.mxu0 %vm283_vm1, %v12586_v36  ;;  %v12522_v21 = vld [vmem:[%s15799_s11 + $0x312] sm:$0xff]  ;;  %v12623_v48 = vld [vmem:[%s15799_s11 + $0x141] sm:$0xff] }
 0x275   : > { %v14678_v35 = vpop.f32.mrf.mxu1  ;;  %14977 = vmatmul.mubr.msk.f32.gmra.mxu1 %vm283_vm1, %v18512_v20  ;;  %15029 = vmatprep.mubr.msk.f32.mxu0 %vm283_vm1, %v12587_v3  ;;  %v12588_v42 = vld [vmem:[%s15799_s11 + $0x390] sm:$0xff] }
 0x276   : > { %20622 = vst [vmem:[#allocation28_spill] sm:$0xff] %v18517_v8  ;;  %v18523_v31 = vadd.f32 %v5166_v27, %v4830_v53  ;;  %v4833_v37 = vadd.f32 %v14678_v35, %v18233_v25  ;;  %14979 = vmatprep.mubr.msk.f32.mxu1 %vm283_vm1, %v12521_v55  ;;  %v5176_v62 = vpop.f32.mrf.mxu0  ;;  %v12689_v8 = vld [vmem:[%s15799_s11 + $0x142] sm:$0xff]  ;;  %v18543_v55 = vld [vmem:[%s15799_s11 + $0x151] sm:$0xff] }
 0x277   : > { %v4785_v59 = vpop.f32.mrf.mxu1  ;;  %v18546_v35 = vld [vmem:[%s15799_s11 + $0x152] sm:$0xff] }
 0x278   : > { %v18532_v10 = vadd.f32 %v14728_v47, %v4833_v37  ;;  %v4832_v36 = vadd.f32 %v4785_v59, %v18238_v4  ;;  %v14731_v53 = vpop.f32.mrf.mxu0  ;;  %15030 = vmatmul.mubr.msk.f32.gmra.mxu0 %vm283_vm1, %v12588_v42  ;;  %20623 = vst [vmem:[#allocation27_spill] sm:$0xff] %v18546_v35  ;;  %v18552_v42 = vld [vmem:[%s15799_s11 + $0x161] sm:$0xff] }
 0x279   : > { %v14681_v27 = vpop.f32.mrf.mxu1  ;;  %14980 = vmatmul.mubr.msk.f32.gmra.mxu1 %vm283_vm1, %v12522_v21  ;;  %15084 = vmatprep.mubr.msk.f32.mxu0 %vm283_vm1, %v12689_v8  ;;  %v18561_v8 = vld [vmem:[%s20387_s2 + $0x5c] sm:$0xf] }
 0x27a   : > { %v18537_v25 = vadd.f32 %v5176_v62, %v4832_v36  ;;  %v4835_v3 = vadd.f32 %v14681_v27, %v18247_v63  ;;  %15034 = vmatprep.mubr.msk.f32.mxu1 %vm283_vm1, %v12623_v48  ;;  %v5186_v47 = vpop.f32.mrf.mxu0  ;;  %v18576_v36 = vld [vmem:[%s15799_s11 + $0x171] sm:$0xff] }
 0x27b   : > { %v4795_v4 = vpop.f32.mrf.mxu1 }
 0x27c   : > { %v18548_v37 = vadd.f32 %v14731_v53, %v4835_v3  ;;  %v4834_v21 = vadd.f32 %v4795_v4, %v18264_v51  ;;  %v14786_v63 = vpop.f32.mrf.mxu0  ;;  %15085 = vmatmul.mubr.msk.f32.vlgmr.msra.gmra.mxu0 %vm283_vm1, %v18546_v35  ;;  %v18566_v51 = vld [vmem:[%s20387_s2 + $0x60] sm:$0xf] }
 0x27d   : > { %v14736_v59 = vpop.f32.mrf.mxu1  ;;  %15035 = vmatmul.mubr.msk.f32.vlgmr.msra.gmra.mxu1 %vm283_vm1, %v18543_v55  ;;  %15183 = vmatpush3.msk.msra.mxu0 %vm380_vm0, %v18262_v26  ;;  %v18583_v3 = vld [vmem:[%s15799_s11 + $0x181] sm:$0xff] }
 0x27e   : > { %v18568_v62 = vadd.f32 %v5186_v47, %v4834_v21  ;;  %v5586_v48 = vadd.f32 %v14736_v59, %v18276_v58  ;;  %15133 = vmatpush3.msk.msra.mxu1 %vm380_vm0, %v18257_v30  ;;  %v5816_v53 = vpop.f32.mrf.mxu0  ;;  %15037 = vmatprep.mubr.msk.f32.mxu1 %vm283_vm1, %v18552_v42 }
 0x27f   : > { %v5426_v27 = vpop.f32.mrf.mxu1  ;;  %15087 = vmatprep.mubr.msk.f32.mxu0 %vm283_vm1, %v18308_v49  ;;  %15232 = vmatprep.subr.msk.mxu1 %vm380_vm0, %v18561_v8 }
 0x280   : > { %v18585_v58 = vadd.f32 %v14786_v63, %v5586_v48  ;;  %v5585_v30 = vadd.f32 %v5426_v27, %v18286_v45  ;;  %15282 = vmatprep.subr.msk.mxu0 %vm380_vm0, %v18566_v51  ;;  %v14789_v4 = vpop.f32.mrf.mxu0  ;;  %15088 = vmatmul.mubr.msk.f32.gmra.mxu0 %vm283_vm1, %v18324_v5  ;;  %v18604_v45 = vld [vmem:[%s15799_s11 + $0x191] sm:$0xff]  ;;  %v18607_v63 = vld [vmem:[%s15799_s11 + $0x1a1] sm:$0xff] }
 0x281   : > { %v14739_v26 = vpop.f32.mrf.mxu1  ;;  %15038 = vmatmul.mubr.msk.f32.gmra.mxu1 %vm283_vm1, %v18576_v36  ;;  %15090 = vmatprep.mubr.msk.f32.mxu0 %vm283_vm1, %v18328_v41 }
 0x282   : > { %v18596_v49 = vadd.f32 %v5816_v53, %v5585_v30  ;;  %v5588_v47 = vadd.f32 %v14739_v26, %v18294_v44  ;;  %15040 = vmatprep.mubr.msk.f32.mxu1 %vm283_vm1, %v18583_v3  ;;  %v5826_v59 = vpop.f32.mrf.mxu0 }
 0x283   : > { %v5436_v21 = vpop.f32.mrf.mxu1 }
 0x284   : > { %v18609_v5 = vadd.f32 %v14789_v4, %v5588_v47  ;;  %v5587_v48 = vadd.f32 %v5436_v21, %v18300_v60  ;;  %v14792_v27 = vpop.f32.mrf.mxu0  ;;  %15091 = vmatmul.mubr.msk.f32.gmra.mxu0 %vm283_vm1, %v18344_v24  ;;  %v18624_v60 = vld [vmem:[%s15799_s11 + $0x1b1] sm:$0xff]  ;;  %v12631_v4 = vld [vmem:[%s15799_s11 + $0x1e1] sm:$0xff] }
 0x285   : > { %v14742_v44 = vpop.f32.mrf.mxu1  ;;  %15041 = vmatmul.mubr.msk.f32.gmra.mxu1 %vm283_vm1, %v18604_v45  ;;  %15093 = vmatprep.mubr.msk.f32.mxu0 %vm283_vm1, %v18347_v23  ;;  %v12697_v47 = vld [vmem:[%s15799_s11 + $0x1e2] sm:$0xff] }
 0x286   : > { %v18616_v41 = vadd.f32 %v5826_v59, %v5587_v48  ;;  %v5590_v53 = vadd.f32 %v14742_v44, %v18311_v32  ;;  %15043 = vmatprep.mubr.msk.f32.mxu1 %vm283_vm1, %v18607_v63  ;;  %v5836_v26 = vpop.f32.mrf.mxu0  ;;  %v18641_v44 = vld [vmem:[%s15799_s11 + $0x1f1] sm:$0xff] }
 0x287   : > { %v5446_v30 = vpop.f32.mrf.mxu1 }
 0x288   : > { %v18628_v24 = vadd.f32 %v14792_v27, %v5590_v53  ;;  %v5589_v21 = vadd.f32 %v5446_v30, %v18317_v57  ;;  %v14795_v59 = vpop.f32.mrf.mxu0  ;;  %15094 = vmatmul.mubr.msk.f32.gmra.mxu0 %vm283_vm1, %v18364_v17  ;;  %v12698_v57 = vld [vmem:[%s15799_s11 + $0x1f2] sm:$0xff]  ;;  %v18645_v30 = vld [vmem:[%s15799_s11 + $0x201] sm:$0xff] }
 0x289   : > { %v14745_v32 = vpop.f32.mrf.mxu1  ;;  %15044 = vmatmul.mubr.msk.f32.gmra.mxu1 %vm283_vm1, %v18624_v60  ;;  %15096 = vmatprep.mubr.msk.f32.mxu0 %vm283_vm1, %v12697_v47  ;;  %v18661_v47 = vld [vmem:[%s15799_s11 + $0x211] sm:$0xff] }
 0x28a   : > { %v18635_v23 = vadd.f32 %v5836_v26, %v5589_v21  ;;  %v5592_v48 = vadd.f32 %v14745_v32, %v18330_v28  ;;  %15046 = vmatprep.mubr.msk.f32.mxu1 %vm283_vm1, %v12631_v4  ;;  %v5846_v53 = vpop.f32.mrf.mxu0 }
 0x28b   : > { %v5456_v27 = vpop.f32.mrf.mxu1 }
 0x28c   : > { %v18647_v35 = vadd.f32 %v14795_v59, %v5592_v48  ;;  %v5591_v17 = vadd.f32 %v5456_v27, %v18336_v19  ;;  %v14798_v21 = vpop.f32.mrf.mxu0  ;;  %15097 = vmatmul.mubr.msk.f32.gmra.mxu0 %vm283_vm1, %v12698_v57  ;;  %v18664_v59 = vld [vmem:[%s15799_s11 + $0x221] sm:$0xff] }
 0x28d   : > { %v14748_v26 = vpop.f32.mrf.mxu1  ;;  %15047 = vmatmul.mubr.msk.f32.gmra.mxu1 %vm283_vm1, %v18641_v44  ;;  %15099 = vmatprep.mubr.msk.f32.mxu0 %vm283_vm1, %v18382_v1 }
 0x28e   : > { %v18653_v28 = vadd.f32 %v5846_v53, %v5591_v17  ;;  %v5594_v4 = vadd.f32 %v14748_v26, %v18349_v52  ;;  %15049 = vmatprep.mubr.msk.f32.mxu1 %vm283_vm1, %v18645_v30  ;;  %v5856_v32 = vpop.f32.mrf.mxu0 }
 0x28f   : > { %v5466_v19 = vpop.f32.mrf.mxu1 }
 0x290   : > { %v18666_v48 = vadd.f32 %v14798_v21, %v5594_v4  ;;  %v5593_v57 = vadd.f32 %v5466_v19, %v18356_v11  ;;  %v14801_v52 = vpop.f32.mrf.mxu0  ;;  %15100 = vmatmul.mubr.msk.f32.gmra.mxu0 %vm283_vm1, %v18398_v43  ;;  %v18681_v11 = vld [vmem:[%s15799_s11 + $0x231] sm:$0xff]  ;;  %v18684_v21 = vld [vmem:[%s15799_s11 + $0x241] sm:$0xff] }
 0x291   : > { %v14751_v27 = vpop.f32.mrf.mxu1  ;;  %15050 = vmatmul.mubr.msk.f32.gmra.mxu1 %vm283_vm1, %v18661_v47  ;;  %15102 = vmatprep.mubr.msk.f32.mxu0 %vm283_vm1, %v18402_v15 }
 0x292   : > { %v18673_v1 = vadd.f32 %v5856_v32, %v5593_v57  ;;  %v5596_v53 = vadd.f32 %v14751_v27, %v18367_v16  ;;  %15052 = vmatprep.mubr.msk.f32.mxu1 %vm283_vm1, %v18664_v59  ;;  %v5866_v26 = vpop.f32.mrf.mxu0 }
 0x293   : > { %v5476_v17 = vpop.f32.mrf.mxu1 }
 0x294   : > { %v18686_v43 = vadd.f32 %v14801_v52, %v5596_v53  ;;  %v5595_v4 = vadd.f32 %v5476_v17, %v18374_v7  ;;  %v14804_v19 = vpop.f32.mrf.mxu0  ;;  %15103 = vmatmul.mubr.msk.f32.gmra.mxu0 %vm283_vm1, %v18418_v14  ;;  %v18701_v7 = vld [vmem:[%s15799_s11 + $0x251] sm:$0xff]  ;;  %v12639_v52 = vld [vmem:[%s15799_s11 + $0x281] sm:$0xff] }
 0x295   : > { %v14754_v16 = vpop.f32.mrf.mxu1  ;;  %15053 = vmatmul.mubr.msk.f32.gmra.mxu1 %vm283_vm1, %v18681_v11  ;;  %15105 = vmatprep.mubr.msk.f32.mxu0 %vm283_vm1, %v18421_v22  ;;  %20624 = vst [vmem:[#allocation5_spill] sm:$0xff] %v18701_v7  ;;  %v12705_v53 = vld [vmem:[%s15799_s11 + $0x282] sm:$0xff] }
 0x296   : > { %v18693_v15 = vadd.f32 %v5866_v26, %v5595_v4  ;;  %v5598_v32 = vadd.f32 %v14754_v16, %v18385_v39  ;;  %15055 = vmatprep.mubr.msk.f32.mxu1 %vm283_vm1, %v18684_v21  ;;  %v5876_v27 = vpop.f32.mrf.mxu0  ;;  %v18718_v16 = vld [vmem:[%s15799_s11 + $0x291] sm:$0xff] }
 0x297   : > { %v5486_v57 = vpop.f32.mrf.mxu1 }
 0x298   : > { %v18705_v14 = vadd.f32 %v14804_v19, %v5598_v32  ;;  %v5597_v17 = vadd.f32 %v5486_v57, %v18391_v46  ;;  %v14807_v26 = vpop.f32.mrf.mxu0  ;;  %15106 = vmatmul.mubr.msk.f32.gmra.mxu0 %vm283_vm1, %v18438_v6  ;;  %v12706_v46 = vld [vmem:[%s15799_s11 + $0x292] sm:$0xff]  ;;  %v18722_v57 = vld [vmem:[%s15799_s11 + $0x2a1] sm:$0xff] }
 0x299   : > { %v14757_v39 = vpop.f32.mrf.mxu1  ;;  %15056 = vmatmul.mubr.msk.f32.gmra.mxu1 %vm283_vm1, %v18701_v7  ;;  %15108 = vmatprep.mubr.msk.f32.mxu0 %vm283_vm1, %v12705_v53  ;;  %v18738_v53 = vld [vmem:[%s15799_s11 + $0x2b1] sm:$0xff] }
 0x29a   : > { %v18712_v22 = vadd.f32 %v5876_v27, %v5597_v17  ;;  %v5600_v4 = vadd.f32 %v14757_v39, %v18404_v54  ;;  %15058 = vmatprep.mubr.msk.f32.mxu1 %vm283_vm1, %v12639_v52  ;;  %v5886_v32 = vpop.f32.mrf.mxu0 }
 0x29b   : > { %v5496_v19 = vpop.f32.mrf.mxu1 }
 0x29c   : > { %v18724_v7 = vadd.f32 %v14807_v26, %v5600_v4  ;;  %v5599_v6 = vadd.f32 %v5496_v19, %v18410_v34  ;;  %v14810_v17 = vpop.f32.mrf.mxu0  ;;  %15109 = vmatmul.mubr.msk.f32.gmra.mxu0 %vm283_vm1, %v12706_v46  ;;  %v18741_v26 = vld [vmem:[%s15799_s11 + $0x2c1] sm:$0xff] }
 0x29d   : > { %v14760_v27 = vpop.f32.mrf.mxu1  ;;  %15059 = vmatmul.mubr.msk.f32.gmra.mxu1 %vm283_vm1, %v18718_v16  ;;  %15111 = vmatprep.mubr.msk.f32.mxu0 %vm283_vm1, %v18456_v18 }
 0x29e   : > { %v18730_v54 = vadd.f32 %v5886_v32, %v5599_v6  ;;  %v5602_v52 = vadd.f32 %v14760_v27, %v18423_v56  ;;  %15061 = vmatprep.mubr.msk.f32.mxu1 %vm283_vm1, %v18722_v57  ;;  %v5896_v39 = vpop.f32.mrf.mxu0 }
 0x29f   : > { %v5506_v34 = vpop.f32.mrf.mxu1 }
 0x2a0   : > { %v18743_v4 = vadd.f32 %v14810_v17, %v5602_v52  ;;  %v5601_v46 = vadd.f32 %v5506_v34, %v18430_v2  ;;  %v14813_v56 = vpop.f32.mrf.mxu0  ;;  %15112 = vmatmul.mubr.msk.f32.gmra.mxu0 %vm283_vm1, %v18472_v61  ;;  %v18758_v2 = vld [vmem:[%s15799_s11 + $0x2d1] sm:$0xff]  ;;  %v18761_v17 = vld [vmem:[%s15799_s11 + $0x2e1] sm:$0xff] }
 0x2a1   : > { %v14763_v19 = vpop.f32.mrf.mxu1  ;;  %15062 = vmatmul.mubr.msk.f32.gmra.mxu1 %vm283_vm1, %v18738_v53  ;;  %15114 = vmatprep.mubr.msk.f32.mxu0 %vm283_vm1, %v18476_v33 }
 0x2a2   : > { %v18750_v18 = vadd.f32 %v5896_v39, %v5601_v46  ;;  %v5604_v32 = vadd.f32 %v14763_v19, %v18441_v40  ;;  %15064 = vmatprep.mubr.msk.f32.mxu1 %vm283_vm1, %v18741_v26  ;;  %v5906_v27 = vpop.f32.mrf.mxu0 }
 0x2a3   : > { %v5516_v6 = vpop.f32.mrf.mxu1 }
 0x2a4   : > { %v18763_v61 = vadd.f32 %v14813_v56, %v5604_v32  ;;  %v5603_v52 = vadd.f32 %v5516_v6, %v18448_v12  ;;  %v14816_v34 = vpop.f32.mrf.mxu0  ;;  %15115 = vmatmul.mubr.msk.f32.gmra.mxu0 %vm283_vm1, %v18492_v13  ;;  %v18778_v12 = vld [vmem:[%s15799_s11 + $0x2f1] sm:$0xff]  ;;  %v12647_v56 = vld [vmem:[%s15799_s11 + $0x321] sm:$0xff] }
 0x2a5   : > { %v14766_v40 = vpop.f32.mrf.mxu1  ;;  %15065 = vmatmul.mubr.msk.f32.gmra.mxu1 %vm283_vm1, %v18758_v2  ;;  %15117 = vmatprep.mubr.msk.f32.mxu0 %vm283_vm1, %v18496_v50  ;;  %20625 = vst [vmem:[#allocation18_spill] sm:$0xff] %v18778_v12  ;;  %v12713_v32 = vld [vmem:[%s15799_s11 + $0x322] sm:$0xff] }
 0x2a6   : > { %v18770_v33 = vadd.f32 %v5906_v27, %v5603_v52  ;;  %v5606_v39 = vadd.f32 %v14766_v40, %v18459_v0  ;;  %15067 = vmatprep.mubr.msk.f32.mxu1 %vm283_vm1, %v18761_v17  ;;  %v5916_v19 = vpop.f32.mrf.mxu0  ;;  %v18795_v40 = vld [vmem:[%s15799_s11 + $0x331] sm:$0xff] }
 0x2a7   : > { %v5526_v46 = vpop.f32.mrf.mxu1  ;;  %20626 = vst [vmem:[#allocation6_spill] sm:$0xff] %v18795_v40 }
 0x2a8   : > { %v18782_v13 = vadd.f32 %v14816_v34, %v5606_v39  ;;  %v5605_v0 = vadd.f32 %v5526_v46, %v18465_v38  ;;  %v14819_v27 = vpop.f32.mrf.mxu0  ;;  %15118 = vmatmul.mubr.msk.f32.gmra.mxu0 %vm283_vm1, %v18512_v20  ;;  %v12714_v38 = vld [vmem:[%s15799_s11 + $0x332] sm:$0xff]  ;;  %v18799_v46 = vld [vmem:[%s15799_s11 + $0x341] sm:$0xff] }
 0x2a9   : > { %v14769_v6 = vpop.f32.mrf.mxu1  ;;  %15068 = vmatmul.mubr.msk.f32.gmra.mxu1 %vm283_vm1, %v18778_v12  ;;  %15120 = vmatprep.mubr.msk.f32.mxu0 %vm283_vm1, %v12713_v32  ;;  %20627 = vst [vmem:[#allocation29_spill] sm:$0xff] %v18799_v46  ;;  %v12715_v12 = vld [vmem:[%s15799_s11 + $0x342] sm:$0xff] }
 0x2aa   : > { %v18789_v50 = vadd.f32 %v5916_v19, %v5605_v0  ;;  %v5608_v52 = vadd.f32 %v14769_v6, %v18479_v9  ;;  %15070 = vmatprep.mubr.msk.f32.mxu1 %vm283_vm1, %v12647_v56  ;;  %v5926_v39 = vpop.f32.mrf.mxu0  ;;  %v20630_v0 = vld [vmem:[#allocation26_spill] sm:$0xff] }
 0x2ab   : > { %v5536_v34 = vpop.f32.mrf.mxu1 }
 0x2ac   : > { %v18802_v20 = vadd.f32 %v14819_v27, %v5608_v52  ;;  %v5607_v9 = vadd.f32 %v5536_v34, %v18485_v29  ;;  %v14822_v56 = vpop.f32.mrf.mxu0  ;;  %15121 = vmatmul.mubr.msk.f32.gmra.mxu0 %vm283_vm1, %v12714_v38  ;;  %v18815_v27 = vld [vmem:[%s15799_s11 + $0x351] sm:$0xff]  ;;  %v12717_v38 = vld [vmem:[%s15799_s11 + $0x362] sm:$0xff] }
 0x2ad   : > { %v14772_v19 = vpop.f32.mrf.mxu1  ;;  %15071 = vmatmul.mubr.msk.f32.gmra.mxu1 %vm283_vm1, %v18795_v40  ;;  %15123 = vmatprep.mubr.msk.f32.mxu0 %vm283_vm1, %v12715_v12  ;;  %20631 = vst [vmem:[#allocation9_spill] sm:$0xff] %v18815_v27  ;;  %v12716_v29 = vld [vmem:[%s15799_s11 + $0x352] sm:$0xff] }
 0x2ae   : > { %20628 = vst [vmem:[#allocation7_spill] sm:$0xff] %v18802_v20  ;;  %v18808_v32 = vadd.f32 %v5926_v39, %v5607_v9  ;;  %v5610_v6 = vadd.f32 %v14772_v19, %v20630_v0  ;;  %15073 = vmatprep.mubr.msk.f32.mxu1 %vm283_vm1, %v18799_v46  ;;  %v5936_v34 = vpop.f32.mrf.mxu0  ;;  %v18819_v20 = vld [vmem:[%s15799_s11 + $0x361] sm:$0xff]  ;;  %v20633_v9 = vld [vmem:[#allocation24_spill] sm:$0xff] }
 0x2af   : > { %v5546_v52 = vpop.f32.mrf.mxu1 }
 0x2b0   : > { %20629 = vst [vmem:[#allocation8_spill] sm:$0xff] %v18808_v32  ;;  %v18822_v39 = vadd.f32 %v14822_v56, %v5610_v6  ;;  %v5609_v19 = vadd.f32 %v5546_v52, %v20633_v9  ;;  %v14825_v46 = vpop.f32.mrf.mxu0  ;;  %15124 = vmatmul.mubr.msk.f32.gmra.mxu0 %vm283_vm1, %v12716_v29  ;;  %v20634_v32 = vld [vmem:[#allocation28_spill] sm:$0xff] }
 0x2b1   : > { %v14775_v0 = vpop.f32.mrf.mxu1  ;;  %15074 = vmatmul.mubr.msk.f32.gmra.mxu1 %vm283_vm1, %v18815_v27  ;;  %15126 = vmatprep.mubr.msk.f32.mxu0 %vm283_vm1, %v12717_v38  ;;  %v18835_v56 = vld [vmem:[%s15799_s11 + $0x371] sm:$0xff]  ;;  %v12719_v27 = vld [vmem:[%s15799_s11 + $0x382] sm:$0xff] }
 0x2b2   : > { %20632 = vst [vmem:[#allocation16_spill] sm:$0xff] %v18822_v39  ;;  %v18828_v12 = vadd.f32 %v5936_v34, %v5609_v19  ;;  %v5612_v40 = vadd.f32 %v14775_v0, %v20634_v32  ;;  %15076 = vmatprep.mubr.msk.f32.mxu1 %vm283_vm1, %v18819_v20  ;;  %v12718_v6 = vld [vmem:[%s15799_s11 + $0x372] sm:$0xff]  ;;  %v5946_v9 = vpop.f32.mrf.mxu0  ;;  %v18839_v39 = vld [vmem:[%s15799_s11 + $0x381] sm:$0xff] }
 0x2b3   : > { %v5556_v52 = vpop.f32.mrf.mxu1 }
 0x2b4   : > { %v18842_v29 = vadd.f32 %v14825_v46, %v5612_v40  ;;  %v5611_v34 = vadd.f32 %v5556_v52, %v18523_v31  ;;  %v14828_v19 = vpop.f32.mrf.mxu0  ;;  %15127 = vmatmul.mubr.msk.f32.gmra.mxu0 %vm283_vm1, %v12718_v6  ;;  %v18855_v40 = vld [vmem:[%s15799_s11 + $0x391] sm:$0xff] }
 0x2b5   : > { %v14778_v32 = vpop.f32.mrf.mxu1  ;;  %15077 = vmatmul.mubr.msk.f32.gmra.mxu1 %vm283_vm1, %v18835_v56  ;;  %15129 = vmatprep.mubr.msk.f32.mxu0 %vm283_vm1, %v12719_v27  ;;  %20636 = vst [vmem:[#allocation20_spill] sm:$0xff] %v18855_v40  ;;  %v12720_v31 = vld [vmem:[%s15799_s11 + $0x392] sm:$0xff] }
 0x2b6   : > { %20635 = vst [vmem:[#allocation17_spill] sm:$0xff] %v18842_v29  ;;  %v18848_v38 = vadd.f32 %v5946_v9, %v5611_v34  ;;  %v5614_v0 = vadd.f32 %v14778_v32, %v18532_v10  ;;  %15079 = vmatprep.mubr.msk.f32.mxu1 %vm283_vm1, %v18839_v39  ;;  %v5956_v52 = vpop.f32.mrf.mxu0  ;;  %v20637_v32 = vld [vmem:[#allocation25_spill] sm:$0xff] }
 0x2b7   : > { %v5566_v46 = vpop.f32.mrf.mxu1 }
 0x2b8   : > { %v18858_v29 = vadd.f32 %v14828_v19, %v5614_v0  ;;  %v5613_v6 = vadd.f32 %v5566_v46, %v18537_v25  ;;  %v14831_v34 = vpop.f32.mrf.mxu0  ;;  %15130 = vmatmul.mubr.msk.f32.gmra.mxu0 %vm283_vm1, %v12720_v31  ;;  %v18872_v19 = vld [vmem:[%s15799_s11 + $0x160] sm:$0xff]  ;;  %v18878_v31 = vld [vmem:[%s15799_s11 + $0x170] sm:$0xff] }
 0x2b9   : > { %v14781_v9 = vpop.f32.mrf.mxu1  ;;  %15080 = vmatmul.mubr.msk.f32.gmra.mxu1 %vm283_vm1, %v18855_v40  ;;  %15184 = vmatprep.mubr.msk.f32.mxu0 %vm283_vm1, %v18543_v55  ;;  %v18887_v55 = vld [vmem:[%s20387_s2 + $0x64] sm:$0xf] }
 0x2ba   : > { %v18864_v10 = vadd.f32 %v5956_v52, %v5613_v6  ;;  %v5616_v27 = vadd.f32 %v14781_v9, %v18548_v37  ;;  %15134 = vmatprep.mubr.msk.f32.mxu1 %vm283_vm1, %v20637_v32  ;;  %v5966_v0 = vpop.f32.mrf.mxu0 }
 0x2bb   : > { %v5576_v25 = vpop.f32.mrf.mxu1 }
 0x2bc   : > { %v18874_v46 = vadd.f32 %v14831_v34, %v5616_v27  ;;  %v5615_v40 = vadd.f32 %v5576_v25, %v18568_v62  ;;  %v14886_v37 = vpop.f32.mrf.mxu0  ;;  %15185 = vmatmul.mubr.msk.f32.vlgmr.msra.gmra.mxu0 %vm283_vm1, %v18552_v42  ;;  %v18892_v62 = vld [vmem:[%s20387_s2 + $0x68] sm:$0xf]  ;;  %v18902_v42 = vld [vmem:[%s15799_s11 + $0x180] sm:$0xff] }
 0x2bd   : > { %v14836_v52 = vpop.f32.mrf.mxu1  ;;  %15135 = vmatmul.mubr.msk.f32.vlgmr.msra.gmra.mxu1 %vm283_vm1, %v18872_v19  ;;  %15283 = vmatpush3.msk.msra.mxu0 %vm380_vm0, %v18566_v51 }
 0x2be   : > { %v18894_v6 = vadd.f32 %v5966_v0, %v5615_v40  ;;  %v6367_v9 = vadd.f32 %v14836_v52, %v18585_v58  ;;  %15233 = vmatpush3.msk.msra.mxu1 %vm380_vm0, %v18561_v8  ;;  %v6597_v27 = vpop.f32.mrf.mxu0  ;;  %15137 = vmatprep.mubr.msk.f32.mxu1 %vm283_vm1, %v18878_v31  ;;  %v18909_v40 = vld [vmem:[%s15799_s11 + $0x190] sm:$0xff] }
 0x2bf   : > { %v6207_v34 = vpop.f32.mrf.mxu1  ;;  %15187 = vmatprep.mubr.msk.f32.mxu0 %vm283_vm1, %v18576_v36  ;;  %15332 = vmatprep.subr.msk.mxu1 %vm380_vm0, %v18887_v55 }
 0x2c0   : > { %v18911_v58 = vadd.f32 %v14886_v37, %v6367_v9  ;;  %v6366_v8 = vadd.f32 %v6207_v34, %v18596_v49  ;;  %15382 = vmatprep.subr.msk.mxu0 %vm380_vm0, %v18892_v62  ;;  %v14889_v32 = vpop.f32.mrf.mxu0  ;;  %15188 = vmatmul.mubr.msk.f32.gmra.mxu0 %vm283_vm1, %v18583_v3  ;;  %v18930_v49 = vld [vmem:[%s15799_s11 + $0x1a0] sm:$0xff]  ;;  %v18933_v37 = vld [vmem:[%s15799_s11 + $0x1b0] sm:$0xff] }
 0x2c1   : > { %v14839_v51 = vpop.f32.mrf.mxu1  ;;  %15138 = vmatmul.mubr.msk.f32.gmra.mxu1 %vm283_vm1, %v18902_v42  ;;  %15190 = vmatprep.mubr.msk.f32.mxu0 %vm283_vm1, %v18604_v45 }
 0x2c2   : > { %v18922_v36 = vadd.f32 %v6597_v27, %v6366_v8  ;;  %v6369_v25 = vadd.f32 %v14839_v51, %v18609_v5  ;;  %15140 = vmatprep.mubr.msk.f32.mxu1 %vm283_vm1, %v18909_v40  ;;  %v6607_v52 = vpop.f32.mrf.mxu0  ;;  %v18953_v8 = vld [vmem:[%s15799_s11 + $0x1c1] sm:$0xff] }
 0x2c3   : > { %v6217_v0 = vpop.f32.mrf.mxu1  ;;  %20638 = vst [vmem:[#allocation19_spill] sm:$0xff] %v18953_v8 }
 0x2c4   : > { %v18935_v3 = vadd.f32 %v14889_v32, %v6369_v25  ;;  %v6368_v9 = vadd.f32 %v6217_v0, %v18616_v41  ;;  %v14892_v34 = vpop.f32.mrf.mxu0  ;;  %15191 = vmatmul.mubr.msk.f32.gmra.mxu0 %vm283_vm1, %v18607_v63  ;;  %v18950_v41 = vld [vmem:[%s15799_s11 + $0x1c0] sm:$0xff]  ;;  %v12763_v25 = vld [vmem:[%s15799_s11 + $0x1f0] sm:$0xff] }
 0x2c5   : > { %v14842_v5 = vpop.f32.mrf.mxu1  ;;  %15141 = vmatmul.mubr.msk.f32.gmra.mxu1 %vm283_vm1, %v18930_v49  ;;  %15193 = vmatprep.mubr.msk.f32.mxu0 %vm283_vm1, %v18624_v60 }
 0x2c6   : > { %v18942_v45 = vadd.f32 %v6607_v52, %v6368_v9  ;;  %v6371_v27 = vadd.f32 %v14842_v5, %v18628_v24  ;;  %15143 = vmatprep.mubr.msk.f32.mxu1 %vm283_vm1, %v18933_v37  ;;  %v6617_v32 = vpop.f32.mrf.mxu0  ;;  %v18970_v5 = vld [vmem:[%s15799_s11 + $0x200] sm:$0xff] }
 0x2c7   : > { %v6227_v51 = vpop.f32.mrf.mxu1 }
 0x2c8   : > { %v18956_v63 = vadd.f32 %v14892_v34, %v6371_v27  ;;  %v6370_v0 = vadd.f32 %v6227_v51, %v18635_v23  ;;  %v14895_v52 = vpop.f32.mrf.mxu0  ;;  %15194 = vmatmul.mubr.msk.f32.gmra.mxu0 %vm283_vm1, %v18953_v8  ;;  %v18973_v27 = vld [vmem:[%s15799_s11 + $0x210] sm:$0xff] }
 0x2c9   : > { %v14845_v24 = vpop.f32.mrf.mxu1  ;;  %15144 = vmatmul.mubr.msk.f32.gmra.mxu1 %vm283_vm1, %v18950_v41  ;;  %15196 = vmatprep.mubr.msk.f32.mxu0 %vm283_vm1, %v18641_v44 }
 0x2ca   : > { %v18963_v60 = vadd.f32 %v6617_v32, %v6370_v0  ;;  %v6373_v9 = vadd.f32 %v14845_v24, %v18647_v35  ;;  %15146 = vmatprep.mubr.msk.f32.mxu1 %vm283_vm1, %v12763_v25  ;;  %v6627_v34 = vpop.f32.mrf.mxu0 }
 0x2cb   : > { %v6237_v23 = vpop.f32.mrf.mxu1 }
 0x2cc   : > { %v18975_v51 = vadd.f32 %v14895_v52, %v6373_v9  ;;  %v6372_v32 = vadd.f32 %v6237_v23, %v18653_v28  ;;  %v14898_v8 = vpop.f32.mrf.mxu0  ;;  %15197 = vmatmul.mubr.msk.f32.gmra.mxu0 %vm283_vm1, %v18645_v30  ;;  %v18990_v28 = vld [vmem:[%s15799_s11 + $0x220] sm:$0xff]  ;;  %v18993_v52 = vld [vmem:[%s15799_s11 + $0x230] sm:$0xff] }
 0x2cd   : > { %v14848_v0 = vpop.f32.mrf.mxu1  ;;  %15147 = vmatmul.mubr.msk.f32.gmra.mxu1 %vm283_vm1, %v18970_v5  ;;  %15199 = vmatprep.mubr.msk.f32.mxu0 %vm283_vm1, %v18661_v47 }
 0x2ce   : > { %v18982_v35 = vadd.f32 %v6627_v34, %v6372_v32  ;;  %v6375_v44 = vadd.f32 %v14848_v0, %v18666_v48  ;;  %15149 = vmatprep.mubr.msk.f32.mxu1 %vm283_vm1, %v18973_v27  ;;  %v6637_v24 = vpop.f32.mrf.mxu0  ;;  %v19013_v0 = vld [vmem:[%s15799_s11 + $0x250] sm:$0xff] }
 0x2cf   : > { %v6247_v25 = vpop.f32.mrf.mxu1 }
 0x2d0   : > { %v18995_v9 = vadd.f32 %v14898_v8, %v6375_v44  ;;  %v6374_v30 = vadd.f32 %v6247_v25, %v18673_v1  ;;  %v14901_v48 = vpop.f32.mrf.mxu0  ;;  %15200 = vmatmul.mubr.msk.f32.gmra.mxu0 %vm283_vm1, %v18664_v59  ;;  %v19010_v1 = vld [vmem:[%s15799_s11 + $0x240] sm:$0xff] }
 0x2d1   : > { %v14851_v23 = vpop.f32.mrf.mxu1  ;;  %15150 = vmatmul.mubr.msk.f32.gmra.mxu1 %vm283_vm1, %v18990_v28  ;;  %15202 = vmatprep.mubr.msk.f32.mxu0 %vm283_vm1, %v18681_v11 }
 0x2d2   : > { %v19002_v47 = vadd.f32 %v6637_v24, %v6374_v30  ;;  %v6377_v34 = vadd.f32 %v14851_v23, %v18686_v43  ;;  %15152 = vmatprep.mubr.msk.f32.mxu1 %vm283_vm1, %v18993_v52  ;;  %v6647_v32 = vpop.f32.mrf.mxu0  ;;  %v20639_v30 = vld [vmem:[#allocation5_spill] sm:$0xff] }
 0x2d3   : > { %v6257_v8 = vpop.f32.mrf.mxu1  ;;  %v19033_v23 = vld [vmem:[%s15799_s11 + $0x261] sm:$0xff] }
 0x2d4   : > { %v19015_v59 = vadd.f32 %v14901_v48, %v6377_v34  ;;  %v6376_v44 = vadd.f32 %v6257_v8, %v18693_v15  ;;  %v14904_v25 = vpop.f32.mrf.mxu0  ;;  %15203 = vmatmul.mubr.msk.f32.gmra.mxu0 %vm283_vm1, %v18684_v21  ;;  %v19030_v15 = vld [vmem:[%s15799_s11 + $0x260] sm:$0xff]  ;;  %20641 = vst [vmem:[#allocation10_spill] sm:$0xff] %v19033_v23  ;;  %v12771_v8 = vld [vmem:[%s15799_s11 + $0x290] sm:$0xff] }
 0x2d5   : > { %v14854_v43 = vpop.f32.mrf.mxu1  ;;  %15153 = vmatmul.mubr.msk.f32.gmra.mxu1 %vm283_vm1, %v19010_v1  ;;  %15205 = vmatprep.mubr.msk.f32.mxu0 %vm283_vm1, %v20639_v30  ;;  %20640 = vst [vmem:[#allocation11_spill] sm:$0xff] %v19030_v15 }
 0x2d6   : > { %v19022_v11 = vadd.f32 %v6647_v32, %v6376_v44  ;;  %v6379_v24 = vadd.f32 %v14854_v43, %v18705_v14  ;;  %15155 = vmatprep.mubr.msk.f32.mxu1 %vm283_vm1, %v19013_v0  ;;  %v6657_v34 = vpop.f32.mrf.mxu0 }
 0x2d7   : > { %v6267_v48 = vpop.f32.mrf.mxu1 }
 0x2d8   : > { %v19036_v21 = vadd.f32 %v14904_v25, %v6379_v24  ;;  %v6378_v32 = vadd.f32 %v6267_v48, %v18712_v22  ;;  %v14907_v44 = vpop.f32.mrf.mxu0  ;;  %15206 = vmatmul.mubr.msk.f32.gmra.mxu0 %vm283_vm1, %v19033_v23  ;;  %v19050_v25 = vld [vmem:[%s15799_s11 + $0x2a0] sm:$0xff]  ;;  %v19053_v48 = vld [vmem:[%s15799_s11 + $0x2b0] sm:$0xff] }
 0x2d9   : > { %v14857_v14 = vpop.f32.mrf.mxu1  ;;  %15156 = vmatmul.mubr.msk.f32.gmra.mxu1 %vm283_vm1, %v19030_v15  ;;  %15208 = vmatprep.mubr.msk.f32.mxu0 %vm283_vm1, %v18718_v16 }
 0x2da   : > { %v19043_v43 = vadd.f32 %v6657_v34, %v6378_v32  ;;  %v6381_v30 = vadd.f32 %v14857_v14, %v18724_v7  ;;  %15158 = vmatprep.mubr.msk.f32.mxu1 %vm283_vm1, %v12771_v8  ;;  %v6667_v24 = vpop.f32.mrf.mxu0 }
 0x2db   : > { %v6277_v22 = vpop.f32.mrf.mxu1 }
 0x2dc   : > { %v19055_v15 = vadd.f32 %v14907_v44, %v6381_v30  ;;  %v6380_v34 = vadd.f32 %v6277_v22, %v18730_v54  ;;  %v14910_v23 = vpop.f32.mrf.mxu0  ;;  %15209 = vmatmul.mubr.msk.f32.gmra.mxu0 %vm283_vm1, %v18722_v57  ;;  %v19070_v54 = vld [vmem:[%s15799_s11 + $0x2c0] sm:$0xff]  ;;  %v19073_v44 = vld [vmem:[%s15799_s11 + $0x2d0] sm:$0xff] }
 0x2dd   : > { %v14860_v32 = vpop.f32.mrf.mxu1  ;;  %15159 = vmatmul.mubr.msk.f32.gmra.mxu1 %vm283_vm1, %v19050_v25  ;;  %15211 = vmatprep.mubr.msk.f32.mxu0 %vm283_vm1, %v18738_v53 }
 0x2de   : > { %v19062_v7 = vadd.f32 %v6667_v24, %v6380_v34  ;;  %v6383_v16 = vadd.f32 %v14860_v32, %v18743_v4  ;;  %15161 = vmatprep.mubr.msk.f32.mxu1 %vm283_vm1, %v19053_v48  ;;  %v6677_v14 = vpop.f32.mrf.mxu0  ;;  %v19093_v32 = vld [vmem:[%s15799_s11 + $0x2f0] sm:$0xff] }
 0x2df   : > { %v6287_v8 = vpop.f32.mrf.mxu1  ;;  %20642 = vst [vmem:[#allocation13_spill] sm:$0xff] %v19093_v32 }
 0x2e0   : > { %v19075_v30 = vadd.f32 %v14910_v23, %v6383_v16  ;;  %v6382_v57 = vadd.f32 %v6287_v8, %v18750_v18  ;;  %v14913_v4 = vpop.f32.mrf.mxu0  ;;  %15212 = vmatmul.mubr.msk.f32.gmra.mxu0 %vm283_vm1, %v18741_v26  ;;  %v19090_v18 = vld [vmem:[%s15799_s11 + $0x2e0] sm:$0xff] }
 0x2e1   : > { %v14863_v22 = vpop.f32.mrf.mxu1  ;;  %15162 = vmatmul.mubr.msk.f32.gmra.mxu1 %vm283_vm1, %v19070_v54  ;;  %15214 = vmatprep.mubr.msk.f32.mxu0 %vm283_vm1, %v18758_v2 }
 0x2e2   : > { %v19082_v53 = vadd.f32 %v6677_v14, %v6382_v57  ;;  %v6385_v24 = vadd.f32 %v14863_v22, %v18763_v61  ;;  %15164 = vmatprep.mubr.msk.f32.mxu1 %vm283_vm1, %v19073_v44  ;;  %v6687_v34 = vpop.f32.mrf.mxu0  ;;  %v20644_v57 = vld [vmem:[#allocation18_spill] sm:$0xff] }
 0x2e3   : > { %v6297_v23 = vpop.f32.mrf.mxu1  ;;  %v19113_v22 = vld [vmem:[%s15799_s11 + $0x301] sm:$0xff] }
 0x2e4   : > { %v19095_v26 = vadd.f32 %v14913_v4, %v6385_v24  ;;  %v6384_v16 = vadd.f32 %v6297_v23, %v18770_v33  ;;  %v14916_v8 = vpop.f32.mrf.mxu0  ;;  %15215 = vmatmul.mubr.msk.f32.gmra.mxu0 %vm283_vm1, %v18761_v17  ;;  %v19110_v33 = vld [vmem:[%s15799_s11 + $0x300] sm:$0xff]  ;;  %20646 = vst [vmem:[#allocation21_spill] sm:$0xff] %v19113_v22  ;;  %v12779_v23 = vld [vmem:[%s15799_s11 + $0x330] sm:$0xff] }
 0x2e5   : > { %v14866_v61 = vpop.f32.mrf.mxu1  ;;  %15165 = vmatmul.mubr.msk.f32.gmra.mxu1 %vm283_vm1, %v19090_v18  ;;  %15217 = vmatprep.mubr.msk.f32.mxu0 %vm283_vm1, %v20644_v57  ;;  %20645 = vst [vmem:[#allocation14_spill] sm:$0xff] %v19110_v33  ;;  %v20649_v57 = vld [vmem:[#allocation7_spill] sm:$0xff] }
 0x2e6   : > { %v19102_v2 = vadd.f32 %v6687_v34, %v6384_v16  ;;  %v6387_v14 = vadd.f32 %v14866_v61, %v18782_v13  ;;  %15167 = vmatprep.mubr.msk.f32.mxu1 %vm283_vm1, %v19093_v32  ;;  %v6697_v24 = vpop.f32.mrf.mxu0 }
 0x2e7   : > { %v6307_v4 = vpop.f32.mrf.mxu1 }
 0x2e8   : > { %20643 = vst [vmem:[#allocation12_spill] sm:$0xff] %v19102_v2  ;;  %v19116_v17 = vadd.f32 %v14916_v8, %v6387_v14  ;;  %v6386_v34 = vadd.f32 %v6307_v4, %v18789_v50  ;;  %v14919_v16 = vpop.f32.mrf.mxu0  ;;  %15218 = vmatmul.mubr.msk.f32.gmra.mxu0 %vm283_vm1, %v19113_v22  ;;  %v20650_v2 = vld [vmem:[#allocation6_spill] sm:$0xff]  ;;  %v19130_v8 = vld [vmem:[%s15799_s11 + $0x340] sm:$0xff]  ;;  %v19133_v4 = vld [vmem:[%s15799_s11 + $0x350] sm:$0xff] }
 0x2e9   : > { %v14869_v13 = vpop.f32.mrf.mxu1  ;;  %15168 = vmatmul.mubr.msk.f32.gmra.mxu1 %vm283_vm1, %v19110_v33  ;;  %15220 = vmatprep.mubr.msk.f32.mxu0 %vm283_vm1, %v20650_v2  ;;  %20651 = vst [vmem:[#allocation22_spill] sm:$0xff] %v19130_v8  ;;  %v20652_v22 = vld [vmem:[#allocation8_spill] sm:$0xff] }
 0x2ea   : > { %20647 = vst [vmem:[#allocation15_spill] sm:$0xff] %v19116_v17  ;;  %v19123_v61 = vadd.f32 %v6697_v24, %v6386_v34  ;;  %v6389_v32 = vadd.f32 %v14869_v13, %v20649_v57  ;;  %15170 = vmatprep.mubr.msk.f32.mxu1 %vm283_vm1, %v12779_v23  ;;  %v6707_v14 = vpop.f32.mrf.mxu0  ;;  %v20653_v23 = vld [vmem:[#allocation29_spill] sm:$0xff]  ;;  %v20654_v13 = vld [vmem:[#allocation16_spill] sm:$0xff] }
 0x2eb   : > { %v6317_v50 = vpop.f32.mrf.mxu1  ;;  %v20655_v17 = vld [vmem:[#allocation9_spill] sm:$0xff] }
 0x2ec   : > { %20648 = vst [vmem:[#allocation23_spill] sm:$0xff] %v19123_v61  ;;  %v19135_v33 = vadd.f32 %v14919_v16, %v6389_v32  ;;  %v6388_v24 = vadd.f32 %v6317_v50, %v20652_v22  ;;  %v14922_v61 = vpop.f32.mrf.mxu0  ;;  %15221 = vmatmul.mubr.msk.f32.gmra.mxu0 %vm283_vm1, %v20653_v23  ;;  %v19150_v32 = vld [vmem:[%s15799_s11 + $0x360] sm:$0xff]  ;;  %v19153_v50 = vld [vmem:[%s15799_s11 + $0x370] sm:$0xff] }
 0x2ed   : > { %v14872_v34 = vpop.f32.mrf.mxu1  ;;  %15171 = vmatmul.mubr.msk.f32.gmra.mxu1 %vm283_vm1, %v19130_v8  ;;  %15223 = vmatprep.mubr.msk.f32.mxu0 %vm283_vm1, %v20655_v17  ;;  %20656 = vst [vmem:[#allocation26_spill] sm:$0xff] %v19150_v32  ;;  %v20657_v23 = vld [vmem:[#allocation17_spill] sm:$0xff] }
 0x2ee   : > { %v19142_v2 = vadd.f32 %v6707_v14, %v6388_v24  ;;  %v6391_v57 = vadd.f32 %v14872_v34, %v20654_v13  ;;  %15173 = vmatprep.mubr.msk.f32.mxu1 %vm283_vm1, %v19133_v4  ;;  %v6717_v16 = vpop.f32.mrf.mxu0 }
 0x2ef   : > { %v6327_v22 = vpop.f32.mrf.mxu1 }
 0x2f0   : > { %v19155_v8 = vadd.f32 %v14922_v61, %v6391_v57  ;;  %v6390_v14 = vadd.f32 %v6327_v22, %v18828_v12  ;;  %v14925_v34 = vpop.f32.mrf.mxu0  ;;  %15224 = vmatmul.mubr.msk.f32.gmra.mxu0 %vm283_vm1, %v18819_v20  ;;  %v19170_v12 = vld [vmem:[%s15799_s11 + $0x380] sm:$0xff]  ;;  %v19173_v22 = vld [vmem:[%s15799_s11 + $0x390] sm:$0xff] }
 0x2f1   : > { %v14875_v24 = vpop.f32.mrf.mxu1  ;;  %15174 = vmatmul.mubr.msk.f32.gmra.mxu1 %vm283_vm1, %v19150_v32  ;;  %15226 = vmatprep.mubr.msk.f32.mxu0 %vm283_vm1, %v18835_v56  ;;  %20658 = vst [vmem:[#allocation24_spill] sm:$0xff] %v19170_v12 }
 0x2f2   : > { %v19162_v17 = vadd.f32 %v6717_v16, %v6390_v14  ;;  %v6393_v13 = vadd.f32 %v14875_v24, %v20657_v23  ;;  %15176 = vmatprep.mubr.msk.f32.mxu1 %vm283_vm1, %v19153_v50  ;;  %v6727_v57 = vpop.f32.mrf.mxu0  ;;  %v20659_v23 = vld [vmem:[#allocation20_spill] sm:$0xff] }
 0x2f3   : > { %v6337_v61 = vpop.f32.mrf.mxu1 }
 0x2f4   : > { %v19175_v32 = vadd.f32 %v14925_v34, %v6393_v13  ;;  %v6392_v20 = vadd.f32 %v6337_v61, %v18848_v38  ;;  %v14928_v14 = vpop.f32.mrf.mxu0  ;;  %15227 = vmatmul.mubr.msk.f32.gmra.mxu0 %vm283_vm1, %v18839_v39  ;;  %v19190_v38 = vld [vmem:[%s15799_s11 + $0x3a0] sm:$0xff] }
 0x2f5   : > { %v14878_v16 = vpop.f32.mrf.mxu1  ;;  %15177 = vmatmul.mubr.msk.f32.gmra.mxu1 %vm283_vm1, %v19170_v12  ;;  %15229 = vmatprep.mubr.msk.f32.mxu0 %vm283_vm1, %v20659_v23  ;;  %v19193_v34 = vld [vmem:[%s15799_s11 + $0x3a1] sm:$0xff]  ;;  %v20661_v23 = vld [vmem:[#allocation27_spill] sm:$0xff] }
 0x2f6   : > { %v19182_v56 = vadd.f32 %v6727_v57, %v6392_v20  ;;  %v6395_v24 = vadd.f32 %v14878_v16, %v18858_v29  ;;  %15179 = vmatprep.mubr.msk.f32.mxu1 %vm283_vm1, %v19173_v22  ;;  %20660 = vst [vmem:[#allocation28_spill] sm:$0xff] %v19193_v34  ;;  %v6737_v61 = vpop.f32.mrf.mxu0 }
 0x2f7   : > { %v6347_v13 = vpop.f32.mrf.mxu1 }
 0x2f8   : > { %v19195_v12 = vadd.f32 %v14928_v14, %v6395_v24  ;;  %v6394_v39 = vadd.f32 %v6347_v13, %v18864_v10  ;;  %v14931_v29 = vpop.f32.mrf.mxu0  ;;  %15230 = vmatmul.mubr.msk.f32.gmra.mxu0 %vm283_vm1, %v19193_v34  ;;  %v19210_v10 = vld [vmem:[%s15799_s11 + $0x162] sm:$0xff] }
 0x2f9   : > { %v14881_v57 = vpop.f32.mrf.mxu1  ;;  %15180 = vmatmul.mubr.msk.f32.gmra.mxu1 %vm283_vm1, %v19190_v38  ;;  %15284 = vmatprep.mubr.msk.f32.mxu0 %vm283_vm1, %v18872_v19 }
 0x2fa   : > { %v19202_v20 = vadd.f32 %v6737_v61, %v6394_v39  ;;  %v6397_v16 = vadd.f32 %v14881_v57, %v18874_v46  ;;  %15234 = vmatprep.mubr.msk.f32.mxu1 %vm283_vm1, %v20661_v23  ;;  %v6747_v24 = vpop.f32.mrf.mxu0  ;;  %v19216_v61 = vld [vmem:[%s15799_s11 + $0x172] sm:$0xff] }
 0x2fb   : > { %v6357_v14 = vpop.f32.mrf.mxu1 }
 0x2fc   : > { %v19212_v13 = vadd.f32 %v14931_v29, %v6397_v16  ;;  %v6396_v34 = vadd.f32 %v6357_v14, %v18894_v6  ;;  %v14986_v46 = vpop.f32.mrf.mxu0  ;;  %15285 = vmatmul.mubr.msk.f32.vlgmr.msra.gmra.mxu0 %vm283_vm1, %v18878_v31  ;;  %v19230_v6 = vld [vmem:[%s15799_s11 + $0x182] sm:$0xff]  ;;  %v19237_v31 = vld [vmem:[%s15799_s11 + $0x192] sm:$0xff] }
 0x2fd   : > { %v14936_v39 = vpop.f32.mrf.mxu1  ;;  %15235 = vmatmul.mubr.msk.f32.vlgmr.msra.gmra.mxu1 %vm283_vm1, %v19210_v10  ;;  %15383 = vmatpush3.msk.msra.mxu0 %vm380_vm0, %v18892_v62 }
 0x2fe   : > { %v19222_v19 = vadd.f32 %v6747_v24, %v6396_v34  ;;  %v7147_v57 = vadd.f32 %v14936_v39, %v18911_v58  ;;  %15333 = vmatpush3.msk.msra.mxu1 %vm380_vm0, %v18887_v55  ;;  %v7378_v16 = vpop.f32.mrf.mxu0  ;;  %15237 = vmatprep.mubr.msk.f32.mxu1 %vm283_vm1, %v19216_v61  ;;  %v19257_v39 = vld [vmem:[%s15799_s11 + $0x1b2] sm:$0xff] }
 0x2ff   : > { %v6987_v29 = vpop.f32.mrf.mxu1  ;;  %15287 = vmatprep.mubr.msk.f32.mxu0 %vm283_vm1, %v18902_v42  ;;  %v19254_v42 = vld [vmem:[%s15799_s11 + $0x1a2] sm:$0xff] }
 0x300   : > { %v19239_v58 = vadd.f32 %v14986_v46, %v7147_v57  ;;  %v7146_v55 = vadd.f32 %v6987_v29, %v18922_v36  ;;  %v14989_v62 = vpop.f32.mrf.mxu0  ;;  %15288 = vmatmul.mubr.msk.f32.gmra.mxu0 %vm283_vm1, %v18909_v40 }
 0x301   : > { %v14939_v34 = vpop.f32.mrf.mxu1  ;;  %15238 = vmatmul.mubr.msk.f32.gmra.mxu1 %vm283_vm1, %v19230_v6  ;;  %15290 = vmatprep.mubr.msk.f32.mxu0 %vm283_vm1, %v18930_v49 }
 0x302   : > { %v19246_v23 = vadd.f32 %v7378_v16, %v7146_v55  ;;  %v7149_v14 = vadd.f32 %v14939_v34, %v18935_v3  ;;  %15240 = vmatprep.mubr.msk.f32.mxu1 %vm283_vm1, %v19237_v31  ;;  %v7388_v24 = vpop.f32.mrf.mxu0  ;;  %v12960_v16 = vld [vmem:[%s15799_s11 + $0x1d0] sm:$0xff] }
 0x303   : > { %v6997_v36 = vpop.f32.mrf.mxu1 }
 0x304   : > { %v19259_v40 = vadd.f32 %v14989_v62, %v7149_v14  ;;  %v7148_v46 = vadd.f32 %v6997_v36, %v18942_v45  ;;  %v14992_v57 = vpop.f32.mrf.mxu0  ;;  %15291 = vmatmul.mubr.msk.f32.gmra.mxu0 %vm283_vm1, %v18933_v37  ;;  %v19274_v45 = vld [vmem:[%s15799_s11 + $0x1c2] sm:$0xff]  ;;  %v12895_v62 = vld [vmem:[%s15799_s11 + $0x1f2] sm:$0xff] }
 0x305   : > { %v14942_v3 = vpop.f32.mrf.mxu1  ;;  %15241 = vmatmul.mubr.msk.f32.gmra.mxu1 %vm283_vm1, %v19254_v42  ;;  %15293 = vmatprep.mubr.msk.f32.mxu0 %vm283_vm1, %v18950_v41 }
 0x306   : > { %v19266_v49 = vadd.f32 %v7388_v24, %v7148_v46  ;;  %v7151_v29 = vadd.f32 %v14942_v3, %v18956_v63  ;;  %15243 = vmatprep.mubr.msk.f32.mxu1 %vm283_vm1, %v19257_v39  ;;  %v7398_v34 = vpop.f32.mrf.mxu0  ;;  %v19291_v46 = vld [vmem:[%s15799_s11 + $0x202] sm:$0xff] }
 0x307   : > { %v7007_v55 = vpop.f32.mrf.mxu1 }
 0x308   : > { %v19278_v14 = vadd.f32 %v14992_v57, %v7151_v29  ;;  %v7150_v37 = vadd.f32 %v7007_v55, %v18963_v60  ;;  %v14995_v63 = vpop.f32.mrf.mxu0  ;;  %15294 = vmatmul.mubr.msk.f32.gmra.mxu0 %vm283_vm1, %v12960_v16  ;;  %v19294_v57 = vld [vmem:[%s15799_s11 + $0x212] sm:$0xff] }
 0x309   : > { %v14945_v36 = vpop.f32.mrf.mxu1  ;;  %15244 = vmatmul.mubr.msk.f32.gmra.mxu1 %vm283_vm1, %v19274_v45  ;;  %15296 = vmatprep.mubr.msk.f32.mxu0 %vm283_vm1, %v18970_v5 }
 0x30a   : > { %v19284_v41 = vadd.f32 %v7398_v34, %v7150_v37  ;;  %v7153_v24 = vadd.f32 %v14945_v36, %v18975_v51  ;;  %15246 = vmatprep.mubr.msk.f32.mxu1 %vm283_vm1, %v12895_v62  ;;  %v7408_v3 = vpop.f32.mrf.mxu0  ;;  %v19314_v36 = vld [vmem:[%s15799_s11 + $0x232] sm:$0xff] }
 0x30b   : > { %v7017_v60 = vpop.f32.mrf.mxu1 }
 0x30c   : > { %v19296_v29 = vadd.f32 %v14995_v63, %v7153_v24  ;;  %v7152_v16 = vadd.f32 %v7017_v60, %v18982_v35  ;;  %v14998_v34 = vpop.f32.mrf.mxu0  ;;  %15297 = vmatmul.mubr.msk.f32.gmra.mxu0 %vm283_vm1, %v18973_v27  ;;  %v19311_v35 = vld [vmem:[%s15799_s11 + $0x222] sm:$0xff] }
 0x30d   : > { %v14948_v55 = vpop.f32.mrf.mxu1  ;;  %15247 = vmatmul.mubr.msk.f32.gmra.mxu1 %vm283_vm1, %v19291_v46  ;;  %15299 = vmatprep.mubr.msk.f32.mxu0 %vm283_vm1, %v18990_v28 }
 0x30e   : > { %v19303_v5 = vadd.f32 %v7408_v3, %v7152_v16  ;;  %v7155_v51 = vadd.f32 %v14948_v55, %v18995_v9  ;;  %15249 = vmatprep.mubr.msk.f32.mxu1 %vm283_vm1, %v19294_v57  ;;  %v7418_v37 = vpop.f32.mrf.mxu0  ;;  %v19334_v55 = vld [vmem:[%s15799_s11 + $0x252] sm:$0xff] }
 0x30f   : > { %v7027_v62 = vpop.f32.mrf.mxu1 }
 0x310   : > { %v19316_v63 = vadd.f32 %v14998_v34, %v7155_v51  ;;  %v7154_v27 = vadd.f32 %v7027_v62, %v19002_v47  ;;  %v15001_v9 = vpop.f32.mrf.mxu0  ;;  %15300 = vmatmul.mubr.msk.f32.gmra.mxu0 %vm283_vm1, %v18993_v52  ;;  %v19331_v47 = vld [vmem:[%s15799_s11 + $0x242] sm:$0xff] }
 0x311   : > { %v14951_v24 = vpop.f32.mrf.mxu1  ;;  %15250 = vmatmul.mubr.msk.f32.gmra.mxu1 %vm283_vm1, %v19311_v35  ;;  %15302 = vmatprep.mubr.msk.f32.mxu0 %vm283_vm1, %v19010_v1 }
 0x312   : > { %v19323_v28 = vadd.f32 %v7418_v37, %v7154_v27  ;;  %v7157_v60 = vadd.f32 %v14951_v24, %v19015_v59  ;;  %15252 = vmatprep.mubr.msk.f32.mxu1 %vm283_vm1, %v19314_v36  ;;  %v7428_v16 = vpop.f32.mrf.mxu0  ;;  %v20662_v37 = vld [vmem:[#allocation11_spill] sm:$0xff] }
 0x313   : > { %v7037_v3 = vpop.f32.mrf.mxu1  ;;  %v12968_v27 = vld [vmem:[%s15799_s11 + $0x270] sm:$0xff] }
 0x314   : > { %v19336_v52 = vadd.f32 %v15001_v9, %v7157_v60  ;;  %v7156_v34 = vadd.f32 %v7037_v3, %v19022_v11  ;;  %v15004_v51 = vpop.f32.mrf.mxu0  ;;  %15303 = vmatmul.mubr.msk.f32.gmra.mxu0 %vm283_vm1, %v19013_v0  ;;  %v19351_v11 = vld [vmem:[%s15799_s11 + $0x262] sm:$0xff]  ;;  %v12903_v60 = vld [vmem:[%s15799_s11 + $0x292] sm:$0xff] }
 0x315   : > { %v14954_v59 = vpop.f32.mrf.mxu1  ;;  %15253 = vmatmul.mubr.msk.f32.gmra.mxu1 %vm283_vm1, %v19331_v47  ;;  %15305 = vmatprep.mubr.msk.f32.mxu0 %vm283_vm1, %v20662_v37  ;;  %v19371_v37 = vld [vmem:[%s15799_s11 + $0x2b2] sm:$0xff] }
 0x316   : > { %v19343_v1 = vadd.f32 %v7428_v16, %v7156_v34  ;;  %v7159_v62 = vadd.f32 %v14954_v59, %v19036_v21  ;;  %15255 = vmatprep.mubr.msk.f32.mxu1 %vm283_vm1, %v19334_v55  ;;  %v7438_v9 = vpop.f32.mrf.mxu0 }
 0x317   : > { %v7047_v24 = vpop.f32.mrf.mxu1 }
 0x318   : > { %v19355_v3 = vadd.f32 %v15004_v51, %v7159_v62  ;;  %v7158_v0 = vadd.f32 %v7047_v24, %v19043_v43  ;;  %v15007_v21 = vpop.f32.mrf.mxu0  ;;  %15306 = vmatmul.mubr.msk.f32.gmra.mxu0 %vm283_vm1, %v12968_v27  ;;  %v19368_v51 = vld [vmem:[%s15799_s11 + $0x2a2] sm:$0xff] }
 0x319   : > { %v14957_v16 = vpop.f32.mrf.mxu1  ;;  %15256 = vmatmul.mubr.msk.f32.gmra.mxu1 %vm283_vm1, %v19351_v11  ;;  %15308 = vmatprep.mubr.msk.f32.mxu0 %vm283_vm1, %v19050_v25 }
 0x31a   : > { %v19361_v34 = vadd.f32 %v7438_v9, %v7158_v0  ;;  %v7161_v59 = vadd.f32 %v14957_v16, %v19055_v15  ;;  %15258 = vmatprep.mubr.msk.f32.mxu1 %vm283_vm1, %v12903_v60  ;;  %v7448_v62 = vpop.f32.mrf.mxu0 }
 0x31b   : > { %v7057_v43 = vpop.f32.mrf.mxu1 }
 0x31c   : > { %v19373_v24 = vadd.f32 %v15007_v21, %v7161_v59  ;;  %v7160_v27 = vadd.f32 %v7057_v43, %v19062_v7  ;;  %v15010_v0 = vpop.f32.mrf.mxu0  ;;  %15309 = vmatmul.mubr.msk.f32.gmra.mxu0 %vm283_vm1, %v19053_v48  ;;  %v19388_v7 = vld [vmem:[%s15799_s11 + $0x2c2] sm:$0xff]  ;;  %v19391_v21 = vld [vmem:[%s15799_s11 + $0x2d2] sm:$0xff] }
 0x31d   : > { %v14960_v9 = vpop.f32.mrf.mxu1  ;;  %15259 = vmatmul.mubr.msk.f32.gmra.mxu1 %vm283_vm1, %v19368_v51  ;;  %15311 = vmatprep.mubr.msk.f32.mxu0 %vm283_vm1, %v19070_v54  ;;  %20663 = vst [vmem:[#allocation25_spill] sm:$0xff] %v19391_v21 }
 0x31e   : > { %v19380_v15 = vadd.f32 %v7448_v62, %v7160_v27  ;;  %v7163_v25 = vadd.f32 %v14960_v9, %v19075_v30  ;;  %15261 = vmatprep.mubr.msk.f32.mxu1 %vm283_vm1, %v19371_v37  ;;  %v7458_v16 = vpop.f32.mrf.mxu0 }
 0x31f   : > { %v7067_v60 = vpop.f32.mrf.mxu1 }
 0x320   : > { %v19393_v59 = vadd.f32 %v15010_v0, %v7163_v25  ;;  %v7162_v48 = vadd.f32 %v7067_v60, %v19082_v53  ;;  %v15013_v30 = vpop.f32.mrf.mxu0  ;;  %15312 = vmatmul.mubr.msk.f32.gmra.mxu0 %vm283_vm1, %v19073_v44  ;;  %v19408_v53 = vld [vmem:[%s15799_s11 + $0x2e2] sm:$0xff]  ;;  %v19411_v0 = vld [vmem:[%s15799_s11 + $0x2f2] sm:$0xff] }
 0x321   : > { %v14963_v43 = vpop.f32.mrf.mxu1  ;;  %15262 = vmatmul.mubr.msk.f32.gmra.mxu1 %vm283_vm1, %v19388_v7  ;;  %15314 = vmatprep.mubr.msk.f32.mxu0 %vm283_vm1, %v19090_v18  ;;  %20665 = vst [vmem:[#allocation18_spill] sm:$0xff] %v19408_v53  ;;  %20666 = vst [vmem:[#allocation7_spill] sm:$0xff] %v19411_v0  ;;  %v20668_v25 = vld [vmem:[#allocation12_spill] sm:$0xff] }
 0x322   : > { %v19400_v54 = vadd.f32 %v7458_v16, %v7162_v48  ;;  %v7165_v62 = vadd.f32 %v14963_v43, %v19095_v26  ;;  %15264 = vmatprep.mubr.msk.f32.mxu1 %vm283_vm1, %v19391_v21  ;;  %v7468_v9 = vpop.f32.mrf.mxu0  ;;  %v20669_v48 = vld [vmem:[#allocation13_spill] sm:$0xff]  ;;  %v20670_v43 = vld [vmem:[#allocation15_spill] sm:$0xff] }
 0x323   : > { %v7077_v27 = vpop.f32.mrf.mxu1 }
 0x324   : > { %20664 = vst [vmem:[#allocation5_spill] sm:$0xff] %v19400_v54  ;;  %v19413_v44 = vadd.f32 %v15013_v30, %v7165_v62  ;;  %v7164_v60 = vadd.f32 %v7077_v27, %v20668_v25  ;;  %v15016_v16 = vpop.f32.mrf.mxu0  ;;  %15315 = vmatmul.mubr.msk.f32.gmra.mxu0 %vm283_vm1, %v20669_v48  ;;  %v20671_v54 = vld [vmem:[#allocation14_spill] sm:$0xff]  ;;  %v12976_v62 = vld [vmem:[%s15799_s11 + $0x310] sm:$0xff] }
 0x325   : > { %v14966_v26 = vpop.f32.mrf.mxu1  ;;  %15265 = vmatmul.mubr.msk.f32.gmra.mxu1 %vm283_vm1, %v19408_v53  ;;  %15317 = vmatprep.mubr.msk.f32.mxu0 %vm283_vm1, %v20671_v54  ;;  %v19428_v30 = vld [vmem:[%s15799_s11 + $0x302] sm:$0xff]  ;;  %v12911_v53 = vld [vmem:[%s15799_s11 + $0x332] sm:$0xff] }
 0x326   : > { %20667 = vst [vmem:[#allocation6_spill] sm:$0xff] %v19413_v44  ;;  %v19420_v18 = vadd.f32 %v7468_v9, %v7164_v60  ;;  %v7167_v21 = vadd.f32 %v14966_v26, %v20670_v43  ;;  %15267 = vmatprep.mubr.msk.f32.mxu1 %vm283_vm1, %v19411_v0  ;;  %20672 = vst [vmem:[#allocation8_spill] sm:$0xff] %v19428_v30  ;;  %v7478_v25 = vpop.f32.mrf.mxu0  ;;  %v20673_v9 = vld [vmem:[#allocation23_spill] sm:$0xff]  ;;  %v20674_v0 = vld [vmem:[#allocation22_spill] sm:$0xff] }
 0x327   : > { %v7087_v27 = vpop.f32.mrf.mxu1 }
 0x328   : > { %v19432_v44 = vadd.f32 %v15016_v16, %v7167_v21  ;;  %v7166_v60 = vadd.f32 %v7087_v27, %v20673_v9  ;;  %v15019_v26 = vpop.f32.mrf.mxu0  ;;  %15318 = vmatmul.mubr.msk.f32.gmra.mxu0 %vm283_vm1, %v12976_v62  ;;  %v19445_v21 = vld [vmem:[%s15799_s11 + $0x342] sm:$0xff]  ;;  %v19448_v9 = vld [vmem:[%s15799_s11 + $0x352] sm:$0xff] }
 0x329   : > { %v14969_v48 = vpop.f32.mrf.mxu1  ;;  %15268 = vmatmul.mubr.msk.f32.gmra.mxu1 %vm283_vm1, %v19428_v30  ;;  %15320 = vmatprep.mubr.msk.f32.mxu0 %vm283_vm1, %v20674_v0  ;;  %v20675_v0 = vld [vmem:[#allocation26_spill] sm:$0xff] }
 0x32a   : > { %v19438_v54 = vadd.f32 %v7478_v25, %v7166_v60  ;;  %v7169_v43 = vadd.f32 %v14969_v48, %v19135_v33  ;;  %15270 = vmatprep.mubr.msk.f32.mxu1 %vm283_vm1, %v12911_v53  ;;  %v7488_v27 = vpop.f32.mrf.mxu0 }
 0x32b   : > { %v7097_v16 = vpop.f32.mrf.mxu1 }
 0x32c   : > { %v19450_v30 = vadd.f32 %v15019_v26, %v7169_v43  ;;  %v7168_v62 = vadd.f32 %v7097_v16, %v19142_v2  ;;  %v15022_v60 = vpop.f32.mrf.mxu0  ;;  %15321 = vmatmul.mubr.msk.f32.gmra.mxu0 %vm283_vm1, %v19133_v4  ;;  %v19465_v2 = vld [vmem:[%s15799_s11 + $0x362] sm:$0xff]  ;;  %v19468_v43 = vld [vmem:[%s15799_s11 + $0x372] sm:$0xff] }
 0x32d   : > { %v14972_v25 = vpop.f32.mrf.mxu1  ;;  %15271 = vmatmul.mubr.msk.f32.gmra.mxu1 %vm283_vm1, %v19445_v21  ;;  %15323 = vmatprep.mubr.msk.f32.mxu0 %vm283_vm1, %v20675_v0  ;;  %v20676_v0 = vld [vmem:[#allocation24_spill] sm:$0xff] }
 0x32e   : > { %v19457_v33 = vadd.f32 %v7488_v27, %v7168_v62  ;;  %v7171_v53 = vadd.f32 %v14972_v25, %v19155_v8  ;;  %15273 = vmatprep.mubr.msk.f32.mxu1 %vm283_vm1, %v19448_v9  ;;  %v7498_v26 = vpop.f32.mrf.mxu0 }
 0x32f   : > { %v7107_v48 = vpop.f32.mrf.mxu1 }
 0x330   : > { %v19470_v16 = vadd.f32 %v15022_v60, %v7171_v53  ;;  %v7170_v4 = vadd.f32 %v7107_v48, %v19162_v17  ;;  %v15025_v8 = vpop.f32.mrf.mxu0  ;;  %15324 = vmatmul.mubr.msk.f32.gmra.mxu0 %vm283_vm1, %v19153_v50  ;;  %v19485_v17 = vld [vmem:[%s15799_s11 + $0x382] sm:$0xff]  ;;  %v19488_v48 = vld [vmem:[%s15799_s11 + $0x392] sm:$0xff] }
 0x331   : > { %v14975_v27 = vpop.f32.mrf.mxu1  ;;  %15274 = vmatmul.mubr.msk.f32.gmra.mxu1 %vm283_vm1, %v19465_v2  ;;  %15326 = vmatprep.mubr.msk.f32.mxu0 %vm283_vm1, %v20676_v0  ;;  %20677 = vst [vmem:[#allocation29_spill] sm:$0xff] %v19485_v17 }
 0x332   : > { %v19477_v62 = vadd.f32 %v7498_v26, %v7170_v4  ;;  %v7173_v25 = vadd.f32 %v14975_v27, %v19175_v32  ;;  %15276 = vmatprep.mubr.msk.f32.mxu1 %vm283_vm1, %v19468_v43  ;;  %v7508_v53 = vpop.f32.mrf.mxu0 }
 0x333   : > { %v7117_v60 = vpop.f32.mrf.mxu1 }
 0x334   : > { %v19490_v50 = vadd.f32 %v15025_v8, %v7173_v25  ;;  %v7172_v26 = vadd.f32 %v7117_v60, %v19182_v56  ;;  %v15028_v4 = vpop.f32.mrf.mxu0  ;;  %15327 = vmatmul.mubr.msk.f32.gmra.mxu0 %vm283_vm1, %v19173_v22  ;;  %v19505_v56 = vld [vmem:[%s15799_s11 + $0x3a2] sm:$0xff]  ;;  %v12984_v8 = vld [vmem:[%s15799_s11 + $0x3b0] sm:$0xff] }
 0x335   : > { %v14978_v32 = vpop.f32.mrf.mxu1  ;;  %15277 = vmatmul.mubr.msk.f32.gmra.mxu1 %vm283_vm1, %v19485_v17  ;;  %15329 = vmatprep.mubr.msk.f32.mxu0 %vm283_vm1, %v19190_v38  ;;  %20679 = vst [vmem:[#allocation9_spill] sm:$0xff] %v19505_v56  ;;  %v13019_v17 = vld [vmem:[%s15799_s11 + $0x161] sm:$0xff] }
 0x336   : > { %20678 = vst [vmem:[#allocation16_spill] sm:$0xff] %v19490_v50  ;;  %v19497_v27 = vadd.f32 %v7508_v53, %v7172_v26  ;;  %v7175_v0 = vadd.f32 %v14978_v32, %v19195_v12  ;;  %15279 = vmatprep.mubr.msk.f32.mxu1 %vm283_vm1, %v19488_v48  ;;  %v7518_v60 = vpop.f32.mrf.mxu0  ;;  %v13020_v32 = vld [vmem:[%s15799_s11 + $0x171] sm:$0xff] }
 0x337   : > { %v7127_v25 = vpop.f32.mrf.mxu1 }
 0x338   : > { %v19509_v50 = vadd.f32 %v15028_v4, %v7175_v0  ;;  %v7174_v22 = vadd.f32 %v7127_v25, %v19202_v20  ;;  %v15031_v12 = vpop.f32.mrf.mxu0  ;;  %15330 = vmatmul.mubr.msk.f32.gmra.mxu0 %vm283_vm1, %v12984_v8  ;;  %v13021_v0 = vld [vmem:[%s15799_s11 + $0x181] sm:$0xff] }
 0x339   : > { %v14981_v53 = vpop.f32.mrf.mxu1  ;;  %15280 = vmatmul.mubr.msk.f32.gmra.mxu1 %vm283_vm1, %v19505_v56  ;;  %15384 = vmatprep.mubr.msk.f32.mxu0 %vm283_vm1, %v19210_v10 }
 0x33a   : > { %v19515_v38 = vadd.f32 %v7518_v60, %v7174_v22  ;;  %v7177_v26 = vadd.f32 %v14981_v53, %v19212_v13  ;;  %15334 = vmatprep.mubr.msk.f32.mxu1 %vm283_vm1, %v13019_v17  ;;  %v7528_v20 = vpop.f32.mrf.mxu0  ;;  %v13022_v17 = vld [vmem:[%s15799_s11 + $0x191] sm:$0xff]  ;;  %v13023_v53 = vld [vmem:[%s15799_s11 + $0x1a1] sm:$0xff] }
 0x33b   : > { %v7137_v4 = vpop.f32.mrf.mxu1 }
 0x33c   : > { %v19523_v25 = vadd.f32 %v15031_v12, %v7177_v26  ;;  %v7176_v56 = vadd.f32 %v7137_v4, %v19222_v19  ;;  %v15086_v60 = vpop.f32.mrf.mxu0  ;;  %15385 = vmatmul.mubr.msk.f32.vlgmr.msra.gmra.mxu0 %vm283_vm1, %v19216_v61 }
 0x33d   : > { %v15036_v8 = vpop.f32.mrf.mxu1  ;;  %15335 = vmatmul.mubr.msk.f32.vlgmr.msra.gmra.mxu1 %vm283_vm1, %v13020_v32  ;;  %15387 = vmatprep.mubr.msk.f32.mxu0 %vm283_vm1, %v19230_v6  ;;  %v13024_v6 = vld [vmem:[%s15799_s11 + $0x1b1] sm:$0xff] }
 0x33e   : > { %v19529_v13 = vadd.f32 %v7528_v20, %v7176_v56  ;;  %v7928_v10 = vadd.f32 %v15036_v8, %v19239_v58  ;;  %15337 = vmatprep.mubr.msk.f32.mxu1 %vm283_vm1, %v13021_v0  ;;  %v8158_v19 = vpop.f32.mrf.mxu0 }
 0x33f   : > { %v7768_v22 = vpop.f32.mrf.mxu1 }
 0x340   : > { %v19537_v12 = vadd.f32 %v15086_v60, %v7928_v10  ;;  %v7927_v26 = vadd.f32 %v7768_v22, %v19246_v23  ;;  %v15089_v61 = vpop.f32.mrf.mxu0  ;;  %15388 = vmatmul.mubr.msk.f32.gmra.mxu0 %vm283_vm1, %v19237_v31  ;;  %v13026_v10 = vld [vmem:[%s15799_s11 + $0x1d1] sm:$0xff] }
 0x341   : > { %v15039_v32 = vpop.f32.mrf.mxu1  ;;  %15338 = vmatmul.mubr.msk.f32.gmra.mxu1 %vm283_vm1, %v13022_v17  ;;  %15390 = vmatprep.mubr.msk.f32.mxu0 %vm283_vm1, %v19254_v42  ;;  %v20680_v42 = vld [vmem:[#allocation19_spill] sm:$0xff] }
 0x342   : > { %v19543_v58 = vadd.f32 %v8158_v19, %v7927_v26  ;;  %v7930_v56 = vadd.f32 %v15039_v32, %v19259_v40  ;;  %15340 = vmatprep.mubr.msk.f32.mxu1 %vm283_vm1, %v13023_v53  ;;  %v8168_v4 = vpop.f32.mrf.mxu0  ;;  %v13027_v19 = vld [vmem:[%s15799_s11 + $0x201] sm:$0xff] }
 0x343   : > { %v7778_v23 = vpop.f32.mrf.mxu1 }
 0x344   : > { %v19550_v20 = vadd.f32 %v15089_v61, %v7930_v56  ;;  %v7929_v0 = vadd.f32 %v7778_v23, %v19266_v49  ;;  %v15092_v8 = vpop.f32.mrf.mxu0  ;;  %15391 = vmatmul.mubr.msk.f32.gmra.mxu0 %vm283_vm1, %v19257_v39  ;;  %v13092_v49 = vld [vmem:[%s15799_s11 + $0x1d2] sm:$0xff] }
 0x345   : > { %v15042_v31 = vpop.f32.mrf.mxu1  ;;  %15341 = vmatmul.mubr.msk.f32.gmra.mxu1 %vm283_vm1, %v13024_v6  ;;  %15393 = vmatprep.mubr.msk.f32.mxu0 %vm283_vm1, %v19274_v45  ;;  %v13028_v61 = vld [vmem:[%s15799_s11 + $0x211] sm:$0xff]  ;;  %v13029_v6 = vld [vmem:[%s15799_s11 + $0x221] sm:$0xff] }
 0x346   : > { %v19556_v40 = vadd.f32 %v8168_v4, %v7929_v0  ;;  %v7932_v60 = vadd.f32 %v15042_v31, %v19278_v14  ;;  %15343 = vmatprep.mubr.msk.f32.mxu1 %vm283_vm1, %v20680_v42  ;;  %v8178_v22 = vpop.f32.mrf.mxu0  ;;  %v13031_v42 = vld [vmem:[%s15799_s11 + $0x241] sm:$0xff] }
 0x347   : > { %v7788_v17 = vpop.f32.mrf.mxu1 }
 0x348   : > { %v19566_v53 = vadd.f32 %v15092_v8, %v7932_v60  ;;  %v7931_v39 = vadd.f32 %v7788_v17, %v19284_v41  ;;  %v15095_v32 = vpop.f32.mrf.mxu0  ;;  %15394 = vmatmul.mubr.msk.f32.gmra.mxu0 %vm283_vm1, %v13092_v49  ;;  %v13030_v8 = vld [vmem:[%s15799_s11 + $0x231] sm:$0xff] }
 0x349   : > { %v15045_v26 = vpop.f32.mrf.mxu1  ;;  %15344 = vmatmul.mubr.msk.f32.gmra.mxu1 %vm283_vm1, %v13026_v10  ;;  %15396 = vmatprep.mubr.msk.f32.mxu0 %vm283_vm1, %v19291_v46 }
 0x34a   : > { %v19571_v14 = vadd.f32 %v8178_v22, %v7931_v39  ;;  %v7934_v45 = vadd.f32 %v15045_v26, %v19296_v29  ;;  %15346 = vmatprep.mubr.msk.f32.mxu1 %vm283_vm1, %v13027_v19  ;;  %v8188_v41 = vpop.f32.mrf.mxu0 }
 0x34b   : > { %v7798_v56 = vpop.f32.mrf.mxu1 }
 0x34c   : > { %v19579_v23 = vadd.f32 %v15095_v32, %v7934_v45  ;;  %v7933_v4 = vadd.f32 %v7798_v56, %v19303_v5  ;;  %v15098_v31 = vpop.f32.mrf.mxu0  ;;  %15397 = vmatmul.mubr.msk.f32.gmra.mxu0 %vm283_vm1, %v19294_v57 }
 0x34d   : > { %v15048_v0 = vpop.f32.mrf.mxu1  ;;  %15347 = vmatmul.mubr.msk.f32.gmra.mxu1 %vm283_vm1, %v13028_v61  ;;  %15399 = vmatprep.mubr.msk.f32.mxu0 %vm283_vm1, %v19311_v35  ;;  %v13032_v35 = vld [vmem:[%s15799_s11 + $0x251] sm:$0xff] }
 0x34e   : > { %v19585_v29 = vadd.f32 %v8188_v41, %v7933_v4  ;;  %v7936_v46 = vadd.f32 %v15048_v0, %v19316_v63  ;;  %15349 = vmatprep.mubr.msk.f32.mxu1 %vm283_vm1, %v13029_v6  ;;  %v8198_v5 = vpop.f32.mrf.mxu0  ;;  %v13034_v61 = vld [vmem:[%s15799_s11 + $0x271] sm:$0xff]  ;;  %v13035_v6 = vld [vmem:[%s15799_s11 + $0x2a1] sm:$0xff] }
 0x34f   : > { %v7808_v60 = vpop.f32.mrf.mxu1 }
 0x350   : > { %v19593_v10 = vadd.f32 %v15098_v31, %v7936_v46  ;;  %v7935_v49 = vadd.f32 %v7808_v60, %v19323_v28  ;;  %v15101_v57 = vpop.f32.mrf.mxu0  ;;  %15400 = vmatmul.mubr.msk.f32.gmra.mxu0 %vm283_vm1, %v19314_v36  ;;  %v13036_v46 = vld [vmem:[%s15799_s11 + $0x2b1] sm:$0xff]  ;;  %v13037_v60 = vld [vmem:[%s15799_s11 + $0x2c1] sm:$0xff] }
 0x351   : > { %v15051_v17 = vpop.f32.mrf.mxu1  ;;  %15350 = vmatmul.mubr.msk.f32.gmra.mxu1 %vm283_vm1, %v13030_v8  ;;  %15402 = vmatprep.mubr.msk.f32.mxu0 %vm283_vm1, %v19331_v47  ;;  %v20681_v47 = vld [vmem:[#allocation10_spill] sm:$0xff] }
 0x352   : > { %v19599_v63 = vadd.f32 %v8198_v5, %v7935_v49  ;;  %v7938_v22 = vadd.f32 %v15051_v17, %v19336_v52  ;;  %15352 = vmatprep.mubr.msk.f32.mxu1 %vm283_vm1, %v13031_v42  ;;  %v8208_v19 = vpop.f32.mrf.mxu0 }
 0x353   : > { %v7818_v28 = vpop.f32.mrf.mxu1 }
 0x354   : > { %v19606_v39 = vadd.f32 %v15101_v57, %v7938_v22  ;;  %v7937_v26 = vadd.f32 %v7818_v28, %v19343_v1  ;;  %v15104_v32 = vpop.f32.mrf.mxu0  ;;  %15403 = vmatmul.mubr.msk.f32.gmra.mxu0 %vm283_vm1, %v19334_v55  ;;  %v13100_v1 = vld [vmem:[%s15799_s11 + $0x272] sm:$0xff] }
 0x355   : > { %v15054_v36 = vpop.f32.mrf.mxu1  ;;  %15353 = vmatmul.mubr.msk.f32.gmra.mxu1 %vm283_vm1, %v13032_v35  ;;  %15405 = vmatprep.mubr.msk.f32.mxu0 %vm283_vm1, %v19351_v11  ;;  %v13038_v57 = vld [vmem:[%s15799_s11 + $0x2d1] sm:$0xff]  ;;  %v13039_v35 = vld [vmem:[%s15799_s11 + $0x2e1] sm:$0xff] }
 0x356   : > { %v19612_v52 = vadd.f32 %v8208_v19, %v7937_v26  ;;  %v7940_v45 = vadd.f32 %v15054_v36, %v19355_v3  ;;  %15355 = vmatprep.mubr.msk.f32.mxu1 %vm283_vm1, %v20681_v47  ;;  %v8218_v41 = vpop.f32.mrf.mxu0  ;;  %v20682_v19 = vld [vmem:[#allocation5_spill] sm:$0xff] }
 0x357   : > { %v7828_v56 = vpop.f32.mrf.mxu1 }
 0x358   : > { %v19622_v4 = vadd.f32 %v15104_v32, %v7940_v45  ;;  %v7939_v55 = vadd.f32 %v7828_v56, %v19361_v34  ;;  %v15107_v31 = vpop.f32.mrf.mxu0  ;;  %15406 = vmatmul.mubr.msk.f32.gmra.mxu0 %vm283_vm1, %v13100_v1  ;;  %v20683_v32 = vld [vmem:[#allocation25_spill] sm:$0xff]  ;;  %v20684_v45 = vld [vmem:[#allocation6_spill] sm:$0xff] }
 0x359   : > { %v15057_v0 = vpop.f32.mrf.mxu1  ;;  %15356 = vmatmul.mubr.msk.f32.gmra.mxu1 %vm283_vm1, %v13034_v61  ;;  %15408 = vmatprep.mubr.msk.f32.mxu0 %vm283_vm1, %v19368_v51  ;;  %v20685_v61 = vld [vmem:[#allocation18_spill] sm:$0xff] }
 0x35a   : > { %v19627_v3 = vadd.f32 %v8218_v41, %v7939_v55  ;;  %v7942_v11 = vadd.f32 %v15057_v0, %v19373_v24  ;;  %15358 = vmatprep.mubr.msk.f32.mxu1 %vm283_vm1, %v13035_v6  ;;  %v8228_v34 = vpop.f32.mrf.mxu0 }
 0x35b   : > { %v7838_v8 = vpop.f32.mrf.mxu1 }
 0x35c   : > { %v19635_v5 = vadd.f32 %v15107_v31, %v7942_v11  ;;  %v7941_v42 = vadd.f32 %v7838_v8, %v19380_v15  ;;  %v15110_v17 = vpop.f32.mrf.mxu0  ;;  %15409 = vmatmul.mubr.msk.f32.gmra.mxu0 %vm283_vm1, %v19371_v37  ;;  %v20686_v31 = vld [vmem:[#allocation7_spill] sm:$0xff]  ;;  %v20687_v8 = vld [vmem:[#allocation21_spill] sm:$0xff] }
 0x35d   : > { %v15060_v49 = vpop.f32.mrf.mxu1  ;;  %15359 = vmatmul.mubr.msk.f32.gmra.mxu1 %vm283_vm1, %v13036_v46  ;;  %15411 = vmatprep.mubr.msk.f32.mxu0 %vm283_vm1, %v19388_v7  ;;  %v13040_v7 = vld [vmem:[%s15799_s11 + $0x2f1] sm:$0xff] }
 0x35e   : > { %v19641_v24 = vadd.f32 %v8228_v34, %v7941_v42  ;;  %v7944_v51 = vadd.f32 %v15060_v49, %v19393_v59  ;;  %15361 = vmatprep.mubr.msk.f32.mxu1 %vm283_vm1, %v13037_v60  ;;  %v8238_v15 = vpop.f32.mrf.mxu0  ;;  %v13042_v34 = vld [vmem:[%s15799_s11 + $0x311] sm:$0xff] }
 0x35f   : > { %v7848_v22 = vpop.f32.mrf.mxu1  ;;  %v20688_v60 = vld [vmem:[#allocation8_spill] sm:$0xff] }
 0x360   : > { %v19649_v28 = vadd.f32 %v15110_v17, %v7944_v51  ;;  %v7943_v26 = vadd.f32 %v7848_v22, %v20682_v19  ;;  %v15113_v37 = vpop.f32.mrf.mxu0  ;;  %15412 = vmatmul.mubr.msk.f32.gmra.mxu0 %vm283_vm1, %v20683_v32  ;;  %v13043_v17 = vld [vmem:[%s15799_s11 + $0x341] sm:$0xff]  ;;  %v13044_v19 = vld [vmem:[%s15799_s11 + $0x351] sm:$0xff] }
 0x361   : > { %v15063_v36 = vpop.f32.mrf.mxu1  ;;  %15362 = vmatmul.mubr.msk.f32.gmra.mxu1 %vm283_vm1, %v13038_v57  ;;  %15414 = vmatprep.mubr.msk.f32.mxu0 %vm283_vm1, %v20685_v61 }
 0x362   : > { %v19655_v59 = vadd.f32 %v8238_v15, %v7943_v26  ;;  %v7946_v47 = vadd.f32 %v15063_v36, %v20684_v45  ;;  %15364 = vmatprep.mubr.msk.f32.mxu1 %vm283_vm1, %v13039_v35  ;;  %v8248_v56 = vpop.f32.mrf.mxu0  ;;  %v13045_v36 = vld [vmem:[%s15799_s11 + $0x361] sm:$0xff] }
 0x363   : > { %v7858_v1 = vpop.f32.mrf.mxu1 }
 0x364   : > { %v19662_v41 = vadd.f32 %v15113_v37, %v7946_v47  ;;  %v7945_v6 = vadd.f32 %v7858_v1, %v19420_v18  ;;  %v15116_v0 = vpop.f32.mrf.mxu0  ;;  %15415 = vmatmul.mubr.msk.f32.gmra.mxu0 %vm283_vm1, %v20686_v31  ;;  %v13108_v18 = vld [vmem:[%s15799_s11 + $0x312] sm:$0xff]  ;;  %v13047_v1 = vld [vmem:[%s15799_s11 + $0x381] sm:$0xff] }
 0x365   : > { %v15066_v55 = vpop.f32.mrf.mxu1  ;;  %15365 = vmatmul.mubr.msk.f32.gmra.mxu1 %vm283_vm1, %v13040_v7  ;;  %15417 = vmatprep.mubr.msk.f32.mxu0 %vm283_vm1, %v20688_v60 }
 0x366   : > { %v19668_v11 = vadd.f32 %v8248_v56, %v7945_v6  ;;  %v7948_v46 = vadd.f32 %v15066_v55, %v19432_v44  ;;  %15367 = vmatprep.mubr.msk.f32.mxu1 %vm283_vm1, %v20687_v8  ;;  %v8258_v49 = vpop.f32.mrf.mxu0 }
 0x367   : > { %v7868_v42 = vpop.f32.mrf.mxu1 }
 0x368   : > { %v19678_v51 = vadd.f32 %v15116_v0, %v7948_v46  ;;  %v7947_v57 = vadd.f32 %v7868_v42, %v19438_v54  ;;  %v15119_v15 = vpop.f32.mrf.mxu0  ;;  %15418 = vmatmul.mubr.msk.f32.gmra.mxu0 %vm283_vm1, %v13108_v18  ;;  %v20689_v0 = vld [vmem:[#allocation16_spill] sm:$0xff]  ;;  %v20690_v46 = vld [vmem:[#allocation29_spill] sm:$0xff] }
 0x369   : > { %v15069_v22 = vpop.f32.mrf.mxu1  ;;  %15368 = vmatmul.mubr.msk.f32.gmra.mxu1 %vm283_vm1, %v13042_v34  ;;  %15420 = vmatprep.mubr.msk.f32.mxu0 %vm283_vm1, %v19445_v21  ;;  %v13046_v21 = vld [vmem:[%s15799_s11 + $0x371] sm:$0xff] }
 0x36a   : > { %v19683_v44 = vadd.f32 %v8258_v49, %v7947_v57  ;;  %v7950_v35 = vadd.f32 %v15069_v22, %v19450_v30  ;;  %15370 = vmatprep.mubr.msk.f32.mxu1 %vm283_vm1, %v13043_v17  ;;  %v8268_v54 = vpop.f32.mrf.mxu0  ;;  %v20691_v17 = vld [vmem:[#allocation28_spill] sm:$0xff]  ;;  %v20692_v22 = vld [vmem:[#allocation9_spill] sm:$0xff] }
 0x36b   : > { %v7878_v26 = vpop.f32.mrf.mxu1  ;;  %v13050_v57 = vld [vmem:[%s15799_s11 + $0x3b1] sm:$0xff] }
 0x36c   : > { %v19691_v37 = vadd.f32 %v15119_v15, %v7950_v35  ;;  %v7949_v32 = vadd.f32 %v7878_v26, %v19457_v33  ;;  %v15122_v47 = vpop.f32.mrf.mxu0  ;;  %15421 = vmatmul.mubr.msk.f32.gmra.mxu0 %vm283_vm1, %v19448_v9  ;;  %v13116_v15 = vld [vmem:[%s15799_s11 + $0x3b2] sm:$0xff] }
 0x36d   : > { %v15072_v45 = vpop.f32.mrf.mxu1  ;;  %15371 = vmatmul.mubr.msk.f32.gmra.mxu1 %vm283_vm1, %v13044_v19  ;;  %15423 = vmatprep.mubr.msk.f32.mxu0 %vm283_vm1, %v19465_v2  ;;  %v13048_v2 = vld [vmem:[%s15799_s11 + $0x391] sm:$0xff]  ;;  %s15642_s11 = scalar_lea.vmem %s15641_s14, 8192 }
 0x36e   : > { %v19697_v30 = vadd.f32 %v8268_v54, %v7949_v32  ;;  %v7952_v7 = vadd.f32 %v15072_v45, %v19470_v16  ;;  %15373 = vmatprep.mubr.msk.f32.mxu1 %vm283_vm1, %v13045_v36  ;;  %v8278_v33 = vpop.f32.mrf.mxu0  ;;  %p15644_p1 = scmp.lt.s32.totalorder %s15642_s11, %s15636_s12 }
 0x36f   : > { %v7888_v61 = vpop.f32.mrf.mxu1 }
 0x370   : > { %v19705_v56 = vadd.f32 %v15122_v47, %v7952_v7  ;;  %v7951_v6 = vadd.f32 %v7888_v61, %v19477_v62  ;;  %v15125_v9 = vpop.f32.mrf.mxu0  ;;  %15424 = vmatmul.mubr.msk.f32.gmra.mxu0 %vm283_vm1, %v19468_v43  ;;  %p15645_p2 = por %p15644_p1, %p15643_p0 }
 0x371   : > { %v15075_v55 = vpop.f32.mrf.mxu1  ;;  %15374 = vmatmul.mubr.msk.f32.gmra.mxu1 %vm283_vm1, %v13046_v21  ;;  %15426 = vmatprep.mubr.msk.f32.mxu0 %vm283_vm1, %v20690_v46 }
 0x372   : > { %v19711_v16 = vadd.f32 %v8278_v33, %v7951_v6  ;;  %v7954_v31 = vadd.f32 %v15075_v55, %v20689_v0  ;;  %15376 = vmatprep.mubr.msk.f32.mxu1 %vm283_vm1, %v13047_v1  ;;  %v8288_v8 = vpop.f32.mrf.mxu0  ;;  %p15646_p3 = pnand %p15645_p2, %p15639_p13 }
 0x373   : > { %v7898_v62 = vpop.f32.mrf.mxu1 }
 0x374   : > { %v19718_v34 = vadd.f32 %v15125_v9, %v7954_v31  ;;  %v7953_v60 = vadd.f32 %v7898_v62, %v19497_v27  ;;  %v15128_v43 = vpop.f32.mrf.mxu0  ;;  %15427 = vmatmul.mubr.msk.f32.gmra.mxu0 %vm283_vm1, %v19488_v48  ;;  %v20479_v62 = vmov 1  }
 0x375   : > { %v15078_v18 = vpop.f32.mrf.mxu1  ;;  %15377 = vmatmul.mubr.msk.f32.gmra.mxu1 %vm283_vm1, %v13048_v2  ;;  %15429 = vmatprep.mubr.msk.f32.mxu0 %vm283_vm1, %v20692_v22 }
 0x376   : > { %v19724_v42 = vadd.f32 %v8288_v8, %v7953_v60  ;;  %v7956_v49 = vadd.f32 %v15078_v18, %v19509_v50  ;;  %15379 = vmatprep.mubr.msk.f32.mxu1 %vm283_vm1, %v20691_v17  ;;  %v8298_v35 = vpop.f32.mrf.mxu0  ;;  %15478 = vset.pattern.permute.xlu1 %v20479_v62 }
 0x377   : > { %v7908_v27 = vpop.f32.mrf.mxu1  ;;  %15479 = vset.pattern.permute.xlu0 %v20479_v62 }
 0x378   : > { %v19733_v19 = vadd.f32 %v15128_v43, %v7956_v49  ;;  %v7955_v26 = vadd.f32 %v7908_v27, %v19515_v38  ;;  %v15131_v48 = vpop.f32.mrf.mxu0  ;;  %15430 = vmatmul.mubr.msk.f32.gmra.mxu0 %vm283_vm1, %v13116_v15 }
 0x379   : > { %v15081_v54 = vpop.f32.mrf.mxu1  ;;  %15380 = vmatmul.mubr.msk.f32.gmra.mxu1 %vm283_vm1, %v13050_v57 }
 0x37a   : > { %v19738_v50 = vadd.f32 %v8298_v35, %v7955_v26  ;;  %v7958_v36 = vadd.f32 %v15081_v54, %v19523_v25  ;;  %v8308_v45 = vpop.f32.mrf.mxu0 }
 0x37b   : > { %v7918_v32 = vpop.f32.mrf.mxu1 }
 0x37c   : > { %v19741_v47 = vadd.f32 %v15131_v48, %v7958_v36  ;;  %v7957_v7 = vadd.f32 %v7918_v32, %v19529_v13  ;;  %v15186_v61 = vpop.f32.mrf.mxu0 }
 0x37d   : > { %v15136_v21 = vpop.f32.mrf.mxu1 }
 0x37e   : > { %v19744_v33 = vadd.f32 %v8308_v45, %v7957_v7  ;;  %v8709_v38 = vadd.f32 %v15136_v21, %v19537_v12  ;;  %v8939_v6 = vpop.f32.mrf.mxu0 }
 0x37f   : > { %v8549_v1 = vpop.f32.mrf.mxu1 }
 0x380   : > { %v19747_v55 = vadd.f32 %v15186_v61, %v8709_v38  ;;  %v8708_v9 = vadd.f32 %v8549_v1, %v19543_v58  ;;  %v15189_v25 = vpop.f32.mrf.mxu0 }
 0x381   : > { %v15139_v0 = vpop.f32.mrf.mxu1 }
 0x382   : > { %v19750_v31 = vadd.f32 %v8939_v6, %v8708_v9  ;;  %v8711_v2 = vadd.f32 %v15139_v0, %v19550_v20  ;;  %v8949_v13 = vpop.f32.mrf.mxu0 }
 0x383   : > { %v8559_v46 = vpop.f32.mrf.mxu1 }
 0x384   : > { %v19755_v12 = vadd.f32 %v15189_v25, %v8711_v2  ;;  %v8710_v8 = vadd.f32 %v8559_v46, %v19556_v40  ;;  %v15192_v18 = vpop.f32.mrf.mxu0 }
 0x385   : > { %v15142_v60 = vpop.f32.mrf.mxu1 }
 0x386   : > { %v19758_v58 = vadd.f32 %v8949_v13, %v8710_v8  ;;  %v8713_v43 = vadd.f32 %v15142_v60, %v19566_v53  ;;  %v8959_v17 = vpop.f32.mrf.mxu0 }
 0x387   : > { %v8569_v49 = vpop.f32.mrf.mxu1 }
 0x388   : > { %v19761_v20 = vadd.f32 %v15192_v18, %v8713_v43  ;;  %v8712_v57 = vadd.f32 %v8569_v49, %v19571_v14  ;;  %v15195_v15 = vpop.f32.mrf.mxu0 }
 0x389   : > { %v15145_v22 = vpop.f32.mrf.mxu1 }
 0x38a   : > { %v19764_v27 = vadd.f32 %v8959_v17, %v8712_v57  ;;  %v8715_v35 = vadd.f32 %v15145_v22, %v19579_v23  ;;  %v8969_v40 = vpop.f32.mrf.mxu0 }
 0x38b   : > { %v8579_v26 = vpop.f32.mrf.mxu1 }
 0x38c   : > { %v19767_v54 = vadd.f32 %v15195_v15, %v8715_v35  ;;  %v8714_v48 = vadd.f32 %v8579_v26, %v19585_v29  ;;  %v15198_v53 = vpop.f32.mrf.mxu0 }
 0x38d   : > { %v15148_v36 = vpop.f32.mrf.mxu1 }
 0x38e   : > { %v19770_v32 = vadd.f32 %v8969_v40, %v8714_v48  ;;  %v8717_v45 = vadd.f32 %v15148_v36, %v19593_v10  ;;  %v8979_v14 = vpop.f32.mrf.mxu0 }
 0x38f   : > { %v8589_v7 = vpop.f32.mrf.mxu1 }
 0x390   : > { %v19773_v21 = vadd.f32 %v15198_v53, %v8717_v45  ;;  %v8716_v61 = vadd.f32 %v8589_v7, %v19599_v63  ;;  %v15201_v23 = vpop.f32.mrf.mxu0 }
 0x391   : > { %v15151_v38 = vpop.f32.mrf.mxu1 }
 0x392   : > { %v19776_v1 = vadd.f32 %v8979_v14, %v8716_v61  ;;  %v8719_v6 = vadd.f32 %v15151_v38, %v19606_v39  ;;  %v8989_v29 = vpop.f32.mrf.mxu0 }
 0x393   : > { %v8599_v9 = vpop.f32.mrf.mxu1 }
 0x394   : > { %v19779_v0 = vadd.f32 %v15201_v23, %v8719_v6  ;;  %v8718_v25 = vadd.f32 %v8599_v9, %v19612_v52  ;;  %v15204_v10 = vpop.f32.mrf.mxu0 }
 0x395   : > { %v15154_v2 = vpop.f32.mrf.mxu1 }
 0x396   : > { %v19782_v46 = vadd.f32 %v8989_v29, %v8718_v25  ;;  %v8721_v13 = vadd.f32 %v15154_v2, %v19622_v4  ;;  %v8999_v63 = vpop.f32.mrf.mxu0 }
 0x397   : > { %v8609_v8 = vpop.f32.mrf.mxu1 }
 0x398   : > { %20693 = vst [vmem:[#allocation17_spill] sm:$0xff] %v19782_v46  ;;  %v19785_v60 = vadd.f32 %v15204_v10, %v8721_v13  ;;  %v8720_v18 = vadd.f32 %v8609_v8, %v19627_v3  ;;  %v15207_v39 = vpop.f32.mrf.mxu0 }
 0x399   : > { %v15157_v43 = vpop.f32.mrf.mxu1 }
 0x39a   : > { %20694 = vst [vmem:[#allocation20_spill] sm:$0xff] %v19785_v60  ;;  %v19788_v49 = vadd.f32 %v8999_v63, %v8720_v18  ;;  %v8723_v17 = vadd.f32 %v15157_v43, %v19635_v5  ;;  %v9009_v52 = vpop.f32.mrf.mxu0 }
 0x39b   : > { %v8619_v57 = vpop.f32.mrf.mxu1 }
 0x39c   : > { %20695 = vst [vmem:[#allocation27_spill] sm:$0xff] %v19788_v49  ;;  %v19791_v22 = vadd.f32 %v15207_v39, %v8723_v17  ;;  %v8722_v15 = vadd.f32 %v8619_v57, %v19641_v24  ;;  %v15210_v4 = vpop.f32.mrf.mxu0 }
 0x39d   : > { %v15160_v35 = vpop.f32.mrf.mxu1 }
 0x39e   : > { %20696 = vst [vmem:[#allocation11_spill] sm:$0xff] %v19791_v22  ;;  %v19794_v26 = vadd.f32 %v9009_v52, %v8722_v15  ;;  %v8725_v40 = vadd.f32 %v15160_v35, %v19649_v28  ;;  %v9019_v3 = vpop.f32.mrf.mxu0 }
 0x39f   : > { %v8629_v48 = vpop.f32.mrf.mxu1 }
 0x3a0   : > { %20697 = vst [vmem:[#allocation12_spill] sm:$0xff] %v19794_v26  ;;  %v19797_v36 = vadd.f32 %v15210_v4, %v8725_v40  ;;  %v8724_v53 = vadd.f32 %v8629_v48, %v19655_v59  ;;  %v15213_v5 = vpop.f32.mrf.mxu0 }
 0x3a1   : > { %v15163_v45 = vpop.f32.mrf.mxu1 }
 0x3a2   : > { %v19800_v7 = vadd.f32 %v9019_v3, %v8724_v53  ;;  %v8727_v14 = vadd.f32 %v15163_v45, %v19662_v41  ;;  %v9029_v24 = vpop.f32.mrf.mxu0 }
 0x3a3   : > { %v8639_v61 = vpop.f32.mrf.mxu1 }
 0x3a4   : > { %20698 = vst [vmem:[#allocation13_spill] sm:$0xff] %v19800_v7  ;;  %v19803_v38 = vadd.f32 %v15213_v5, %v8727_v14  ;;  %v8726_v23 = vadd.f32 %v8639_v61, %v19668_v11  ;;  %v15216_v28 = vpop.f32.mrf.mxu0 }
 0x3a5   : > { %v15166_v6 = vpop.f32.mrf.mxu1 }
 0x3a6   : > { %v19806_v9 = vadd.f32 %v9029_v24, %v8726_v23  ;;  %v8729_v29 = vadd.f32 %v15166_v6, %v19678_v51  ;;  %v9039_v59 = vpop.f32.mrf.mxu0 }
 0x3a7   : > { %v8649_v25 = vpop.f32.mrf.mxu1 }
 0x3a8   : > { %v19809_v2 = vadd.f32 %v15216_v28, %v8729_v29  ;;  %v8728_v10 = vadd.f32 %v8649_v25, %v19683_v44  ;;  %v15219_v41 = vpop.f32.mrf.mxu0 }
 0x3a9   : > { %v15169_v13 = vpop.f32.mrf.mxu1 }
 0x3aa   : > { %v19812_v8 = vadd.f32 %v9039_v59, %v8728_v10  ;;  %v8731_v63 = vadd.f32 %v15169_v13, %v19691_v37  ;;  %v9049_v11 = vpop.f32.mrf.mxu0 }
 0x3ab   : > { %v8659_v18 = vpop.f32.mrf.mxu1 }
 0x3ac   : > { %v19815_v43 = vadd.f32 %v15219_v41, %v8731_v63  ;;  %v8730_v39 = vadd.f32 %v8659_v18, %v19697_v30  ;;  %v15222_v51 = vpop.f32.mrf.mxu0 }
 0x3ad   : > { %v15172_v17 = vpop.f32.mrf.mxu1 }
 0x3ae   : > { %v19818_v57 = vadd.f32 %v9049_v11, %v8730_v39  ;;  %v8733_v52 = vadd.f32 %v15172_v17, %v19705_v56  ;;  %v9059_v44 = vpop.f32.mrf.mxu0 }
 0x3af   : > { %v8669_v15 = vpop.f32.mrf.mxu1 }
 0x3b0   : > { %v19821_v35 = vadd.f32 %v15222_v51, %v8733_v52  ;;  %v8732_v4 = vadd.f32 %v8669_v15, %v19711_v16  ;;  %v15225_v37 = vpop.f32.mrf.mxu0 }
 0x3b1   : > { %v15175_v40 = vpop.f32.mrf.mxu1 }
 0x3b2   : > { %v19824_v48 = vadd.f32 %v9059_v44, %v8732_v4  ;;  %v8735_v3 = vadd.f32 %v15175_v40, %v19718_v34  ;;  %v9069_v30 = vpop.f32.mrf.mxu0 }
 0x3b3   : > { %v8679_v53 = vpop.f32.mrf.mxu1 }
 0x3b4   : > { %v19827_v45 = vadd.f32 %v15225_v37, %v8735_v3  ;;  %v8734_v5 = vadd.f32 %v8679_v53, %v19724_v42  ;;  %v15228_v56 = vpop.f32.mrf.mxu0 }
 0x3b5   : > { %v15178_v14 = vpop.f32.mrf.mxu1 }
 0x3b6   : > { %v19830_v61 = vadd.f32 %v9069_v30, %v8734_v5  ;;  %v8737_v24 = vadd.f32 %v15178_v14, %v19733_v19  ;;  %v9079_v16 = vpop.f32.mrf.mxu0 }
 0x3b7   : > { %v8689_v23 = vpop.f32.mrf.mxu1 }
 0x3b8   : > { %v19833_v6 = vadd.f32 %v15228_v56, %v8737_v24  ;;  %v8736_v28 = vadd.f32 %v8689_v23, %v19738_v50  ;;  %v15231_v34 = vpop.f32.mrf.mxu0 }
 0x3b9   : > { %v15181_v29 = vpop.f32.mrf.mxu1 }
 0x3ba   : > { %v19836_v25 = vadd.f32 %v9079_v16, %v8736_v28  ;;  %v8739_v59 = vadd.f32 %v15181_v29, %v19741_v47  ;;  %v9089_v42 = vpop.f32.mrf.mxu0 }
 0x3bb   : > { %v8699_v10 = vpop.f32.mrf.mxu1 }
 0x3bc   : > { %v19839_v13 = vadd.f32 %v15231_v34, %v8739_v59  ;;  %v8738_v41 = vadd.f32 %v8699_v10, %v19744_v33  ;;  %v19844_v19 = vpop.f32.mrf.mxu0 }
 0x3bd   : > { %v19842_v63 = vpop.f32.mrf.mxu1 }
 0x3be   : > { %v19846_v18 = vadd.f32 %v9089_v42, %v8738_v41  ;;  %v19850_v50 = vpop.f32.mrf.mxu0 }
 0x3bf   : > { %v19848_v11 = vpop.f32.mrf.mxu1 }
 0x3c0   : > { %v19854_v17 = vpop.f32.mrf.mxu0 }
 0x3c1   : > { %v19852_v39 = vpop.f32.mrf.mxu1 }
 0x3c2   : > { %v19858_v51 = vpop.f32.mrf.mxu0 }
 0x3c3   : > { %v19856_v47 = vpop.f32.mrf.mxu1 }
 0x3c4   : > { %v19862_v33 = vpop.f32.mrf.mxu0 }
 0x3c5   : > { %v19860_v52 = vpop.f32.mrf.mxu1 }
 0x3c6   : > { %v19866_v44 = vpop.f32.mrf.mxu0 }
 0x3c7   : > { %v19864_v15 = vpop.f32.mrf.mxu1 }
 0x3c8   : > { %v19870_v40 = vpop.f32.mrf.mxu0 }
 0x3c9   : > { %v19868_v4 = vpop.f32.mrf.mxu1 }
 0x3ca   : > { %v19874_v3 = vpop.f32.mrf.mxu0 }
 0x3cb   : > { %v19872_v37 = vpop.f32.mrf.mxu1 }
 0x3cc   : > { %v19878_v30 = vpop.f32.mrf.mxu0 }
 0x3cd   : > { %v19876_v53 = vpop.f32.mrf.mxu1 }
 0x3ce   : > { %v19882_v14 = vpop.f32.mrf.mxu0 }
 0x3cf   : > { %v19880_v5 = vpop.f32.mrf.mxu1 }
 0x3d0   : > { %v19886_v24 = vpop.f32.mrf.mxu0 }
 0x3d1   : > { %v19884_v56 = vpop.f32.mrf.mxu1 }
 0x3d2   : > { %v19890_v16 = vpop.f32.mrf.mxu0 }
 0x3d3   : > { %v19888_v23 = vpop.f32.mrf.mxu1  ;;  %20700 = vst [vmem:[#allocation14_spill] sm:$0xff] %v19890_v16 }
 0x3d4   : > { %20699 = vst [vmem:[#allocation15_spill] sm:$0xff] %v19888_v23  ;;  %v19894_v29 = vpop.f32.mrf.mxu0 }
 0x3d5   : > { %v19892_v28 = vpop.f32.mrf.mxu1  ;;  %20702 = vst [vmem:[#allocation22_spill] sm:$0xff] %v19894_v29 }
 0x3d6   : > { %20701 = vst [vmem:[#allocation23_spill] sm:$0xff] %v19892_v28  ;;  %v19898_v59 = vpop.f32.mrf.mxu0 }
 0x3d7   : > { %v19896_v34 = vpop.f32.mrf.mxu1  ;;  %20704 = vst [vmem:[#allocation24_spill] sm:$0xff] %v19898_v59 }
 0x3d8   : > { %20703 = vst [vmem:[#allocation26_spill] sm:$0xff] %v19896_v34  ;;  %v19902_v42 = vpop.f32.mrf.mxu0 }
 0x3d9   : > { %v19900_v10 = vpop.f32.mrf.mxu1  ;;  %20706 = vst [vmem:[#allocation10_spill] sm:$0xff] %v19902_v42 }
 0x3da   : > { %20705 = vst [vmem:[#allocation19_spill] sm:$0xff] %v19900_v10  ;;  %v19906_v62 = vpop.f32.mrf.mxu0 }
 0x3db   : > { %v19904_v41 = vpop.f32.mrf.mxu1  ;;  %20708 = vst [vmem:[#allocation25_spill] sm:$0xff] %v19906_v62 }
 0x3dc   : > { %20707 = vst [vmem:[#allocation5_spill] sm:$0xff] %v19904_v41  ;;  %v15310_v26 = vpop.f32.mrf.mxu0 }
 0x3dd   : > { %v15260_v7 = vpop.f32.mrf.mxu1 }
 0x3de   : > { %v9505_v22 = vadd.f32 %v15260_v7, %v19797_v36  ;;  %v19911_v49 = vpop.f32.mrf.mxu0 }
 0x3df   : > { %v19909_v16 = vpop.f32.mrf.mxu1  ;;  %20709 = vst [vmem:[#allocation6_spill] sm:$0xff] %v19911_v49 }
 0x3e0   : > { %v19913_v29 = vadd.f32 %v15310_v26, %v9505_v22  ;;  %v15313_v59 = vpop.f32.mrf.mxu0 }
 0x3e1   : > { %v15263_v34 = vpop.f32.mrf.mxu1 }
 0x3e2   : > { %20710 = vst [vmem:[#allocation18_spill] sm:$0xff] %v19913_v29  ;;  %v9507_v10 = vadd.f32 %v15263_v34, %v19803_v38  ;;  %v9810_v42 = vpop.f32.mrf.mxu0 }
 0x3e3   : > { %v9419_v28 = vpop.f32.mrf.mxu1 }
 0x3e4   : > { %v19916_v60 = vadd.f32 %v15313_v59, %v9507_v10  ;;  %v9506_v62 = vadd.f32 %v9419_v28, %v19806_v9  ;;  %v15316_v23 = vpop.f32.mrf.mxu0 }
 0x3e5   : > { %v15266_v41 = vpop.f32.mrf.mxu1 }
 0x3e6   : > { %v19919_v46 = vadd.f32 %v9810_v42, %v9506_v62  ;;  %v9509_v36 = vadd.f32 %v15266_v41, %v19809_v2  ;;  %v9820_v49 = vpop.f32.mrf.mxu0 }
 0x3e7   : > { %v9429_v7 = vpop.f32.mrf.mxu1 }
 0x3e8   : > { %v19922_v22 = vadd.f32 %v15316_v23, %v9509_v36  ;;  %v9508_v26 = vadd.f32 %v9429_v7, %v19812_v8  ;;  %v15319_v38 = vpop.f32.mrf.mxu0 }
 0x3e9   : > { %v15269_v29 = vpop.f32.mrf.mxu1 }
 0x3ea   : > { %v19925_v34 = vadd.f32 %v9820_v49, %v9508_v26  ;;  %v9511_v59 = vadd.f32 %v15269_v29, %v19815_v43  ;;  %v9830_v9 = vpop.f32.mrf.mxu0 }
 0x3eb   : > { %v9439_v10 = vpop.f32.mrf.mxu1 }
 0x3ec   : > { %v19928_v28 = vadd.f32 %v15319_v38, %v9511_v59  ;;  %v9510_v62 = vadd.f32 %v9439_v10, %v19818_v57  ;;  %v15322_v2 = vpop.f32.mrf.mxu0 }
 0x3ed   : > { %v15272_v42 = vpop.f32.mrf.mxu1 }
 0x3ee   : > { %v19931_v41 = vadd.f32 %v9830_v9, %v9510_v62  ;;  %v9513_v23 = vadd.f32 %v15272_v42, %v19821_v35  ;;  %v9840_v8 = vpop.f32.mrf.mxu0 }
 0x3ef   : > { %v9449_v36 = vpop.f32.mrf.mxu1 }
 0x3f0   : > { %v19934_v7 = vadd.f32 %v15322_v2, %v9513_v23  ;;  %v9512_v49 = vadd.f32 %v9449_v36, %v19824_v48  ;;  %v15325_v43 = vpop.f32.mrf.mxu0  ;;  %v9489_v36 = vadd.f32 %v19842_v63, %v19747_v55  ;;  %v9491_v55 = vadd.f32 %v19852_v39, %v19755_v12  ;;  %v19972_v12 = vld [vmem:[%s20388_s3] ss:$0 sm:$0xff] }
 0x3f1   : > { %v15275_v26 = vpop.f32.mrf.mxu1 }
 0x3f2   : > { %v19937_v29 = vadd.f32 %v9840_v8, %v9512_v49  ;;  %v9515_v38 = vadd.f32 %v15275_v26, %v19827_v45  ;;  %v9850_v57 = vpop.f32.mrf.mxu0 }
 0x3f3   : > { %v9459_v59 = vpop.f32.mrf.mxu1 }
 0x3f4   : > { %v19940_v10 = vadd.f32 %v15325_v43, %v9515_v38  ;;  %v9514_v9 = vadd.f32 %v9459_v59, %v19830_v61  ;;  %v15328_v35 = vpop.f32.mrf.mxu0  ;;  %v9488_v61 = vadd.f32 %v19848_v11, %v19750_v31  ;;  %v9490_v31 = vadd.f32 %v19856_v47, %v19758_v58 }
 0x3f5   : > { %v15278_v62 = vpop.f32.mrf.mxu1  ;;  %v9492_v58 = vadd.f32 %v19864_v15, %v19764_v27  ;;  %v9495_v15 = vadd.f32 %v19868_v4, %v19767_v54 }
 0x3f6   : > { %v19943_v42 = vadd.f32 %v9850_v57, %v9514_v9  ;;  %v9517_v2 = vadd.f32 %v15278_v62, %v19833_v6  ;;  %v9860_v48 = vpop.f32.mrf.mxu0  ;;  %v9880_v57 = vadd.f32 %v19844_v19, %v9489_v36  ;;  %v9493_v19 = vadd.f32 %v19860_v52, %v19761_v20 }
 0x3f7   : > { %v9469_v23 = vpop.f32.mrf.mxu1  ;;  %v9881_v36 = vadd.f32 %v19858_v51, %v9490_v31  ;;  %v9883_v27 = vadd.f32 %v19866_v44, %v9492_v58  ;;  %v9494_v51 = vadd.f32 %v19872_v37, %v19770_v32  ;;  %v9886_v32 = vadd.f32 %v19870_v40, %v9495_v15 }
 0x3f8   : > { %v19948_v8 = vadd.f32 %v15328_v35, %v9517_v2  ;;  %v9516_v45 = vadd.f32 %v9469_v23, %v19836_v25  ;;  %v15331_v26 = vpop.f32.mrf.mxu0  ;;  %v9879_v35 = vadd.f32 %v19850_v50, %v9488_v61 }
 0x3f9   : > { %v15281_v49 = vpop.f32.mrf.mxu1  ;;  %v9885_v37 = vadd.f32 %v19874_v3, %v9494_v51 }
 0x3fa   : > { %v19953_v43 = vadd.f32 %v9860_v48, %v9516_v45  ;;  %v9519_v38 = vadd.f32 %v15281_v49, %v19839_v13  ;;  %v9870_v6 = vpop.f32.mrf.mxu0  ;;  %v9884_v49 = vadd.f32 %v19862_v33, %v9493_v19 }
 0x3fb   : > { %v9479_v59 = vpop.f32.mrf.mxu1 }
 0x3fc   : > { %v19959_v63 = vadd.f32 %v15331_v26, %v9519_v38  ;;  %v9518_v25 = vadd.f32 %v9479_v59, %v19846_v18  ;;  %v15386_v62 = vpop.f32.mrf.mxu0  ;;  %v9882_v18 = vadd.f32 %v19854_v17, %v9491_v55 }
 0x3fd   : > { %v15336_v9 = vpop.f32.mrf.mxu1 }
 0x3fe   : > { %v19965_v11 = vadd.f32 %v9870_v6, %v9518_v25  ;;  %v10270_v13 = vadd.f32 %v15336_v9, %v9880_v57  ;;  %v10500_v23 = vpop.f32.mrf.mxu0 }
 0x3ff   : > { %v10110_v2 = vpop.f32.mrf.mxu1 }
 0x400   : > { %v10660_v39 = vadd.f32 %v15386_v62, %v10270_v13  ;;  %v10269_v50 = vadd.f32 %v10110_v2, %v9879_v35  ;;  %v15389_v48 = vpop.f32.mrf.mxu0  ;;  %v9497_v62 = vadd.f32 %v19876_v53, %v19773_v21  ;;  %v9499_v21 = vadd.f32 %v19884_v56, %v19779_v0  ;;  %v20711_v56 = vld [vmem:[#allocation17_spill] sm:$0xff] }
 0x401   : > { %v15339_v47 = vpop.f32.mrf.mxu1 }
 0x402   : > { %v10659_v45 = vadd.f32 %v10500_v23, %v10269_v50  ;;  %v10272_v20 = vadd.f32 %v15339_v47, %v9882_v18  ;;  %v10699_v52 = vadd.f32 %v19972_v12, %v10660_v39  ;;  %v10510_v61 = vpop.f32.mrf.mxu0  ;;  %v9496_v23 = vadd.f32 %v19880_v5, %v19776_v1 }
 0x403   : > { %v10120_v26 = vpop.f32.mrf.mxu1  ;;  %v9888_v40 = vadd.f32 %v19878_v30, %v9497_v62  ;;  %v9890_v0 = vadd.f32 %v19886_v24, %v9499_v21  ;;  %v20716_v24 = vld [vmem:[#allocation26_spill] sm:$0xff] }
 0x404   : > { %v10662_v38 = vadd.f32 %v15389_v48, %v10272_v20  ;;  %v10271_v59 = vadd.f32 %v10120_v26, %v9881_v36  ;;  %11153 = vperm.xlu1 %15478, %v10699_v52   ;;  %v13153_v17 = vmul.f32 -1.442695, %v10699_v52  ;;  %v10698_v6 = vadd.f32 %v19972_v12, %v10659_v45  ;;  %v15392_v55 = vpop.f32.mrf.mxu0  ;;  %v20712_v26 = vld [vmem:[#allocation15_spill] sm:$0xff] }
 0x405   : > { %v15342_v57 = vpop.f32.mrf.mxu1  ;;  %v9887_v20 = vadd.f32 %v19882_v14, %v9496_v23  ;;  %v9498_v30 = vadd.f32 %v20712_v26, %v20711_v56  ;;  %v20719_v23 = vld [vmem:[#allocation11_spill] sm:$0xff] }
 0x406   : > { %v10701_v33 = vadd.f32 %v19972_v12, %v10662_v38  ;;  %v10661_v25 = vadd.f32 %v10510_v61, %v10271_v59  ;;  %15508 = vpow2.f32 %v13153_v17  ;;  %v10274_v9 = vadd.f32 %v15342_v57, %v9884_v49  ;;  %11148 = vperm.xlu0 %15479, %v10698_v6   ;;  %v10520_v31 = vpop.f32.mrf.mxu0  ;;  %v20713_v61 = vld [vmem:[#allocation20_spill] sm:$0xff]  ;;  %v20714_v38 = vld [vmem:[#allocation23_spill] sm:$0xff] }
 0x407   : > { %v10130_v35 = vpop.f32.mrf.mxu1  ;;  %v13152_v53 = vmul.f32 -1.442695, %v10698_v6  ;;  %v9501_v59 = vadd.f32 %v20714_v38, %v20713_v61  ;;  %v20724_v61 = vld [vmem:[#allocation10_spill] sm:$0xff] }
 0x408   : > { %v13155_v44 = vmul.f32 -1.442695, %v10701_v33  ;;  %v10700_v13 = vadd.f32 %v19972_v12, %v10661_v25  ;;  %v10664_v54 = vadd.f32 %v15392_v55, %v10274_v9  ;;  %v10273_v4 = vadd.f32 %v10130_v35, %v9883_v27  ;;  %v15395_v2 = vpop.f32.mrf.mxu0 }
 0x409   : > { %v15345_v19 = vpop.f32.mrf.mxu1 }
 0x40a   : > { %15510 = vpow2.f32 %v13155_v44  ;;  %v13154_v18 = vmul.f32 -1.442695, %v10700_v13  ;;  %v10663_v39 = vadd.f32 %v10520_v31, %v10273_v4  ;;  %11158 = vperm.xlu1 %15478, %v10700_v13   ;;  %11163 = vperm.xlu0 %15479, %v10701_v33   ;;  %v10276_v50 = vadd.f32 %v15345_v19, %v9886_v32  ;;  %v10530_v47 = vpop.f32.mrf.mxu0  ;;  %v20715_v33 = vld [vmem:[#allocation27_spill] sm:$0xff]  ;;  %v20717_v31 = vld [vmem:[#allocation14_spill] sm:$0xff] }
 0x40b   : > { %v10140_v58 = vpop.f32.mrf.mxu1  ;;  %v10703_v3 = vadd.f32 %v19972_v12, %v10664_v54  ;;  %v9500_v25 = vadd.f32 %v20716_v24, %v20715_v33  ;;  %v9889_v44 = vadd.f32 %v20717_v31, %v9498_v30  ;;  %v20718_v4 = vld [vmem:[#allocation22_spill] sm:$0xff] }
 0x40c   : > { %v10702_v48 = vadd.f32 %v19972_v12, %v10663_v39  ;;  %v10275_v36 = vadd.f32 %v10140_v58, %v9885_v37  ;;  %v10666_v1 = vadd.f32 %v15395_v2, %v10276_v50  ;;  %v15398_v45 = vpop.f32.mrf.mxu0  ;;  %15512 = vpow2.f32 %v13154_v18  ;;  %v20720_v18 = vld [vmem:[#allocation19_spill] sm:$0xff] }
 0x40d   : > { %v15348_v5 = vpop.f32.mrf.mxu1  ;;  %15514 = vpow2.f32 %v13152_v53  ;;  %v9892_v32 = vadd.f32 %v20718_v4, %v9501_v59  ;;  %v13157_v37 = vmul.f32 -1.442695, %v10703_v3  ;;  %v9503_v39 = vadd.f32 %v20720_v18, %v20719_v23  ;;  %v20727_v23 = vld [vmem:[#allocation6_spill] sm:$0xff] }
 0x40e   : > { %v10665_v52 = vadd.f32 %v10530_v47, %v10275_v36  ;;  %v10278_v49 = vadd.f32 %v15348_v5, %v9888_v40  ;;  %11168 = vperm.xlu1 %15478, %v10702_v48   ;;  %11173 = vperm.xlu0 %15479, %v10703_v3   ;;  %v10540_v6 = vpop.f32.mrf.mxu0  ;;  %v10705_v27 = vadd.f32 %v19972_v12, %v10666_v1  ;;  %v20721_v40 = vld [vmem:[#allocation24_spill] sm:$0xff]  ;;  %v13156_v59 = vmul.f32 -1.442695, %v10702_v48 }
 0x40f   : > { %v10150_v17 = vpop.f32.mrf.mxu1  ;;  %v9891_v36 = vadd.f32 %v20721_v40, %v9500_v25  ;;  %v20722_v5 = vld [vmem:[#allocation12_spill] sm:$0xff]  ;;  %15516 = vpow2.f32 %v13157_v37  ;;  %v9894_v38 = vadd.f32 %v20724_v61, %v9503_v39  ;;  %v20726_v25 = vld [vmem:[#allocation25_spill] sm:$0xff] }
 0x410   : > { %v20007_v14 = vadd.f32 %v19972_v12, %v10665_v52  ;;  %v10668_v15 = vadd.f32 %v15398_v45, %v10278_v49  ;;  %v10277_v51 = vadd.f32 %v10150_v17, %v9887_v20  ;;  %v15401_v55 = vpop.f32.mrf.mxu0  ;;  %v20723_v45 = vld [vmem:[#allocation5_spill] sm:$0xff] }
 0x411   : > { %v15351_v57 = vpop.f32.mrf.mxu1  ;;  %v9502_v20 = vadd.f32 %v20723_v45, %v20722_v5 }
 0x412   : > { %v10667_v9 = vadd.f32 %v10540_v6, %v10277_v51  ;;  %v10280_v62 = vadd.f32 %v15351_v57, %v9890_v0  ;;  %11178 = vperm.xlu1 %15478, %v20007_v14   ;;  %11183 = vperm.xlu0 %15479, %v10705_v27   ;;  %v10550_v54 = vpop.f32.mrf.mxu0  ;;  %v20015_v19 = vadd.f32 %v19972_v12, %v10668_v15  ;;  %v20725_v51 = vld [vmem:[#allocation13_spill] sm:$0xff] }
 0x413   : > { %v15509_v35 = vpop.eup %15508  ;;  %v10160_v13 = vpop.f32.mrf.mxu1  ;;  %v9504_v57 = vadd.f32 %v19909_v16, %v20725_v51  ;;  %v13159_v16 = vmul.f32 -1.442695, %v10705_v27 }
 0x414   : > { %v20018_v2 = vadd.f32 %v19972_v12, %v10667_v9  ;;  %v10827_v21 = vadd.f32 1.0, %v15509_v35  ;;  %v10670_v53 = vadd.f32 %v15401_v55, %v10280_v62  ;;  %v10279_v50 = vadd.f32 %v10160_v13, %v9889_v44  ;;  %v15404_v47 = vpop.f32.mrf.mxu0 }
 0x415   : > { %v15354_v58 = vpop.f32.mrf.mxu1  ;;  %v9893_v9 = vadd.f32 %v20726_v25, %v9502_v20  ;;  %v9895_v18 = vadd.f32 %v20727_v23, %v9504_v57  ;;  %v13158_v20 = vmul.f32 -1.442695, %v20007_v14 }
 0x416   : > { %v10282_v1 = vadd.f32 %v15354_v58, %v9892_v32  ;;  %11188 = vperm.xlu1 %15478, %v20018_v2   ;;  %11193 = vperm.xlu0 %15479, %v20015_v19   ;;  %v10669_v52 = vadd.f32 %v10550_v54, %v10279_v50  ;;  %v10560_v0 = vpop.f32.mrf.mxu0  ;;  %v20028_v56 = vadd.f32 %v19972_v12, %v10670_v53  ;;  %15518 = vrcp.f32 %v10827_v21 }
 0x417   : > { %v15511_v3 = vpop.eup %15510  ;;  %v10170_v49 = vpop.f32.mrf.mxu1  ;;  %15520 = vpow2.f32 %v13156_v59 }
 0x418   : > { %v10672_v26 = vadd.f32 %v15404_v47, %v10282_v1  ;;  %v10281_v30 = vadd.f32 %v10170_v49, %v9891_v36  ;;  %v20032_v17 = vadd.f32 %v19972_v12, %v10669_v52  ;;  %v15407_v15 = vpop.f32.mrf.mxu0  ;;  %v10829_v55 = vadd.f32 1.0, %v15511_v3  ;;  %v20728_v3 = vld [vmem:[#allocation18_spill] sm:$0xff] }
 0x419   : > { %v15357_v6 = vpop.f32.mrf.mxu1  ;;  %v15513_v24 = vpop.eup %15512 }
 0x41a   : > { %v10671_v33 = vadd.f32 %v10560_v0, %v10281_v30  ;;  %11203 = vperm.xlu0 %15479, %v20028_v56   ;;  %v10284_v62 = vadd.f32 %v15357_v6, %v9894_v38  ;;  %11198 = vperm.xlu1 %15478, %v20032_v17   ;;  %v10570_v48 = vpop.f32.mrf.mxu0  ;;  %v15515_v31 = vpop.eup %15514  ;;  %v20040_v44 = vadd.f32 %v19972_v12, %v10672_v26  ;;  %15522 = vrcp.f32 %v10829_v55 }
 0x41b   : > { %v10180_v35 = vpop.f32.mrf.mxu1  ;;  %v10828_v39 = vadd.f32 1.0, %v15513_v24  ;;  %v10826_v21 = vadd.f32 1.0, %v15515_v31  ;;  %15524 = vpow2.f32 %v13159_v16  ;;  %v15699_v6 = vmov 0  }
 0x41c   : > { %v20043_v13 = vadd.f32 %v19972_v12, %v10671_v33  ;;  %v10674_v54 = vadd.f32 %v15407_v15, %v10284_v62  ;;  %v10283_v4 = vadd.f32 %v10180_v35, %v9893_v9  ;;  %v15410_v37 = vpop.f32.mrf.mxu0  ;;  %v15517_v26 = vpop.eup %15516  ;;  %v13161_v15 = vmul.f32 -1.442695, %v20015_v19 }
 0x41d   : > { %v15360_v32 = vpop.f32.mrf.mxu1  ;;  %15526 = vrcp.f32 %v10828_v39  ;;  %v10831_v57 = vadd.f32 1.0, %v15517_v26  ;;  %v20729_v31 = vmov 1  }
 0x41e   : > { %11213 = vperm.xlu0 %15479, %v20040_v44   ;;  %v10673_v53 = vadd.f32 %v10570_v48, %v10283_v4  ;;  %11208 = vperm.xlu1 %15478, %v20043_v13   ;;  %v10580_v58 = vpop.f32.mrf.mxu0  ;;  %v20049_v47 = vadd.f32 %v19972_v12, %v10674_v54  ;;  %v10286_v5 = vadd.f32 %v15360_v32, %v20728_v3  ;;  %15528 = vrcp.f32 %v10826_v21 }
 0x41f   : > { %v10190_v50 = vpop.f32.mrf.mxu1  ;;  %15530 = vpow2.f32 %v13158_v20  ;;  %v13160_v54 = vmul.f32 -1.442695, %v20018_v2 }
 0x420   : > { %v10285_v27 = vadd.f32 %v10190_v50, %v9895_v18  ;;  %v20052_v40 = vadd.f32 %v19972_v12, %v10673_v53  ;;  %v15413_v1 = vpop.f32.mrf.mxu0  ;;  %v10676_v59 = vadd.f32 %v15410_v37, %v10286_v5  ;;  %15532 = vpow2.f32 %v13161_v15 }
 0x421   : > { %v15363_v36 = vpop.f32.mrf.mxu1  ;;  %15534 = vrcp.f32 %v10831_v57 }
 0x422   : > { %v10675_v45 = vadd.f32 %v10580_v58, %v10285_v27  ;;  %11223 = vperm.xlu0 %15479, %v20049_v47   ;;  %11218 = vperm.xlu1 %15478, %v20052_v40   ;;  %v10590_v49 = vpop.f32.mrf.mxu0  ;;  %v20069_v25 = vadd.f32 %v19972_v12, %v10676_v59  ;;  %v10288_v35 = vadd.f32 %v15363_v36, %v19916_v60  ;;  %15536 = vpow2.f32 %v13160_v54 }
 0x423   : > { %v10200_v52 = vpop.f32.mrf.mxu1  ;;  %v15519_v38 = vpop.eup %15518 }
 0x424   : > { %v20059_v0 = vadd.f32 %v19972_v12, %v10675_v45  ;;  %v20061_v61 = vpop.f32.mrf.mxu0  ;;  %v15521_v24 = vpop.eup %15520  ;;  %v10287_v19 = vadd.f32 %v10200_v52, %v19919_v46  ;;  %v10678_v21 = vadd.f32 %v15413_v1, %v10288_v35 }
 0x425   : > { %v15366_v30 = vpop.f32.mrf.mxu1 }
 0x426   : > { %15480 = vset.pattern.permute.xlu0 %v15699_v6  ;;  %11228 = vperm.xlu1 %15478, %v20059_v0   ;;  %v20066_v51 = vpop.f32.mrf.mxu0  ;;  %v10290_v53 = vadd.f32 %v15366_v30, %v19922_v22  ;;  %v10677_v50 = vadd.f32 %v10590_v49, %v10287_v19  ;;  %v13163_v22 = vmul.f32 -1.442695, %v20028_v56  ;;  %v20098_v59 = vadd.f32 %v19972_v12, %v10678_v21 }
 0x427   : > { %v10210_v14 = vpop.f32.mrf.mxu1  ;;  %10961 = vperm.xlu0 %15480, %v15519_v38   ;;  %v15523_v62 = vpop.eup %15522 }
 0x428   : > { %v15419_v33 = vpop.f32.mrf.mxu0  ;;  %v15525_v23 = vpop.eup %15524  ;;  %v20095_v49 = vadd.f32 %v19972_v12, %v10677_v50  ;;  %v10680_v56 = vadd.f32 %v20061_v61, %v10290_v53  ;;  %v10289_v57 = vadd.f32 %v10210_v14, %v19925_v34  ;;  %v13162_v61 = vmul.f32 -1.442695, %v20032_v17 }
 0x429   : > { %v15369_v55 = vpop.f32.mrf.mxu1  ;;  %v10833_v45 = vadd.f32 1.0, %v15525_v23 }
 0x42a   : > { %v10292_v9 = vadd.f32 %v15369_v55, %v19928_v28  ;;  %15483 = vset.pattern.permute.xlu1 %v15699_v6  ;;  %v10610_v16 = vpop.f32.mrf.mxu0  ;;  %v10830_v28 = vadd.f32 1.0, %v15521_v24  ;;  %v15527_v39 = vpop.eup %15526 }
 0x42b   : > { %v10220_v48 = vpop.f32.mrf.mxu1  ;;  %15481 = vset.pattern.permute.xlu0 %v20729_v31  ;;  %10971 = vperm.xlu1 %15483, %v15523_v62   ;;  %v15529_v27 = vpop.eup %15528 }
 0x42c   : > { %v10291_v4 = vadd.f32 %v10220_v48, %v19931_v41  ;;  %11233 = vperm.xlu0 %15481, %v20069_v25   ;;  %v10682_v32 = vadd.f32 %v15419_v33, %v10292_v9  ;;  %v15422_v60 = vpop.f32.mrf.mxu0  ;;  %15538 = vrcp.f32 %v10830_v28  ;;  %v15531_v38 = vpop.eup %15530  ;;  %v20116_v48 = vadd.f32 %v19972_v12, %v10680_v56 }
 0x42d   : > { %v15372_v37 = vpop.f32.mrf.mxu1  ;;  %15540 = vpow2.f32 %v13163_v22  ;;  %v10832_v62 = vadd.f32 1.0, %v15531_v38  ;;  %v15533_v19 = vpop.eup %15532 }
 0x42e   : > { %v10294_v46 = vadd.f32 %v15372_v37, %v19934_v7  ;;  %v10681_v18 = vadd.f32 %v10610_v16, %v10291_v4  ;;  %v20082_v2 = vadd.f32 %v19972_v12, %v10682_v32  ;;  %v10620_v58 = vpop.f32.mrf.mxu0  ;;  %15542 = vrcp.f32 %v10833_v45 }
 0x42f   : > { %v10230_v41 = vpop.f32.mrf.mxu1  ;;  %10966 = vperm.xlu1 %15483, %v15527_v39   ;;  %v10679_v4 = vadd.f32 %v20066_v51, %v10289_v57  ;;  %15544 = vpow2.f32 %v13162_v61  ;;  %v13165_v37 = vmul.f32 -1.442695, %v20040_v44  ;;  %v10835_v51 = vadd.f32 1.0, %v15533_v19 }
 0x430   : > { %v20085_v36 = vadd.f32 %v19972_v12, %v10681_v18  ;;  %v10293_v3 = vadd.f32 %v10230_v41, %v19937_v29  ;;  %v10684_v5 = vadd.f32 %v15422_v60, %v10294_v46  ;;  %15482 = vset.pattern.permute.xlu0 %v15699_v6  ;;  %v15425_v1 = vpop.f32.mrf.mxu0  ;;  %15546 = vrcp.f32 %v10832_v62 }
 0x431   : > { %v15375_v7 = vpop.f32.mrf.mxu1  ;;  %10956 = vperm.xlu0 %15482, %v15529_v27   ;;  %v10718_v53 = vadd.f32 %v19972_v12, %v10679_v4  ;;  %15548 = vpow2.f32 %v13165_v37  ;;  %v13173_v38 = vmul.f32 -1.442695, %v20116_v48 }
 0x432   : > { %v20091_v20 = vadd.f32 %v19972_v12, %v10684_v5  ;;  %v10296_v52 = vadd.f32 %v15375_v7, %v19940_v10  ;;  %v10683_v29 = vadd.f32 %v10620_v58, %v10293_v3  ;;  %v10630_v30 = vpop.f32.mrf.mxu0  ;;  %15550 = vrcp.f32 %v10835_v51 }
 0x433   : > { %v10240_v26 = vpop.f32.mrf.mxu1  ;;  %15485 = vset.pattern.permute.xlu1 %v20729_v31  ;;  %v13167_v7 = vmul.f32 -1.442695, %v20049_v47  ;;  %v13168_v47 = vmul.f32 -1.442695, %v20059_v0 }
 0x434   : > { %v10295_v15 = vadd.f32 %v10240_v26, %v19943_v42  ;;  %v20105_v10 = vadd.f32 %v19972_v12, %v10683_v29  ;;  %v10686_v55 = vadd.f32 %v15425_v1, %v10296_v52  ;;  %11238 = vperm.xlu1 %15485, %v20095_v49   ;;  %v15428_v24 = vpop.f32.mrf.mxu0  ;;  %v13166_v1 = vmul.f32 -1.442695, %v20052_v40 }
 0x435   : > { %v15378_v33 = vpop.f32.mrf.mxu1  ;;  %15484 = vset.pattern.permute.xlu0 %v20729_v31  ;;  %v13171_v40 = vmul.f32 -1.442695, %v20098_v59 }
 0x436   : > { %v10298_v42 = vadd.f32 %v15378_v33, %v19948_v8  ;;  %v10685_v9 = vadd.f32 %v10630_v30, %v10295_v15  ;;  %11243 = vperm.xlu0 %15484, %v20098_v59   ;;  %v20113_v34 = vadd.f32 %v19972_v12, %v10686_v55  ;;  %v10640_v35 = vpop.f32.mrf.mxu0  ;;  %v15535_v8 = vpop.eup %15534  ;;  %v13172_v59 = vmul.f32 -1.442695, %v10718_v53 }
 0x437   : > { %v10250_v14 = vpop.f32.mrf.mxu1  ;;  %v15537_v21 = vpop.eup %15536  ;;  %v13174_v33 = vmul.f32 -1.442695, %v20085_v36 }
 0x438   : > { %v20119_v16 = vadd.f32 %v19972_v12, %v10685_v9  ;;  %v10297_v17 = vadd.f32 %v10250_v14, %v19953_v43  ;;  %v10688_v54 = vadd.f32 %v15428_v24, %v10298_v42  ;;  %15486 = vset.pattern.permute.xlu1 %v15699_v6  ;;  %v15431_v32 = vpop.f32.mrf.mxu0  ;;  %v10834_v3 = vadd.f32 1.0, %v15537_v21 }
 0x439   : > { %v15381_v28 = vpop.f32.mrf.mxu1  ;;  %10981 = vperm.xlu1 %15486, %v15535_v8   ;;  %v15539_v41 = vpop.eup %15538  ;;  %v13175_v24 = vmul.f32 -1.442695, %v20082_v2 }
 0x43a   : > { %v20126_v60 = vadd.f32 %v19972_v12, %v10688_v54  ;;  %11253 = vperm.xlu0 %15484, %v20116_v48   ;;  %v10300_v43 = vadd.f32 %v15381_v28, %v19959_v63  ;;  %v10687_v23 = vadd.f32 %v10640_v35, %v10297_v17  ;;  %v10650_v18 = vpop.f32.mrf.mxu0  ;;  %v15541_v5 = vpop.eup %15540  ;;  %v13176_v35 = vmul.f32 -1.442695, %v20105_v10 }
 0x43b   : > { %v10260_v46 = vpop.f32.mrf.mxu1  ;;  %v15543_v22 = vpop.eup %15542  ;;  %v13178_v8 = vmul.f32 -1.442695, %v20119_v16 }
 0x43c   : > { %v10299_v39 = vadd.f32 %v10260_v46, %v19965_v11  ;;  %v20133_v44 = vadd.f32 %v19972_v12, %v10687_v23  ;;  %v10690_v50 = vadd.f32 %v15431_v32, %v10300_v43  ;;  %v13164_v11 = vmul.f32 -1.442695, %v20043_v13  ;;  %v15545_v45 = vpop.eup %15544 }
 0x43d   : > { %15488 = vset.pattern.permute.xlu1 %v20729_v31  ;;  %v10837_v13 = vadd.f32 1.0, %v15541_v5  ;;  %v15547_v52 = vpop.eup %15546  ;;  %v10836_v26 = vadd.f32 1.0, %v15545_v45 }
 0x43e   : > { %v10689_v58 = vadd.f32 %v10650_v18, %v10299_v39  ;;  %15487 = vset.pattern.permute.xlu0 %v15699_v6  ;;  %v20138_v63 = vadd.f32 %v19972_v12, %v10690_v50  ;;  %11248 = vperm.xlu1 %15488, %v10718_v53   ;;  %15552 = vpow2.f32 %v13164_v11  ;;  %v15549_v29 = vpop.eup %15548  ;;  %v13180_v43 = vmul.f32 -1.442695, %v20133_v44 }
 0x43f   : > { %10976 = vperm.xlu0 %15487, %v15539_v41   ;;  %15554 = vrcp.f32 %v10834_v3  ;;  %v15551_v30 = vpop.eup %15550  ;;  %v10839_v0 = vadd.f32 1.0, %v15549_v29 }
 0x440   : > { %v20142_v27 = vadd.f32 %v19972_v12, %v10689_v58  ;;  %15556 = vpow2.f32 %v13167_v7  ;;  %v13169_v12 = vmul.f32 -1.442695, %v20069_v25  ;;  %v13170_v25 = vmul.f32 -1.442695, %v20095_v49 }
 0x441   : > { %15558 = vpow2.f32 %v13166_v1  ;;  %v13183_v39 = vmul.f32 -1.442695, %v20138_v63 }
 0x442   : > { %15489 = vset.pattern.permute.xlu1 %v15699_v6  ;;  %15560 = vrcp.f32 %v10837_v13  ;;  %v13182_v18 = vmul.f32 -1.442695, %v20142_v27 }
 0x443   : > { %15490 = vset.pattern.permute.xlu0 %v20729_v31  ;;  %10991 = vperm.xlu1 %15489, %v15543_v22   ;;  %15562 = vpow2.f32 %v13169_v12 }
 0x444   : > { %11263 = vperm.xlu0 %15490, %v20082_v2   ;;  %15564 = vpow2.f32 %v13168_v47 }
 0x445   : > { %15566 = vpow2.f32 %v13171_v40 }
 0x446   : > { %15568 = vrcp.f32 %v10836_v26 }
 0x447   : > { %15492 = vset.pattern.permute.xlu1 %v20729_v31  ;;  %15570 = vpow2.f32 %v13170_v25 }
 0x448   : > { %15491 = vset.pattern.permute.xlu0 %v15699_v6  ;;  %11258 = vperm.xlu1 %15492, %v20085_v36   ;;  %15572 = vrcp.f32 %v10839_v0  ;;  %v13177_v36 = vmul.f32 -1.442695, %v20091_v20 }
 0x449   : > { %10986 = vperm.xlu0 %15491, %v15547_v52   ;;  %15574 = vpow2.f32 %v13173_v38 }
 0x44a   : > { %15576 = vpow2.f32 %v13172_v59 }
 0x44b   : > { %v15553_v56 = vpop.eup %15552 }
 0x44c   : > { %15493 = vset.pattern.permute.xlu1 %v15699_v6  ;;  %v15555_v15 = vpop.eup %15554  ;;  %v10838_v57 = vadd.f32 1.0, %v15553_v56 }
 0x44d   : > { %15494 = vset.pattern.permute.xlu0 %v20729_v31  ;;  %11001 = vperm.xlu1 %15493, %v15551_v30   ;;  %v15557_v49 = vpop.eup %15556 }
 0x44e   : > { %11273 = vperm.xlu0 %15494, %v20091_v20   ;;  %v15559_v55 = vpop.eup %15558  ;;  %v10841_v42 = vadd.f32 1.0, %v15557_v49  ;;  %15578 = vrcp.f32 %v10838_v57  ;;  %v13179_v20 = vmul.f32 -1.442695, %v20113_v34 }
 0x44f   : > { %v15561_v61 = vpop.eup %15560  ;;  %v10840_v62 = vadd.f32 1.0, %v15559_v55  ;;  %15580 = vpow2.f32 %v13174_v33 }
 0x450   : > { %v15563_v9 = vpop.eup %15562  ;;  %15582 = vpow2.f32 %v13175_v24 }
 0x451   : > { %15496 = vset.pattern.permute.xlu1 %v20729_v31  ;;  %v15565_v14 = vpop.eup %15564  ;;  %15584 = vrcp.f32 %v10841_v42  ;;  %v10843_v19 = vadd.f32 1.0, %v15563_v9 }
 0x452   : > { %15495 = vset.pattern.permute.xlu0 %v15699_v6  ;;  %11268 = vperm.xlu1 %15496, %v20105_v10   ;;  %v15567_v2 = vpop.eup %15566  ;;  %15586 = vrcp.f32 %v10840_v62  ;;  %v10842_v17 = vadd.f32 1.0, %v15565_v14 }
 0x453   : > { %10996 = vperm.xlu0 %15495, %v15555_v15   ;;  %v15569_v48 = vpop.eup %15568  ;;  %15588 = vpow2.f32 %v13176_v35  ;;  %v10845_v4 = vadd.f32 1.0, %v15567_v2 }
 0x454   : > { %v15571_v54 = vpop.eup %15570  ;;  %15590 = vpow2.f32 %v13177_v36 }
 0x455   : > { %v15573_v10 = vpop.eup %15572  ;;  %15592 = vrcp.f32 %v10843_v19  ;;  %v10844_v32 = vadd.f32 1.0, %v15571_v54 }
 0x456   : > { %15497 = vset.pattern.permute.xlu1 %v15699_v6  ;;  %v15575_v28 = vpop.eup %15574  ;;  %15594 = vrcp.f32 %v10842_v17 }
 0x457   : > { %15498 = vset.pattern.permute.xlu0 %v20729_v31  ;;  %11011 = vperm.xlu1 %15497, %v15561_v61   ;;  %v15577_v37 = vpop.eup %15576  ;;  %15596 = vpow2.f32 %v13178_v8 }
 0x458   : > { %11283 = vperm.xlu0 %15498, %v20113_v34   ;;  %15598 = vpow2.f32 %v13179_v20  ;;  %v10847_v34 = vadd.f32 1.0, %v15575_v28  ;;  %v10846_v23 = vadd.f32 1.0, %v15577_v37 }
 0x459   : > { %15600 = vrcp.f32 %v10845_v4 }
 0x45a   : > { %15602 = vrcp.f32 %v10844_v32 }
 0x45b   : > { %15500 = vset.pattern.permute.xlu1 %v20729_v31  ;;  %v15579_v46 = vpop.eup %15578  ;;  %15604 = vpow2.f32 %v13180_v43 }
 0x45c   : > { %15499 = vset.pattern.permute.xlu0 %v15699_v6  ;;  %11278 = vperm.xlu1 %15500, %v20119_v16   ;;  %v13181_v16 = vmul.f32 -1.442695, %v20126_v60  ;;  %v15581_v51 = vpop.eup %15580 }
 0x45d   : > { %11006 = vperm.xlu0 %15499, %v15569_v48   ;;  %v15583_v21 = vpop.eup %15582  ;;  %v10848_v50 = vadd.f32 1.0, %v15581_v51  ;;  %v10924_v51 = vld [vmem:[%s20210_s28 + $0x10] sm:$0xff] }
 0x45e   : > { %15606 = vpow2.f32 %v13181_v16  ;;  %v10849_v58 = vadd.f32 1.0, %v15583_v21  ;;  %v10922_v21 = vld [vmem:[%s20210_s28] sm:$0xff] }
 0x45f   : > { %15608 = vrcp.f32 %v10847_v34  ;;  %v10925_v34 = vld [vmem:[%s20210_s28 + $0x18] sm:$0xff] }
 0x460   : > { %15501 = vset.pattern.permute.xlu1 %v15699_v6  ;;  %15610 = vrcp.f32 %v10846_v23 }
 0x461   : > { %15502 = vset.pattern.permute.xlu0 %v20729_v31  ;;  %11021 = vperm.xlu1 %15501, %v15573_v10   ;;  %15612 = vpow2.f32 %v13182_v18 }
 0x462   : > { %11293 = vperm.xlu0 %15502, %v20126_v60   ;;  %v15585_v60 = vpop.eup %15584  ;;  %15614 = vpow2.f32 %v13183_v39 }
 0x463   : > { %v15587_v53 = vpop.eup %15586  ;;  %15616 = vrcp.f32 %v10848_v50 }
 0x464   : > { %v15589_v41 = vpop.eup %15588  ;;  %15618 = vrcp.f32 %v10849_v58 }
 0x465   : > { %15504 = vset.pattern.permute.xlu1 %v20729_v31  ;;  %v15591_v11 = vpop.eup %15590  ;;  %v10850_v22 = vadd.f32 1.0, %v15589_v41 }
 0x466   : > { %15503 = vset.pattern.permute.xlu0 %v15699_v6  ;;  %11288 = vperm.xlu1 %15504, %v20133_v44   ;;  %v15593_v3 = vpop.eup %15592  ;;  %v10851_v44 = vadd.f32 1.0, %v15591_v11 }
 0x467   : > { %11016 = vperm.xlu0 %15503, %v15579_v46   ;;  %v15595_v5 = vpop.eup %15594  ;;  %15620 = vrcp.f32 %v10850_v22  ;;  %v10927_v22 = vld [vmem:[%s20210_s28 + $0x28] sm:$0xff] }
 0x468   : > { %v15597_v7 = vpop.eup %15596  ;;  %15622 = vrcp.f32 %v10851_v44 }
 0x469   : > { %v15599_v1 = vpop.eup %15598  ;;  %v10852_v12 = vadd.f32 1.0, %v15597_v7 }
 0x46a   : > { %15505 = vset.pattern.permute.xlu1 %v15699_v6  ;;  %v15601_v13 = vpop.eup %15600  ;;  %v10853_v47 = vadd.f32 1.0, %v15599_v1 }
 0x46b   : > { %11026 = vperm.xlu0 %15503, %v15587_v53   ;;  %11031 = vperm.xlu1 %15505, %v15585_v60   ;;  %v15603_v45 = vpop.eup %15602  ;;  %15624 = vrcp.f32 %v10852_v12 }
 0x46c   : > { %v15605_v52 = vpop.eup %15604  ;;  %15626 = vrcp.f32 %v10853_v47 }
 0x46d   : > { %v15607_v6 = vpop.eup %15606  ;;  %v10854_v26 = vadd.f32 1.0, %v15605_v52 }
 0x46e   : > { %v15609_v40 = vpop.eup %15608  ;;  %v10855_v30 = vadd.f32 1.0, %v15607_v6 }
 0x46f   : > { %11036 = vperm.xlu0 %15503, %v15595_v5   ;;  %11041 = vperm.xlu1 %15505, %v15593_v3   ;;  %v15611_v29 = vpop.eup %15610  ;;  %15628 = vrcp.f32 %v10854_v26 }
 0x470   : > { %v15613_v25 = vpop.eup %15612  ;;  %15630 = vrcp.f32 %v10855_v30 }
 0x471   : > { %v15615_v0 = vpop.eup %15614  ;;  %v10856_v38 = vadd.f32 1.0, %v15613_v25 }
 0x472   : > { %v15617_v59 = vpop.eup %15616  ;;  %v10857_v56 = vadd.f32 1.0, %v15615_v0  ;;  %v10928_v0 = vld [vmem:[%s20210_s28 + $0x30] sm:$0xff] }
 0x473   : > { %11046 = vperm.xlu0 %15503, %v15603_v45   ;;  %11051 = vperm.xlu1 %15505, %v15601_v13   ;;  %v15619_v15 = vpop.eup %15618  ;;  %15632 = vrcp.f32 %v10856_v38  ;;  %v10926_v45 = vld [vmem:[%s20210_s28 + $0x20] sm:$0xff] }
 0x474   : > { %v15621_v49 = vpop.eup %15620  ;;  %15634 = vrcp.f32 %v10857_v56 }
 0x475   : > { %v15623_v57 = vpop.eup %15622 }
 0x477   : > { %11056 = vperm.xlu0 %15503, %v15611_v29   ;;  %11061 = vperm.xlu1 %15505, %v15609_v40   ;;  %v10929_v40 = vld [vmem:[%s20210_s28 + $0x38] sm:$0xff] }
 0x478   : > { %v15625_v24 = vpop.eup %15624 }
 0x479   : > { %v15627_v61 = vpop.eup %15626 }
 0x47b   : > { %11066 = vperm.xlu0 %15503, %v15617_v59   ;;  %11071 = vperm.xlu1 %15505, %v15619_v15  }
 0x47c   : > { %v15629_v62 = vpop.eup %15628 }
 0x47d   : > { %v15631_v14 = vpop.eup %15630 }
 0x47f   : > { %11076 = vperm.xlu0 %15503, %v15621_v49   ;;  %11081 = vperm.xlu1 %15505, %v15623_v57   ;;  %v11154_v55 = vpop.permute.xlu1 %11153  ;;  %v10931_v49 = vld [vmem:[%s20210_s28 + $0x48] sm:$0xff] }
 0x480   : > { %v15633_v2 = vpop.eup %15632 }
 0x481   : > { %v11149_v33 = vpop.permute.xlu0 %11148  ;;  %v15635_v19 = vpop.eup %15634 }
 0x483   : > { %11086 = vperm.xlu0 %15503, %v15625_v24   ;;  %11091 = vperm.xlu1 %15505, %v15627_v61   ;;  %v10930_v61 = vld [vmem:[%s20210_s28 + $0x40] sm:$0xff] }
 0x485   : > { %v11159_v42 = vpop.permute.xlu1 %11158  ;;  %v11164_v9 = vpop.permute.xlu0 %11163 }
 0x487   : > { %11096 = vperm.xlu0 %15503, %v15629_v62   ;;  %11101 = vperm.xlu1 %15505, %v15631_v14  }
 0x489   : > { %v11169_v35 = vpop.permute.xlu1 %11168  ;;  %v11174_v36 = vpop.permute.xlu0 %11173 }
 0x48b   : > { %11106 = vperm.xlu0 %15503, %v15633_v2   ;;  %11111 = vperm.xlu1 %15505, %v15635_v19  }
 0x48d   : > { %v20186_v48 = vpop.permute.xlu1 %11178  ;;  %v11184_v17 = vpop.permute.xlu0 %11183 }
 0x48f   : > { %15507 = vset.pattern.permute.xlu0 %v20729_v31  ;;  %15506 = vset.pattern.permute.xlu1 %v20729_v31 }
 0x490   : > { %11303 = vperm.xlu0 %15507, %v20138_v63   ;;  %11298 = vperm.xlu1 %15506, %v20142_v27   ;;  %v10923_v63 = vld [vmem:[%s20210_s28 + $0x8] sm:$0xff] }
 0x491   : > { %v20192_v54 = vpop.permute.xlu1 %11188  ;;  %v20194_v8 = vpop.permute.xlu0 %11193 }
 0x495   : > { %v20196_v20 = vpop.permute.xlu0 %11203  ;;  %v20198_v10 = vpop.permute.xlu1 %11198 }
 0x499   : > { %v20200_v4 = vpop.permute.xlu0 %11213  ;;  %v20202_v28 = vpop.permute.xlu1 %11208 }
 0x49d   : > { %v20205_v32 = vpop.permute.xlu0 %11223  ;;  %v20212_v31 = vpop.permute.xlu1 %11218 }
 0x4a1   : > { %v20218_v27 = vpop.permute.xlu1 %11228 }
 0x4a2   : > { %v10962_v37 = vpop.permute.xlu0 %10961 }
 0x4a3   : > { %v11115_v43 = vmul.f32 %v10962_v37, %v10923_v63 }
 0x4a5   : > { %v11307_v16 = vadd.f32 %v11154_v55, %v11115_v43  ;;  %v10935_v43 = vld [vmem:[%s20210_s28 + $0x68] sm:$0xff] }
 0x4a6   : > { %v10972_v23 = vpop.permute.xlu1 %10971 }
 0x4a7   : > { %11339 = vst [vmem:[%s20221_s7 + $0x8] sm:$0xff] %v11307_v16  ;;  %v20224_v46 = vpop.permute.xlu0 %11233  ;;  %v11117_v18 = vmul.f32 %v10972_v23, %v10925_v34 }
 0x4a9   : > { %v11309_v39 = vadd.f32 %v11164_v9, %v11117_v18  ;;  %v10934_v18 = vld [vmem:[%s20210_s28 + $0x60] sm:$0xff] }
 0x4aa   : > { %v10967_v60 = vpop.permute.xlu1 %10966 }
 0x4ab   : > { %11341 = vst [vmem:[%s20221_s7 + $0x18] sm:$0xff] %v11309_v39  ;;  %v11116_v53 = vmul.f32 %v10967_v60, %v10924_v51  ;;  %v10936_v60 = vld [vmem:[%s20210_s28 + $0x70] sm:$0xff] }
 0x4ac   : > { %v10957_v50 = vpop.permute.xlu0 %10956 }
 0x4ad   : > { %v11114_v41 = vmul.f32 %v10957_v50, %v10922_v21  ;;  %v11308_v58 = vadd.f32 %v11159_v42, %v11116_v53  ;;  %v10937_v53 = vld [vmem:[%s20210_s28 + $0x78] sm:$0xff] }
 0x4af   : > { %v11306_v11 = vadd.f32 %v11149_v33, %v11114_v41  ;;  %11340 = vst [vmem:[%s20221_s7 + $0x10] sm:$0xff] %v11308_v58  ;;  %v20230_v3 = vpop.permute.xlu1 %11238 }
 0x4b1   : > { %11338 = vst [vmem:[%s20221_s7] sm:$0xff] %v11306_v11  ;;  %v20233_v5 = vpop.permute.xlu0 %11243  ;;  %v10938_v11 = vld [vmem:[%s20210_s28 + $0x80] sm:$0xff] }
 0x4b4   : > { %v10982_v7 = vpop.permute.xlu1 %10981 }
 0x4b5   : > { %v20236_v44 = vpop.permute.xlu0 %11253  ;;  %v11119_v1 = vmul.f32 %v10982_v7, %v10927_v22  ;;  %v10939_v7 = vld [vmem:[%s20210_s28 + $0x88] sm:$0xff] }
 0x4b7   : > { %v11311_v13 = vadd.f32 %v11174_v36, %v11119_v1 }
 0x4b9   : > { %11343 = vst [vmem:[%s20221_s7 + $0x28] sm:$0xff] %v11311_v13  ;;  %v20240_v12 = vpop.permute.xlu1 %11248 }
 0x4ba   : > { %v10977_v52 = vpop.permute.xlu0 %10976 }
 0x4bb   : > { %v11118_v47 = vmul.f32 %v10977_v52, %v10926_v45 }
 0x4bd   : > { %v11310_v6 = vadd.f32 %v11169_v35, %v11118_v47  ;;  %v10933_v35 = vld [vmem:[%s20210_s28 + $0x58] sm:$0xff]  ;;  %v10940_v47 = vld [vmem:[%s20210_s28 + $0x90] sm:$0xff] }
 0x4be   : > { %v10992_v29 = vpop.permute.xlu1 %10991 }
 0x4bf   : > { %11342 = vst [vmem:[%s20221_s7 + $0x20] sm:$0xff] %v11310_v6  ;;  %v20244_v26 = vpop.permute.xlu0 %11263  ;;  %v11121_v25 = vmul.f32 %v10992_v29, %v10929_v40  ;;  %v10941_v40 = vld [vmem:[%s20210_s28 + $0x98] sm:$0xff] }
 0x4c1   : > { %v11313_v30 = vadd.f32 %v11184_v17, %v11121_v25  ;;  %v10932_v17 = vld [vmem:[%s20210_s28 + $0x50] sm:$0xff] }
 0x4c3   : > { %11345 = vst [vmem:[%s20221_s7 + $0x38] sm:$0xff] %v11313_v30  ;;  %v20248_v38 = vpop.permute.xlu1 %11258 }
 0x4c4   : > { %v10987_v59 = vpop.permute.xlu0 %10986 }
 0x4c5   : > { %v11120_v56 = vmul.f32 %v10987_v59, %v10928_v0  ;;  %v10942_v0 = vld [vmem:[%s20210_s28 + $0xa0] sm:$0xff] }
 0x4c7   : > { %v11312_v15 = vadd.f32 %v20186_v48, %v11120_v56  ;;  %v10943_v56 = vld [vmem:[%s20210_s28 + $0xa8] sm:$0xff] }
 0x4c8   : > { %v11002_v57 = vpop.permute.xlu1 %11001 }
 0x4c9   : > { %11344 = vst [vmem:[%s20221_s7 + $0x30] sm:$0xff] %v11312_v15  ;;  %v20253_v55 = vpop.permute.xlu0 %11273  ;;  %v11123_v33 = vmul.f32 %v11002_v57, %v10931_v49 }
 0x4cb   : > { %v11315_v24 = vadd.f32 %v20194_v8, %v11123_v33  ;;  %v10944_v33 = vld [vmem:[%s20210_s28 + $0xb0] sm:$0xff] }
 0x4cd   : > { %11347 = vst [vmem:[%s20221_s7 + $0x48] sm:$0xff] %v11315_v24  ;;  %v20258_v42 = vpop.permute.xlu1 %11268 }
 0x4ce   : > { %v10997_v9 = vpop.permute.xlu0 %10996 }
 0x4cf   : > { %v11122_v62 = vmul.f32 %v10997_v9, %v10930_v61  ;;  %v10945_v61 = vld [vmem:[%s20210_s28 + $0xb8] sm:$0xff] }
 0x4d1   : > { %v11314_v14 = vadd.f32 %v20192_v54, %v11122_v62 }
 0x4d2   : > { %v11012_v36 = vpop.permute.xlu1 %11011 }
 0x4d3   : > { %11346 = vst [vmem:[%s20221_s7 + $0x40] sm:$0xff] %v11314_v14  ;;  %v20263_v2 = vpop.permute.xlu0 %11283  ;;  %v11125_v19 = vmul.f32 %v11012_v36, %v10933_v35  ;;  %v10946_v35 = vld [vmem:[%s20210_s28 + $0xc0] sm:$0xff] }
 0x4d5   : > { %v11317_v48 = vadd.f32 %v20196_v20, %v11125_v19  ;;  %v10947_v19 = vld [vmem:[%s20210_s28 + $0xc8] sm:$0xff] }
 0x4d7   : > { %11349 = vst [vmem:[%s20221_s7 + $0x58] sm:$0xff] %v11317_v48  ;;  %v20268_v8 = vpop.permute.xlu1 %11278 }
 0x4d8   : > { %v11007_v63 = vpop.permute.xlu0 %11006 }
 0x4d9   : > { %v11124_v37 = vmul.f32 %v11007_v63, %v10932_v17 }
 0x4db   : > { %v11316_v54 = vadd.f32 %v20198_v10, %v11124_v37  ;;  %v10948_v37 = vld [vmem:[%s20210_s28 + $0xd0] sm:$0xff] }
 0x4dc   : > { %v11022_v16 = vpop.permute.xlu1 %11021 }
 0x4dd   : > { %11348 = vst [vmem:[%s20221_s7 + $0x50] sm:$0xff] %v11316_v54  ;;  %v20273_v34 = vpop.permute.xlu0 %11293  ;;  %v11127_v23 = vmul.f32 %v11022_v16, %v10935_v43  ;;  %v10949_v43 = vld [vmem:[%s20210_s28 + $0xd8] sm:$0xff] }
 0x4df   : > { %v11319_v20 = vadd.f32 %v20200_v4, %v11127_v23 }
 0x4e1   : > { %11351 = vst [vmem:[%s20221_s7 + $0x68] sm:$0xff] %v11319_v20  ;;  %v20278_v51 = vpop.permute.xlu1 %11288 }
 0x4e2   : > { %v11017_v39 = vpop.permute.xlu0 %11016 }
 0x4e3   : > { %v11126_v21 = vmul.f32 %v11017_v39, %v10934_v18  ;;  %v10950_v18 = vld [vmem:[%s20210_s28 + $0xe0] sm:$0xff] }
 0x4e5   : > { %v11318_v10 = vadd.f32 %v20202_v28, %v11126_v21  ;;  %v10951_v21 = vld [vmem:[%s20210_s28 + $0xe8] sm:$0xff] }
 0x4e6   : > { %v11027_v50 = vpop.permute.xlu0 %11026  ;;  %v11032_v41 = vpop.permute.xlu1 %11031 }
 0x4e7   : > { %11350 = vst [vmem:[%s20221_s7 + $0x60] sm:$0xff] %v11318_v10  ;;  %v11128_v58 = vmul.f32 %v11027_v50, %v10936_v60  ;;  %v11129_v4 = vmul.f32 %v11032_v41, %v10937_v53 }
 0x4e9   : > { %v11320_v22 = vadd.f32 %v20212_v31, %v11128_v58  ;;  %v11321_v1 = vadd.f32 %v20205_v32, %v11129_v4 }
 0x4ea   : > { %v11037_v13 = vpop.permute.xlu0 %11036  ;;  %v11042_v28 = vpop.permute.xlu1 %11041 }
 0x4eb   : > { %11352 = vst [vmem:[%s20221_s7 + $0x70] sm:$0xff] %v11320_v22  ;;  %v11130_v45 = vmul.f32 %v11037_v13, %v10938_v11  ;;  %11353 = vst [vmem:[%s20221_s7 + $0x78] sm:$0xff] %v11321_v1  ;;  %v11131_v52 = vmul.f32 %v11042_v28, %v10939_v7 }
 0x4ed   : > { %v11322_v6 = vadd.f32 %v20218_v27, %v11130_v45  ;;  %v11323_v31 = vadd.f32 %v20224_v46, %v11131_v52 }
 0x4ee   : > { %v11047_v29 = vpop.permute.xlu0 %11046  ;;  %v11052_v32 = vpop.permute.xlu1 %11051 }
 0x4ef   : > { %11354 = vst [vmem:[%s20221_s7 + $0x80] sm:$0xff] %v11322_v6  ;;  %v11132_v25 = vmul.f32 %v11047_v29, %v10940_v47  ;;  %11355 = vst [vmem:[%s20221_s7 + $0x88] sm:$0xff] %v11323_v31  ;;  %v11133_v30 = vmul.f32 %v11052_v32, %v10941_v40 }
 0x4f1   : > { %v11324_v59 = vadd.f32 %v20230_v3, %v11132_v25  ;;  %v11325_v27 = vadd.f32 %v20233_v5, %v11133_v30 }
 0x4f2   : > { %v11057_v15 = vpop.permute.xlu0 %11056  ;;  %v11062_v46 = vpop.permute.xlu1 %11061 }
 0x4f3   : > { %11356 = vst [vmem:[%s20221_s7 + $0x90] sm:$0xff] %v11324_v59  ;;  %v11134_v49 = vmul.f32 %v11057_v15, %v10942_v0  ;;  %11357 = vst [vmem:[%s20221_s7 + $0x98] sm:$0xff] %v11325_v27  ;;  %v11135_v57 = vmul.f32 %v11062_v46, %v10943_v56 }
 0x4f5   : > { %v11326_v24 = vadd.f32 %v20240_v12, %v11134_v49  ;;  %v11327_v3 = vadd.f32 %v20236_v44, %v11135_v57 }
 0x4f6   : > { %v11067_v9 = vpop.permute.xlu0 %11066  ;;  %v11072_v5 = vpop.permute.xlu1 %11071 }
 0x4f7   : > { %11358 = vst [vmem:[%s20221_s7 + $0xa0] sm:$0xff] %v11326_v24  ;;  %v11136_v62 = vmul.f32 %v11067_v9, %v10944_v33  ;;  %11359 = vst [vmem:[%s20221_s7 + $0xa8] sm:$0xff] %v11327_v3  ;;  %v11137_v14 = vmul.f32 %v11072_v5, %v10945_v61 }
 0x4f9   : > { %v11328_v36 = vadd.f32 %v20248_v38, %v11136_v62  ;;  %v11329_v12 = vadd.f32 %v20244_v26, %v11137_v14 }
 0x4fa   : > { %v11077_v48 = vpop.permute.xlu0 %11076  ;;  %v11082_v44 = vpop.permute.xlu1 %11081 }
 0x4fb   : > { %11360 = vst [vmem:[%s20221_s7 + $0xb0] sm:$0xff] %v11328_v36  ;;  %v11138_v17 = vmul.f32 %v11077_v48, %v10946_v35  ;;  %11361 = vst [vmem:[%s20221_s7 + $0xb8] sm:$0xff] %v11329_v12  ;;  %v11139_v63 = vmul.f32 %v11082_v44, %v10947_v19 }
 0x4fd   : > { %v11330_v54 = vadd.f32 %v20258_v42, %v11138_v17  ;;  %v11331_v38 = vadd.f32 %v20253_v55, %v11139_v63 }
 0x4fe   : > { %v11087_v16 = vpop.permute.xlu0 %11086  ;;  %v11092_v23 = vpop.permute.xlu1 %11091 }
 0x4ff   : > { %11362 = vst [vmem:[%s20221_s7 + $0xc0] sm:$0xff] %v11330_v54  ;;  %v11140_v26 = vmul.f32 %v11087_v16, %v10948_v37  ;;  %11363 = vst [vmem:[%s20221_s7 + $0xc8] sm:$0xff] %v11331_v38  ;;  %v11141_v20 = vmul.f32 %v11092_v23, %v10949_v43 }
 0x501   : > { %v11332_v39 = vadd.f32 %v20268_v8, %v11140_v26  ;;  %v11333_v42 = vadd.f32 %v20263_v2, %v11141_v20  ;;  %v10953_v8 = vld [vmem:[%s20210_s28 + $0xf8] sm:$0xff]  ;;  %v10952_v2 = vld [vmem:[%s20210_s28 + $0xf0] sm:$0xff] }
 0x502   : > { %v11097_v60 = vpop.permute.xlu0 %11096  ;;  %v11102_v55 = vpop.permute.xlu1 %11101 }
 0x503   : > { %11364 = vst [vmem:[%s20221_s7 + $0xd0] sm:$0xff] %v11332_v39  ;;  %v11142_v10 = vmul.f32 %v11097_v60, %v10950_v18  ;;  %11365 = vst [vmem:[%s20221_s7 + $0xd8] sm:$0xff] %v11333_v42  ;;  %v11143_v53 = vmul.f32 %v11102_v55, %v10951_v21 }
 0x505   : > { %v11334_v50 = vadd.f32 %v20278_v51, %v11142_v10  ;;  %v11335_v41 = vadd.f32 %v20273_v34, %v11143_v53 }
 0x506   : > { %v11107_v58 = vpop.permute.xlu0 %11106  ;;  %v11112_v4 = vpop.permute.xlu1 %11111 }
 0x507   : > { %11366 = vst [vmem:[%s20221_s7 + $0xe0] sm:$0xff] %v11334_v50  ;;  %11367 = vst [vmem:[%s20221_s7 + $0xe8] sm:$0xff] %v11335_v41  ;;  %v11145_v11 = vmul.f32 %v11112_v4, %v10953_v8  ;;  %v11144_v22 = vmul.f32 %v11107_v58, %v10952_v2 }
 0x50b   : > { %v11304_v7 = vpop.permute.xlu0 %11303  ;;  %v11299_v1 = vpop.permute.xlu1 %11298 }
 0x50c   : > { %v11337_v13 = vadd.f32 %v11304_v7, %v11145_v11  ;;  %v11336_v34 = vadd.f32 %v11299_v1, %v11144_v22 }
 0x50e   : > { %11369 = vst [vmem:[%s20221_s7 + $0xf8] sm:$0xff] %v11337_v13  ;;  %11368 = vst [vmem:[%s20221_s7 + $0xf0] sm:$0xff] %v11336_v34 }
 0x50f   : > { %15649 = shalt.err (!%p15646_p3)
}
 0x510   : > { %s15650_s20 = scalar_lea.hbm %s20337_s10, 4096  ;;  %s15654_s27 = scalar_lea.hbm %s20389_s4, 8192 }
 0x511   : > { %p15651_p4 = scmp.ne.s32.totalorder %s20337_s10, %s15650_s20  ;;  %p15655_p9 = scmp.lt.s32.totalorder %s20337_s10, %s20389_s4 }
 0x512   : > { %p15656_p10 = scmp.lt.s32.totalorder %s15654_s27, %s15650_s20 }
 0x513   : > { %p15652_p7 = pnand %p15651_p4, %p15766_p5 }
 0x514   : > { %p15657_p11 = por %p15656_p10, %p15655_p9 }
 0x515   : > { %p15653_p8 = pneg %p15652_p7 }
 0x517   : > { %p15658_p12 = pnand %p15657_p11, %p15653_p8 }
 0x519   : > { %15661 = shalt.err (!%p15658_p12)
}
 0x51a   : > { %s15701_s30 = smov 128   ;;  %s15702_s7 = smov 8  }
 0x51b   : > { %15435 = dma.vmem_to_hbm [thread:$0]  (%p15766_p5), %s20339_s6, 4096, %s20337_s10, %s20345_s19, %s15701_s30, %s15701_s30, %s15702_s7  }
 0x51c PF: > { %p15441_p13 = scmp.ge.s32.totalorder %s15696_s18, 2  ;;  %s11399_s5 = sand.u32 1, %s15684_s15  }
 0x51d   : > { %s11400_s8 = scalar_lea.sflag [#allocation3], %s11399_s5 }
 0x51e   : > { %p15438_p0 = pnand %p15441_p13, %p15770_p6 }
 0x520   : > { %p15439_p1 = pneg %p15438_p0 }
 0x522   : > { %15679 = dma.done.wait (%p15439_p1), %s11400_s8, 4096  }
 0x523   : > { %15681 = vsyncadd (%p15439_p1), %s11400_s8, 4294963200  ;;  %p14_p2 = scmp.ge.s32.totalorder %s15753_s21, 4   ;;  %s20730_s15 = smov %s15688_s16 }
 0x524   : > { %s20731_s16 = smov %s15692_s17  ;;  %s20732_s17 = smov %s15764_s24 }
 0x525   : > { %s20733_s18 = smov %s15753_s21  ;;  %16 = sbr.rel (!%p14_p2) target bundleno = 3 (0x3), region = 108 }
 0x52a   :  { %11405 = vsyncpa [#allocation3], 1 }
 0x52b   :  { %11407 = vsyncpa [#allocation3 + $0x1], 1 }

</bundles_post_ra>
